<compile_context>
chip_gen: v7x
topology: tpu7x:2x2x1
jax: 0.10.0
libtpu: 0.0.40
codegen_flags: <defaults>
</compile_context>

<pallas_src>
import jax
import jax.numpy as jnp
from jax.experimental import pallas as pl
from jax.experimental.pallas import tpu as pltpu


# ----------------------------- kernel -----------------------------

def _make_kernel(D, T, h, c_pad):
    """Build the ResnetPointnet forward kernel (closes over static sizes)."""
    h2 = 2 * h
    R_BPOS = D                               # fc_pos bias row in the small slab
    R_BY = lambda i: D + 1 + 2 * i           # [0 | b0_i]  bias of the fused matmul
    R_B1 = lambda i: D + 2 + 2 * i           # [b1_i | 0]  fc_1 bias
    R_BC = D + 11                            # [fc_c bias | 0]
    OFF_TOP = lambda i: 4 * h + (i - 1) * 4 * h   # block i top-half fused weight
    OFF_BOT = lambda i: OFF_TOP(i) + 2 * h        # block i bottom-half fused weight

    def kernel(p_ref, sm_ref, wblk_ref, w1_ref, wc_ref, out_ref,
               cat0_ref, catr_ref, pcat_ref):
        f32, bf16 = jnp.float32, jnp.bfloat16
        relu = lambda v: jnp.maximum(v, 0.0)

        Bb = p_ref.shape[0]
        R = Bb * T
        x = p_ref[...].reshape(R, D)                       # (R, D) f32

        # ---- fc_pos: K=D (=3) matmul done on the VPU as broadcast MACs ----
        net = x[:, 0:1] * sm_ref[0:1, :]
        for d in range(1, D):
            net = net + x[:, d:d + 1] * sm_ref[d:d + 1, :]
        net = net + sm_ref[R_BPOS:R_BPOS + 1, :]           # (R, 2h)

        # ---- block_0: one fused [shortcut | fc_0] matmul (K=4h, N=2h) ----
        cat0_ref[:, 0:h2] = net.astype(bf16)
        cat0_ref[:, h2:2 * h2] = relu(net).astype(bf16)
        y = jnp.dot(cat0_ref[...], wblk_ref[0:4 * h, :],
                    preferred_element_type=f32) + sm_ref[R_BY(0):R_BY(0) + 1, :]
        dx = jnp.dot(relu(y[:, h:]).astype(bf16), w1_ref[0:h, :],
                     preferred_element_type=f32) + sm_ref[R_B1(0):R_B1(0) + 1, :h]
        net = y[:, :h] + dx                                # (R, h)

        # ---- blocks 1..4: per-cloud max-pool enters via split (top/bottom) weights ----
        for i in range(1, 5):
            pooled = jnp.max(net.reshape(Bb, T, h), axis=1)            # (Bb, h)

            catr_ref[:, 0:h] = net.astype(bf16)
            catr_ref[:, h:h2] = relu(net).astype(bf16)
            y = jnp.dot(catr_ref[...], wblk_ref[OFF_TOP(i):OFF_TOP(i) + h2, :],
                        preferred_element_type=f32)                    # (R, 2h)

            pcat_ref[:, 0:h] = pooled.astype(bf16)
            pcat_ref[:, h:h2] = relu(pooled).astype(bf16)
            py = jnp.dot(pcat_ref[...], wblk_ref[OFF_BOT(i):OFF_BOT(i) + h2, :],
                         preferred_element_type=f32)                   # (Bb, 2h)

            y = (y.reshape(Bb, T, h2) + py[:, None, :]).reshape(R, h2) \
                + sm_ref[R_BY(i):R_BY(i) + 1, :]
            dx = jnp.dot(relu(y[:, h:]).astype(bf16), w1_ref[i * h:(i + 1) * h, :],
                         preferred_element_type=f32) + sm_ref[R_B1(i):R_B1(i) + 1, :h]
            net = y[:, :h] + dx                            # (R, h)

        # ---- final max-pool over points + fc_c ----
        ret = relu(jnp.max(net.reshape(Bb, T, h), axis=1)).astype(bf16)    # (Bb, h)
        out = jnp.dot(ret, wc_ref[...], preferred_element_type=f32) \
            + sm_ref[R_BC:R_BC + 1, :c_pad]
        out_ref[...] = out.astype(out_ref.dtype)

    return kernel


# ----------------------------- parameter packing -----------------------------

def _pack_params(params, D, h, c_dim, c_pad):
    """Pack the 37 ResnetPointnet parameter arrays into 4 lane-dense slabs."""
    h2 = 2 * h
    f32, bf16 = jnp.float32, jnp.bfloat16

    def pad_cols(a, w):
        a = jnp.asarray(a, f32)
        return jnp.pad(a, ((0, 0), (0, w - a.shape[1])))

    # Small slab (f32): fc_pos weight rows + every bias, one row each.
    rows = [pad_cols(params["fc_pos_w"], h2),                      # rows [0, D)
            pad_cols(params["fc_pos_b"], h2)]                      # row D
    for i in range(5):
        rows.append(jnp.concatenate([jnp.zeros((1, h), f32),
                                     jnp.asarray(params[f"b{i}_b0"], f32)], axis=1))
        rows.append(pad_cols(params[f"b{i}_b1"], h2))
    rows.append(pad_cols(params["fc_c_b"], h2))                    # row D + 11
    small = jnp.concatenate(rows, axis=0)                          # (D + 12, 2h) f32

    # Fused block-diagonal weights: [net | relu(net)] @ [[ws, 0], [0, w0]].
    def blockdiag(ws_part, w0_part):
        k = ws_part.shape[0]
        z = jnp.zeros((k, h), f32)
        return jnp.concatenate(
            [jnp.concatenate([jnp.asarray(ws_part, f32), z], axis=1),
             jnp.concatenate([z, jnp.asarray(w0_part, f32)], axis=1)], axis=0)

    wrows = [blockdiag(params["b0_ws"], params["b0_w0"])]          # (4h, 2h)  block 0
    for i in range(1, 5):
        ws, w0 = params[f"b{i}_ws"], params[f"b{i}_w0"]
        wrows.append(blockdiag(ws[:h], w0[:h]))                    # top halves    (2h, 2h)
        wrows.append(blockdiag(ws[h:], w0[h:]))                    # bottom halves (2h, 2h)
    wblk = jnp.concatenate(wrows, axis=0).astype(bf16)             # (20h, 2h) bf16

    w1s = jnp.concatenate([jnp.asarray(params[f"b{i}_w1"], f32) for i in range(5)],
                          axis=0).astype(bf16)                     # (5h, h) bf16
    wc = pad_cols(params["fc_c_w"], c_pad).astype(bf16)            # (h, c_pad) bf16
    return small, wblk, w1s, wc


# ----------------------------- wrapper -----------------------------

def _device_kind():
    try:
        return jax.devices()[0].device_kind.lower()
    except Exception:
        return ""


def _pick_block_b(B, T, h, kind):
    """Point clouds per grid step: VMEM-budgeted and generation aware."""
    single_core = ("v5e" in kind) or ("v5 lite" in kind) or ("v6" in kind)
    # Rough f32+bf16 activation bytes per point row, plus the 3->128 lane-padded
    # double-buffered points tile (1 KiB/row).
    per_row = 48 * h + 1024
    budget = (24 if single_core else 12) * 1024 * 1024
    target_rows = max(256, min(budget // per_row, 16384))
    max_bb = max(1, target_rows // max(T, 1))
    if not single_core and B >= 2:
        max_bb = min(max_bb, B // 2)       # >= 2 grid steps so both TCs get work
    for cand in range(min(B, max_bb), 0, -1):
        if B % cand == 0 and (cand % 8 == 0 or cand == B):
            return cand
    return 8 if B % 8 == 0 else B


def _compiler_params(kind):
    # Raise the scoped-VMEM limit on single-TC v5e/v6e (128 MiB physical,
    # 16/32 MiB scoped default); leave the default elsewhere (v7x has only
    # 64 MiB physical and the block-size budget above already respects it).
    single_core = ("v5e" in kind) or ("v5 lite" in kind) or ("v6" in kind)
    vmem = 96 * 1024 * 1024 if single_core else None
    return pltpu.CompilerParams(dimension_semantics=("parallel",),
                                vmem_limit_bytes=vmem)


def resnet_pointnet_forward(p, params, block_b=None):
    """Pallas forward pass of ResnetPointnet. p: (B, T, D) point clouds."""
    p = jnp.asarray(p, jnp.float32)
    B, T, D = p.shape
    h = params["b0_w1"].shape[0]
    h2 = 2 * h
    c_dim = params["fc_c_w"].shape[1]
    c_pad = ((c_dim + 127) // 128) * 128
    # TODO(synk): for c_dim > 2*hidden_dim the fc_c bias would need its own slab.
    assert c_pad <= h2, "bias packing assumes padded c_dim <= 2*hidden_dim"

    # Pad T to a sublane multiple by repeating the last point: duplicates leave
    # every max-pool (the only cross-point op) unchanged, and keep the
    # (B*T, h) <-> (B, T, h) reshapes inside the kernel layout-preserving.
    T_pad = max(8, -(-T // 8) * 8)
    if T_pad != T:
        p = jnp.concatenate(
            [p, jnp.broadcast_to(p[:, -1:, :], (B, T_pad - T, D))], axis=1)

    kind = _device_kind()
    if block_b is None:
        block_b = _pick_block_b(B, T_pad, h, kind)
    assert B % block_b == 0, "batch must be divisible by block_b"

    small, wblk, w1s, wc = _pack_params(params, D, h, c_dim, c_pad)
    kernel = _make_kernel(D, T_pad, h, c_pad)
    rows = block_b * T_pad

    out = pl.pallas_call(
        kernel,
        out_shape=jax.ShapeDtypeStruct((B, c_pad), jnp.float32),
        grid=(B // block_b,),
        in_specs=[
            pl.BlockSpec((block_b, T_pad, D), lambda b: (b, 0, 0)),
            pl.BlockSpec(small.shape, lambda b: (0, 0)),   # params stay resident
            pl.BlockSpec(wblk.shape, lambda b: (0, 0)),
            pl.BlockSpec(w1s.shape, lambda b: (0, 0)),
            pl.BlockSpec(wc.shape, lambda b: (0, 0)),
        ],
        out_specs=pl.BlockSpec((block_b, c_pad), lambda b: (b, 0)),
        scratch_shapes=[
            pltpu.VMEM((rows, 4 * h), jnp.bfloat16),   # block_0 fused-LHS concat
            pltpu.VMEM((rows, h2), jnp.bfloat16),      # blocks 1..4 fused-LHS concat
            pltpu.VMEM((block_b, h2), jnp.bfloat16),   # pooled-path fused-LHS concat
        ],
        compiler_params=_compiler_params(kind),
    )(p, small, wblk, w1s, wc)
    # TODO(synk): return_unpooled=True (per-point features) is not implemented.
    return out[:, :c_dim]


# ----------------------------- params & reference -----------------------------

def init_params(key, dim=3, hidden_dim=64, c_dim=32):
    """Deterministic init. Linear weights stored transposed as (in, out).
    NOTE: the PyTorch module zero-inits every fc_1 weight; small random values
    are used here so the correctness check also exercises that matmul path
    (forward semantics do not depend on the init)."""
    h = hidden_dim
    keys = iter(jax.random.split(key, 32))

    def w(k, fi, fo, scale=1.0):
        s = scale / jnp.sqrt(fi)
        return jax.random.uniform(k, (fi, fo), jnp.float32, -s, s)

    def b(k, fi, fo):
        s = 1.0 / jnp.sqrt(fi)
        return jax.random.uniform(k, (1, fo), jnp.float32, -s, s)

    params = {"fc_pos_w": w(next(keys), dim, 2 * h),
              "fc_pos_b": b(next(keys), dim, 2 * h)}
    for i in range(5):
        params[f"b{i}_w0"] = w(next(keys), 2 * h, h)
        params[f"b{i}_b0"] = b(next(keys), 2 * h, h)
        params[f"b{i}_w1"] = w(next(keys), h, h, scale=0.5)
        params[f"b{i}_b1"] = b(next(keys), h, h)
        params[f"b{i}_ws"] = w(next(keys), 2 * h, h)   # shortcut, no bias
    params["fc_c_w"] = w(next(keys), h, c_dim)
    params["fc_c_b"] = b(next(keys), h, c_dim)
    return params


def reference_forward(p, params):
    relu = jax.nn.relu

    def block(x, i):
        net = relu(x) @ params[f"b{i}_w0"] + params[f"b{i}_b0"]
        dx = relu(net) @ params[f"b{i}_w1"] + params[f"b{i}_b1"]
        xs = x @ params[f"b{i}_ws"]
        return xs + dx

    net = p @ params["fc_pos_w"] + params["fc_pos_b"]
    net = block(net, 0)
    for i in range(1, 5):
        pooled = jnp.max(net, axis=1, keepdims=True)
        pooled = jnp.broadcast_to(pooled, net.shape)
        net = jnp.concatenate([net, pooled], axis=2)
        net = block(net, i)
    ret = jnp.max(net, axis=1)
    return relu(ret) @ params["fc_c_w"] + params["fc_c_b"]


# ----------------------------- main -----------------------------

if __name__ == "__main__":
    B, T, D = 16, 32, 3        # batch of point clouds, points per cloud, point dim
    hidden_dim, c_dim = 64, 32

    key = jax.random.PRNGKey(0)
    k_p, k_params = jax.random.split(key)
    p = jax.random.normal(k_p, (B, T, D), dtype=jnp.float32)
    params = init_params(k_params, dim=D, hidden_dim=hidden_dim, c_dim=c_dim)

    out = resnet_pointnet_forward(p, params)   # generation-aware block_b
    out = jax.block_until_ready(out)

    ref = reference_forward(p, params)
    assert out.shape == (B, c_dim)
    err = float(jnp.max(jnp.abs(out - ref)))
    # bf16 MXU operands (f32 accumulation): allow a few 1e-2 of absolute drift.
    assert err < 5e-2, f"Pallas output != reference (max abs err {err:.4f})"

    print("KERNEL_OK")
</pallas_src>

<mosaic_0001>
module attributes {stable_mosaic.version = 11 : i64} {
  func.func @kernel(%arg0: i32, %arg1: memref<8x32x3xf32, #tpu.memory_space<vmem>>, %arg2: memref<15x128xf32, #tpu.memory_space<vmem>>, %arg3: memref<1280x128xbf16, #tpu.memory_space<vmem>>, %arg4: memref<320x64xbf16, #tpu.memory_space<vmem>>, %arg5: memref<64x128xbf16, #tpu.memory_space<vmem>>, %arg6: memref<8x128xf32, #tpu.memory_space<vmem>>, %arg7: memref<256x256xbf16, #tpu.memory_space<vmem>>, %arg8: memref<256x128xbf16, #tpu.memory_space<vmem>>, %arg9: memref<8x128xbf16, #tpu.memory_space<vmem>>) attributes {dimension_semantics = [#tpu.dimension_semantics<parallel>], iteration_bounds = array<i64: 2>, scalar_prefetch = 0 : i64, scratch_operands = 3 : i64, tpu.core_type = #tpu.core_type<tc>, window_params = [{transform_indices = @transform_0, window_bounds = array<i64: 8, 32, 3>}, {pipeline_mode = #tpu.pipeline_mode<synchronous>, transform_indices = @transform_1, window_bounds = array<i64: 15, 128>}, {pipeline_mode = #tpu.pipeline_mode<synchronous>, transform_indices = @transform_2, window_bounds = array<i64: 1280, 128>}, {pipeline_mode = #tpu.pipeline_mode<synchronous>, transform_indices = @transform_3, window_bounds = array<i64: 320, 64>}, {pipeline_mode = #tpu.pipeline_mode<synchronous>, transform_indices = @transform_4, window_bounds = array<i64: 64, 128>}, {transform_indices = @transform_5, window_bounds = array<i64: 8, 128>}]} {
    %c0 = arith.constant 0 : index
    %c0_0 = arith.constant 0 : index
    %c0_1 = arith.constant 0 : index
    %0 = vector.load %arg1[%c0, %c0_0, %c0_1] : memref<8x32x3xf32, #tpu.memory_space<vmem>>, vector<8x32x3xf32>
    %1 = vector.shape_cast %0 : vector<8x32x3xf32> to vector<256x3xf32>
    %2 = vector.extract_strided_slice %1 {offsets = [0, 0], sizes = [256, 1], strides = [1, 1]} : vector<256x3xf32> to vector<256x1xf32>
    %c0_2 = arith.constant 0 : index
    %c0_3 = arith.constant 0 : index
    %3 = vector.load %arg2[%c0_2, %c0_3] : memref<15x128xf32, #tpu.memory_space<vmem>>, vector<1x128xf32>
    %4 = vector.broadcast %2 : vector<256x1xf32> to vector<256x128xf32>
    %5 = vector.broadcast %3 : vector<1x128xf32> to vector<256x128xf32>
    %6 = arith.mulf %4, %5 : vector<256x128xf32>
    %7 = vector.extract_strided_slice %1 {offsets = [0, 1], sizes = [256, 1], strides = [1, 1]} : vector<256x3xf32> to vector<256x1xf32>
    %c1 = arith.constant 1 : index
    %c0_4 = arith.constant 0 : index
    %8 = vector.load %arg2[%c1, %c0_4] : memref<15x128xf32, #tpu.memory_space<vmem>>, vector<1x128xf32>
    %9 = vector.broadcast %7 : vector<256x1xf32> to vector<256x128xf32>
    %10 = vector.broadcast %8 : vector<1x128xf32> to vector<256x128xf32>
    %11 = arith.mulf %9, %10 : vector<256x128xf32>
    %12 = arith.addf %6, %11 : vector<256x128xf32>
    %13 = vector.extract_strided_slice %1 {offsets = [0, 2], sizes = [256, 1], strides = [1, 1]} : vector<256x3xf32> to vector<256x1xf32>
    %c2 = arith.constant 2 : index
    %c0_5 = arith.constant 0 : index
    %14 = vector.load %arg2[%c2, %c0_5] : memref<15x128xf32, #tpu.memory_space<vmem>>, vector<1x128xf32>
    %15 = vector.broadcast %13 : vector<256x1xf32> to vector<256x128xf32>
    %16 = vector.broadcast %14 : vector<1x128xf32> to vector<256x128xf32>
    %17 = arith.mulf %15, %16 : vector<256x128xf32>
    %18 = arith.addf %12, %17 : vector<256x128xf32>
    %c3 = arith.constant 3 : index
    %c0_6 = arith.constant 0 : index
    %19 = vector.load %arg2[%c3, %c0_6] : memref<15x128xf32, #tpu.memory_space<vmem>>, vector<1x128xf32>
    %20 = vector.broadcast %19 : vector<1x128xf32> to vector<256x128xf32>
    %21 = arith.addf %18, %20 : vector<256x128xf32>
    %22 = arith.truncf %21 : vector<256x128xf32> to vector<256x128xbf16>
    %c0_7 = arith.constant 0 : index
    %c0_8 = arith.constant 0 : index
    %23 = vector.load %arg7[%c0_7, %c0_8] : memref<256x256xbf16, #tpu.memory_space<vmem>>, vector<256x128xbf16>
    tpu.vector_store %arg7[%c0_7, %c0_8], %22 {strides = array<i32>} : memref<256x256xbf16, #tpu.memory_space<vmem>>, vector<256x128xbf16>,
    %cst = arith.constant 0.000000e+00 : f32
    %24 = vector.broadcast %cst : f32 to vector<256x128xf32>
    %25 = arith.maximumf %21, %24 : vector<256x128xf32>
    %26 = arith.truncf %25 : vector<256x128xf32> to vector<256x128xbf16>
    %c0_9 = arith.constant 0 : index
    %c128 = arith.constant 128 : index
    %27 = vector.load %arg7[%c0_9, %c128] : memref<256x256xbf16, #tpu.memory_space<vmem>>, vector<256x128xbf16>
    tpu.vector_store %arg7[%c0_9, %c128], %26 {strides = array<i32>} : memref<256x256xbf16, #tpu.memory_space<vmem>>, vector<256x128xbf16>,
    %c0_10 = arith.constant 0 : index
    %c0_11 = arith.constant 0 : index
    %28 = vector.load %arg7[%c0_10, %c0_11] : memref<256x256xbf16, #tpu.memory_space<vmem>>, vector<256x256xbf16>
    %c0_12 = arith.constant 0 : index
    %c0_13 = arith.constant 0 : index
    %29 = vector.load %arg3[%c0_12, %c0_13] : memref<1280x128xbf16, #tpu.memory_space<vmem>>, vector<256x128xbf16>
    %cst_14 = arith.constant dense<0.000000e+00> : vector<256x128xf32>
    %30 = tpu.matmul %28, %29, %cst_14 {dimension_numbers = #tpu.dot_dimension_numbers<[1], [0], [0], [1], [0, 0, 1, 1], [], []>} : vector<256x256xbf16>, vector<256x128xbf16>, vector<256x128xf32> -> vector<256x128xf32>
    %c4 = arith.constant 4 : index
    %c0_15 = arith.constant 0 : index
    %31 = vector.load %arg2[%c4, %c0_15] : memref<15x128xf32, #tpu.memory_space<vmem>>, vector<1x128xf32>
    %32 = vector.broadcast %31 : vector<1x128xf32> to vector<256x128xf32>
    %33 = arith.addf %30, %32 : vector<256x128xf32>
    %34 = vector.extract_strided_slice %33 {offsets = [0, 64], sizes = [256, 64], strides = [1, 1]} : vector<256x128xf32> to vector<256x64xf32>
    %cst_16 = arith.constant 0.000000e+00 : f32
    %35 = vector.broadcast %cst_16 : f32 to vector<256x64xf32>
    %36 = arith.maximumf %34, %35 : vector<256x64xf32>
    %37 = arith.truncf %36 : vector<256x64xf32> to vector<256x64xbf16>
    %c0_17 = arith.constant 0 : index
    %c0_18 = arith.constant 0 : index
    %38 = vector.load %arg4[%c0_17, %c0_18] : memref<320x64xbf16, #tpu.memory_space<vmem>>, vector<64x64xbf16>
    %cst_19 = arith.constant dense<0.000000e+00> : vector<256x64xf32>
    %39 = tpu.matmul %37, %38, %cst_19 {dimension_numbers = #tpu.dot_dimension_numbers<[1], [0], [0], [1], [0, 0, 1, 1], [], []>} : vector<256x64xbf16>, vector<64x64xbf16>, vector<256x64xf32> -> vector<256x64xf32>
    %c5 = arith.constant 5 : index
    %c0_20 = arith.constant 0 : index
    %40 = vector.load %arg2[%c5, %c0_20] : memref<15x128xf32, #tpu.memory_space<vmem>>, vector<1x64xf32>
    %41 = vector.broadcast %40 : vector<1x64xf32> to vector<256x64xf32>
    %42 = arith.addf %39, %41 : vector<256x64xf32>
    %43 = vector.extract_strided_slice %33 {offsets = [0, 0], sizes = [256, 64], strides = [1, 1]} : vector<256x128xf32> to vector<256x64xf32>
    %44 = arith.addf %43, %42 : vector<256x64xf32>
    %45 = vector.shape_cast %44 : vector<256x64xf32> to vector<8x32x64xf32>
    %cst_21 = arith.constant dense<0xFF800000> : vector<8x64xf32>
    %46 = vector.multi_reduction <maximumf>, %45, %cst_21 [1] : vector<8x32x64xf32> to vector<8x64xf32>
    %47 = arith.truncf %44 : vector<256x64xf32> to vector<256x64xbf16>
    %c0_22 = arith.constant 0 : index
    %c0_23 = arith.constant 0 : index
    %48 = vector.load %arg8[%c0_22, %c0_23] : memref<256x128xbf16, #tpu.memory_space<vmem>>, vector<256x64xbf16>
    tpu.vector_store %arg8[%c0_22, %c0_23], %47 {strides = array<i32>} : memref<256x128xbf16, #tpu.memory_space<vmem>>, vector<256x64xbf16>,
    %cst_24 = arith.constant 0.000000e+00 : f32
    %49 = vector.broadcast %cst_24 : f32 to vector<256x64xf32>
    %50 = arith.maximumf %44, %49 : vector<256x64xf32>
    %51 = arith.truncf %50 : vector<256x64xf32> to vector<256x64xbf16>
    %c0_25 = arith.constant 0 : index
    %c64 = arith.constant 64 : index
    %52 = vector.load %arg8[%c0_25, %c64] : memref<256x128xbf16, #tpu.memory_space<vmem>>, vector<256x64xbf16>
    tpu.vector_store %arg8[%c0_25, %c64], %51 {strides = array<i32>} : memref<256x128xbf16, #tpu.memory_space<vmem>>, vector<256x64xbf16>,
    %c0_26 = arith.constant 0 : index
    %c0_27 = arith.constant 0 : index
    %53 = vector.load %arg8[%c0_26, %c0_27] : memref<256x128xbf16, #tpu.memory_space<vmem>>, vector<256x128xbf16>
    %c256 = arith.constant 256 : index
    %c0_28 = arith.constant 0 : index
    %54 = vector.load %arg3[%c256, %c0_28] : memref<1280x128xbf16, #tpu.memory_space<vmem>>, vector<128x128xbf16>
    %cst_29 = arith.constant dense<0.000000e+00> : vector<256x128xf32>
    %55 = tpu.matmul %53, %54, %cst_29 {dimension_numbers = #tpu.dot_dimension_numbers<[1], [0], [0], [1], [0, 0, 1, 1], [], []>} : vector<256x128xbf16>, vector<128x128xbf16>, vector<256x128xf32> -> vector<256x128xf32>
    %56 = arith.truncf %46 : vector<8x64xf32> to vector<8x64xbf16>
    %c0_30 = arith.constant 0 : index
    %c0_31 = arith.constant 0 : index
    %57 = vector.load %arg9[%c0_30, %c0_31] : memref<8x128xbf16, #tpu.memory_space<vmem>>, vector<8x64xbf16>
    tpu.vector_store %arg9[%c0_30, %c0_31], %56 {strides = array<i32>} : memref<8x128xbf16, #tpu.memory_space<vmem>>, vector<8x64xbf16>,
    %cst_32 = arith.constant 0.000000e+00 : f32
    %58 = vector.broadcast %cst_32 : f32 to vector<8x64xf32>
    %59 = arith.maximumf %46, %58 : vector<8x64xf32>
    %60 = arith.truncf %59 : vector<8x64xf32> to vector<8x64xbf16>
    %c0_33 = arith.constant 0 : index
    %c64_34 = arith.constant 64 : index
    %61 = vector.load %arg9[%c0_33, %c64_34] : memref<8x128xbf16, #tpu.memory_space<vmem>>, vector<8x64xbf16>
    tpu.vector_store %arg9[%c0_33, %c64_34], %60 {strides = array<i32>} : memref<8x128xbf16, #tpu.memory_space<vmem>>, vector<8x64xbf16>,
    %c0_35 = arith.constant 0 : index
    %c0_36 = arith.constant 0 : index
    %62 = vector.load %arg9[%c0_35, %c0_36] : memref<8x128xbf16, #tpu.memory_space<vmem>>, vector<8x128xbf16>
    %c384 = arith.constant 384 : index
    %c0_37 = arith.constant 0 : index
    %63 = vector.load %arg3[%c384, %c0_37] : memref<1280x128xbf16, #tpu.memory_space<vmem>>, vector<128x128xbf16>
    %cst_38 = arith.constant dense<0.000000e+00> : vector<8x128xf32>
    %64 = tpu.matmul %62, %63, %cst_38 {dimension_numbers = #tpu.dot_dimension_numbers<[1], [0], [0], [1], [0, 0, 1, 1], [], []>} : vector<8x128xbf16>, vector<128x128xbf16>, vector<8x128xf32> -> vector<8x128xf32>
    %65 = vector.shape_cast %55 : vector<256x128xf32> to vector<8x32x128xf32>
    %66 = vector.shape_cast %64 : vector<8x128xf32> to vector<8x1x128xf32>
    %67 = vector.broadcast %66 : vector<8x1x128xf32> to vector<8x32x128xf32>
    %68 = arith.addf %65, %67 : vector<8x32x128xf32>
    %69 = vector.shape_cast %68 : vector<8x32x128xf32> to vector<256x128xf32>
    %c6 = arith.constant 6 : index
    %c0_39 = arith.constant 0 : index
    %70 = vector.load %arg2[%c6, %c0_39] : memref<15x128xf32, #tpu.memory_space<vmem>>, vector<1x128xf32>
    %71 = vector.broadcast %70 : vector<1x128xf32> to vector<256x128xf32>
    %72 = arith.addf %69, %71 : vector<256x128xf32>
    %73 = vector.extract_strided_slice %72 {offsets = [0, 64], sizes = [256, 64], strides = [1, 1]} : vector<256x128xf32> to vector<256x64xf32>
    %cst_40 = arith.constant 0.000000e+00 : f32
    %74 = vector.broadcast %cst_40 : f32 to vector<256x64xf32>
    %75 = arith.maximumf %73, %74 : vector<256x64xf32>
    %76 = arith.truncf %75 : vector<256x64xf32> to vector<256x64xbf16>
    %c64_41 = arith.constant 64 : index
    %c0_42 = arith.constant 0 : index
    %77 = vector.load %arg4[%c64_41, %c0_42] : memref<320x64xbf16, #tpu.memory_space<vmem>>, vector<64x64xbf16>
    %cst_43 = arith.constant dense<0.000000e+00> : vector<256x64xf32>
    %78 = tpu.matmul %76, %77, %cst_43 {dimension_numbers = #tpu.dot_dimension_numbers<[1], [0], [0], [1], [0, 0, 1, 1], [], []>} : vector<256x64xbf16>, vector<64x64xbf16>, vector<256x64xf32> -> vector<256x64xf32>
    %c7 = arith.constant 7 : index
    %c0_44 = arith.constant 0 : index
    %79 = vector.load %arg2[%c7, %c0_44] : memref<15x128xf32, #tpu.memory_space<vmem>>, vector<1x64xf32>
    %80 = vector.broadcast %79 : vector<1x64xf32> to vector<256x64xf32>
    %81 = arith.addf %78, %80 : vector<256x64xf32>
    %82 = vector.extract_strided_slice %72 {offsets = [0, 0], sizes = [256, 64], strides = [1, 1]} : vector<256x128xf32> to vector<256x64xf32>
    %83 = arith.addf %82, %81 : vector<256x64xf32>
    %84 = vector.shape_cast %83 : vector<256x64xf32> to vector<8x32x64xf32>
    %cst_45 = arith.constant dense<0xFF800000> : vector<8x64xf32>
    %85 = vector.multi_reduction <maximumf>, %84, %cst_45 [1] : vector<8x32x64xf32> to vector<8x64xf32>
    %86 = arith.truncf %83 : vector<256x64xf32> to vector<256x64xbf16>
    %c0_46 = arith.constant 0 : index
    %c0_47 = arith.constant 0 : index
    %87 = vector.load %arg8[%c0_46, %c0_47] : memref<256x128xbf16, #tpu.memory_space<vmem>>, vector<256x64xbf16>
    tpu.vector_store %arg8[%c0_46, %c0_47], %86 {strides = array<i32>} : memref<256x128xbf16, #tpu.memory_space<vmem>>, vector<256x64xbf16>,
    %cst_48 = arith.constant 0.000000e+00 : f32
    %88 = vector.broadcast %cst_48 : f32 to vector<256x64xf32>
    %89 = arith.maximumf %83, %88 : vector<256x64xf32>
    %90 = arith.truncf %89 : vector<256x64xf32> to vector<256x64xbf16>
    %c0_49 = arith.constant 0 : index
    %c64_50 = arith.constant 64 : index
    %91 = vector.load %arg8[%c0_49, %c64_50] : memref<256x128xbf16, #tpu.memory_space<vmem>>, vector<256x64xbf16>
    tpu.vector_store %arg8[%c0_49, %c64_50], %90 {strides = array<i32>} : memref<256x128xbf16, #tpu.memory_space<vmem>>, vector<256x64xbf16>,
    %c0_51 = arith.constant 0 : index
    %c0_52 = arith.constant 0 : index
    %92 = vector.load %arg8[%c0_51, %c0_52] : memref<256x128xbf16, #tpu.memory_space<vmem>>, vector<256x128xbf16>
    %c512 = arith.constant 512 : index
    %c0_53 = arith.constant 0 : index
    %93 = vector.load %arg3[%c512, %c0_53] : memref<1280x128xbf16, #tpu.memory_space<vmem>>, vector<128x128xbf16>
    %cst_54 = arith.constant dense<0.000000e+00> : vector<256x128xf32>
    %94 = tpu.matmul %92, %93, %cst_54 {dimension_numbers = #tpu.dot_dimension_numbers<[1], [0], [0], [1], [0, 0, 1, 1], [], []>} : vector<256x128xbf16>, vector<128x128xbf16>, vector<256x128xf32> -> vector<256x128xf32>
    %95 = arith.truncf %85 : vector<8x64xf32> to vector<8x64xbf16>
    %c0_55 = arith.constant 0 : index
    %c0_56 = arith.constant 0 : index
    %96 = vector.load %arg9[%c0_55, %c0_56] : memref<8x128xbf16, #tpu.memory_space<vmem>>, vector<8x64xbf16>
    tpu.vector_store %arg9[%c0_55, %c0_56], %95 {strides = array<i32>} : memref<8x128xbf16, #tpu.memory_space<vmem>>, vector<8x64xbf16>,
    %cst_57 = arith.constant 0.000000e+00 : f32
    %97 = vector.broadcast %cst_57 : f32 to vector<8x64xf32>
    %98 = arith.maximumf %85, %97 : vector<8x64xf32>
    %99 = arith.truncf %98 : vector<8x64xf32> to vector<8x64xbf16>
    %c0_58 = arith.constant 0 : index
    %c64_59 = arith.constant 64 : index
    %100 = vector.load %arg9[%c0_58, %c64_59] : memref<8x128xbf16, #tpu.memory_space<vmem>>, vector<8x64xbf16>
    tpu.vector_store %arg9[%c0_58, %c64_59], %99 {strides = array<i32>} : memref<8x128xbf16, #tpu.memory_space<vmem>>, vector<8x64xbf16>,
    %c0_60 = arith.constant 0 : index
    %c0_61 = arith.constant 0 : index
    %101 = vector.load %arg9[%c0_60, %c0_61] : memref<8x128xbf16, #tpu.memory_space<vmem>>, vector<8x128xbf16>
    %c640 = arith.constant 640 : index
    %c0_62 = arith.constant 0 : index
    %102 = vector.load %arg3[%c640, %c0_62] : memref<1280x128xbf16, #tpu.memory_space<vmem>>, vector<128x128xbf16>
    %cst_63 = arith.constant dense<0.000000e+00> : vector<8x128xf32>
    %103 = tpu.matmul %101, %102, %cst_63 {dimension_numbers = #tpu.dot_dimension_numbers<[1], [0], [0], [1], [0, 0, 1, 1], [], []>} : vector<8x128xbf16>, vector<128x128xbf16>, vector<8x128xf32> -> vector<8x128xf32>
    %104 = vector.shape_cast %94 : vector<256x128xf32> to vector<8x32x128xf32>
    %105 = vector.shape_cast %103 : vector<8x128xf32> to vector<8x1x128xf32>
    %106 = vector.broadcast %105 : vector<8x1x128xf32> to vector<8x32x128xf32>
    %107 = arith.addf %104, %106 : vector<8x32x128xf32>
    %108 = vector.shape_cast %107 : vector<8x32x128xf32> to vector<256x128xf32>
    %c8 = arith.constant 8 : index
    %c0_64 = arith.constant 0 : index
    %109 = vector.load %arg2[%c8, %c0_64] : memref<15x128xf32, #tpu.memory_space<vmem>>, vector<1x128xf32>
    %110 = vector.broadcast %109 : vector<1x128xf32> to vector<256x128xf32>
    %111 = arith.addf %108, %110 : vector<256x128xf32>
    %112 = vector.extract_strided_slice %111 {offsets = [0, 64], sizes = [256, 64], strides = [1, 1]} : vector<256x128xf32> to vector<256x64xf32>
    %cst_65 = arith.constant 0.000000e+00 : f32
    %113 = vector.broadcast %cst_65 : f32 to vector<256x64xf32>
    %114 = arith.maximumf %112, %113 : vector<256x64xf32>
    %115 = arith.truncf %114 : vector<256x64xf32> to vector<256x64xbf16>
    %c128_66 = arith.constant 128 : index
    %c0_67 = arith.constant 0 : index
    %116 = vector.load %arg4[%c128_66, %c0_67] : memref<320x64xbf16, #tpu.memory_space<vmem>>, vector<64x64xbf16>
    %cst_68 = arith.constant dense<0.000000e+00> : vector<256x64xf32>
    %117 = tpu.matmul %115, %116, %cst_68 {dimension_numbers = #tpu.dot_dimension_numbers<[1], [0], [0], [1], [0, 0, 1, 1], [], []>} : vector<256x64xbf16>, vector<64x64xbf16>, vector<256x64xf32> -> vector<256x64xf32>
    %c9 = arith.constant 9 : index
    %c0_69 = arith.constant 0 : index
    %118 = vector.load %arg2[%c9, %c0_69] : memref<15x128xf32, #tpu.memory_space<vmem>>, vector<1x64xf32>
    %119 = vector.broadcast %118 : vector<1x64xf32> to vector<256x64xf32>
    %120 = arith.addf %117, %119 : vector<256x64xf32>
    %121 = vector.extract_strided_slice %111 {offsets = [0, 0], sizes = [256, 64], strides = [1, 1]} : vector<256x128xf32> to vector<256x64xf32>
    %122 = arith.addf %121, %120 : vector<256x64xf32>
    %123 = vector.shape_cast %122 : vector<256x64xf32> to vector<8x32x64xf32>
    %cst_70 = arith.constant dense<0xFF800000> : vector<8x64xf32>
    %124 = vector.multi_reduction <maximumf>, %123, %cst_70 [1] : vector<8x32x64xf32> to vector<8x64xf32>
    %125 = arith.truncf %122 : vector<256x64xf32> to vector<256x64xbf16>
    %c0_71 = arith.constant 0 : index
    %c0_72 = arith.constant 0 : index
    %126 = vector.load %arg8[%c0_71, %c0_72] : memref<256x128xbf16, #tpu.memory_space<vmem>>, vector<256x64xbf16>
    tpu.vector_store %arg8[%c0_71, %c0_72], %125 {strides = array<i32>} : memref<256x128xbf16, #tpu.memory_space<vmem>>, vector<256x64xbf16>,
    %cst_73 = arith.constant 0.000000e+00 : f32
    %127 = vector.broadcast %cst_73 : f32 to vector<256x64xf32>
    %128 = arith.maximumf %122, %127 : vector<256x64xf32>
    %129 = arith.truncf %128 : vector<256x64xf32> to vector<256x64xbf16>
    %c0_74 = arith.constant 0 : index
    %c64_75 = arith.constant 64 : index
    %130 = vector.load %arg8[%c0_74, %c64_75] : memref<256x128xbf16, #tpu.memory_space<vmem>>, vector<256x64xbf16>
    tpu.vector_store %arg8[%c0_74, %c64_75], %129 {strides = array<i32>} : memref<256x128xbf16, #tpu.memory_space<vmem>>, vector<256x64xbf16>,
    %c0_76 = arith.constant 0 : index
    %c0_77 = arith.constant 0 : index
    %131 = vector.load %arg8[%c0_76, %c0_77] : memref<256x128xbf16, #tpu.memory_space<vmem>>, vector<256x128xbf16>
    %c768 = arith.constant 768 : index
    %c0_78 = arith.constant 0 : index
    %132 = vector.load %arg3[%c768, %c0_78] : memref<1280x128xbf16, #tpu.memory_space<vmem>>, vector<128x128xbf16>
    %cst_79 = arith.constant dense<0.000000e+00> : vector<256x128xf32>
    %133 = tpu.matmul %131, %132, %cst_79 {dimension_numbers = #tpu.dot_dimension_numbers<[1], [0], [0], [1], [0, 0, 1, 1], [], []>} : vector<256x128xbf16>, vector<128x128xbf16>, vector<256x128xf32> -> vector<256x128xf32>
    %134 = arith.truncf %124 : vector<8x64xf32> to vector<8x64xbf16>
    %c0_80 = arith.constant 0 : index
    %c0_81 = arith.constant 0 : index
    %135 = vector.load %arg9[%c0_80, %c0_81] : memref<8x128xbf16, #tpu.memory_space<vmem>>, vector<8x64xbf16>
    tpu.vector_store %arg9[%c0_80, %c0_81], %134 {strides = array<i32>} : memref<8x128xbf16, #tpu.memory_space<vmem>>, vector<8x64xbf16>,
    %cst_82 = arith.constant 0.000000e+00 : f32
    %136 = vector.broadcast %cst_82 : f32 to vector<8x64xf32>
    %137 = arith.maximumf %124, %136 : vector<8x64xf32>
    %138 = arith.truncf %137 : vector<8x64xf32> to vector<8x64xbf16>
    %c0_83 = arith.constant 0 : index
    %c64_84 = arith.constant 64 : index
    %139 = vector.load %arg9[%c0_83, %c64_84] : memref<8x128xbf16, #tpu.memory_space<vmem>>, vector<8x64xbf16>
    tpu.vector_store %arg9[%c0_83, %c64_84], %138 {strides = array<i32>} : memref<8x128xbf16, #tpu.memory_space<vmem>>, vector<8x64xbf16>,
    %c0_85 = arith.constant 0 : index
    %c0_86 = arith.constant 0 : index
    %140 = vector.load %arg9[%c0_85, %c0_86] : memref<8x128xbf16, #tpu.memory_space<vmem>>, vector<8x128xbf16>
    %c896 = arith.constant 896 : index
    %c0_87 = arith.constant 0 : index
    %141 = vector.load %arg3[%c896, %c0_87] : memref<1280x128xbf16, #tpu.memory_space<vmem>>, vector<128x128xbf16>
    %cst_88 = arith.constant dense<0.000000e+00> : vector<8x128xf32>
    %142 = tpu.matmul %140, %141, %cst_88 {dimension_numbers = #tpu.dot_dimension_numbers<[1], [0], [0], [1], [0, 0, 1, 1], [], []>} : vector<8x128xbf16>, vector<128x128xbf16>, vector<8x128xf32> -> vector<8x128xf32>
    %143 = vector.shape_cast %133 : vector<256x128xf32> to vector<8x32x128xf32>
    %144 = vector.shape_cast %142 : vector<8x128xf32> to vector<8x1x128xf32>
    %145 = vector.broadcast %144 : vector<8x1x128xf32> to vector<8x32x128xf32>
    %146 = arith.addf %143, %145 : vector<8x32x128xf32>
    %147 = vector.shape_cast %146 : vector<8x32x128xf32> to vector<256x128xf32>
    %c10 = arith.constant 10 : index
    %c0_89 = arith.constant 0 : index
    %148 = vector.load %arg2[%c10, %c0_89] : memref<15x128xf32, #tpu.memory_space<vmem>>, vector<1x128xf32>
    %149 = vector.broadcast %148 : vector<1x128xf32> to vector<256x128xf32>
    %150 = arith.addf %147, %149 : vector<256x128xf32>
    %151 = vector.extract_strided_slice %150 {offsets = [0, 64], sizes = [256, 64], strides = [1, 1]} : vector<256x128xf32> to vector<256x64xf32>
    %cst_90 = arith.constant 0.000000e+00 : f32
    %152 = vector.broadcast %cst_90 : f32 to vector<256x64xf32>
    %153 = arith.maximumf %151, %152 : vector<256x64xf32>
    %154 = arith.truncf %153 : vector<256x64xf32> to vector<256x64xbf16>
    %c192 = arith.constant 192 : index
    %c0_91 = arith.constant 0 : index
    %155 = vector.load %arg4[%c192, %c0_91] : memref<320x64xbf16, #tpu.memory_space<vmem>>, vector<64x64xbf16>
    %cst_92 = arith.constant dense<0.000000e+00> : vector<256x64xf32>
    %156 = tpu.matmul %154, %155, %cst_92 {dimension_numbers = #tpu.dot_dimension_numbers<[1], [0], [0], [1], [0, 0, 1, 1], [], []>} : vector<256x64xbf16>, vector<64x64xbf16>, vector<256x64xf32> -> vector<256x64xf32>
    %c11 = arith.constant 11 : index
    %c0_93 = arith.constant 0 : index
    %157 = vector.load %arg2[%c11, %c0_93] : memref<15x128xf32, #tpu.memory_space<vmem>>, vector<1x64xf32>
    %158 = vector.broadcast %157 : vector<1x64xf32> to vector<256x64xf32>
    %159 = arith.addf %156, %158 : vector<256x64xf32>
    %160 = vector.extract_strided_slice %150 {offsets = [0, 0], sizes = [256, 64], strides = [1, 1]} : vector<256x128xf32> to vector<256x64xf32>
    %161 = arith.addf %160, %159 : vector<256x64xf32>
    %162 = vector.shape_cast %161 : vector<256x64xf32> to vector<8x32x64xf32>
    %cst_94 = arith.constant dense<0xFF800000> : vector<8x64xf32>
    %163 = vector.multi_reduction <maximumf>, %162, %cst_94 [1] : vector<8x32x64xf32> to vector<8x64xf32>
    %164 = arith.truncf %161 : vector<256x64xf32> to vector<256x64xbf16>
    %c0_95 = arith.constant 0 : index
    %c0_96 = arith.constant 0 : index
    %165 = vector.load %arg8[%c0_95, %c0_96] : memref<256x128xbf16, #tpu.memory_space<vmem>>, vector<256x64xbf16>
    tpu.vector_store %arg8[%c0_95, %c0_96], %164 {strides = array<i32>} : memref<256x128xbf16, #tpu.memory_space<vmem>>, vector<256x64xbf16>,
    %cst_97 = arith.constant 0.000000e+00 : f32
    %166 = vector.broadcast %cst_97 : f32 to vector<256x64xf32>
    %167 = arith.maximumf %161, %166 : vector<256x64xf32>
    %168 = arith.truncf %167 : vector<256x64xf32> to vector<256x64xbf16>
    %c0_98 = arith.constant 0 : index
    %c64_99 = arith.constant 64 : index
    %169 = vector.load %arg8[%c0_98, %c64_99] : memref<256x128xbf16, #tpu.memory_space<vmem>>, vector<256x64xbf16>
    tpu.vector_store %arg8[%c0_98, %c64_99], %168 {strides = array<i32>} : memref<256x128xbf16, #tpu.memory_space<vmem>>, vector<256x64xbf16>,
    %c0_100 = arith.constant 0 : index
    %c0_101 = arith.constant 0 : index
    %170 = vector.load %arg8[%c0_100, %c0_101] : memref<256x128xbf16, #tpu.memory_space<vmem>>, vector<256x128xbf16>
    %c1024 = arith.constant 1024 : index
    %c0_102 = arith.constant 0 : index
    %171 = vector.load %arg3[%c1024, %c0_102] : memref<1280x128xbf16, #tpu.memory_space<vmem>>, vector<128x128xbf16>
    %cst_103 = arith.constant dense<0.000000e+00> : vector<256x128xf32>
    %172 = tpu.matmul %170, %171, %cst_103 {dimension_numbers = #tpu.dot_dimension_numbers<[1], [0], [0], [1], [0, 0, 1, 1], [], []>} : vector<256x128xbf16>, vector<128x128xbf16>, vector<256x128xf32> -> vector<256x128xf32>
    %173 = arith.truncf %163 : vector<8x64xf32> to vector<8x64xbf16>
    %c0_104 = arith.constant 0 : index
    %c0_105 = arith.constant 0 : index
    %174 = vector.load %arg9[%c0_104, %c0_105] : memref<8x128xbf16, #tpu.memory_space<vmem>>, vector<8x64xbf16>
    tpu.vector_store %arg9[%c0_104, %c0_105], %173 {strides = array<i32>} : memref<8x128xbf16, #tpu.memory_space<vmem>>, vector<8x64xbf16>,
    %cst_106 = arith.constant 0.000000e+00 : f32
    %175 = vector.broadcast %cst_106 : f32 to vector<8x64xf32>
    %176 = arith.maximumf %163, %175 : vector<8x64xf32>
    %177 = arith.truncf %176 : vector<8x64xf32> to vector<8x64xbf16>
    %c0_107 = arith.constant 0 : index
    %c64_108 = arith.constant 64 : index
    %178 = vector.load %arg9[%c0_107, %c64_108] : memref<8x128xbf16, #tpu.memory_space<vmem>>, vector<8x64xbf16>
    tpu.vector_store %arg9[%c0_107, %c64_108], %177 {strides = array<i32>} : memref<8x128xbf16, #tpu.memory_space<vmem>>, vector<8x64xbf16>,
    %c0_109 = arith.constant 0 : index
    %c0_110 = arith.constant 0 : index
    %179 = vector.load %arg9[%c0_109, %c0_110] : memref<8x128xbf16, #tpu.memory_space<vmem>>, vector<8x128xbf16>
    %c1152 = arith.constant 1152 : index
    %c0_111 = arith.constant 0 : index
    %180 = vector.load %arg3[%c1152, %c0_111] : memref<1280x128xbf16, #tpu.memory_space<vmem>>, vector<128x128xbf16>
    %cst_112 = arith.constant dense<0.000000e+00> : vector<8x128xf32>
    %181 = tpu.matmul %179, %180, %cst_112 {dimension_numbers = #tpu.dot_dimension_numbers<[1], [0], [0], [1], [0, 0, 1, 1], [], []>} : vector<8x128xbf16>, vector<128x128xbf16>, vector<8x128xf32> -> vector<8x128xf32>
    %182 = vector.shape_cast %172 : vector<256x128xf32> to vector<8x32x128xf32>
    %183 = vector.shape_cast %181 : vector<8x128xf32> to vector<8x1x128xf32>
    %184 = vector.broadcast %183 : vector<8x1x128xf32> to vector<8x32x128xf32>
    %185 = arith.addf %182, %184 : vector<8x32x128xf32>
    %186 = vector.shape_cast %185 : vector<8x32x128xf32> to vector<256x128xf32>
    %c12 = arith.constant 12 : index
    %c0_113 = arith.constant 0 : index
    %187 = vector.load %arg2[%c12, %c0_113] : memref<15x128xf32, #tpu.memory_space<vmem>>, vector<1x128xf32>
    %188 = vector.broadcast %187 : vector<1x128xf32> to vector<256x128xf32>
    %189 = arith.addf %186, %188 : vector<256x128xf32>
    %190 = vector.extract_strided_slice %189 {offsets = [0, 64], sizes = [256, 64], strides = [1, 1]} : vector<256x128xf32> to vector<256x64xf32>
    %cst_114 = arith.constant 0.000000e+00 : f32
    %191 = vector.broadcast %cst_114 : f32 to vector<256x64xf32>
    %192 = arith.maximumf %190, %191 : vector<256x64xf32>
    %193 = arith.truncf %192 : vector<256x64xf32> to vector<256x64xbf16>
    %c256_115 = arith.constant 256 : index
    %c0_116 = arith.constant 0 : index
    %194 = vector.load %arg4[%c256_115, %c0_116] : memref<320x64xbf16, #tpu.memory_space<vmem>>, vector<64x64xbf16>
    %cst_117 = arith.constant dense<0.000000e+00> : vector<256x64xf32>
    %195 = tpu.matmul %193, %194, %cst_117 {dimension_numbers = #tpu.dot_dimension_numbers<[1], [0], [0], [1], [0, 0, 1, 1], [], []>} : vector<256x64xbf16>, vector<64x64xbf16>, vector<256x64xf32> -> vector<256x64xf32>
    %c13 = arith.constant 13 : index
    %c0_118 = arith.constant 0 : index
    %196 = vector.load %arg2[%c13, %c0_118] : memref<15x128xf32, #tpu.memory_space<vmem>>, vector<1x64xf32>
    %197 = vector.broadcast %196 : vector<1x64xf32> to vector<256x64xf32>
    %198 = arith.addf %195, %197 : vector<256x64xf32>
    %199 = vector.extract_strided_slice %189 {offsets = [0, 0], sizes = [256, 64], strides = [1, 1]} : vector<256x128xf32> to vector<256x64xf32>
    %200 = arith.addf %199, %198 : vector<256x64xf32>
    %201 = vector.shape_cast %200 : vector<256x64xf32> to vector<8x32x64xf32>
    %cst_119 = arith.constant dense<0xFF800000> : vector<8x64xf32>
    %202 = vector.multi_reduction <maximumf>, %201, %cst_119 [1] : vector<8x32x64xf32> to vector<8x64xf32>
    %cst_120 = arith.constant 0.000000e+00 : f32
    %203 = vector.broadcast %cst_120 : f32 to vector<8x64xf32>
    %204 = arith.maximumf %202, %203 : vector<8x64xf32>
    %205 = arith.truncf %204 : vector<8x64xf32> to vector<8x64xbf16>
    %c0_121 = arith.constant 0 : index
    %c0_122 = arith.constant 0 : index
    %206 = vector.load %arg5[%c0_121, %c0_122] : memref<64x128xbf16, #tpu.memory_space<vmem>>, vector<64x128xbf16>
    %cst_123 = arith.constant dense<0.000000e+00> : vector<8x128xf32>
    %207 = tpu.matmul %205, %206, %cst_123 {dimension_numbers = #tpu.dot_dimension_numbers<[1], [0], [0], [1], [0, 0, 1, 1], [], []>} : vector<8x64xbf16>, vector<64x128xbf16>, vector<8x128xf32> -> vector<8x128xf32>
    %c14 = arith.constant 14 : index
    %c0_124 = arith.constant 0 : index
    %208 = vector.load %arg2[%c14, %c0_124] : memref<15x128xf32, #tpu.memory_space<vmem>>, vector<1x128xf32>
    %209 = vector.broadcast %208 : vector<1x128xf32> to vector<8x128xf32>
    %210 = arith.addf %207, %209 : vector<8x128xf32>
    %c0_125 = arith.constant 0 : index
    %c0_126 = arith.constant 0 : index
    %211 = vector.load %arg6[%c0_125, %c0_126] : memref<8x128xf32, #tpu.memory_space<vmem>>, vector<8x128xf32>
    tpu.vector_store %arg6[%c0_125, %c0_126], %210 {strides = array<i32>} : memref<8x128xf32, #tpu.memory_space<vmem>>, vector<8x128xf32>,
    return
  }
  func.func @transform_0(%arg0: i32) -> (i32, i32, i32) {
    %c0_i32 = arith.constant 0 : i32
    %c0_i32_0 = arith.constant 0 : i32
    %c0_i32_1 = arith.constant 0 : i32
    return %arg0, %c0_i32, %c0_i32_0 : i32, i32, i32
  }
  func.func @transform_1(%arg0: i32) -> (i32, i32) {
    %c0_i32 = arith.constant 0 : i32
    %c0_i32_0 = arith.constant 0 : i32
    %c0_i32_1 = arith.constant 0 : i32
    return %c0_i32, %c0_i32_0 : i32, i32
  }
  func.func @transform_2(%arg0: i32) -> (i32, i32) {
    %c0_i32 = arith.constant 0 : i32
    %c0_i32_0 = arith.constant 0 : i32
    %c0_i32_1 = arith.constant 0 : i32
    return %c0_i32, %c0_i32_0 : i32, i32
  }
  func.func @transform_3(%arg0: i32) -> (i32, i32) {
    %c0_i32 = arith.constant 0 : i32
    %c0_i32_0 = arith.constant 0 : i32
    %c0_i32_1 = arith.constant 0 : i32
    return %c0_i32, %c0_i32_0 : i32, i32
  }
  func.func @transform_4(%arg0: i32) -> (i32, i32) {
    %c0_i32 = arith.constant 0 : i32
    %c0_i32_0 = arith.constant 0 : i32
    %c0_i32_1 = arith.constant 0 : i32
    return %c0_i32, %c0_i32_0 : i32, i32
  }
  func.func @transform_5(%arg0: i32) -> (i32, i32) {
    %c0_i32 = arith.constant 0 : i32
    %c0_i32_0 = arith.constant 0 : i32
    return %arg0, %c0_i32 : i32, i32
  }
}

</mosaic_0001>

<bundles_post_ra>
// kernel: tpu_custom_call.1
= control target key start
LH: loop header
LB: loop body
LE: loop exit
PB: predicated region body
PF: predicated region fallthrough
CT: control target
= control target key end

     0   :  { %10 = vsyncpa [#allocation6], 0  ;;  %s11414_s0 = inlined_call_operand.vmem [shape: f32[16,32,3], index: 0, kind: input, shape index: {}]   ;;  %s11415_s1 = inlined_call_operand.vmem [shape: f32[15,128], index: 1, kind: input, shape index: {}]   ;;  %s11416_s2 = inlined_call_operand.vmem [shape: bf16[1280,128], index: 2, kind: input, shape index: {}]   ;;  %s11417_s3 = inlined_call_operand.vmem [shape: bf16[320,64], index: 3, kind: input, shape index: {}]   ;;  %s11418_s4 = inlined_call_operand.vmem [shape: bf16[64,128], index: 4, kind: input, shape index: {}]   ;;  %s11419_s5 = inlined_call_operand.hbm [shape: f32[16,128], index: 5, kind: output, shape index: {}]  }
   0x1   :  { %12 = vsyncpa [#allocation6 + $0x1], 0  ;;  %s8486_s18 = smov 0   ;;  %s8488_s19 = smov 0  }
   0x2   :  { %s8490_s20 = smov 0   ;;  %s8492_s21 = smov 0  }
   0x3 LB: > { %s8507_s22 = sadd.s32 4294967295, %s8446_s21   ;;  %s7006_s23 = sadd.s32 4294967294, %s8446_s21   ;;  %s8446_s21 = sphi %s8492_s21, %s11425_s21   ;;  %s8442_s20 = sphi %s8490_s20, %s11424_s20   ;;  %s8438_s19 = sphi %s8488_s19, %s11423_s19   ;;  %s8434_s18 = sphi %s8486_s18, %s11422_s18  }
   0x4   : > { %s8511_s24 = sadd.s32 1, %s8446_s21   ;;  %s135_s25 = sadd.s32 1, %s8442_s20 }
   0x5   : > { %s132_s26 = ssub.s32 %s8446_s21, %s8511_s24  ;;  %p145_p0 = scmp.ne.s32.totalorder %s8442_s20, %s8438_s19 }
   0x6   : > { %p133_p1 = scmp.eq.s32.totalorder %s132_s26, 0  ;;  %p146_p2 = scmp.eq.s32.totalorder %s8507_s22, 1 }
   0x7   : > { %p151_p3 = scmp.ne.s32.totalorder %s8438_s19, %s8434_s18  ;;  %p152_p4 = scmp.eq.s32.totalorder %s7006_s23, 1 }
   0x8   : > { %s8522_s27 = scalar_select %p133_p1, %s8442_s20, %s135_s25  }
   0x9   : > { %p8524_p5 = por %p146_p2, %p145_p0  ;;  %p8528_p6 = por %p152_p4, %p151_p3 }
   0xa   : > { %p7009_p7 = scmp.ge.s32.totalorder %s8446_s21, 1  ;;  %p192_p8 = scmp.lt.s32.totalorder %s8446_s21, 3 }
   0xc   : > { %p193_p9 = pnand %p7009_p7, %p192_p8 }
   0xd   : > { %s7011_s30 = sshll.u32 (!%p193_p9), %s8507_s22, 3  ;;  %v8448_v0 = vmov (!%p193_p9), 2   ;;  %v8449_v1 = vmov (!%p193_p9), 1   ;;  %v8280_v2 = vld [vmem:[%s11416_s2 + $0x40] sm:$0xff] (!%p193_p9)   ;;  %v8282_v8 = vld [vmem:[%s11416_s2 + $0x48] sm:$0xff] (!%p193_p9)   ;;  %v8284_v10 = vld [vmem:[%s11416_s2 + $0x50] sm:$0xff] (!%p193_p9)  }
   0xe   : > { %196 = sbr.rel (%p193_p9) target bundleno = 4356 (0x1104), region = 40  ;;  %8227 = vset.pattern.permute.xlu0 (!%p193_p9), %v8448_v0  ;;  %8226 = vset.pattern.permute.xlu1 (!%p193_p9), %v8449_v1  ;;  %p222_p10 = scmp.lt.s32.totalorder (!%p193_p9), %s7011_s30, 15  ;;  %v8281_v3 = vld [vmem:[%s11416_s2] sm:$0xff] (!%p193_p9)   ;;  %v8283_v9 = vld [vmem:[%s11416_s2 + $0x8] sm:$0xff] (!%p193_p9)   ;;  %v8285_v11 = vld [vmem:[%s11416_s2 + $0x10] sm:$0xff] (!%p193_p9)   ;;  %v8450_v13 = vmov (!%p193_p9), 0  }
   0xf   : > { %7347 = vmatprep.subr.bf16.mxu0 (!%p193_p9), %v8280_v2  ;;  %v8286_v12 = vld [vmem:[%s11416_s2 + $0x58] sm:$0xff] (!%p193_p9)   ;;  %v8288_v15 = vld [vmem:[%s11416_s2 + $0x60] sm:$0xff] (!%p193_p9)   ;;  %v8290_v18 = vld [vmem:[%s11416_s2 + $0x68] sm:$0xff] (!%p193_p9)   ;;  %s8451_s14 = smov (!%p193_p9), 64   ;;  %vm1444_vm0 = vcmask (!%p193_p9), 523264   ;;  %vm2232_vm1 = vcmask (!%p193_p9), 1041409  }
  0x10   : > { %7348 = vmatpush3.bf16.msra.mxu0 (!%p193_p9), %v8281_v3  ;;  %v8287_v14 = vld [vmem:[%s11416_s2 + $0x18] sm:$0xff] (!%p193_p9)   ;;  %v8289_v17 = vld [vmem:[%s11416_s2 + $0x20] sm:$0xff] (!%p193_p9)   ;;  %v8291_v20 = vld [vmem:[%s11416_s2 + $0x28] sm:$0xff] (!%p193_p9)   ;;  %vm2234_vm2 = vcmask (!%p193_p9), 1042434   ;;  %vm1934_vm3 = vcmask (!%p193_p9), 1048064   ;;  %vm2236_vm4 = vcmask (!%p193_p9), 1043459  }
  0x11   : > { %7349 = vmatprep.subr.bf16.mxu0 (!%p193_p9), %v8282_v8  ;;  %v8292_v21 = vld [vmem:[%s11416_s2 + $0x70] sm:$0xff] (!%p193_p9)   ;;  %v8294_v24 = vld [vmem:[%s11416_s2 + $0x78] sm:$0xff] (!%p193_p9)   ;;  %v8703_v54 = vld [vmem:[%s11415_s1 + $0x1] ss:$0 sm:$0xff] (!%p193_p9)  ;;  %vm2238_vm5 = vcmask (!%p193_p9), 1044484   ;;  %vm2240_vm6 = vcmask (!%p193_p9), 1045509  }
  0x12   : > { %v8293_v23 = vld [vmem:[%s11416_s2 + $0x30] sm:$0xff] (!%p193_p9)   ;;  %v8295_v26 = vld [vmem:[%s11416_s2 + $0x38] sm:$0xff] (!%p193_p9)   ;;  %v8708_v55 = vld [vmem:[%s11415_s1] ss:$0 sm:$0xff] (!%p193_p9)  ;;  %vm2242_vm7 = vcmask (!%p193_p9), 1046534   ;;  %vm2244_vm8 = vcmask (!%p193_p9), 1047559  }
  0x13   : > { %v8713_v56 = vld [vmem:[%s11415_s1 + $0x2] ss:$0 sm:$0xff] (!%p193_p9)  ;;  %vm8453_vm9 = vmmov (!%p193_p9), 0   ;;  %vm2248_vm10 = vcmask (!%p193_p9), 519168   ;;  %vm2309_vm11 = vcmask (!%p193_p9), 1043968   ;;  %s7279_s7 = sshll.u32 (!%p193_p9), %s8507_s22, 7 }
  0x14   : > { %7350 = vmatpush3.bf16.msra.mxu0 (!%p193_p9), %v8283_v9  ;;  %s11372_s11 = scalar_lea.hbm (!%p193_p9), %s11419_s5, %s7279_s7  ;;  %s8455_s15 = smov (!%p193_p9), [#allocation5]  }
  0x15   : > { %s11427_s30 = smov (!%p222_p10, %s7011_s30), 15  ;;  %7351 = vmatprep.subr.bf16.mxu0 %v8284_v10  ;;  %s8388_s16 = sshll.u32 %s8455_s15, 4  ;;  %s8389_s16 = int_to_ptr.vmem [resolvable:$false] %s8388_s16 }
  0x16   : > { %s7282_s10 = sshll.u32 %s11427_s30, 5  ;;  %s8390_s17 = scalar_lea.vmem %s8389_s16, 256 }
  0x17   : > { %s8546_s13 = scalar_lea.vmem %s11414_s0, %s7282_s10 }
  0x18   : > { %v229_v4 = vld [vmem:[%s8546_s13] sm:$0xff]  ;;  %v231_v5 = vld [vmem:[%s8546_s13 + $0x10] sm:$0xff]  ;;  %v230_v6 = vld [vmem:[%s8546_s13 + $0x8] sm:$0xff]  ;;  %7352 = vmatpush3.bf16.msra.mxu0 %v8285_v11 }
  0x19   : > { %657 = vperm.xlu0 %8227, %v229_v4   ;;  %460 = vperm.xlu1 %8226, %v229_v4   ;;  %v233_v7 = vld [vmem:[%s8546_s13 + $0x20] sm:$0xff]  ;;  %v232_v16 = vld [vmem:[%s8546_s13 + $0x18] sm:$0xff]  ;;  %v234_v19 = vld [vmem:[%s8546_s13 + $0x28] sm:$0xff] }
  0x1a   : > { %7353 = vmatprep.subr.bf16.mxu0 %v8286_v12  ;;  %v236_v22 = vld [vmem:[%s8546_s13 + $0x38] sm:$0xff]  ;;  %v238_v25 = vld [vmem:[%s8546_s13 + $0x48] sm:$0xff]  ;;  %v235_v30 = vld [vmem:[%s8546_s13 + $0x30] sm:$0xff] }
  0x1b   : > { %v8605_v27 = vld [vmem:[%s8546_s13 + $0x58] sm:$0xff]  ;;  %v8608_v28 = vld [vmem:[%s8546_s13 + $0x68] sm:$0xff]  ;;  %v237_v31 = vld [vmem:[%s8546_s13 + $0x40] sm:$0xff] }
  0x1c   : > { %7354 = vmatpush3.bf16.msra.mxu0 %v8287_v14  ;;  %v8613_v29 = vld [vmem:[%s8546_s13 + $0x78] sm:$0xff]  ;;  %v239_v32 = vld [vmem:[%s8546_s13 + $0x50] sm:$0xff]  ;;  %v241_v33 = vld [vmem:[%s8546_s13 + $0x60] sm:$0xff] }
  0x1d   : > { %665 = vperm.xlu0 %8227, %v231_v5   ;;  %464 = vperm.xlu1 %8226, %v230_v6   ;;  %v243_v34 = vld [vmem:[%s8546_s13 + $0x70] sm:$0xff]  ;;  %v8628_v35 = vld [vmem:[%s8546_s13 + $0x80] sm:$0xff]  ;;  %v8642_v38 = vld [vmem:[%s8546_s13 + $0x88] sm:$0xff] }
  0x1e   : > { %7355 = vmatprep.subr.bf16.mxu0 %v8288_v15  ;;  %v8633_v36 = vld [vmem:[%s8546_s13 + $0x90] sm:$0xff]  ;;  %v8638_v37 = vld [vmem:[%s8546_s13 + $0xa0] sm:$0xff]  ;;  %v8648_v39 = vld [vmem:[%s8546_s13 + $0x98] sm:$0xff] }
  0x1f   : > { %v8652_v40 = vld [vmem:[%s8546_s13 + $0xa8] sm:$0xff]  ;;  %v8657_v41 = vld [vmem:[%s8546_s13 + $0xb8] sm:$0xff]  ;;  %v8673_v44 = vld [vmem:[%s8546_s13 + $0xb0] sm:$0xff] }
  0x20   : > { %7356 = vmatpush3.bf16.msra.mxu0 %v8289_v17  ;;  %v8662_v42 = vld [vmem:[%s8546_s13 + $0xc8] sm:$0xff]  ;;  %v8667_v43 = vld [vmem:[%s8546_s13 + $0xd8] sm:$0xff]  ;;  %v8679_v45 = vld [vmem:[%s8546_s13 + $0xc0] sm:$0xff] }
  0x21   : > { %673 = vperm.xlu0 %8227, %v233_v7   ;;  %8228 = vset.pattern.permute.xlu1 %v8448_v0  ;;  %v8684_v46 = vld [vmem:[%s8546_s13 + $0xd0] sm:$0xff]  ;;  %v8693_v51 = vld [vmem:[%s8546_s13 + $0xe0] sm:$0xff]  ;;  %v8720_v62 = vld [vmem:[%s8546_s13 + $0xe8] sm:$0xff] }
  0x22   : > { %661 = vperm.xlu1 %8228, %v230_v6   ;;  %7357 = vmatprep.subr.bf16.mxu0 %v8290_v18 }
  0x24   : > { %7358 = vmatpush3.bf16.msra.mxu0 %v8291_v20 }
  0x25   : > { %8234 = vset.pattern.permute.xlu0 %v8450_v13  ;;  %7359 = vmatprep.subr.bf16.mxu0 %v8292_v21 }
  0x26   : > { %264 = vperm.xlu0 %8234, %v229_v4   ;;  %8229 = vset.pattern.permute.xlu1 %v8450_v13 }
  0x27   : > { %274 = vperm.xlu1 %8229, %v231_v5  }
  0x28   : > { %7360 = vmatpush3.bf16.msra.mxu0 %v8293_v23 }
  0x29   : > { %7361 = vmatprep.subr.bf16.mxu0 %v8294_v24 }
  0x2a   : > { %269 = vperm.xlu0 %8234, %v230_v6   ;;  %v8730_v6 = vld [vmem:[%s11415_s1 + $0x3] ss:$0 sm:$0xff] }
  0x2b   : > { %8230 = vset.pattern.permute.xlu1 %v8449_v1 }
  0x2c   : > { %468 = vperm.xlu1 %8230, %v231_v5   ;;  %7362 = vmatpush3.bf16.msra.mxu0 %v8295_v26 }
  0x2e   : > { %279 = vperm.xlu0 %8234, %v232_v16  }
  0x30   : > { %472 = vperm.xlu1 %8230, %v232_v16  }
  0x32   : > { %289 = vperm.xlu0 %8234, %v234_v19  }
  0x34   : > { %8231 = vset.pattern.permute.xlu1 %v8448_v0 }
  0x35   : > { %669 = vperm.xlu1 %8231, %v232_v16  }
  0x36   : > { %299 = vperm.xlu0 %8234, %v236_v22  }
  0x39   : > { %8232 = vset.pattern.permute.xlu1 %v8450_v13 }
  0x3a   : > { %284 = vperm.xlu1 %8232, %v233_v7   ;;  %309 = vperm.xlu0 %8234, %v238_v25  }
  0x3e   : > { %8233 = vset.pattern.permute.xlu1 %v8449_v1  ;;  %319 = vperm.xlu0 %8234, %v8605_v27  }
  0x3f   : > { %476 = vperm.xlu1 %8233, %v233_v7  }
  0x42   : > { %329 = vperm.xlu0 %8234, %v8608_v28  }
  0x43   : > { %480 = vperm.xlu1 %8233, %v234_v19  }
  0x46   : > { %339 = vperm.xlu0 %8234, %v8613_v29  }
  0x47   : > { %8235 = vset.pattern.permute.xlu1 %v8448_v0 }
  0x48   : > { %677 = vperm.xlu1 %8235, %v234_v19  }
  0x4a   : > { %8249 = vset.pattern.permute.xlu0 %v8448_v0 }
  0x4b   : > { %681 = vperm.xlu0 %8249, %v235_v30  }
  0x4c   : > { %8236 = vset.pattern.permute.xlu1 %v8450_v13 }
  0x4d   : > { %294 = vperm.xlu1 %8236, %v235_v30  }
  0x4f   : > { %689 = vperm.xlu0 %8249, %v237_v31  }
  0x51   : > { %8237 = vset.pattern.permute.xlu1 %v8449_v1 }
  0x52   : > { %484 = vperm.xlu1 %8237, %v235_v30  }
  0x53   : > { %697 = vperm.xlu0 %8249, %v239_v32  }
  0x56   : > { %488 = vperm.xlu1 %8237, %v236_v22  }
  0x57   : > { %705 = vperm.xlu0 %8249, %v241_v33  }
  0x5a   : > { %8238 = vset.pattern.permute.xlu1 %v8448_v0 }
  0x5b   : > { %685 = vperm.xlu1 %8238, %v236_v22   ;;  %713 = vperm.xlu0 %8249, %v243_v34  }
  0x5f   : > { %8239 = vset.pattern.permute.xlu1 %v8450_v13  ;;  %721 = vperm.xlu0 %8249, %v8628_v35  }
  0x60   : > { %304 = vperm.xlu1 %8239, %v237_v31  }
  0x63   : > { %729 = vperm.xlu0 %8249, %v8633_v36  }
  0x64   : > { %8240 = vset.pattern.permute.xlu1 %v8449_v1 }
  0x65   : > { %492 = vperm.xlu1 %8240, %v237_v31  }
  0x67   : > { %737 = vperm.xlu0 %8249, %v8638_v37  }
  0x69   : > { %496 = vperm.xlu1 %8240, %v238_v25  }
  0x6b   : > { %8260 = vset.pattern.permute.xlu0 %v8450_v13 }
  0x6c   : > { %349 = vperm.xlu0 %8260, %v8642_v38  }
  0x6d   : > { %8241 = vset.pattern.permute.xlu1 %v8448_v0 }
  0x6e   : > { %693 = vperm.xlu1 %8241, %v238_v25   ;;  %v8744_v25 = vld [vmem:[%s8546_s13 + $0xf8] sm:$0xff] }
  0x70   : > { %359 = vperm.xlu0 %8260, %v8648_v39  }
  0x72   : > { %8242 = vset.pattern.permute.xlu1 %v8450_v13 }
  0x73   : > { %314 = vperm.xlu1 %8242, %v239_v32  }
  0x74   : > { %369 = vperm.xlu0 %8260, %v8652_v40  }
  0x77   : > { %8243 = vset.pattern.permute.xlu1 %v8449_v1 }
  0x78   : > { %500 = vperm.xlu1 %8243, %v239_v32   ;;  %379 = vperm.xlu0 %8260, %v8657_v41  }
  0x7c   : > { %504 = vperm.xlu1 %8243, %v8605_v27   ;;  %389 = vperm.xlu0 %8260, %v8662_v42  }
  0x80   : > { %8244 = vset.pattern.permute.xlu1 %v8448_v0  ;;  %399 = vperm.xlu0 %8260, %v8667_v43  }
  0x81   : > { %701 = vperm.xlu1 %8244, %v8605_v27  }
  0x84   : > { %8269 = vset.pattern.permute.xlu0 %v8448_v0 }
  0x85   : > { %8245 = vset.pattern.permute.xlu1 %v8450_v13  ;;  %745 = vperm.xlu0 %8269, %v8673_v44  }
  0x86   : > { %324 = vperm.xlu1 %8245, %v241_v33  }
  0x89   : > { %753 = vperm.xlu0 %8269, %v8679_v45  }
  0x8a   : > { %8246 = vset.pattern.permute.xlu1 %v8449_v1 }
  0x8b   : > { %508 = vperm.xlu1 %8246, %v241_v33  }
  0x8d   : > { %761 = vperm.xlu0 %8269, %v8684_v46  }
  0x8f   : > { %512 = vperm.xlu1 %8246, %v8608_v28  }
  0x91   : > { %769 = vperm.xlu0 %8269, %v8693_v51  }
  0x93   : > { %8247 = vset.pattern.permute.xlu1 %v8448_v0 }
  0x94   : > { %709 = vperm.xlu1 %8247, %v8608_v28  }
  0x95   : > { %8274 = vset.pattern.permute.xlu0 %v8450_v13 }
  0x96   : > { %409 = vperm.xlu0 %8274, %v8720_v62  }
  0x98   : > { %8248 = vset.pattern.permute.xlu1 %v8450_v13  ;;  %v461_v47 = vpop.permute.xlu1 %460  ;;  %v658_v48 = vpop.permute.xlu0 %657 }
  0x99   : > { %334 = vperm.xlu1 %8248, %v243_v34   ;;  %v591_v58 = vmul.f32 %v8703_v54, %v461_v47  ;;  %v788_v59 = vmul.f32 %v8713_v56, %v658_v48 }
  0x9a   : > { %419 = vperm.xlu0 %8274, %v8744_v25  }
  0x9c   : > { %v465_v49 = vpop.permute.xlu1 %464  ;;  %v666_v50 = vpop.permute.xlu0 %665 }
  0x9d   : > { %8250 = vset.pattern.permute.xlu1 %v8449_v1  ;;  %v592_v3 = vmul.f32 %v8703_v54, %v465_v49  ;;  %v790_v16 = vmul.f32 %v8713_v56, %v666_v50 }
  0x9e   : > { %516 = vperm.xlu1 %8250, %v243_v34   ;;  %8278 = vset.pattern.permute.xlu0 %v8448_v0 }
  0xa0   : > { %v8696_v52 = vpop.permute.xlu0 %673 }
  0xa1   : > { %v662_v53 = vpop.permute.xlu1 %661 }
  0xa2   : > { %520 = vperm.xlu1 %8250, %v8613_v29   ;;  %v789_v8 = vmul.f32 %v8713_v56, %v662_v53 }
  0xa5   : > { %v265_v57 = vpop.permute.xlu0 %264 }
  0xa6   : > { %v426_v60 = vmul.f32 %v8708_v55, %v265_v57  ;;  %8251 = vset.pattern.permute.xlu1 %v8448_v0  ;;  %v275_v61 = vpop.permute.xlu1 %274 }
  0xa7   : > { %717 = vperm.xlu1 %8251, %v8613_v29   ;;  %v428_v11 = vmul.f32 %v8708_v55, %v275_v61 }
  0xa8   : > { %v623_v63 = vadd.f32 %v591_v58, %v426_v60 }
  0xa9   : > { %v270_v2 = vpop.permute.xlu0 %269 }
  0xaa   : > { %v820_v4 = vadd.f32 %v788_v59, %v623_v63  ;;  %v427_v5 = vmul.f32 %v8708_v55, %v270_v2 }
  0xab   : > { %8252 = vset.pattern.permute.xlu1 %v8450_v13  ;;  %v469_v7 = vpop.permute.xlu1 %468 }
  0xac   : > { %v624_v9 = vadd.f32 %v592_v3, %v427_v5  ;;  %v593_v10 = vmul.f32 %v8703_v54, %v469_v7  ;;  %344 = vperm.xlu1 %8252, %v8628_v35   ;;  %v857_v15 = vadd.f32 %v8730_v6, %v820_v4 }
  0xad   : > { %v280_v12 = vpop.permute.xlu0 %279 }
  0xae   : > { %v821_v14 = vadd.f32 %v789_v8, %v624_v9  ;;  %v625_v17 = vadd.f32 %v593_v10, %v428_v11  ;;  %v429_v20 = vmul.f32 %v8708_v55, %v280_v12  ;;  %v921_v23 = vmax.f32 %v857_v15, 0.0 }
  0xaf   : > { %v473_v18 = vpop.permute.xlu1 %472 }
  0xb0   : > { %8253 = vset.pattern.permute.xlu1 %v8449_v1  ;;  %v858_v19 = vadd.f32 %v8730_v6, %v821_v14  ;;  %v594_v21 = vmul.f32 %v8703_v54, %v473_v18  ;;  %v822_v26 = vadd.f32 %v790_v16, %v625_v17 }
  0xb1   : > { %524 = vperm.xlu1 %8253, %v8628_v35   ;;  %v290_v22 = vpop.permute.xlu0 %289  ;;  %v8751_v35 = vld [vmem:[%s8546_s13 + $0xf0] sm:$0xff]  ;;  %s218_s13 = sand.u32 1, %s8438_s19  }
  0xb2   : > { %v922_v24 = vmax.f32 %v858_v19, 0.0  ;;  %v626_v29 = vadd.f32 %v594_v21, %v429_v20  ;;  %v889_v31 = vpack.c.bf16 %v858_v19, %v857_v15  ;;  %v859_v33 = vadd.f32 %v8730_v6, %v822_v26  ;;  %777 = vperm.xlu0 %8278, %v8751_v35   ;;  %s7010_s26 = sshll.u32 %s218_s13, 3  ;;  %s6934_s12 = scalar_lea.sflag [#allocation6], %s218_s13 }
  0xb3   : > { %v431_v4 = vmul.f32 %v8708_v55, %v290_v22  ;;  %s220_s8 = scalar_lea.vmem [#allocation5], %s7010_s26 }
  0xb4   : > { %v670_v27 = vpop.permute.xlu1 %669  ;;  %v953_v28 = vpack.c.bf16 %v922_v24, %v921_v23  ;;  %v923_v50 = vmax.f32 %v859_v33, 0.0 }
  0xb5   : > { %v791_v30 = vmul.f32 %v8713_v56, %v670_v27  ;;  %528 = vperm.xlu1 %8253, %v8642_v38   ;;  %v300_v32 = vpop.permute.xlu0 %299 }
  0xb6   : > { %1182 = vmatprep.mubr.bf16.mxu0 %v953_v28  ;;  %v433_v27 = vmul.f32 %v8708_v55, %v300_v32 }
  0xb7   : > { %v823_v34 = vadd.f32 %v791_v30, %v626_v29  ;;  %1183 = vmatmul.mubr.bf16.vlgmr.msra.gmra.mrb[0].mxu0 %v889_v31 }
  0xb9   : > { %v860_v47 = vadd.f32 %v8730_v6, %v823_v34  ;;  %8254 = vset.pattern.permute.xlu1 %v8448_v0  ;;  %v285_v48 = vpop.permute.xlu1 %284  ;;  %v8758_v49 = vpop.permute.xlu0 %309 }
  0xba   : > { %725 = vperm.xlu1 %8254, %v8642_v38   ;;  %v430_v61 = vmul.f32 %v8708_v55, %v285_v48  ;;  %v792_v38 = vmul.f32 %v8713_v56, %v8696_v52 }
  0xbb   : > { %v924_v53 = vmax.f32 %v860_v47, 0.0  ;;  %v890_v59 = vpack.c.bf16 %v860_v47, %v859_v33 }
  0xbd   : > { %v954_v57 = vpack.c.bf16 %v924_v53, %v923_v50  ;;  %v8764_v63 = vpop.permute.xlu0 %319 }
  0xbe   : > { %8255 = vset.pattern.permute.xlu1 %v8450_v13  ;;  %v477_v58 = vpop.permute.xlu1 %476 }
  0xbf   : > { %v595_v60 = vmul.f32 %v8703_v54, %v477_v58  ;;  %354 = vperm.xlu1 %8255, %v8633_v36   ;;  %1190 = vmatprep.mubr.bf16.mxu0 %v954_v57 }
  0xc0   : > { %1191 = vmatmul.mubr.bf16.gmra.mrb[4].mxu0 %v890_v59 }
  0xc1   : > { %v627_v2 = vadd.f32 %v595_v60, %v430_v61  ;;  %v8772_v8 = vpop.permute.xlu0 %329 }
  0xc2   : > { %v481_v3 = vpop.permute.xlu1 %480 }
  0xc3   : > { %8256 = vset.pattern.permute.xlu1 %v8449_v1  ;;  %v596_v5 = vmul.f32 %v8703_v54, %v481_v3  ;;  %v824_v7 = vadd.f32 %v792_v38, %v627_v2  ;;  %v435_v3 = vmul.f32 %v8708_v55, %v8758_v49 }
  0xc4   : > { %532 = vperm.xlu1 %8256, %v8633_v36  }
  0xc5   : > { %v628_v10 = vadd.f32 %v596_v5, %v431_v4  ;;  %v861_v52 = vadd.f32 %v8730_v6, %v824_v7  ;;  %v8779_v16 = vpop.permute.xlu0 %339 }
  0xc7   : > { %v678_v9 = vpop.permute.xlu1 %677  ;;  %v925_v36 = vmax.f32 %v861_v52, 0.0 }
  0xc8   : > { %v793_v11 = vmul.f32 %v8713_v56, %v678_v9  ;;  %536 = vperm.xlu1 %8256, %v8648_v39  }
  0xca   : > { %v825_v12 = vadd.f32 %v793_v11, %v628_v10  ;;  %v682_v22 = vpop.permute.xlu0 %681 }
  0xcb   : > { %v794_v26 = vmul.f32 %v8713_v56, %v682_v22 }
  0xcc   : > { %v862_v14 = vadd.f32 %v8730_v6, %v825_v12  ;;  %8257 = vset.pattern.permute.xlu1 %v8448_v0  ;;  %v295_v15 = vpop.permute.xlu1 %294 }
  0xcd   : > { %733 = vperm.xlu1 %8257, %v8648_v39   ;;  %v432_v23 = vmul.f32 %v8708_v55, %v295_v15 }
  0xce   : > { %v926_v17 = vmax.f32 %v862_v14, 0.0  ;;  %v891_v20 = vpack.c.bf16 %v862_v14, %v861_v52  ;;  %v690_v60 = vpop.permute.xlu0 %689 }
  0xcf   : > { %v796_v2 = vmul.f32 %v8713_v56, %v690_v60 }
  0xd0   : > { %v955_v18 = vpack.c.bf16 %v926_v17, %v925_v36 }
  0xd1   : > { %8258 = vset.pattern.permute.xlu1 %v8450_v13  ;;  %v485_v19 = vpop.permute.xlu1 %484 }
  0xd2   : > { %v597_v21 = vmul.f32 %v8703_v54, %v485_v19  ;;  %364 = vperm.xlu1 %8258, %v8638_v37   ;;  %1198 = vmatprep.mubr.bf16.mxu0 %v955_v18  ;;  %v698_v19 = vpop.permute.xlu0 %697 }
  0xd3   : > { %1199 = vmatmul.mubr.bf16.gmra.mrb[8].mxu0 %v891_v20  ;;  %v798_v22 = vmul.f32 %v8713_v56, %v698_v19 }
  0xd4   : > { %v629_v24 = vadd.f32 %v597_v21, %v432_v23  ;;  %v437_v23 = vmul.f32 %v8708_v55, %v8764_v63 }
  0xd5   : > { %v489_v39 = vpop.permute.xlu1 %488 }
  0xd6   : > { %8259 = vset.pattern.permute.xlu1 %v8449_v1  ;;  %v598_v28 = vmul.f32 %v8703_v54, %v489_v39  ;;  %v826_v29 = vadd.f32 %v794_v26, %v629_v24 }
  0xd7   : > { %540 = vperm.xlu1 %8259, %v8638_v37  }
  0xd8   : > { %v630_v31 = vadd.f32 %v598_v28, %v433_v27  ;;  %v863_v34 = vadd.f32 %v8730_v6, %v826_v29 }
  0xda   : > { %v686_v30 = vpop.permute.xlu1 %685  ;;  %v927_v32 = vmax.f32 %v863_v34, 0.0 }
  0xdb   : > { %v795_v33 = vmul.f32 %v8713_v56, %v686_v30  ;;  %544 = vperm.xlu1 %8259, %v8652_v40  }
  0xdd   : > { %v827_v47 = vadd.f32 %v795_v33, %v630_v31 }
  0xdf   : > { %v864_v48 = vadd.f32 %v8730_v6, %v827_v47  ;;  %8261 = vset.pattern.permute.xlu1 %v8448_v0  ;;  %v305_v50 = vpop.permute.xlu1 %304 }
  0xe0   : > { %741 = vperm.xlu1 %8261, %v8652_v40   ;;  %v434_v61 = vmul.f32 %v8708_v55, %v305_v50 }
  0xe1   : > { %v928_v53 = vmax.f32 %v864_v48, 0.0  ;;  %v892_v58 = vpack.c.bf16 %v864_v48, %v863_v34 }
  0xe3   : > { %v956_v37 = vpack.c.bf16 %v928_v53, %v927_v32  ;;  %v706_v32 = vpop.permute.xlu0 %705 }
  0xe4   : > { %8262 = vset.pattern.permute.xlu1 %v8450_v13  ;;  %v493_v57 = vpop.permute.xlu1 %492 }
  0xe5   : > { %v599_v59 = vmul.f32 %v8703_v54, %v493_v57  ;;  %374 = vperm.xlu1 %8262, %v8673_v44   ;;  %1206 = vmatprep.mubr.bf16.mxu0 %v956_v37  ;;  %v800_v57 = vmul.f32 %v8713_v56, %v706_v32 }
  0xe6   : > { %1207 = vmatmul.mubr.bf16.gmra.mrb[12].mxu0 %v892_v58  ;;  %v439_v58 = vmul.f32 %v8708_v55, %v8772_v8 }
  0xe7   : > { %v631_v38 = vadd.f32 %v599_v59, %v434_v61 }
  0xe8   : > { %v497_v40 = vpop.permute.xlu1 %496 }
  0xe9   : > { %8263 = vset.pattern.permute.xlu1 %v8449_v1  ;;  %v600_v4 = vmul.f32 %v8703_v54, %v497_v40  ;;  %v828_v5 = vadd.f32 %v796_v2, %v631_v38 }
  0xea   : > { %548 = vperm.xlu1 %8263, %v8673_v44  }
  0xeb   : > { %v632_v9 = vadd.f32 %v600_v4, %v435_v3  ;;  %v865_v11 = vadd.f32 %v8730_v6, %v828_v5 }
  0xed   : > { %v694_v7 = vpop.permute.xlu1 %693  ;;  %v929_v49 = vmax.f32 %v865_v11, 0.0 }
  0xee   : > { %v797_v10 = vmul.f32 %v8713_v56, %v694_v7  ;;  %552 = vperm.xlu1 %8263, %v8657_v41  }
  0xf0   : > { %v829_v52 = vadd.f32 %v797_v10, %v632_v9  ;;  %v714_v10 = vpop.permute.xlu0 %713 }
  0xf2   : > { %v866_v12 = vadd.f32 %v8730_v6, %v829_v52  ;;  %8264 = vset.pattern.permute.xlu1 %v8448_v0  ;;  %v315_v14 = vpop.permute.xlu1 %314 }
  0xf3   : > { %749 = vperm.xlu1 %8264, %v8657_v41   ;;  %v436_v20 = vmul.f32 %v8708_v55, %v315_v14 }
  0xf4   : > { %v930_v15 = vmax.f32 %v866_v12, 0.0  ;;  %v893_v17 = vpack.c.bf16 %v866_v12, %v865_v11 }
  0xf6   : > { %v957_v44 = vpack.c.bf16 %v930_v15, %v929_v49  ;;  %v802_v49 = vmul.f32 %v8713_v56, %v714_v10  ;;  %v722_v15 = vpop.permute.xlu0 %721 }
  0xf7   : > { %8265 = vset.pattern.permute.xlu1 %v8450_v13  ;;  %v501_v36 = vpop.permute.xlu1 %500 }
  0xf8   : > { %v601_v18 = vmul.f32 %v8703_v54, %v501_v36  ;;  %384 = vperm.xlu1 %8265, %v8679_v45   ;;  %1214 = vmatprep.mubr.bf16.mxu0 %v957_v44  ;;  %v441_v44 = vmul.f32 %v8708_v55, %v8779_v16 }
  0xf9   : > { %1215 = vmatmul.mubr.bf16.gmra.mrb[16].mxu0 %v893_v17 }
  0xfa   : > { %v633_v21 = vadd.f32 %v601_v18, %v436_v20 }
  0xfb   : > { %v505_v41 = vpop.permute.xlu1 %504 }
  0xfc   : > { %8266 = vset.pattern.permute.xlu1 %v8449_v1  ;;  %v602_v24 = vmul.f32 %v8703_v54, %v505_v41  ;;  %v830_v26 = vadd.f32 %v798_v22, %v633_v21  ;;  %v730_v21 = vpop.permute.xlu0 %729 }
  0xfd   : > { %556 = vperm.xlu1 %8266, %v8679_v45  }
  0xfe   : > { %v634_v27 = vadd.f32 %v602_v24, %v437_v23  ;;  %v867_v29 = vadd.f32 %v8730_v6, %v830_v26 }
 0x100   : > { %v702_v39 = vpop.permute.xlu1 %701  ;;  %v931_v63 = vmax.f32 %v867_v29, 0.0  ;;  %v8861_v24 = vpop.permute.xlu0 %737 }
 0x101   : > { %v799_v28 = vmul.f32 %v8713_v56, %v702_v39  ;;  %560 = vperm.xlu1 %8266, %v8662_v42  }
 0x103   : > { %v831_v30 = vadd.f32 %v799_v28, %v634_v27 }
 0x105   : > { %v868_v31 = vadd.f32 %v8730_v6, %v831_v30  ;;  %8267 = vset.pattern.permute.xlu1 %v8448_v0  ;;  %v325_v33 = vpop.permute.xlu1 %324 }
 0x106   : > { %757 = vperm.xlu1 %8267, %v8662_v42   ;;  %v438_v53 = vmul.f32 %v8708_v55, %v325_v33 }
 0x107   : > { %v932_v34 = vmax.f32 %v868_v31, 0.0  ;;  %v894_v48 = vpack.c.bf16 %v868_v31, %v867_v29  ;;  %v350_v31 = vpop.permute.xlu0 %349 }
 0x109   : > { %v958_v45 = vpack.c.bf16 %v932_v34, %v931_v63  ;;  %v443_v34 = vmul.f32 %v8708_v55, %v350_v31 }
 0x10a   : > { %8268 = vset.pattern.permute.xlu1 %v8450_v13  ;;  %v509_v47 = vpop.permute.xlu1 %508 }
 0x10b   : > { %v603_v50 = vmul.f32 %v8703_v54, %v509_v47  ;;  %394 = vperm.xlu1 %8268, %v8684_v46   ;;  %1222 = vmatprep.mubr.bf16.mxu0 %v958_v45 }
 0x10c   : > { %1223 = vmatmul.mubr.bf16.gmra.mrb[20].mxu0 %v894_v48 }
 0x10d   : > { %v635_v37 = vadd.f32 %v603_v50, %v438_v53 }
 0x10e   : > { %v513_v42 = vpop.permute.xlu1 %512 }
 0x10f   : > { %8270 = vset.pattern.permute.xlu1 %v8449_v1  ;;  %v604_v59 = vmul.f32 %v8703_v54, %v513_v42  ;;  %v832_v60 = vadd.f32 %v800_v57, %v635_v37 }
 0x110   : > { %564 = vperm.xlu1 %8270, %v8684_v46  }
 0x111   : > { %v636_v38 = vadd.f32 %v604_v59, %v439_v58  ;;  %v869_v40 = vadd.f32 %v8730_v6, %v832_v60 }
 0x113   : > { %v710_v61 = vpop.permute.xlu1 %709  ;;  %v933_v8 = vmax.f32 %v869_v40, 0.0 }
 0x114   : > { %v801_v2 = vmul.f32 %v8713_v56, %v710_v61  ;;  %568 = vperm.xlu1 %8270, %v8667_v43  }
 0x116   : > { %v833_v3 = vadd.f32 %v801_v2, %v636_v38  ;;  %v360_v38 = vpop.permute.xlu0 %359  ;;  %v806_v2 = vmul.f32 %v8713_v56, %v730_v21 }
 0x118   : > { %v870_v4 = vadd.f32 %v8730_v6, %v833_v3  ;;  %8271 = vset.pattern.permute.xlu1 %v8448_v0  ;;  %v335_v5 = vpop.permute.xlu1 %334 }
 0x119   : > { %765 = vperm.xlu1 %8271, %v8667_v43   ;;  %v440_v12 = vmul.f32 %v8708_v55, %v335_v5 }
 0x11a   : > { %v934_v7 = vmax.f32 %v870_v4, 0.0  ;;  %v895_v11 = vpack.c.bf16 %v870_v4, %v869_v40 }
 0x11c   : > { %v959_v46 = vpack.c.bf16 %v934_v7, %v933_v8 }
 0x11d   : > { %8272 = vset.pattern.permute.xlu1 %v8450_v13  ;;  %v517_v9 = vpop.permute.xlu1 %516 }
 0x11e   : > { %v605_v52 = vmul.f32 %v8703_v54, %v517_v9  ;;  %404 = vperm.xlu1 %8272, %v8693_v51   ;;  %1230 = vmatprep.mubr.bf16.mxu0 %v959_v46 }
 0x11f   : > { %1231 = vmatmul.mubr.bf16.gmra.mrb[24].mxu0 %v895_v11 }
 0x120   : > { %v637_v14 = vadd.f32 %v605_v52, %v440_v12  ;;  %v370_v52 = vpop.permute.xlu0 %369 }
 0x121   : > { %v521_v43 = vpop.permute.xlu1 %520  ;;  %v447_v21 = vmul.f32 %v8708_v55, %v370_v52  ;;  %v8297_v52 = vld [vmem:[%s11417_s3 + $0x8] sm:$0xff]  }
 0x122   : > { %8273 = vset.pattern.permute.xlu1 %v8449_v1  ;;  %v606_v36 = vmul.f32 %v8703_v54, %v521_v43  ;;  %v834_v17 = vadd.f32 %v802_v49, %v637_v14 }
 0x123   : > { %572 = vperm.xlu1 %8273, %v8693_v51  }
 0x124   : > { %v638_v19 = vadd.f32 %v606_v36, %v441_v44  ;;  %v871_v22 = vadd.f32 %v8730_v6, %v834_v17  ;;  %v380_v17 = vpop.permute.xlu0 %379 }
 0x126   : > { %v718_v18 = vpop.permute.xlu1 %717  ;;  %v935_v51 = vmax.f32 %v871_v22, 0.0 }
 0x127   : > { %v803_v20 = vmul.f32 %v8713_v56, %v718_v18  ;;  %576 = vperm.xlu1 %8273, %v8720_v62   ;;  %v808_v18 = vmul.f32 %v8713_v56, %v8861_v24 }
 0x129   : > { %v835_v41 = vadd.f32 %v803_v20, %v638_v19 }
 0x12b   : > { %v872_v23 = vadd.f32 %v8730_v6, %v835_v41  ;;  %8275 = vset.pattern.permute.xlu1 %v8448_v0  ;;  %v345_v16 = vpop.permute.xlu1 %344 }
 0x12c   : > { %773 = vperm.xlu1 %8275, %v8720_v62   ;;  %v442_v30 = vmul.f32 %v8708_v55, %v345_v16  ;;  %v804_v62 = vmul.f32 %v8713_v56, %v722_v15 }
 0x12d   : > { %v936_v26 = vmax.f32 %v872_v23, 0.0  ;;  %v896_v28 = vpack.c.bf16 %v872_v23, %v871_v22  ;;  %v390_v23 = vpop.permute.xlu0 %389 }
 0x12f   : > { %v960_v39 = vpack.c.bf16 %v936_v26, %v935_v51 }
 0x130   : > { %8276 = vset.pattern.permute.xlu1 %v8450_v13  ;;  %v525_v27 = vpop.permute.xlu1 %524 }
 0x131   : > { %v607_v29 = vmul.f32 %v8703_v54, %v525_v27  ;;  %414 = vperm.xlu1 %8276, %v8751_v35   ;;  %1238 = vmatprep.mubr.bf16.mxu0 %v960_v39 }
 0x132   : > { %1239 = vmatmul.mubr.bf16.gmra.mrb[28].mxu0 %v896_v28 }
 0x133   : > { %v639_v33 = vadd.f32 %v607_v29, %v442_v30  ;;  %v8895_v30 = vpop.permute.xlu0 %399 }
 0x134   : > { %v529_v63 = vpop.permute.xlu1 %528 }
 0x135   : > { %8277 = vset.pattern.permute.xlu1 %v8449_v1  ;;  %v608_v13 = vmul.f32 %v8703_v54, %v529_v63  ;;  %v836_v45 = vadd.f32 %v804_v62, %v639_v33 }
 0x136   : > { %580 = vperm.xlu1 %8277, %v8751_v35  }
 0x137   : > { %v640_v48 = vadd.f32 %v608_v13, %v443_v34  ;;  %v873_v32 = vadd.f32 %v8730_v6, %v836_v45  ;;  %v746_v13 = vpop.permute.xlu0 %745 }
 0x139   : > { %v726_v47 = vpop.permute.xlu1 %725  ;;  %v937_v57 = vmax.f32 %v873_v32, 0.0 }
 0x13a   : > { %v805_v50 = vmul.f32 %v8713_v56, %v726_v47  ;;  %584 = vperm.xlu1 %8277, %v8744_v25  }
 0x13c   : > { %v837_v53 = vadd.f32 %v805_v50, %v640_v48  ;;  %v810_v48 = vmul.f32 %v8713_v56, %v746_v13 }
 0x13e   : > { %v874_v37 = vadd.f32 %v8730_v6, %v837_v53  ;;  %8279 = vset.pattern.permute.xlu1 %v8448_v0  ;;  %v355_v1 = vpop.permute.xlu1 %354  ;;  %v445_v0 = vmul.f32 %v8708_v55, %v360_v38 }
 0x13f   : > { %781 = vperm.xlu1 %8279, %v8744_v25   ;;  %v444_v61 = vmul.f32 %v8708_v55, %v355_v1 }
 0x140   : > { %v938_v42 = vmax.f32 %v874_v37, 0.0  ;;  %v897_v59 = vpack.c.bf16 %v874_v37, %v873_v32  ;;  %v449_v32 = vmul.f32 %v8708_v55, %v380_v17 }
 0x142   : > { %v961_v35 = vpack.c.bf16 %v938_v42, %v937_v57 }
 0x143   : > { %v533_v58 = vpop.permute.xlu1 %532 }
 0x144   : > { %v609_v60 = vmul.f32 %v8703_v54, %v533_v58  ;;  %1246 = vmatprep.mubr.bf16.mxu0 %v961_v35 }
 0x145   : > { %1247 = vmatmul.mubr.bf16.gmra.mrb[32].mxu0 %v897_v59 }
 0x146   : > { %v641_v40 = vadd.f32 %v609_v60, %v444_v61 }
 0x147   : > { %v537_v3 = vpop.permute.xlu1 %536 }
 0x148   : > { %v610_v25 = vmul.f32 %v8703_v54, %v537_v3  ;;  %v838_v4 = vadd.f32 %v806_v2, %v641_v40 }
 0x14a   : > { %v642_v8 = vadd.f32 %v610_v25, %v445_v0  ;;  %v875_v46 = vadd.f32 %v8730_v6, %v838_v4  ;;  %v754_v25 = vpop.permute.xlu0 %753 }
 0x14c   : > { %v734_v5 = vpop.permute.xlu1 %733  ;;  %v939_v12 = vmax.f32 %v875_v46, 0.0 }
 0x14d   : > { %v807_v7 = vmul.f32 %v8713_v56, %v734_v5  ;;  %v8296_v5 = vld [vmem:[%s11417_s3] sm:$0xff]  }
 0x14e   : > { %7696 = vmatprep.subr.bf16.mxu1 %v8296_v5 }
 0x14f   : > { %v839_v9 = vadd.f32 %v807_v7, %v642_v8  ;;  %v812_v7 = vmul.f32 %v8713_v56, %v754_v25  ;;  %7697 = vmatpush3.bf16.msra.mxu1 %v8296_v5 }
 0x150   : > { %7698 = vmatprep.subr.bf16.mxu1 %v8297_v52 }
 0x151   : > { %v876_v10 = vadd.f32 %v8730_v6, %v839_v9  ;;  %v365_v11 = vpop.permute.xlu1 %364  ;;  %v451_v9 = vmul.f32 %v8708_v55, %v390_v23 }
 0x152   : > { %v446_v36 = vmul.f32 %v8708_v55, %v365_v11 }
 0x153   : > { %v940_v14 = vmax.f32 %v876_v10, 0.0  ;;  %v898_v15 = vpack.c.bf16 %v876_v10, %v875_v46  ;;  %7699 = vmatpush3.bf16.msra.mxu1 %v8297_v52 }
 0x155   : > { %v962_v49 = vpack.c.bf16 %v940_v14, %v939_v12 }
 0x156   : > { %v541_v43 = vpop.permute.xlu1 %540 }
 0x157   : > { %v611_v44 = vmul.f32 %v8703_v54, %v541_v43  ;;  %1254 = vmatprep.mubr.bf16.mxu0 %v962_v49 }
 0x158   : > { %1255 = vmatmul.mubr.bf16.gmra.mrb[36].mxu0 %v898_v15 }
 0x159   : > { %v643_v19 = vadd.f32 %v611_v44, %v446_v36  ;;  %v8298_v44 = vld [vmem:[%s11417_s3 + $0x10] sm:$0xff]  }
 0x15a   : > { %v545_v20 = vpop.permute.xlu1 %544  ;;  %7700 = vmatprep.subr.bf16.mxu1 %v8298_v44 }
 0x15b   : > { %v612_v22 = vmul.f32 %v8703_v54, %v545_v20  ;;  %v840_v41 = vadd.f32 %v808_v18, %v643_v19  ;;  %v8925_v19 = vld [vmem:[%s11415_s1 + $0x4] ss:$0 sm:$0xff]  ;;  %7701 = vmatpush3.bf16.msra.mxu1 %v8298_v44 }
 0x15d   : > { %v644_v51 = vadd.f32 %v612_v22, %v447_v21  ;;  %v877_v39 = vadd.f32 %v8730_v6, %v840_v41 }
 0x15f   : > { %v742_v16 = vpop.permute.xlu1 %741  ;;  %v941_v24 = vmax.f32 %v877_v39, 0.0 }
 0x160   : > { %v809_v26 = vmul.f32 %v8713_v56, %v742_v16  ;;  %v8299_v16 = vld [vmem:[%s11417_s3 + $0x18] sm:$0xff]  }
 0x161   : > { %7702 = vmatprep.subr.bf16.mxu1 %v8299_v16 }
 0x162   : > { %v841_v27 = vadd.f32 %v809_v26, %v644_v51  ;;  %7703 = vmatpush3.bf16.msra.mxu1 %v8299_v16 }
 0x164   : > { %v878_v28 = vadd.f32 %v8730_v6, %v841_v27  ;;  %v375_v29 = vpop.permute.xlu1 %374 }
 0x165   : > { %v448_v45 = vmul.f32 %v8708_v55, %v375_v29 }
 0x166   : > { %v942_v31 = vmax.f32 %v878_v28, 0.0  ;;  %v899_v63 = vpack.c.bf16 %v878_v28, %v877_v39 }
 0x168   : > { %v963_v62 = vpack.c.bf16 %v942_v31, %v941_v24 }
 0x169   : > { %v549_v33 = vpop.permute.xlu1 %548 }
 0x16a   : > { %v613_v34 = vmul.f32 %v8703_v54, %v549_v33  ;;  %1262 = vmatprep.mubr.bf16.mxu0 %v963_v62  ;;  %v762_v62 = vpop.permute.xlu0 %761 }
 0x16b   : > { %1263 = vmatmul.mubr.bf16.gmra.mrb[40].mxu0 %v899_v63 }
 0x16c   : > { %v645_v47 = vadd.f32 %v613_v34, %v448_v45  ;;  %v814_v45 = vmul.f32 %v8713_v56, %v762_v62 }
 0x16d   : > { %v553_v50 = vpop.permute.xlu1 %552 }
 0x16e   : > { %v614_v53 = vmul.f32 %v8703_v54, %v553_v50  ;;  %v842_v37 = vadd.f32 %v810_v48, %v645_v47 }
 0x170   : > { %v646_v57 = vadd.f32 %v614_v53, %v449_v32  ;;  %v879_v35 = vadd.f32 %v8730_v6, %v842_v37 }
 0x172   : > { %v750_v1 = vpop.permute.xlu1 %749  ;;  %v943_v61 = vmax.f32 %v879_v35, 0.0 }
 0x173   : > { %v811_v42 = vmul.f32 %v8713_v56, %v750_v1 }
 0x175   : > { %v843_v58 = vadd.f32 %v811_v42, %v646_v57  ;;  %v453_v42 = vmul.f32 %v8708_v55, %v8895_v30 }
 0x177   : > { %v880_v59 = vadd.f32 %v8730_v6, %v843_v58  ;;  %v385_v60 = vpop.permute.xlu1 %384 }
 0x178   : > { %v450_v4 = vmul.f32 %v8708_v55, %v385_v60 }
 0x179   : > { %v944_v38 = vmax.f32 %v880_v59, 0.0  ;;  %v900_v3 = vpack.c.bf16 %v880_v59, %v879_v35 }
 0x17b   : > { %v964_v2 = vpack.c.bf16 %v944_v38, %v943_v61 }
 0x17c   : > { %v557_v40 = vpop.permute.xlu1 %556 }
 0x17d   : > { %v615_v0 = vmul.f32 %v8703_v54, %v557_v40  ;;  %1270 = vmatprep.mubr.bf16.mxu0 %v964_v2 }
 0x17e   : > { %1271 = vmatmul.mubr.bf16.gmra.mrb[44].mxu0 %v900_v3 }
 0x17f   : > { %v647_v8 = vadd.f32 %v615_v0, %v450_v4 }
 0x180   : > { %v561_v46 = vpop.permute.xlu1 %560 }
 0x181   : > { %v616_v10 = vmul.f32 %v8703_v54, %v561_v46  ;;  %v844_v11 = vadd.f32 %v812_v7, %v647_v8  ;;  %v770_v46 = vpop.permute.xlu0 %769 }
 0x183   : > { %v648_v14 = vadd.f32 %v616_v10, %v451_v9  ;;  %v881_v43 = vadd.f32 %v8730_v6, %v844_v11 }
 0x185   : > { %v758_v12 = vpop.permute.xlu1 %757  ;;  %v945_v41 = vmax.f32 %v881_v43, 0.0 }
 0x186   : > { %v813_v49 = vmul.f32 %v8713_v56, %v758_v12 }
 0x188   : > { %v845_v15 = vadd.f32 %v813_v49, %v648_v14  ;;  %v410_v14 = vpop.permute.xlu0 %409 }
 0x18a   : > { %v882_v36 = vadd.f32 %v8730_v6, %v845_v15  ;;  %v7363_v17 = vpop.f32.mrb[0].mxu0  ;;  %v395_v18 = vpop.permute.xlu1 %394 }
 0x18b   : > { %v7364_v20 = vpop.f32.mrb[1].mxu0  ;;  %v452_v33 = vmul.f32 %v8708_v55, %v395_v18 }
 0x18c   : > { %v7365_v21 = vadd.f32 %v7364_v20, %v7363_v17  ;;  %v7366_v22 = vpop.f32.mrb[2].mxu0  ;;  %v946_v23 = vmax.f32 %v882_v36, 0.0  ;;  %v901_v29 = vpack.c.bf16 %v882_v36, %v881_v43  ;;  %v816_v36 = vmul.f32 %v8713_v56, %v770_v46 }
 0x18d   : > { %v7367_v51 = vpop.f32.mrb[3].mxu0  ;;  %v455_v17 = vmul.f32 %v8708_v55, %v410_v14 }
 0x18e   : > { %v8931_v26 = vadd.f32 %v7365_v21, %v8925_v19  ;;  %v7368_v39 = vadd.f32 %v7367_v51, %v7366_v22  ;;  %v965_v27 = vpack.c.bf16 %v946_v23, %v945_v41 }
 0x18f   : > { %v565_v28 = vpop.permute.xlu1 %564 }
 0x190   : > { %v8934_v24 = vadd.f32 %v7368_v39, %v8925_v19  ;;  %v617_v31 = vmul.f32 %v8703_v54, %v565_v28  ;;  %1278 = vmatprep.mubr.bf16.mxu0 %v965_v27  ;;  %v1311_v63 = vmax.f32 %v8931_v26, 0.0 }
 0x191   : > { %1279 = vmatmul.mubr.bf16.gmra.mrb[48].mxu0 %v901_v29 }
 0x192   : > { %v1312_v34 = vmax.f32 %v8934_v24, 0.0  ;;  %v649_v13 = vadd.f32 %v617_v31, %v452_v33 }
 0x193   : > { %v7369_v47 = vpop.f32.mrb[4].mxu0  ;;  %v569_v48 = vpop.permute.xlu1 %568 }
 0x194   : > { %v1343_v50 = vpack.c.bf16 %v1312_v34, %v1311_v63  ;;  %v7370_v32 = vpop.f32.mrb[5].mxu0  ;;  %v618_v53 = vmul.f32 %v8703_v54, %v569_v48  ;;  %v846_v35 = vadd.f32 %v814_v45, %v649_v13  ;;  %v420_v45 = vpop.permute.xlu0 %419 }
 0x195   : > { %v7371_v37 = vadd.f32 %v7370_v32, %v7369_v47  ;;  %v7372_v1 = vpop.f32.mrb[6].mxu0 }
 0x196   : > { %v7373_v57 = vpop.f32.mrb[7].mxu0  ;;  %1388 = vrot.lane.b32.xlu1 %v1343_v50, %s8451_s14  ;;  %v650_v61 = vadd.f32 %v618_v53, %v453_v42  ;;  %v883_v40 = vadd.f32 %v8730_v6, %v846_v35 }
 0x197   : > { %v8946_v58 = vadd.f32 %v7371_v37, %v8925_v19  ;;  %v7374_v59 = vadd.f32 %v7373_v57, %v7372_v1 }
 0x198   : > { %v766_v60 = vpop.permute.xlu1 %765  ;;  %v947_v8 = vmax.f32 %v883_v40, 0.0  ;;  %v778_v1 = vpop.permute.xlu0 %777 }
 0x199   : > { %v8949_v38 = vadd.f32 %v7374_v59, %v8925_v19  ;;  %v815_v2 = vmul.f32 %v8713_v56, %v766_v60  ;;  %v1313_v3 = vmax.f32 %v8946_v58, 0.0  ;;  %v818_v35 = vmul.f32 %v8713_v56, %v778_v1 }
 0x19b   : > { %v1314_v0 = vmax.f32 %v8949_v38, 0.0  ;;  %v847_v25 = vadd.f32 %v815_v2, %v650_v61 }
 0x19d   : > { %v884_v30 = vadd.f32 %v8730_v6, %v847_v25  ;;  %v405_v4 = vpop.permute.xlu1 %404  ;;  %v1344_v5 = vpack.c.bf16 %v1314_v0, %v1313_v3  ;;  %v457_v25 = vmul.f32 %v8708_v55, %v420_v45 }
 0x19e   : > { %v454_v12 = vmul.f32 %v8708_v55, %v405_v4 }
 0x19f   : > { %1390 = vrot.lane.b32.xlu0 %v1344_v5, %s8451_s14  ;;  %v948_v7 = vmax.f32 %v884_v30, 0.0  ;;  %v902_v11 = vpack.c.bf16 %v884_v30, %v883_v40 }
 0x1a1   : > { %v966_v9 = vpack.c.bf16 %v948_v7, %v947_v8 }
 0x1a2   : > { %v573_v10 = vpop.permute.xlu1 %572 }
 0x1a3   : > { %v619_v52 = vmul.f32 %v8703_v54, %v573_v10  ;;  %1286 = vmatprep.mubr.bf16.mxu0 %v966_v9 }
 0x1a4   : > { %1287 = vmatmul.mubr.bf16.gmra.mrb[52].mxu0 %v902_v11 }
 0x1a5   : > { %v651_v49 = vadd.f32 %v619_v52, %v454_v12 }
 0x1a6   : > { %v7375_v43 = vpop.f32.mrb[8].mxu0  ;;  %v577_v15 = vpop.permute.xlu1 %576 }
 0x1a7   : > { %v7376_v44 = vpop.f32.mrb[9].mxu0  ;;  %v620_v18 = vmul.f32 %v8703_v54, %v577_v15  ;;  %v848_v41 = vadd.f32 %v816_v36, %v651_v49 }
 0x1a8   : > { %v7377_v20 = vadd.f32 %v7376_v44, %v7375_v43  ;;  %v7378_v21 = vpop.f32.mrb[10].mxu0 }
 0x1a9   : > { %v7379_v22 = vpop.f32.mrb[11].mxu0  ;;  %v652_v39 = vadd.f32 %v620_v18, %v455_v17  ;;  %v885_v29 = vadd.f32 %v8730_v6, %v848_v41 }
 0x1aa   : > { %v8963_v23 = vadd.f32 %v7377_v20, %v8925_v19  ;;  %v7380_v16 = vadd.f32 %v7379_v22, %v7378_v21 }
 0x1ab   : > { %v774_v51 = vpop.permute.xlu1 %773  ;;  %v949_v47 = vmax.f32 %v885_v29, 0.0 }
 0x1ac   : > { %v8966_v27 = vadd.f32 %v7380_v16, %v8925_v19  ;;  %v817_v28 = vmul.f32 %v8713_v56, %v774_v51  ;;  %v1315_v31 = vmax.f32 %v8963_v23, 0.0 }
 0x1ae   : > { %v1316_v62 = vmax.f32 %v8966_v27, 0.0  ;;  %v849_v33 = vadd.f32 %v817_v28, %v652_v39 }
 0x1b0   : > { %v1345_v63 = vpack.c.bf16 %v1316_v62, %v1315_v31  ;;  %v886_v34 = vadd.f32 %v8730_v6, %v849_v33  ;;  %v415_v13 = vpop.permute.xlu1 %414 }
 0x1b1   : > { %v456_v57 = vmul.f32 %v8708_v55, %v415_v13 }
 0x1b2   : > { %1392 = vrot.lane.b32.xlu1 %v1345_v63, %s8451_s14  ;;  %v950_v48 = vmax.f32 %v886_v34, 0.0  ;;  %v903_v53 = vpack.c.bf16 %v886_v34, %v885_v29 }
 0x1b4   : > { %v967_v50 = vpack.c.bf16 %v950_v48, %v949_v47 }
 0x1b5   : > { %v581_v32 = vpop.permute.xlu1 %580 }
 0x1b6   : > { %v621_v37 = vmul.f32 %v8703_v54, %v581_v32  ;;  %1294 = vmatprep.mubr.bf16.mxu0 %v967_v50 }
 0x1b7   : > { %1295 = vmatmul.mubr.bf16.gmra.mrb[56].mxu0 %v903_v53 }
 0x1b8   : > { %v653_v42 = vadd.f32 %v621_v37, %v456_v57 }
 0x1b9   : > { %v7381_v59 = vpop.f32.mrb[12].mxu0  ;;  %v585_v60 = vpop.permute.xlu1 %584 }
 0x1ba   : > { %v7382_v61 = vpop.f32.mrb[13].mxu0  ;;  %v622_v2 = vmul.f32 %v8703_v54, %v585_v60  ;;  %v850_v30 = vadd.f32 %v818_v35, %v653_v42 }
 0x1bb   : > { %v7383_v40 = vadd.f32 %v7382_v61, %v7381_v59  ;;  %v7384_v3 = vpop.f32.mrb[14].mxu0 }
 0x1bc   : > { %v7385_v0 = vpop.f32.mrb[15].mxu0  ;;  %v654_v7 = vadd.f32 %v622_v2, %v457_v25  ;;  %v887_v10 = vadd.f32 %v8730_v6, %v850_v30 }
 0x1bd   : > { %v8980_v4 = vadd.f32 %v7383_v40, %v8925_v19  ;;  %v7386_v5 = vadd.f32 %v7385_v0, %v7384_v3 }
 0x1be   : > { %v782_v8 = vpop.permute.xlu1 %781  ;;  %v951_v14 = vmax.f32 %v887_v10, 0.0 }
 0x1bf   : > { %v8983_v46 = vadd.f32 %v7386_v5, %v8925_v19  ;;  %v819_v9 = vmul.f32 %v8713_v56, %v782_v8  ;;  %v1317_v54 = vmax.f32 %v8980_v4, 0.0 }
 0x1c1   : > { %v1318_v11 = vmax.f32 %v8983_v46, 0.0  ;;  %v851_v52 = vadd.f32 %v819_v9, %v654_v7 }
 0x1c3   : > { %v888_v55 = vadd.f32 %v8730_v6, %v851_v52  ;;  %v1346_v12 = vpack.c.bf16 %v1318_v11, %v1317_v54 }
 0x1c5   : > { %1394 = vrot.lane.b32.xlu0 %v1346_v12, %s8451_s14  ;;  %v952_v49 = vmax.f32 %v888_v55, 0.0  ;;  %v904_v15 = vpack.c.bf16 %v888_v55, %v887_v10 }
 0x1c7   : > { %v968_v43 = vpack.c.bf16 %v952_v49, %v951_v14 }
 0x1c9   : > { %1302 = vmatprep.mubr.bf16.mxu0 %v968_v43 }
 0x1ca   : > { %1303 = vmatmul.mubr.bf16.gmra.mrb[60].mxu0 %v904_v15 }
 0x1cc   : > { %v7387_v44 = vpop.f32.mrb[16].mxu0 }
 0x1cd   : > { %v7388_v56 = vpop.f32.mrb[17].mxu0 }
 0x1ce   : > { %v7389_v36 = vadd.f32 %v7388_v56, %v7387_v44  ;;  %v7390_v17 = vpop.f32.mrb[18].mxu0 }
 0x1cf   : > { %v7391_v18 = vpop.f32.mrb[19].mxu0 }
 0x1d0   : > { %v8992_v20 = vadd.f32 %v7389_v36, %v8925_v19  ;;  %v7392_v21 = vadd.f32 %v7391_v18, %v7390_v17 }
 0x1d2   : > { %v8995_v6 = vadd.f32 %v7392_v21, %v8925_v19  ;;  %v1319_v22 = vmax.f32 %v8992_v20, 0.0 }
 0x1d4   : > { %v1320_v41 = vmax.f32 %v8995_v6, 0.0 }
 0x1d6   : > { %v1347_v16 = vpack.c.bf16 %v1320_v41, %v1319_v22 }
 0x1d8   : > { %1396 = vrot.lane.b32.xlu1 %v1347_v16, %s8451_s14 }
 0x1df   : > { %v7393_v51 = vpop.f32.mrb[20].mxu0 }
 0x1e0   : > { %v7394_v39 = vpop.f32.mrb[21].mxu0 }
 0x1e1   : > { %v7395_v28 = vadd.f32 %v7394_v39, %v7393_v51  ;;  %v7396_v29 = vpop.f32.mrb[22].mxu0 }
 0x1e2   : > { %v7397_v31 = vpop.f32.mrb[23].mxu0 }
 0x1e3   : > { %v9001_v62 = vadd.f32 %v7395_v28, %v8925_v19  ;;  %v7398_v33 = vadd.f32 %v7397_v31, %v7396_v29 }
 0x1e5   : > { %v9004_v63 = vadd.f32 %v7398_v33, %v8925_v19  ;;  %v1321_v34 = vmax.f32 %v9001_v62, 0.0 }
 0x1e7   : > { %v1322_v13 = vmax.f32 %v9004_v63, 0.0 }
 0x1e9   : > { %v1348_v45 = vpack.c.bf16 %v1322_v13, %v1321_v34 }
 0x1eb   : > { %1398 = vrot.lane.b32.xlu0 %v1348_v45, %s8451_s14 }
 0x1f2   : > { %v7399_v47 = vpop.f32.mrb[24].mxu0 }
 0x1f3   : > { %v7400_v48 = vpop.f32.mrb[25].mxu0 }
 0x1f4   : > { %v7401_v50 = vadd.f32 %v7400_v48, %v7399_v47  ;;  %v7402_v32 = vpop.f32.mrb[26].mxu0 }
 0x1f5   : > { %v7403_v53 = vpop.f32.mrb[27].mxu0 }
 0x1f6   : > { %v9010_v37 = vadd.f32 %v7401_v50, %v8925_v19  ;;  %v7404_v1 = vadd.f32 %v7403_v53, %v7402_v32 }
 0x1f8   : > { %v9013_v57 = vadd.f32 %v7404_v1, %v8925_v19  ;;  %v1323_v42 = vmax.f32 %v9010_v37, 0.0 }
 0x1fa   : > { %v1324_v35 = vmax.f32 %v9013_v57, 0.0 }
 0x1fc   : > { %v1349_v59 = vpack.c.bf16 %v1324_v35, %v1323_v42 }
 0x1fe   : > { %1400 = vrot.lane.b32.xlu1 %v1349_v59, %s8451_s14 }
 0x205   : > { %v7405_v60 = vpop.f32.mrb[28].mxu0 }
 0x206   : > { %v7406_v61 = vpop.f32.mrb[29].mxu0 }
 0x207   : > { %v7407_v2 = vadd.f32 %v7406_v61, %v7405_v60  ;;  %v7408_v40 = vpop.f32.mrb[30].mxu0 }
 0x208   : > { %v7409_v3 = vpop.f32.mrb[31].mxu0  ;;  %v1389_v0 = vpop.permute.xlu1 %1388 }
 0x209   : > { %v9019_v25 = vadd.f32 %v7407_v2, %v8925_v19  ;;  %v7410_v30 = vadd.f32 %v7409_v3, %v7408_v40  ;;  %7704 = vmatprep.mubr.msk.bf16.mxu1 %vm1444_vm0, %v1389_v0 }
 0x20b   : > { %v9023_v5 = vadd.f32 %v7410_v30, %v8925_v19  ;;  %v1325_v8 = vmax.f32 %v9019_v25, 0.0 }
 0x20d   : > { %v1326_v7 = vmax.f32 %v9023_v5, 0.0 }
 0x20f   : > { %v1350_v9 = vpack.c.bf16 %v1326_v7, %v1325_v8 }
 0x211   : > { %v1391_v10 = vpop.permute.xlu0 %1390  ;;  %1402 = vrot.lane.b32.xlu0 %v1350_v9, %s8451_s14 }
 0x212   : > { %7705 = vmatmul.mubr.msk.bf16.vlgmr.msra.gmra.mrb[0].mxu1 %vm1444_vm0, %v1391_v10 }
 0x218   : > { %v7411_v54 = vpop.f32.mrb[32].mxu0 }
 0x219   : > { %v7412_v11 = vpop.f32.mrb[33].mxu0 }
 0x21a   : > { %v7413_v52 = vadd.f32 %v7412_v11, %v7411_v54  ;;  %v7414_v55 = vpop.f32.mrb[34].mxu0 }
 0x21b   : > { %v7415_v12 = vpop.f32.mrb[35].mxu0 }
 0x21c   : > { %v9030_v14 = vadd.f32 %v7413_v52, %v8925_v19  ;;  %v7416_v49 = vadd.f32 %v7415_v12, %v7414_v55 }
 0x21e   : > { %v9033_v43 = vadd.f32 %v7416_v49, %v8925_v19  ;;  %v1327_v15 = vmax.f32 %v9030_v14, 0.0 }
 0x220   : > { %v1328_v44 = vmax.f32 %v9033_v43, 0.0 }
 0x222   : > { %v1351_v56 = vpack.c.bf16 %v1328_v44, %v1327_v15 }
 0x224   : > { %1404 = vrot.lane.b32.xlu1 %v1351_v56, %s8451_s14  ;;  %v1393_v36 = vpop.permute.xlu1 %1392 }
 0x225   : > { %7708 = vmatprep.mubr.msk.bf16.mxu1 %vm1444_vm0, %v1393_v36 }
 0x22b   : > { %v7417_v17 = vpop.f32.mrb[36].mxu0 }
 0x22c   : > { %v7418_v18 = vpop.f32.mrb[37].mxu0 }
 0x22d   : > { %v7419_v21 = vadd.f32 %v7418_v18, %v7417_v17  ;;  %v7420_v22 = vpop.f32.mrb[38].mxu0 }
 0x22e   : > { %v7421_v41 = vpop.f32.mrb[39].mxu0 }
 0x22f   : > { %v9040_v16 = vadd.f32 %v7419_v21, %v8925_v19  ;;  %v7422_v51 = vadd.f32 %v7421_v41, %v7420_v22 }
 0x231   : > { %v9043_v39 = vadd.f32 %v7422_v51, %v8925_v19  ;;  %v1329_v28 = vmax.f32 %v9040_v16, 0.0 }
 0x233   : > { %v1330_v29 = vmax.f32 %v9043_v39, 0.0 }
 0x235   : > { %v1352_v31 = vpack.c.bf16 %v1330_v29, %v1329_v28 }
 0x237   : > { %v1395_v33 = vpop.permute.xlu0 %1394  ;;  %1406 = vrot.lane.b32.xlu0 %v1352_v31, %s8451_s14 }
 0x238   : > { %7709 = vmatmul.mubr.msk.bf16.gmra.mrb[4].mxu1 %vm1444_vm0, %v1395_v33 }
 0x23e   : > { %v7423_v34 = vpop.f32.mrb[40].mxu0 }
 0x23f   : > { %v7424_v13 = vpop.f32.mrb[41].mxu0 }
 0x240   : > { %v7425_v45 = vadd.f32 %v7424_v13, %v7423_v34  ;;  %v7426_v47 = vpop.f32.mrb[42].mxu0 }
 0x241   : > { %v7427_v48 = vpop.f32.mrb[43].mxu0 }
 0x242   : > { %v9050_v50 = vadd.f32 %v7425_v45, %v8925_v19  ;;  %v7428_v32 = vadd.f32 %v7427_v48, %v7426_v47 }
 0x244   : > { %v9053_v53 = vadd.f32 %v7428_v32, %v8925_v19  ;;  %v1331_v1 = vmax.f32 %v9050_v50, 0.0 }
 0x246   : > { %v1332_v42 = vmax.f32 %v9053_v53, 0.0 }
 0x248   : > { %v1353_v35 = vpack.c.bf16 %v1332_v42, %v1331_v1 }
 0x24a   : > { %1408 = vrot.lane.b32.xlu1 %v1353_v35, %s8451_s14  ;;  %v1397_v59 = vpop.permute.xlu1 %1396 }
 0x24b   : > { %7712 = vmatprep.mubr.msk.bf16.mxu1 %vm1444_vm0, %v1397_v59 }
 0x251   : > { %v7429_v60 = vpop.f32.mrb[44].mxu0 }
 0x252   : > { %v7430_v61 = vpop.f32.mrb[45].mxu0 }
 0x253   : > { %v7431_v2 = vadd.f32 %v7430_v61, %v7429_v60  ;;  %v7432_v40 = vpop.f32.mrb[46].mxu0 }
 0x254   : > { %v7433_v3 = vpop.f32.mrb[47].mxu0 }
 0x255   : > { %v9060_v0 = vadd.f32 %v7431_v2, %v8925_v19  ;;  %v7434_v30 = vadd.f32 %v7433_v3, %v7432_v40 }
 0x257   : > { %v9063_v8 = vadd.f32 %v7434_v30, %v8925_v19  ;;  %v1333_v7 = vmax.f32 %v9060_v0, 0.0 }
 0x259   : > { %v1334_v9 = vmax.f32 %v9063_v8, 0.0 }
 0x25b   : > { %v1354_v10 = vpack.c.bf16 %v1334_v9, %v1333_v7 }
 0x25d   : > { %v1399_v54 = vpop.permute.xlu0 %1398  ;;  %1410 = vrot.lane.b32.xlu0 %v1354_v10, %s8451_s14 }
 0x25e   : > { %7713 = vmatmul.mubr.msk.bf16.gmra.mrb[8].mxu1 %vm1444_vm0, %v1399_v54 }
 0x264   : > { %v7435_v11 = vpop.f32.mrb[48].mxu0 }
 0x265   : > { %v7436_v52 = vpop.f32.mrb[49].mxu0 }
 0x266   : > { %v7437_v55 = vadd.f32 %v7436_v52, %v7435_v11  ;;  %v7438_v12 = vpop.f32.mrb[50].mxu0 }
 0x267   : > { %v7439_v49 = vpop.f32.mrb[51].mxu0 }
 0x268   : > { %v9070_v15 = vadd.f32 %v7437_v55, %v8925_v19  ;;  %v7440_v44 = vadd.f32 %v7439_v49, %v7438_v12 }
 0x26a   : > { %v9073_v56 = vadd.f32 %v7440_v44, %v8925_v19  ;;  %v1335_v36 = vmax.f32 %v9070_v15, 0.0 }
 0x26c   : > { %v1336_v17 = vmax.f32 %v9073_v56, 0.0 }
 0x26e   : > { %v1355_v18 = vpack.c.bf16 %v1336_v17, %v1335_v36 }
 0x270   : > { %1412 = vrot.lane.b32.xlu1 %v1355_v18, %s8451_s14  ;;  %v1401_v21 = vpop.permute.xlu1 %1400 }
 0x271   : > { %7716 = vmatprep.mubr.msk.bf16.mxu1 %vm1444_vm0, %v1401_v21 }
 0x277   : > { %v7441_v22 = vpop.f32.mrb[52].mxu0 }
 0x278   : > { %v7442_v41 = vpop.f32.mrb[53].mxu0 }
 0x279   : > { %v7443_v51 = vadd.f32 %v7442_v41, %v7441_v22  ;;  %v7444_v28 = vpop.f32.mrb[54].mxu0 }
 0x27a   : > { %v7445_v29 = vpop.f32.mrb[55].mxu0 }
 0x27b   : > { %v9080_v31 = vadd.f32 %v7443_v51, %v8925_v19  ;;  %v7446_v33 = vadd.f32 %v7445_v29, %v7444_v28 }
 0x27d   : > { %v9083_v34 = vadd.f32 %v7446_v33, %v8925_v19  ;;  %v1337_v13 = vmax.f32 %v9080_v31, 0.0 }
 0x27f   : > { %v1338_v45 = vmax.f32 %v9083_v34, 0.0 }
 0x281   : > { %v1356_v47 = vpack.c.bf16 %v1338_v45, %v1337_v13 }
 0x283   : > { %v1403_v48 = vpop.permute.xlu0 %1402  ;;  %1414 = vrot.lane.b32.xlu0 %v1356_v47, %s8451_s14 }
 0x284   : > { %7717 = vmatmul.mubr.msk.bf16.gmra.mrb[12].mxu1 %vm1444_vm0, %v1403_v48 }
 0x28a   : > { %v7447_v32 = vpop.f32.mrb[56].mxu0 }
 0x28b   : > { %v7448_v1 = vpop.f32.mrb[57].mxu0 }
 0x28c   : > { %v7449_v42 = vadd.f32 %v7448_v1, %v7447_v32  ;;  %v7450_v35 = vpop.f32.mrb[58].mxu0 }
 0x28d   : > { %v7451_v59 = vpop.f32.mrb[59].mxu0 }
 0x28e   : > { %v9090_v60 = vadd.f32 %v7449_v42, %v8925_v19  ;;  %v7452_v61 = vadd.f32 %v7451_v59, %v7450_v35 }
 0x290   : > { %v9093_v2 = vadd.f32 %v7452_v61, %v8925_v19  ;;  %v1339_v40 = vmax.f32 %v9090_v60, 0.0 }
 0x292   : > { %v1340_v3 = vmax.f32 %v9093_v2, 0.0 }
 0x294   : > { %v1357_v30 = vpack.c.bf16 %v1340_v3, %v1339_v40 }
 0x296   : > { %1416 = vrot.lane.b32.xlu1 %v1357_v30, %s8451_s14  ;;  %v1405_v7 = vpop.permute.xlu1 %1404 }
 0x297   : > { %7720 = vmatprep.mubr.msk.bf16.mxu1 %vm1444_vm0, %v1405_v7 }
 0x29d   : > { %v7453_v9 = vpop.f32.mrb[60].mxu0 }
 0x29e   : > { %v7454_v10 = vpop.f32.mrb[61].mxu0 }
 0x29f   : > { %v7455_v54 = vadd.f32 %v7454_v10, %v7453_v9  ;;  %v7456_v11 = vpop.f32.mrb[62].mxu0 }
 0x2a0   : > { %v7457_v52 = vpop.f32.mrb[63].mxu0 }
 0x2a1   : > { %v9100_v55 = vadd.f32 %v7455_v54, %v8925_v19  ;;  %v7458_v12 = vadd.f32 %v7457_v52, %v7456_v11 }
 0x2a3   : > { %v9103_v49 = vadd.f32 %v7458_v12, %v8925_v19  ;;  %v1341_v44 = vmax.f32 %v9100_v55, 0.0  ;;  %v9115_v19 = vld [vmem:[%s11415_s1 + $0x5] ss:$0 sm:$0xff] }
 0x2a5   : > { %v1342_v36 = vmax.f32 %v9103_v49, 0.0 }
 0x2a7   : > { %v1358_v17 = vpack.c.bf16 %v1342_v36, %v1341_v44 }
 0x2a9   : > { %v1407_v18 = vpop.permute.xlu0 %1406  ;;  %1418 = vrot.lane.b32.xlu0 %v1358_v17, %s8451_s14 }
 0x2aa   : > { %7721 = vmatmul.mubr.msk.bf16.gmra.mrb[16].mxu1 %vm1444_vm0, %v1407_v18 }
 0x2bc   : > { %v1409_v21 = vpop.permute.xlu1 %1408 }
 0x2bd   : > { %7724 = vmatprep.mubr.msk.bf16.mxu1 %vm1444_vm0, %v1409_v21 }
 0x2cf   : > { %v1411_v22 = vpop.permute.xlu0 %1410 }
 0x2d0   : > { %7725 = vmatmul.mubr.msk.bf16.gmra.mrb[20].mxu1 %vm1444_vm0, %v1411_v22 }
 0x2e2   : > { %v1413_v41 = vpop.permute.xlu1 %1412 }
 0x2e3   : > { %7728 = vmatprep.mubr.msk.bf16.mxu1 %vm1444_vm0, %v1413_v41 }
 0x2e5   : > { %v7706_v51 = vpop.f32.mrb[0].mxu1 }
 0x2e6   : > { %v1536_v28 = vadd.f32 %v7706_v51, %v9115_v19  ;;  %v1527_v29 = vpop.f32.mrb[1].mxu1 }
 0x2e7   : > { %v1528_v33 = vadd.f32 %v9115_v19, %v1527_v29  ;;  %v7707_v13 = vpop.f32.mrb[2].mxu1 }
 0x2e8   : > { %v1656_v45 = vadd.f32 %v1536_v28, %v8946_v58  ;;  %v1539_v47 = vadd.f32 %v7707_v13, %v9115_v19  ;;  %v1530_v48 = vpop.f32.mrb[3].mxu1 }
 0x2e9   : > { %v1654_v32 = vadd.f32 %v1528_v33, %v8931_v26  ;;  %v1531_v1 = vadd.f32 %v9115_v19, %v1530_v48 }
 0x2ea   : > { %v1657_v42 = vadd.f32 %v1539_v47, %v8949_v38  ;;  %v1824_v59 = vmax.f32 %v1656_v45, 0.0  ;;  %v1689_v26 = vsel %vm1444_vm0, %v1656_v45, -inf }
 0x2eb   : > { %v1655_v35 = vadd.f32 %v1531_v1, %v8934_v24  ;;  %v1686_v61 = vsel %vm1444_vm0, %v1654_v32, -inf  ;;  %v1822_v7 = vmax.f32 %v1654_v32, 0.0 }
 0x2ec   : > { %v1825_v40 = vmax.f32 %v1657_v42, 0.0  ;;  %v1791_v3 = vpack.c.bf16 %v1657_v42, %v1656_v45  ;;  %v1691_v11 = vsel %vm1444_vm0, %v1657_v42, -inf }
 0x2ed   : > { %v1687_v30 = vsel %vm1444_vm0, %v1655_v35, -inf  ;;  %v1823_v58 = vmax.f32 %v1655_v35, 0.0  ;;  %v1790_v9 = vpack.c.bf16 %v1655_v35, %v1654_v32 }
 0x2ee   : > { %v1688_v10 = vmax.f32 %v1686_v61, %v1687_v30  ;;  %v9127_v54 = vpack.c.bf16 %v1825_v40, %v1824_v59  ;;  %1807 = vst.msk [vmem:[#allocation3 + $0x8] sm:$0xff] %vm1444_vm0, %v1791_v3 }
 0x2ef   : > { %v1854_v38 = vpack.c.bf16 %v1823_v58, %v1822_v7  ;;  %1806 = vst.msk [vmem:[#allocation3] sm:$0xff] %vm1444_vm0, %v1790_v9 }
 0x2f0   : > { %v1690_v24 = vmax.f32 %v1688_v10, %v1689_v26 }
 0x2f1   : > { %1886 = vrot.lane.b32.xlu0 %v1854_v38, %s8451_s14 }
 0x2f2   : > { %v1692_v52 = vmax.f32 %v1690_v24, %v1691_v11 }
 0x2f4   : > { %v1693_v36 = vrot.slane %v1692_v52, 4 }
 0x2f5   : > { %v1415_v12 = vpop.permute.xlu0 %1414 }
 0x2f6   : > { %7729 = vmatmul.mubr.msk.bf16.gmra.mrb[24].mxu1 %vm1444_vm0, %v1415_v12  ;;  %v1694_v22 = vmax.f32 %v1692_v52, %v1693_v36 }
 0x2f8   : > { %v1695_v48 = vrot.slane %v1694_v22, 2 }
 0x308   : > { %v1417_v44 = vpop.permute.xlu1 %1416 }
 0x309   : > { %7732 = vmatprep.mubr.msk.bf16.mxu1 %vm1444_vm0, %v1417_v44 }
 0x30b   : > { %v7710_v17 = vpop.f32.mrb[4].mxu1 }
 0x30c   : > { %v1552_v18 = vadd.f32 %v7710_v17, %v9115_v19  ;;  %v1543_v21 = vpop.f32.mrb[5].mxu1 }
 0x30d   : > { %v1544_v41 = vadd.f32 %v9115_v19, %v1543_v21  ;;  %v7711_v51 = vpop.f32.mrb[6].mxu1 }
 0x30e   : > { %v1660_v28 = vadd.f32 %v1552_v18, %v8980_v4  ;;  %v1555_v29 = vadd.f32 %v7711_v51, %v9115_v19  ;;  %v1546_v33 = vpop.f32.mrb[7].mxu1 }
 0x30f   : > { %v1658_v13 = vadd.f32 %v1544_v41, %v8963_v23  ;;  %v1547_v45 = vadd.f32 %v9115_v19, %v1546_v33 }
 0x310   : > { %v1661_v47 = vadd.f32 %v1555_v29, %v8983_v46  ;;  %v1828_v1 = vmax.f32 %v1660_v28, 0.0  ;;  %v1702_v23 = vsel %vm1444_vm0, %v1660_v28, -inf }
 0x311   : > { %v1659_v32 = vadd.f32 %v1547_v45, %v8966_v27  ;;  %v1699_v42 = vsel %vm1444_vm0, %v1658_v13, -inf  ;;  %v1826_v4 = vmax.f32 %v1658_v13, 0.0  ;;  %v1696_v27 = vmax.f32 %v1694_v22, %v1695_v48 }
 0x312   : > { %v1829_v35 = vmax.f32 %v1661_v47, 0.0  ;;  %v1793_v59 = vpack.c.bf16 %v1661_v47, %v1660_v28  ;;  %v1704_v9 = vsel %vm1444_vm0, %v1661_v47, -inf }
 0x313   : > { %v1700_v61 = vsel %vm1444_vm0, %v1659_v32, -inf  ;;  %v1827_v40 = vmax.f32 %v1659_v32, 0.0  ;;  %v1792_v3 = vpack.c.bf16 %v1659_v32, %v1658_v13  ;;  %v1697_v26 = vrot.slane %v1696_v27, 1 }
 0x314   : > { %v1701_v30 = vmax.f32 %v1699_v42, %v1700_v61  ;;  %v9146_v7 = vpack.c.bf16 %v1829_v35, %v1828_v1  ;;  %1809 = vst.msk [vmem:[#allocation3 + $0x18] sm:$0xff] %vm1444_vm0, %v1793_v59 }
 0x315   : > { %v1856_v46 = vpack.c.bf16 %v1827_v40, %v1826_v4  ;;  %1808 = vst.msk [vmem:[#allocation3 + $0x10] sm:$0xff] %vm1444_vm0, %v1792_v3  ;;  %v1698_v52 = vmax.f32 %v1696_v27, %v1697_v26 }
 0x316   : > { %v1703_v58 = vmax.f32 %v1701_v30, %v1702_v23 }
 0x317   : > { %1890 = vrot.lane.b32.xlu0 %v1856_v46, %s8451_s14  ;;  %v2250_v36 = vmax.f32 %v1698_v52, 0.0  ;;  %v7283_v18 = vpack.c.bf16 %v1698_v52, %v1698_v52 }
 0x318   : > { %v1705_v10 = vmax.f32 %v1703_v58, %v1704_v9 }
 0x319   : > { %v7291_v22 = vpack.c.bf16 %v2250_v36, %v2250_v36  ;;  %v2224_v28 = vunpack.c.l.b16 %v7283_v18 }
 0x31a   : > { %v1706_v38 = vrot.slane %v1705_v10, 4 }
 0x31b   : > { %v1419_v24 = vpop.permute.xlu0 %1418  ;;  %v2290_v13 = vunpack.c.l.b16 %v7291_v22 }
 0x31c   : > { %v1707_v11 = vmax.f32 %v1705_v10, %v1706_v38  ;;  %7733 = vmatmul.mubr.msk.bf16.gmra.mrb[28].mxu1 %vm1444_vm0, %v1419_v24 }
 0x31e   : > { %v1708_v12 = vrot.slane %v1707_v11, 2 }
 0x320   : > { %v1709_v44 = vmax.f32 %v1707_v11, %v1708_v12 }
 0x322   : > { %v1710_v17 = vrot.slane %v1709_v44, 1 }
 0x324   : > { %v1711_v21 = vmax.f32 %v1709_v44, %v1710_v17 }
 0x326   : > { %v7284_v41 = vpack.c.bf16 %v1711_v21, %v1711_v21  ;;  %v2251_v51 = vmax.f32 %v1711_v21, 0.0 }
 0x328   : > { %v2225_v29 = vunpack.c.l.b16 %v7284_v41  ;;  %v7292_v33 = vpack.c.bf16 %v2251_v51, %v2251_v51 }
 0x32a   : > { %v2291_v45 = vunpack.c.l.b16 %v7292_v33  ;;  %v2233_v47 = vsel %vm2232_vm1, %v2225_v29, %v2224_v28 }
 0x32c   : > { %v2298_v48 = vsel %vm2232_vm1, %v2291_v45, %v2290_v13 }
 0x331   : > { %v7714_v32 = vpop.f32.mrb[8].mxu1 }
 0x332   : > { %v1568_v1 = vadd.f32 %v7714_v32, %v9115_v19  ;;  %v1559_v42 = vpop.f32.mrb[9].mxu1 }
 0x333   : > { %v1560_v35 = vadd.f32 %v9115_v19, %v1559_v42  ;;  %v7715_v59 = vpop.f32.mrb[10].mxu1 }
 0x334   : > { %v1664_v61 = vadd.f32 %v1568_v1, %v9001_v62  ;;  %v1571_v4 = vadd.f32 %v7715_v59, %v9115_v19  ;;  %v1562_v40 = vpop.f32.mrb[11].mxu1 }
 0x335   : > { %v1662_v3 = vadd.f32 %v1560_v35, %v8992_v20  ;;  %v1563_v30 = vadd.f32 %v9115_v19, %v1562_v40 }
 0x336   : > { %v1665_v23 = vadd.f32 %v1571_v4, %v9004_v63  ;;  %v1832_v27 = vmax.f32 %v1664_v61, 0.0  ;;  %v1715_v20 = vsel %vm1444_vm0, %v1664_v61, -inf }
 0x337   : > { %v1663_v46 = vadd.f32 %v1563_v30, %v8995_v6  ;;  %v1712_v58 = vsel %vm1444_vm0, %v1662_v3, -inf  ;;  %v1830_v38 = vmax.f32 %v1662_v3, 0.0 }
 0x338   : > { %v1833_v9 = vmax.f32 %v1665_v23, 0.0  ;;  %v1795_v10 = vpack.c.bf16 %v1665_v23, %v1664_v61  ;;  %v1717_v12 = vsel %vm1444_vm0, %v1665_v23, -inf }
 0x339   : > { %v1713_v26 = vsel %vm1444_vm0, %v1663_v46, -inf  ;;  %v1831_v62 = vmax.f32 %v1663_v46, 0.0  ;;  %v1794_v24 = vpack.c.bf16 %v1663_v46, %v1662_v3 }
 0x33a   : > { %v1714_v11 = vmax.f32 %v1712_v58, %v1713_v26  ;;  %v9166_v52 = vpack.c.bf16 %v1833_v9, %v1832_v27  ;;  %1811 = vst.msk [vmem:[#allocation3 + $0x28] sm:$0xff] %vm1444_vm0, %v1795_v10 }
 0x33b   : > { %v1858_v63 = vpack.c.bf16 %v1831_v62, %v1830_v38  ;;  %1810 = vst.msk [vmem:[#allocation3 + $0x20] sm:$0xff] %vm1444_vm0, %v1794_v24 }
 0x33c   : > { %v1716_v6 = vmax.f32 %v1714_v11, %v1715_v20 }
 0x33d   : > { %1894 = vrot.lane.b32.xlu0 %v1858_v63, %s8451_s14 }
 0x33e   : > { %v1718_v44 = vmax.f32 %v1716_v6, %v1717_v12 }
 0x340   : > { %v1719_v36 = vrot.slane %v1718_v44, 4 }
 0x342   : > { %v1720_v17 = vmax.f32 %v1718_v44, %v1719_v36 }
 0x344   : > { %v1721_v18 = vrot.slane %v1720_v17, 2 }
 0x346   : > { %v1722_v21 = vmax.f32 %v1720_v17, %v1721_v18 }
 0x348   : > { %v1723_v22 = vrot.slane %v1722_v21, 1 }
 0x34a   : > { %v1724_v41 = vmax.f32 %v1722_v21, %v1723_v22 }
 0x34c   : > { %v7285_v51 = vpack.c.bf16 %v1724_v41, %v1724_v41  ;;  %v2252_v28 = vmax.f32 %v1724_v41, 0.0 }
 0x34e   : > { %v2226_v29 = vunpack.c.l.b16 %v7285_v51  ;;  %v7293_v33 = vpack.c.bf16 %v2252_v28, %v2252_v28 }
 0x350   : > { %v2292_v13 = vunpack.c.l.b16 %v7293_v33  ;;  %v2235_v45 = vsel %vm2234_vm2, %v2226_v29, %v2233_v47 }
 0x352   : > { %v2299_v32 = vsel %vm2234_vm2, %v2292_v13, %v2298_v48 }
 0x357   : > { %v7718_v1 = vpop.f32.mrb[12].mxu1 }
 0x358   : > { %v1584_v42 = vadd.f32 %v7718_v1, %v9115_v19  ;;  %v1575_v35 = vpop.f32.mrb[13].mxu1 }
 0x359   : > { %v1576_v59 = vadd.f32 %v9115_v19, %v1575_v35  ;;  %v7719_v61 = vpop.f32.mrb[14].mxu1 }
 0x35a   : > { %v1668_v4 = vadd.f32 %v1584_v42, %v9019_v25  ;;  %v1587_v40 = vadd.f32 %v7719_v61, %v9115_v19  ;;  %v1578_v3 = vpop.f32.mrb[15].mxu1 }
 0x35b   : > { %v1666_v30 = vadd.f32 %v1576_v59, %v9010_v37  ;;  %v1579_v23 = vadd.f32 %v9115_v19, %v1578_v3 }
 0x35c   : > { %v1669_v47 = vadd.f32 %v1587_v40, %v9023_v5  ;;  %v1836_v46 = vmax.f32 %v1668_v4, 0.0  ;;  %v1728_v37 = vsel %vm1444_vm0, %v1668_v4, -inf }
 0x35d   : > { %v1667_v48 = vadd.f32 %v1579_v23, %v9013_v57  ;;  %v1725_v27 = vsel %vm1444_vm0, %v1666_v30, -inf  ;;  %v1834_v26 = vmax.f32 %v1666_v30, 0.0 }
 0x35e   : > { %v1837_v58 = vmax.f32 %v1669_v47, 0.0  ;;  %v1797_v9 = vpack.c.bf16 %v1669_v47, %v1668_v4  ;;  %v1730_v11 = vsel %vm1444_vm0, %v1669_v47, -inf }
 0x35f   : > { %v1726_v10 = vsel %vm1444_vm0, %v1667_v48, -inf  ;;  %v1835_v25 = vmax.f32 %v1667_v48, 0.0  ;;  %v1796_v38 = vpack.c.bf16 %v1667_v48, %v1666_v30 }
 0x360   : > { %v1727_v62 = vmax.f32 %v1725_v27, %v1726_v10  ;;  %v9185_v24 = vpack.c.bf16 %v1837_v58, %v1836_v46  ;;  %1813 = vst.msk [vmem:[#allocation3 + $0x38] sm:$0xff] %vm1444_vm0, %v1797_v9  ;;  %v8300_v27 = vld [vmem:[%s11416_s2 + $0xc0] sm:$0xff]  }
 0x361   : > { %v1860_v5 = vpack.c.bf16 %v1835_v25, %v1834_v26  ;;  %1812 = vst.msk [vmem:[#allocation3 + $0x30] sm:$0xff] %vm1444_vm0, %v1796_v38  ;;  %v8452_v26 = vmov 0.0  }
 0x362   : > { %v1729_v57 = vmax.f32 %v1727_v62, %v1728_v37  ;;  %7784 = vmatprep.subr.bf16.mxu0 %v8452_v26  ;;  %7800 = vmatprep.mubr.msk.bf16.mxu0 %vm8453_vm9, %v8452_v26 }
 0x363   : > { %v1887_v20 = vpop.permute.xlu0 %1886  ;;  %1898 = vrot.lane.b32.xlu0 %v1860_v5, %s8451_s14  ;;  %7785 = vmatpush3.bf16.msra.mxu0 %v8300_v27 }
 0x364   : > { %v1731_v63 = vmax.f32 %v1729_v57, %v1730_v11  ;;  %1935 = vst.msk [vmem:[#allocation3] sm:$0xff] %vm1934_vm3, %v1887_v20  ;;  %7786 = vmatprep.subr.bf16.mxu0 %v8452_v26 }
 0x366   : > { %v1732_v6 = vrot.slane %v1731_v63, 4 }
 0x368   : > { %v1733_v12 = vmax.f32 %v1731_v63, %v1732_v6 }
 0x36a   : > { %v1734_v44 = vrot.slane %v1733_v12, 2 }
 0x36b   : > { %v1951_v36 = vld [vmem:[#allocation3] sm:$0xff] }
 0x36c   : > { %v1735_v17 = vmax.f32 %v1733_v12, %v1734_v44  ;;  %7752 = vmatprep.mubr.bf16.mxu1 %v1951_v36 }
 0x36e   : > { %v1736_v18 = vrot.slane %v1735_v17, 1 }
 0x370   : > { %v1737_v21 = vmax.f32 %v1735_v17, %v1736_v18 }
 0x372   : > { %v7286_v22 = vpack.c.bf16 %v1737_v21, %v1737_v21  ;;  %v2253_v41 = vmax.f32 %v1737_v21, 0.0 }
 0x374   : > { %v7294_v51 = vpack.c.bf16 %v2253_v41, %v2253_v41  ;;  %v2227_v28 = vunpack.c.l.b16 %v7286_v22  ;;  %v8301_v22 = vld [vmem:[%s11416_s2 + $0xc8] sm:$0xff]  }
 0x375   : > { %7787 = vmatpush3.bf16.msra.mxu0 %v8301_v22  ;;  %v8306_v22 = vld [vmem:[%s11416_s2 + $0x88] sm:$0xff]  }
 0x376   : > { %v2293_v29 = vunpack.c.l.b16 %v7294_v51  ;;  %v2237_v33 = vsel %vm2236_vm4, %v2227_v28, %v2235_v45  ;;  %7788 = vmatprep.subr.bf16.mxu0 %v8452_v26 }
 0x378   : > { %v2300_v13 = vsel %vm2236_vm4, %v2293_v29, %v2299_v32 }
 0x37d   : > { %v7722_v1 = vpop.f32.mrb[16].mxu1 }
 0x37e   : > { %v1600_v42 = vadd.f32 %v7722_v1, %v9115_v19  ;;  %v1591_v35 = vpop.f32.mrb[17].mxu1 }
 0x37f   : > { %v1592_v59 = vadd.f32 %v9115_v19, %v1591_v35  ;;  %v7723_v61 = vpop.f32.mrb[18].mxu1 }
 0x380   : > { %v1672_v4 = vadd.f32 %v1600_v42, %v9040_v16  ;;  %v1603_v40 = vadd.f32 %v7723_v61, %v9115_v19  ;;  %v1594_v3 = vpop.f32.mrb[19].mxu1 }
 0x381   : > { %v1670_v30 = vadd.f32 %v1592_v59, %v9030_v14  ;;  %v1595_v23 = vadd.f32 %v9115_v19, %v1594_v3 }
 0x382   : > { %v1673_v45 = vadd.f32 %v1603_v40, %v9043_v39  ;;  %v1840_v47 = vmax.f32 %v1672_v4, 0.0 }
 0x383   : > { %v1671_v32 = vadd.f32 %v1595_v23, %v9033_v43  ;;  %v1738_v48 = vsel %vm1444_vm0, %v1670_v30, -inf  ;;  %v1838_v9 = vmax.f32 %v1670_v30, 0.0  ;;  %v1741_v43 = vsel %vm1444_vm0, %v1672_v4, -inf }
 0x384   : > { %v1841_v46 = vmax.f32 %v1673_v45, 0.0  ;;  %v1799_v16 = vpack.c.bf16 %v1673_v45, %v1672_v4  ;;  %v1743_v37 = vsel %vm1444_vm0, %v1673_v45, -inf }
 0x385   : > { %v1739_v58 = vsel %vm1444_vm0, %v1671_v32, -inf  ;;  %v1839_v10 = vmax.f32 %v1671_v32, 0.0  ;;  %v1798_v14 = vpack.c.bf16 %v1671_v32, %v1670_v30 }
 0x386   : > { %v1740_v39 = vmax.f32 %v1738_v48, %v1739_v58  ;;  %v9209_v25 = vpack.c.bf16 %v1841_v46, %v1840_v47  ;;  %1815 = vst.msk [vmem:[#allocation3 + $0x48] sm:$0xff] %vm1444_vm0, %v1799_v16 }
 0x387   : > { %v1862_v38 = vpack.c.bf16 %v1839_v10, %v1838_v9  ;;  %1814 = vst.msk [vmem:[#allocation3 + $0x40] sm:$0xff] %vm1444_vm0, %v1798_v14 }
 0x388   : > { %v1742_v62 = vmax.f32 %v1740_v39, %v1741_v43 }
 0x389   : > { %v1891_v5 = vpop.permute.xlu0 %1890  ;;  %1902 = vrot.lane.b32.xlu0 %v1862_v38, %s8451_s14  ;;  %v8303_v38 = vld [vmem:[%s11416_s2 + $0xd8] sm:$0xff]  }
 0x38a   : > { %v1744_v57 = vmax.f32 %v1742_v62, %v1743_v37  ;;  %1937 = vst.msk [vmem:[#allocation3 + $0x10] sm:$0xff] %vm1934_vm3, %v1891_v5 }
 0x38c   : > { %v1745_v11 = vrot.slane %v1744_v57, 4 }
 0x38e   : > { %v1746_v20 = vmax.f32 %v1744_v57, %v1745_v11 }
 0x390   : > { %v1747_v63 = vrot.slane %v1746_v20, 2 }
 0x392   : > { %v1748_v6 = vmax.f32 %v1746_v20, %v1747_v63 }
 0x394   : > { %v1749_v12 = vrot.slane %v1748_v6, 1 }
 0x396   : > { %v1750_v44 = vmax.f32 %v1748_v6, %v1749_v12 }
 0x398   : > { %v2254_v36 = vmax.f32 %v1750_v44, 0.0  ;;  %v7287_v17 = vpack.c.bf16 %v1750_v44, %v1750_v44 }
 0x39a   : > { %v7295_v18 = vpack.c.bf16 %v2254_v36, %v2254_v36  ;;  %v2228_v21 = vunpack.c.l.b16 %v7287_v17 }
 0x39c   : > { %v2294_v41 = vunpack.c.l.b16 %v7295_v18  ;;  %v2239_v51 = vsel %vm2238_vm5, %v2228_v21, %v2237_v33  ;;  %v8304_v18 = vld [vmem:[%s11416_s2 + $0xe0] sm:$0xff]  }
 0x39d   : > { %v8305_v21 = vld [vmem:[%s11416_s2 + $0x80] sm:$0xff]  }
 0x39e   : > { %v2301_v28 = vsel %vm2238_vm5, %v2294_v41, %v2300_v13  ;;  %7736 = vmatprep.subr.bf16.mxu1 %v8305_v21 }
 0x39f   : > { %7737 = vmatpush3.bf16.msra.mxu1 %v8305_v21 }
 0x3a0   : > { %7738 = vmatprep.subr.bf16.mxu1 %v8306_v22 }
 0x3a3   : > { %v7726_v29 = vpop.f32.mrb[20].mxu1  ;;  %7739 = vmatpush3.bf16.msra.mxu1 %v8306_v22 }
 0x3a4   : > { %v1616_v1 = vadd.f32 %v7726_v29, %v9115_v19  ;;  %v1607_v42 = vpop.f32.mrb[21].mxu1 }
 0x3a5   : > { %v1608_v35 = vadd.f32 %v9115_v19, %v1607_v42  ;;  %v7727_v59 = vpop.f32.mrb[22].mxu1 }
 0x3a6   : > { %v1676_v61 = vadd.f32 %v1616_v1, %v9060_v0  ;;  %v1619_v4 = vadd.f32 %v7727_v59, %v9115_v19  ;;  %v1610_v40 = vpop.f32.mrb[23].mxu1 }
 0x3a7   : > { %v1674_v3 = vadd.f32 %v1608_v35, %v9050_v50  ;;  %v1611_v33 = vadd.f32 %v9115_v19, %v1610_v40  ;;  %v8302_v50 = vld [vmem:[%s11416_s2 + $0xd0] sm:$0xff]  }
 0x3a8   : > { %v1677_v13 = vadd.f32 %v1619_v4, %v9063_v8  ;;  %v1844_v23 = vmax.f32 %v1676_v61, 0.0  ;;  %7789 = vmatpush3.bf16.msra.mxu0 %v8302_v50  ;;  %v8308_v4 = vld [vmem:[%s11416_s2 + $0x90] sm:$0xff]  }
 0x3a9   : > { %v1675_v30 = vadd.f32 %v1611_v33, %v9053_v53  ;;  %v1751_v45 = vsel %vm1444_vm0, %v1674_v3, -inf  ;;  %v1842_v46 = vmax.f32 %v1674_v3, 0.0  ;;  %v1754_v53 = vsel %vm1444_vm0, %v1676_v61, -inf  ;;  %7790 = vmatprep.subr.bf16.mxu0 %v8452_v26  ;;  %7740 = vmatprep.subr.bf16.mxu1 %v8308_v4 }
 0x3aa   : > { %v1845_v47 = vmax.f32 %v1677_v13, 0.0  ;;  %v1801_v32 = vpack.c.bf16 %v1677_v13, %v1676_v61  ;;  %v1756_v10 = vsel %vm1444_vm0, %v1677_v13, -inf  ;;  %7741 = vmatpush3.bf16.msra.mxu1 %v8308_v4 }
 0x3ab   : > { %v1752_v48 = vsel %vm1444_vm0, %v1675_v30, -inf  ;;  %v1843_v0 = vmax.f32 %v1675_v30, 0.0  ;;  %v1800_v27 = vpack.c.bf16 %v1675_v30, %v1674_v3 }
 0x3ac   : > { %v1753_v16 = vmax.f32 %v1751_v45, %v1752_v48  ;;  %v9237_v58 = vpack.c.bf16 %v1845_v47, %v1844_v23  ;;  %1817 = vst.msk [vmem:[#allocation3 + $0x58] sm:$0xff] %vm1444_vm0, %v1801_v32  ;;  %7791 = vmatpush3.bf16.msra.mxu0 %v8303_v38  ;;  %v8309_v45 = vld [vmem:[%s11416_s2 + $0x98] sm:$0xff]  }
 0x3ad   : > { %v1864_v8 = vpack.c.bf16 %v1843_v0, %v1842_v46  ;;  %1816 = vst.msk [vmem:[#allocation3 + $0x50] sm:$0xff] %vm1444_vm0, %v1800_v27  ;;  %7792 = vmatprep.subr.bf16.mxu0 %v8452_v26  ;;  %7742 = vmatprep.subr.bf16.mxu1 %v8309_v45 }
 0x3ae   : > { %v1755_v9 = vmax.f32 %v1753_v16, %v1754_v53  ;;  %7743 = vmatpush3.bf16.msra.mxu1 %v8309_v45 }
 0x3af   : > { %v1895_v14 = vpop.permute.xlu0 %1894  ;;  %1906 = vrot.lane.b32.xlu0 %v1864_v8, %s8451_s14 }
 0x3b0   : > { %v1757_v39 = vmax.f32 %v1755_v9, %v1756_v10  ;;  %1939 = vst.msk [vmem:[#allocation3 + $0x20] sm:$0xff] %vm1934_vm3, %v1895_v14  ;;  %7793 = vmatpush3.bf16.msra.mxu0 %v8304_v18 }
 0x3b1   : > { %7794 = vmatprep.subr.bf16.mxu0 %v8452_v26 }
 0x3b2   : > { %v1758_v43 = vrot.slane %v1757_v39, 4 }
 0x3b4   : > { %v1759_v62 = vmax.f32 %v1757_v39, %v1758_v43 }
 0x3b6   : > { %v1760_v37 = vrot.slane %v1759_v62, 2 }
 0x3b8   : > { %v1761_v5 = vmax.f32 %v1759_v62, %v1760_v37 }
 0x3ba   : > { %v1762_v57 = vrot.slane %v1761_v5, 1 }
 0x3bc   : > { %v1763_v11 = vmax.f32 %v1761_v5, %v1762_v57 }
 0x3be   : > { %v2255_v20 = vmax.f32 %v1763_v11, 0.0  ;;  %v7288_v63 = vpack.c.bf16 %v1763_v11, %v1763_v11 }
 0x3c0   : > { %v7296_v6 = vpack.c.bf16 %v2255_v20, %v2255_v20  ;;  %v2229_v12 = vunpack.c.l.b16 %v7288_v63 }
 0x3c2   : > { %v2295_v44 = vunpack.c.l.b16 %v7296_v6  ;;  %v9251_v36 = vsel %vm2240_vm6, %v2229_v12, %v2239_v51  ;;  %v8310_v6 = vld [vmem:[%s11416_s2 + $0xf0] sm:$0xff]   ;;  %v8311_v12 = vld [vmem:[%s11416_s2 + $0xa0] sm:$0xff]  }
 0x3c3   : > { %7744 = vmatprep.subr.bf16.mxu1 %v8311_v12 }
 0x3c4   : > { %v9254_v17 = vsel %vm2240_vm6, %v2295_v44, %v2301_v28  ;;  %v8307_v28 = vld [vmem:[%s11416_s2 + $0xe8] sm:$0xff]   ;;  %7745 = vmatpush3.bf16.msra.mxu1 %v8311_v12 }
 0x3c5   : > { %7795 = vmatpush3.bf16.msra.mxu0 %v8307_v28  ;;  %v8312_v44 = vld [vmem:[%s11416_s2 + $0xa8] sm:$0xff]  }
 0x3c6   : > { %7796 = vmatprep.subr.bf16.mxu0 %v8452_v26  ;;  %7746 = vmatprep.subr.bf16.mxu1 %v8312_v44 }
 0x3c8   : > { %7747 = vmatpush3.bf16.msra.mxu1 %v8312_v44 }
 0x3c9   : > { %v7730_v41 = vpop.f32.mrb[24].mxu1  ;;  %7797 = vmatpush3.bf16.msra.mxu0 %v8310_v6 }
 0x3ca   : > { %v1632_v29 = vadd.f32 %v7730_v41, %v9115_v19  ;;  %v1623_v51 = vpop.f32.mrb[25].mxu1  ;;  %7798 = vmatprep.subr.bf16.mxu0 %v8452_v26 }
 0x3cb   : > { %v1624_v1 = vadd.f32 %v9115_v19, %v1623_v51  ;;  %v7731_v42 = vpop.f32.mrb[26].mxu1 }
 0x3cc   : > { %v1680_v35 = vadd.f32 %v1632_v29, %v9080_v31  ;;  %v1635_v59 = vadd.f32 %v7731_v42, %v9115_v19  ;;  %v1626_v61 = vpop.f32.mrb[27].mxu1 }
 0x3cd   : > { %v1678_v40 = vadd.f32 %v1624_v1, %v9070_v15  ;;  %v1627_v3 = vadd.f32 %v9115_v19, %v1626_v61  ;;  %v8314_v1 = vld [vmem:[%s11416_s2 + $0xb0] sm:$0xff]  }
 0x3ce   : > { %v1681_v33 = vadd.f32 %v1635_v59, %v9083_v34  ;;  %v1848_v31 = vmax.f32 %v1680_v35, 0.0  ;;  %v1767_v0 = vsel %vm1444_vm0, %v1680_v35, -inf  ;;  %7748 = vmatprep.subr.bf16.mxu1 %v8314_v1 }
 0x3cf   : > { %v1679_v13 = vadd.f32 %v1627_v3, %v9073_v56  ;;  %v1764_v30 = vsel %vm1444_vm0, %v1678_v40, -inf  ;;  %v1846_v32 = vmax.f32 %v1678_v40, 0.0  ;;  %7749 = vmatpush3.bf16.msra.mxu1 %v8314_v1 }
 0x3d0   : > { %v1849_v23 = vmax.f32 %v1681_v33, 0.0  ;;  %v1803_v15 = vpack.c.bf16 %v1681_v33, %v1680_v35  ;;  %v1769_v16 = vsel %vm1444_vm0, %v1681_v33, -inf }
 0x3d1   : > { %v1765_v47 = vsel %vm1444_vm0, %v1679_v13, -inf  ;;  %v1847_v34 = vmax.f32 %v1679_v13, 0.0  ;;  %v1802_v48 = vpack.c.bf16 %v1679_v13, %v1678_v40 }
 0x3d2   : > { %v1766_v46 = vmax.f32 %v1764_v30, %v1765_v47  ;;  %v9286_v56 = vpack.c.bf16 %v1849_v23, %v1848_v31  ;;  %1819 = vst.msk [vmem:[#allocation3 + $0x68] sm:$0xff] %vm1444_vm0, %v1803_v15 }
 0x3d3   : > { %v1866_v27 = vpack.c.bf16 %v1847_v34, %v1846_v32  ;;  %1818 = vst.msk [vmem:[#allocation3 + $0x60] sm:$0xff] %vm1444_vm0, %v1802_v48 }
 0x3d4   : > { %v1768_v50 = vmax.f32 %v1766_v46, %v1767_v0 }
 0x3d5   : > { %v1899_v53 = vpop.permute.xlu0 %1898  ;;  %1910 = vrot.lane.b32.xlu0 %v1866_v27, %s8451_s14  ;;  %v8315_v27 = vld [vmem:[%s11416_s2 + $0xb8] sm:$0xff]  }
 0x3d6   : > { %v1770_v8 = vmax.f32 %v1768_v50, %v1769_v16  ;;  %1941 = vst.msk [vmem:[#allocation3 + $0x30] sm:$0xff] %vm1934_vm3, %v1899_v53  ;;  %7750 = vmatprep.subr.bf16.mxu1 %v8315_v27 }
 0x3d7   : > { %7751 = vmatpush3.bf16.msra.mxu1 %v8315_v27 }
 0x3d8   : > { %v1771_v9 = vrot.slane %v1770_v8, 4 }
 0x3da   : > { %v1772_v10 = vmax.f32 %v1770_v8, %v1771_v9 }
 0x3dc   : > { %v1773_v14 = vrot.slane %v1772_v10, 2 }
 0x3de   : > { %v1774_v39 = vmax.f32 %v1772_v10, %v1773_v14 }
 0x3e0   : > { %v1775_v43 = vrot.slane %v1774_v39, 1 }
 0x3e2   : > { %v1776_v38 = vmax.f32 %v1774_v39, %v1775_v43 }
 0x3e4   : > { %v2256_v62 = vmax.f32 %v1776_v38, 0.0  ;;  %v7289_v37 = vpack.c.bf16 %v1776_v38, %v1776_v38 }
 0x3e6   : > { %v7297_v5 = vpack.c.bf16 %v2256_v62, %v2256_v62  ;;  %v2230_v57 = vunpack.c.l.b16 %v7289_v37 }
 0x3e8   : > { %v2296_v11 = vunpack.c.l.b16 %v7297_v5  ;;  %v9296_v20 = vsel %vm2242_vm7, %v2230_v57, %v9251_v36  ;;  %v1953_v5 = vld [vmem:[#allocation3 + $0x10] sm:$0xff] }
 0x3ea   : > { %v9300_v63 = vsel %vm2242_vm7, %v2296_v11, %v9254_v17  ;;  %v8313_v17 = vld [vmem:[%s11416_s2 + $0xf8] sm:$0xff]  }
 0x3eb   : > { %7799 = vmatpush3.bf16.msra.mxu0 %v8313_v17 }
 0x3ef   : > { %v7734_v18 = vpop.f32.mrb[28].mxu1 }
 0x3f0   : > { %v1648_v36 = vadd.f32 %v7734_v18, %v9115_v19  ;;  %v1639_v21 = vpop.f32.mrb[29].mxu1  ;;  %v1957_v18 = vld [vmem:[#allocation3 + $0x30] sm:$0xff] }
 0x3f1   : > { %v1640_v22 = vadd.f32 %v9115_v19, %v1639_v21  ;;  %v7735_v41 = vpop.f32.mrb[30].mxu1 }
 0x3f2   : > { %v1684_v29 = vadd.f32 %v1648_v36, %v9100_v55  ;;  %v1651_v51 = vadd.f32 %v7735_v41, %v9115_v19  ;;  %v1642_v28 = vpop.f32.mrb[31].mxu1 }
 0x3f3   : > { %v1682_v42 = vadd.f32 %v1640_v22, %v9090_v60  ;;  %v1643_v35 = vadd.f32 %v9115_v19, %v1642_v28 }
 0x3f4   : > { %v1685_v59 = vadd.f32 %v1651_v51, %v9103_v49  ;;  %v1852_v4 = vmax.f32 %v1684_v29, 0.0  ;;  %v1780_v49 = vsel %vm1444_vm0, %v1684_v29, -inf }
 0x3f5   : > { %v1683_v61 = vadd.f32 %v1643_v35, %v9093_v2  ;;  %v1777_v55 = vsel %vm1444_vm0, %v1682_v42, -inf  ;;  %v1850_v13 = vmax.f32 %v1682_v42, 0.0  ;;  %v8316_v35 = vld [vmem:[%s11417_s3 + $0x20] sm:$0xff]  }
 0x3f6   : > { %v1853_v40 = vmax.f32 %v1685_v59, 0.0  ;;  %v1805_v3 = vpack.c.bf16 %v1685_v59, %v1684_v29  ;;  %v1782_v45 = vsel %vm1444_vm0, %v1685_v59, -inf  ;;  %v8317_v59 = vld [vmem:[%s11417_s3 + $0x28] sm:$0xff]   ;;  %7804 = vmatprep.subr.bf16.mxu0 %v8316_v35 }
 0x3f7   : > { %v1778_v33 = vsel %vm1444_vm0, %v1683_v61, -inf  ;;  %v1851_v31 = vmax.f32 %v1683_v61, 0.0  ;;  %v1804_v30 = vpack.c.bf16 %v1683_v61, %v1682_v42  ;;  %v8318_v61 = vld [vmem:[%s11417_s3 + $0x30] sm:$0xff]  }
 0x3f8   : > { %v1779_v60 = vmax.f32 %v1777_v55, %v1778_v33  ;;  %v1869_v23 = vpack.c.bf16 %v1853_v40, %v1852_v4  ;;  %1821 = vst.msk [vmem:[#allocation3 + $0x78] sm:$0xff] %vm1444_vm0, %v1805_v3  ;;  %v8319_v4 = vld [vmem:[%s11417_s3 + $0x38] sm:$0xff]   ;;  %v8454_v55 = vmov 1966171168   ;;  %v2421_v3 = vlaneseq }
 0x3f9   : > { %v1868_v19 = vpack.c.bf16 %v1851_v31, %v1850_v13  ;;  %1820 = vst.msk [vmem:[#allocation3 + $0x70] sm:$0xff] %vm1444_vm0, %v1804_v30  ;;  %v2419_v40 = vunpack.c.l.s4 %v8454_v55 }
 0x3fa   : > { %v1781_v2 = vmax.f32 %v1779_v60, %v1780_v49  ;;  %v2422_v13 = vshrl.u32 %v2421_v3, 7 }
 0x3fb   : > { %v1903_v15 = vpop.permute.xlu0 %1902  ;;  %1914 = vrot.lane.b32.xlu0 %v1868_v19, %s8451_s14  ;;  %v2420_v33 = vunpack.c.0.s8 %v2419_v40 }
 0x3fc   : > { %v1783_v47 = vmax.f32 %v1781_v2, %v1782_v45  ;;  %1943 = vst.msk [vmem:[#allocation3 + $0x40] sm:$0xff] %vm1934_vm3, %v1903_v15  ;;  %v9391_v49 = vsub.s32 0, %v2422_v13 }
 0x3fd   : > { %v9385_v31 = vsub.s32 %v2420_v33, %v2422_v13 }
 0x3fe   : > { %v1784_v32 = vrot.slane %v1783_v47, 4 }
 0x400   : > { %v1785_v34 = vmax.f32 %v1783_v47, %v1784_v32 }
 0x402   : > { %v1786_v48 = vrot.slane %v1785_v34, 2 }
 0x403   : > { %v1959_v17 = vld [vmem:[#allocation3 + $0x40] sm:$0xff] }
 0x404   : > { %v1787_v46 = vmax.f32 %v1785_v34, %v1786_v48 }
 0x406   : > { %v1788_v0 = vrot.slane %v1787_v46, 1 }
 0x408   : > { %v1789_v50 = vmax.f32 %v1787_v46, %v1788_v0  ;;  %v9399_v0 = vld [vmem:[%s11415_s1 + $0x6] ss:$0 sm:$0xff] }
 0x40a   : > { %v2257_v16 = vmax.f32 %v1789_v50, 0.0  ;;  %v7290_v53 = vpack.c.bf16 %v1789_v50, %v1789_v50 }
 0x40c   : > { %v7298_v8 = vpack.c.bf16 %v2257_v16, %v2257_v16  ;;  %v2231_v9 = vunpack.c.l.b16 %v7290_v53 }
 0x40e   : > { %v2297_v10 = vunpack.c.l.b16 %v7298_v8  ;;  %v2245_v14 = vsel %vm2244_vm8, %v2231_v9, %v9296_v20 }
 0x40f   : > { %v2246_v39 = vpack.c.b16 %v2245_v14, %v2245_v14 }
 0x410   : > { %v2304_v43 = vsel %vm2244_vm8, %v2297_v10, %v9300_v63  ;;  %v1955_v63 = vld [vmem:[#allocation3 + $0x20] sm:$0xff] }
 0x411   : > { %v2305_v38 = vpack.c.b16 %v2304_v43, %v2304_v43  ;;  %2249 = vst.msk [vmem:[#allocation4] sm:$0xf] %vm2248_vm10, %v2246_v39 }
 0x413   : > { %2306 = vrot.lane.b32.xlu1 %v2305_v38, %s8451_s14 }
 0x417   : > { %1888 = vrot.lane.b32.xlu1 %v9127_v54, %s8451_s14 }
 0x41b   : > { %1892 = vrot.lane.b32.xlu1 %v9146_v7, %s8451_s14 }
 0x41f   : > { %1896 = vrot.lane.b32.xlu1 %v9166_v52, %s8451_s14 }
 0x421   : > { %v1907_v62 = vpop.permute.xlu0 %1906 }
 0x422   : > { %1945 = vst.msk [vmem:[#allocation3 + $0x50] sm:$0xff] %vm1934_vm3, %v1907_v62 }
 0x423   : > { %1900 = vrot.lane.b32.xlu1 %v9185_v24, %s8451_s14 }
 0x427   : > { %1904 = vrot.lane.b32.xlu1 %v9209_v25, %s8451_s14 }
 0x429   : > { %v1961_v41 = vld [vmem:[#allocation3 + $0x50] sm:$0xff] }
 0x42b   : > { %1908 = vrot.lane.b32.xlu1 %v9237_v58, %s8451_s14 }
 0x42f   : > { %1912 = vrot.lane.b32.xlu1 %v9286_v56, %s8451_s14 }
 0x433   : > { %1916 = vrot.lane.b32.xlu1 %v1869_v23, %s8451_s14 }
 0x447   : > { %v1911_v54 = vpop.permute.xlu0 %1910 }
 0x448   : > { %1947 = vst.msk [vmem:[#allocation3 + $0x60] sm:$0xff] %vm1934_vm3, %v1911_v54 }
 0x44f   : > { %v1963_v51 = vld [vmem:[#allocation3 + $0x60] sm:$0xff] }
 0x46d   : > { %v1915_v7 = vpop.permute.xlu0 %1914 }
 0x46e   : > { %1949 = vst.msk [vmem:[#allocation3 + $0x70] sm:$0xff] %vm1934_vm3, %v1915_v7 }
 0x475   : > { %v1965_v1 = vld [vmem:[#allocation3 + $0x70] sm:$0xff] }
 0x485   : > { %v2307_v52 = vpop.permute.xlu1 %2306 }
 0x486   : > { %2310 = vst.msk [vmem:[#allocation4] sm:$0xf] %vm2309_vm11, %v2307_v52 }
 0x489   : > { %v1889_v24 = vpop.permute.xlu1 %1888 }
 0x48a   : > { %1936 = vst.msk [vmem:[#allocation3 + $0x8] sm:$0xff] %vm1934_vm3, %v1889_v24 }
 0x48d   : > { %v1893_v25 = vpop.permute.xlu1 %1892  ;;  %v2311_v58 = vld [vmem:[#allocation4] sm:$0xf] }
 0x48e   : > { %1938 = vst.msk [vmem:[#allocation3 + $0x18] sm:$0xff] %vm1934_vm3, %v1893_v25  ;;  %7801 = vmatmul.mubr.bf16.vlgmr.msra.gmra.mrb[64].mxu0 %v2311_v58 }
 0x48f   : > { %7805 = vmatpush3.bf16.msra.mxu0 %v8316_v35 }
 0x490   : > { %7806 = vmatprep.subr.bf16.mxu0 %v8317_v59 }
 0x491   : > { %v1897_v56 = vpop.permute.xlu1 %1896  ;;  %v1952_v37 = vld [vmem:[#allocation3 + $0x8] sm:$0xff] }
 0x492   : > { %1940 = vst.msk [vmem:[#allocation3 + $0x28] sm:$0xff] %vm1934_vm3, %v1897_v56  ;;  %7753 = vmatmul.mubr.bf16.vlgmr.msra.gmra.mrb[32].mxu1 %v1952_v37 }
 0x493   : > { %7756 = vmatprep.mubr.bf16.mxu1 %v1953_v5  ;;  %7807 = vmatpush3.bf16.msra.mxu0 %v8317_v59 }
 0x494   : > { %7808 = vmatprep.subr.bf16.mxu0 %v8318_v61 }
 0x495   : > { %v1901_v57 = vpop.permute.xlu1 %1900  ;;  %v1954_v20 = vld [vmem:[#allocation3 + $0x18] sm:$0xff] }
 0x496   : > { %1942 = vst.msk [vmem:[#allocation3 + $0x38] sm:$0xff] %vm1934_vm3, %v1901_v57 }
 0x497   : > { %7809 = vmatpush3.bf16.msra.mxu0 %v8318_v61 }
 0x498   : > { %7810 = vmatprep.subr.bf16.mxu0 %v8319_v4 }
 0x499   : > { %v1905_v11 = vpop.permute.xlu1 %1904  ;;  %v1956_v44 = vld [vmem:[#allocation3 + $0x28] sm:$0xff] }
 0x49a   : > { %1944 = vst.msk [vmem:[#allocation3 + $0x48] sm:$0xff] %vm1934_vm3, %v1905_v11  ;;  %7757 = vmatmul.mubr.bf16.gmra.mrb[36].mxu1 %v1954_v20 }
 0x49b   : > { %7760 = vmatprep.mubr.bf16.mxu1 %v1955_v63  ;;  %7811 = vmatpush3.bf16.msra.mxu0 %v8319_v4 }
 0x49c   : > { %7892 = vmatprep.subr.bf16.mxu0 %v8452_v26 }
 0x49d   : > { %v1909_v6 = vpop.permute.xlu1 %1908  ;;  %v1958_v21 = vld [vmem:[#allocation3 + $0x38] sm:$0xff] }
 0x49e   : > { %1946 = vst.msk [vmem:[#allocation3 + $0x58] sm:$0xff] %vm1934_vm3, %v1909_v6 }
 0x4a1   : > { %v1913_v12 = vpop.permute.xlu1 %1912  ;;  %v1960_v22 = vld [vmem:[#allocation3 + $0x48] sm:$0xff] }
 0x4a2   : > { %1948 = vst.msk [vmem:[#allocation3 + $0x68] sm:$0xff] %vm1934_vm3, %v1913_v12  ;;  %7761 = vmatmul.mubr.bf16.gmra.mrb[40].mxu1 %v1956_v44 }
 0x4a3   : > { %7764 = vmatprep.mubr.bf16.mxu1 %v1957_v18 }
 0x4a5   : > { %v1917_v36 = vpop.permute.xlu1 %1916  ;;  %v1962_v29 = vld [vmem:[#allocation3 + $0x58] sm:$0xff] }
 0x4a6   : > { %1950 = vst.msk [vmem:[#allocation3 + $0x78] sm:$0xff] %vm1934_vm3, %v1917_v36 }
 0x4a9   : > { %v1964_v28 = vld [vmem:[#allocation3 + $0x68] sm:$0xff] }
 0x4aa   : > { %7765 = vmatmul.mubr.bf16.gmra.mrb[44].mxu1 %v1958_v21 }
 0x4ab   : > { %7768 = vmatprep.mubr.bf16.mxu1 %v1959_v17 }
 0x4ad   : > { %v1966_v42 = vld [vmem:[#allocation3 + $0x78] sm:$0xff] }
 0x4b2   : > { %7769 = vmatmul.mubr.bf16.gmra.mrb[48].mxu1 %v1960_v22 }
 0x4b3   : > { %7772 = vmatprep.mubr.bf16.mxu1 %v1961_v41 }
 0x4ba   : > { %7773 = vmatmul.mubr.bf16.gmra.mrb[52].mxu1 %v1962_v29 }
 0x4bb   : > { %7776 = vmatprep.mubr.bf16.mxu1 %v1963_v51 }
 0x4c2   : > { %7777 = vmatmul.mubr.bf16.gmra.mrb[56].mxu1 %v1964_v28 }
 0x4c3   : > { %7780 = vmatprep.mubr.bf16.mxu1 %v1965_v1 }
 0x4ca   : > { %7781 = vmatmul.mubr.bf16.gmra.mrb[60].mxu1 %v1966_v42 }
 0x561   : > { %v9387_v30 = vpop.f32.mrb[64].mxu0 }
 0x562   : > { %v2424_v60 = vrot.slane %v9387_v30, %v9385_v31  ;;  %v7802_v23 = vpop.f32.mrb[65].mxu0  ;;  %v2417_v61 = vcombine.high %v9387_v30, %v9387_v30 }
 0x563   : > { %v2413_v19 = vpop.f32.mrb[66].mxu0 }
 0x564   : > { %v2432_v2 = vcombine.high %v2424_v60, %v2424_v60  ;;  %v2440_v45 = vrot.slane %v2424_v60, %v9385_v31  ;;  %v7803_v15 = vpop.f32.mrb[67].mxu0  ;;  %v2431_v30 = vrot.slane %v2417_v61, %v9385_v31 }
 0x565   : > { %v7754_v47 = vpop.f32.mrb[32].mxu1 }
 0x566   : > { %v2065_v32 = vpop.f32.mrb[33].mxu1  ;;  %v2469_v34 = vrot.slane %v2440_v45, %v9391_v49  ;;  %v2454_v46 = vrot.slane %v2432_v2, %v9385_v31  ;;  %v2462_v58 = vcombine.high %v2440_v45, %v2440_v45 }
 0x567   : > { %v7755_v48 = vpop.f32.mrb[34].mxu1 }
 0x568   : > { %v2068_v27 = vpop.f32.mrb[35].mxu1  ;;  %v2508_v50 = vadd.f32 %v7754_v47, %v2469_v34  ;;  %v2506_v16 = vadd.f32 %v2469_v34, %v2065_v32  ;;  %v2509_v53 = vadd.f32 %v7755_v48, %v2469_v34  ;;  %v2473_v14 = vrot.slane %v2454_v46, %v9391_v49 }
 0x569   : > { %v2507_v8 = vadd.f32 %v2469_v34, %v2068_v27  ;;  %v2477_v36 = vrot.slane %v2462_v58, %v9391_v49  ;;  %v2464_v4 = vcombine.high %v2454_v46, %v2454_v46 }
 0x56a   : > { %v9402_v9 = vadd.f32 %v9399_v0, %v2508_v50  ;;  %v9405_v10 = vadd.f32 %v9399_v0, %v2506_v16  ;;  %v9409_v39 = vadd.f32 %v9399_v0, %v2509_v53  ;;  %v2447_v53 = vrot.slane %v2431_v30, %v9385_v31 }
 0x56b   : > { %v9412_v43 = vadd.f32 %v9399_v0, %v2507_v8  ;;  %v2481_v45 = vrot.slane %v2464_v4, %v9391_v49 }
 0x56c   : > { %v2577_v38 = vmax.f32 %v9402_v9, 0.0  ;;  %v2575_v62 = vmax.f32 %v9405_v10, 0.0  ;;  %v2578_v7 = vmax.f32 %v9409_v39, 0.0 }
 0x56d   : > { %v7758_v54 = vpop.f32.mrb[36].mxu1  ;;  %v2576_v52 = vmax.f32 %v9412_v43, 0.0 }
 0x56e   : > { %v2512_v24 = vadd.f32 %v7758_v54, %v2473_v14  ;;  %v2081_v25 = vpop.f32.mrb[37].mxu1  ;;  %v2608_v5 = vpack.c.bf16 %v2578_v7, %v2577_v38 }
 0x56f   : > { %v2510_v56 = vadd.f32 %v2473_v14, %v2081_v25  ;;  %v7759_v37 = vpop.f32.mrb[38].mxu1  ;;  %v2607_v57 = vpack.c.bf16 %v2576_v52, %v2575_v62  ;;  %v2485_v25 = vrot.slane %v2447_v53, %v9391_v49 }
 0x570   : > { %v9419_v11 = vadd.f32 %v9399_v0, %v2512_v24  ;;  %v2513_v20 = vadd.f32 %v7759_v37, %v2473_v14  ;;  %v2084_v63 = vpop.f32.mrb[39].mxu1  ;;  %2654 = vrot.lane.b32.xlu1 %v2608_v5, %s8451_s14  ;;  %v2433_v24 = vcombine.high %v2431_v30, %v2431_v30 }
 0x571   : > { %v9422_v6 = vadd.f32 %v9399_v0, %v2510_v56  ;;  %v2511_v12 = vadd.f32 %v2473_v14, %v2084_v63  ;;  %2652 = vrot.lane.b32.xlu0 %v2607_v57, %s8451_s14 }
 0x572   : > { %v9425_v44 = vadd.f32 %v9399_v0, %v2513_v20  ;;  %v2581_v21 = vmax.f32 %v9419_v11, 0.0 }
 0x573   : > { %v9430_v18 = vadd.f32 %v9399_v0, %v2511_v12  ;;  %v2579_v22 = vmax.f32 %v9422_v6, 0.0 }
 0x574   : > { %v2582_v17 = vmax.f32 %v9425_v44, 0.0 }
 0x575   : > { %v2580_v41 = vmax.f32 %v9430_v18, 0.0  ;;  %v7762_v29 = vpop.f32.mrb[40].mxu1 }
 0x576   : > { %v2610_v51 = vpack.c.bf16 %v2582_v17, %v2581_v21  ;;  %v2516_v28 = vadd.f32 %v7762_v29, %v2477_v36  ;;  %v2097_v1 = vpop.f32.mrb[41].mxu1 }
 0x577   : > { %v2609_v42 = vpack.c.bf16 %v2580_v41, %v2579_v22  ;;  %v2514_v35 = vadd.f32 %v2477_v36, %v2097_v1  ;;  %v7763_v59 = vpop.f32.mrb[42].mxu1  ;;  %v2461_v22 = vrot.slane %v2433_v24, %v9385_v31 }
 0x578   : > { %v9440_v55 = vadd.f32 %v9399_v0, %v2516_v28  ;;  %v2517_v40 = vadd.f32 %v7763_v59, %v2477_v36  ;;  %v2100_v3 = vpop.f32.mrb[43].mxu1  ;;  %2658 = vrot.lane.b32.xlu1 %v2610_v51, %s8451_s14 }
 0x579   : > { %v9444_v33 = vadd.f32 %v9399_v0, %v2514_v35  ;;  %v2515_v13 = vadd.f32 %v2477_v36, %v2100_v3  ;;  %2656 = vrot.lane.b32.xlu0 %v2609_v42, %s8451_s14  ;;  %v2489_v4 = vrot.slane %v2461_v22, %v9391_v49 }
 0x57a   : > { %v9448_v60 = vadd.f32 %v9399_v0, %v2517_v40  ;;  %v2585_v19 = vmax.f32 %v9440_v55, 0.0 }
 0x57b   : > { %v9451_v23 = vadd.f32 %v9399_v0, %v2515_v13  ;;  %v2583_v15 = vmax.f32 %v9444_v33, 0.0 }
 0x57c   : > { %v2586_v2 = vmax.f32 %v9448_v60, 0.0 }
 0x57d   : > { %v2584_v47 = vmax.f32 %v9451_v23, 0.0  ;;  %v7766_v32 = vpop.f32.mrb[44].mxu1 }
 0x57e   : > { %v2612_v34 = vpack.c.bf16 %v2586_v2, %v2585_v19  ;;  %v2520_v48 = vadd.f32 %v7766_v32, %v2481_v45  ;;  %v2113_v46 = vpop.f32.mrb[45].mxu1  ;;  %v2463_v32 = vcombine.high %v2447_v53, %v2447_v53 }
 0x57f   : > { %v2611_v27 = vpack.c.bf16 %v2584_v47, %v2583_v15  ;;  %v2518_v50 = vadd.f32 %v2481_v45, %v2113_v46  ;;  %v7767_v16 = vpop.f32.mrb[46].mxu1 }
 0x580   : > { %v9461_v8 = vadd.f32 %v9399_v0, %v2520_v48  ;;  %v2521_v14 = vadd.f32 %v7767_v16, %v2481_v45  ;;  %v2116_v38 = vpop.f32.mrb[47].mxu1  ;;  %2662 = vrot.lane.b32.xlu1 %v2612_v34, %s8451_s14 }
 0x581   : > { %v9465_v62 = vadd.f32 %v9399_v0, %v2518_v50  ;;  %v2519_v54 = vadd.f32 %v2481_v45, %v2116_v38  ;;  %2660 = vrot.lane.b32.xlu0 %v2611_v27, %s8451_s14 }
 0x582   : > { %v9469_v7 = vadd.f32 %v9399_v0, %v2521_v14  ;;  %v2589_v58 = vmax.f32 %v9461_v8, 0.0 }
 0x583   : > { %v9472_v52 = vadd.f32 %v9399_v0, %v2519_v54  ;;  %v2587_v37 = vmax.f32 %v9465_v62, 0.0  ;;  %v2493_v54 = vrot.slane %v2463_v32, %v9391_v49 }
 0x584   : > { %v2590_v56 = vmax.f32 %v9469_v7, 0.0 }
 0x585   : > { %v2588_v5 = vmax.f32 %v9472_v52, 0.0  ;;  %v7770_v57 = vpop.f32.mrb[48].mxu1 }
 0x586   : > { %v2614_v20 = vpack.c.bf16 %v2590_v56, %v2589_v58  ;;  %v2524_v63 = vadd.f32 %v7770_v57, %v2485_v25  ;;  %v2129_v12 = vpop.f32.mrb[49].mxu1 }
 0x587   : > { %v2613_v36 = vpack.c.bf16 %v2588_v5, %v2587_v37  ;;  %v2522_v21 = vadd.f32 %v2485_v25, %v2129_v12  ;;  %v7771_v17 = vpop.f32.mrb[50].mxu1  ;;  %v2465_v12 = vcombine.high %v2461_v22, %v2461_v22 }
 0x588   : > { %v9481_v41 = vadd.f32 %v9399_v0, %v2524_v63  ;;  %v2525_v29 = vadd.f32 %v7771_v17, %v2485_v25  ;;  %v2132_v51 = vpop.f32.mrb[51].mxu1  ;;  %2666 = vrot.lane.b32.xlu1 %v2614_v20, %s8451_s14 }
 0x589   : > { %v9485_v28 = vadd.f32 %v9399_v0, %v2522_v21  ;;  %v2523_v1 = vadd.f32 %v2485_v25, %v2132_v51  ;;  %2664 = vrot.lane.b32.xlu0 %v2613_v36, %s8451_s14 }
 0x58a   : > { %v9489_v42 = vadd.f32 %v9399_v0, %v2525_v29  ;;  %v2593_v59 = vmax.f32 %v9481_v41, 0.0 }
 0x58b   : > { %v9492_v35 = vadd.f32 %v9399_v0, %v2523_v1  ;;  %v2591_v40 = vmax.f32 %v9485_v28, 0.0 }
 0x58c   : > { %v2594_v61 = vmax.f32 %v9489_v42, 0.0 }
 0x58d   : > { %v2592_v3 = vmax.f32 %v9492_v35, 0.0  ;;  %v7774_v13 = vpop.f32.mrb[52].mxu1 }
 0x58e   : > { %v2616_v30 = vpack.c.bf16 %v2594_v61, %v2593_v59  ;;  %v2528_v19 = vadd.f32 %v7774_v13, %v2489_v4  ;;  %v2145_v2 = vpop.f32.mrb[53].mxu1 }
 0x58f   : > { %v2615_v45 = vpack.c.bf16 %v2592_v3, %v2591_v40  ;;  %v2526_v15 = vadd.f32 %v2489_v4, %v2145_v2  ;;  %v7775_v47 = vpop.f32.mrb[54].mxu1 }
 0x590   : > { %v9500_v34 = vadd.f32 %v9399_v0, %v2528_v19  ;;  %v2529_v48 = vadd.f32 %v7775_v47, %v2489_v4  ;;  %v2148_v46 = vpop.f32.mrb[55].mxu1  ;;  %2670 = vrot.lane.b32.xlu1 %v2616_v30, %s8451_s14 }
 0x591   : > { %v9504_v27 = vadd.f32 %v9399_v0, %v2526_v15  ;;  %v2527_v50 = vadd.f32 %v2489_v4, %v2148_v46  ;;  %2668 = vrot.lane.b32.xlu0 %v2615_v45, %s8451_s14  ;;  %v2497_v4 = vrot.slane %v2465_v12, %v9391_v49 }
 0x592   : > { %v9508_v16 = vadd.f32 %v9399_v0, %v2529_v48  ;;  %v2597_v53 = vmax.f32 %v9500_v34, 0.0 }
 0x593   : > { %v9511_v14 = vadd.f32 %v9399_v0, %v2527_v50  ;;  %v2595_v24 = vmax.f32 %v9504_v27, 0.0 }
 0x594   : > { %v2598_v38 = vmax.f32 %v9508_v16, 0.0 }
 0x595   : > { %v2596_v25 = vmax.f32 %v9511_v14, 0.0  ;;  %v7778_v58 = vpop.f32.mrb[56].mxu1 }
 0x596   : > { %v2618_v56 = vpack.c.bf16 %v2598_v38, %v2597_v53  ;;  %v2532_v37 = vadd.f32 %v7778_v58, %v2493_v54  ;;  %v2161_v5 = vpop.f32.mrb[57].mxu1 }
 0x597   : > { %v2617_v57 = vpack.c.bf16 %v2596_v25, %v2595_v24  ;;  %v2530_v20 = vadd.f32 %v2493_v54, %v2161_v5  ;;  %v7779_v63 = vpop.f32.mrb[58].mxu1 }
 0x598   : > { %v9519_v36 = vadd.f32 %v9399_v0, %v2532_v37  ;;  %v2533_v21 = vadd.f32 %v7779_v63, %v2493_v54  ;;  %v2164_v17 = vpop.f32.mrb[59].mxu1  ;;  %2674 = vrot.lane.b32.xlu1 %v2618_v56, %s8451_s14 }
 0x599   : > { %v9523_v29 = vadd.f32 %v9399_v0, %v2530_v20  ;;  %v2531_v51 = vadd.f32 %v2493_v54, %v2164_v17  ;;  %2672 = vrot.lane.b32.xlu0 %v2617_v57, %s8451_s14 }
 0x59a   : > { %v9527_v1 = vadd.f32 %v9399_v0, %v2533_v21  ;;  %v2601_v22 = vmax.f32 %v9519_v36, 0.0 }
 0x59b   : > { %v9530_v59 = vadd.f32 %v9399_v0, %v2531_v51  ;;  %v2599_v40 = vmax.f32 %v9523_v29, 0.0 }
 0x59c   : > { %v2602_v61 = vmax.f32 %v9527_v1, 0.0 }
 0x59d   : > { %v2600_v3 = vmax.f32 %v9530_v59, 0.0  ;;  %v7782_v13 = vpop.f32.mrb[60].mxu1 }
 0x59e   : > { %v2620_v30 = vpack.c.bf16 %v2602_v61, %v2601_v22  ;;  %v2536_v19 = vadd.f32 %v7782_v13, %v2497_v4  ;;  %v2177_v2 = vpop.f32.mrb[61].mxu1 }
 0x59f   : > { %v2619_v45 = vpack.c.bf16 %v2600_v3, %v2599_v40  ;;  %v2534_v15 = vadd.f32 %v2497_v4, %v2177_v2  ;;  %v7783_v47 = vpop.f32.mrb[62].mxu1  ;;  %v9578_v2 = vld [vmem:[%s11415_s1 + $0x7] ss:$0 sm:$0xff] }
 0x5a0   : > { %v9538_v32 = vadd.f32 %v9399_v0, %v2536_v19  ;;  %v2537_v48 = vadd.f32 %v7783_v47, %v2497_v4  ;;  %v2180_v46 = vpop.f32.mrb[63].mxu1  ;;  %2678 = vrot.lane.b32.xlu1 %v2620_v30, %s8451_s14 }
 0x5a1   : > { %v9542_v50 = vadd.f32 %v9399_v0, %v2534_v15  ;;  %v2535_v53 = vadd.f32 %v2497_v4, %v2180_v46  ;;  %2676 = vrot.lane.b32.xlu0 %v2619_v45, %s8451_s14 }
 0x5a2   : > { %v9546_v38 = vadd.f32 %v9399_v0, %v2537_v48  ;;  %v2605_v24 = vmax.f32 %v9538_v32, 0.0 }
 0x5a3   : > { %v9549_v54 = vadd.f32 %v9399_v0, %v2535_v53  ;;  %v2603_v58 = vmax.f32 %v9542_v50, 0.0 }
 0x5a4   : > { %v2606_v25 = vmax.f32 %v9546_v38, 0.0 }
 0x5a5   : > { %v2604_v56 = vmax.f32 %v9549_v54, 0.0 }
 0x5a6   : > { %v2622_v37 = vpack.c.bf16 %v2606_v25, %v2605_v24 }
 0x5a7   : > { %v2621_v5 = vpack.c.bf16 %v2604_v56, %v2603_v58 }
 0x5a8   : > { %2682 = vrot.lane.b32.xlu1 %v2622_v37, %s8451_s14 }
 0x5a9   : > { %2680 = vrot.lane.b32.xlu0 %v2621_v5, %s8451_s14 }
 0x5e2   : > { %v2655_v20 = vpop.permute.xlu1 %2654 }
 0x5e3   : > { %v2653_v57 = vpop.permute.xlu0 %2652 }
 0x5e4   : > { %7812 = vmatprep.mubr.msk.bf16.mxu0 %vm1444_vm0, %v2653_v57 }
 0x5e5   : > { %7813 = vmatmul.mubr.msk.bf16.vlgmr.msra.gmra.mrb[68].mxu0 %vm1444_vm0, %v2655_v20 }
 0x5ea   : > { %v2659_v63 = vpop.permute.xlu1 %2658 }
 0x5eb   : > { %v2657_v0 = vpop.permute.xlu0 %2656 }
 0x5ec   : > { %7816 = vmatprep.mubr.msk.bf16.mxu0 %vm1444_vm0, %v2657_v0 }
 0x5ed   : > { %7817 = vmatmul.mubr.msk.bf16.gmra.mrb[72].mxu0 %vm1444_vm0, %v2659_v63 }
 0x5f2   : > { %v2663_v21 = vpop.permute.xlu1 %2662 }
 0x5f3   : > { %v2661_v12 = vpop.permute.xlu0 %2660 }
 0x5f4   : > { %7820 = vmatprep.mubr.msk.bf16.mxu0 %vm1444_vm0, %v2661_v12 }
 0x5f5   : > { %7821 = vmatmul.mubr.msk.bf16.gmra.mrb[76].mxu0 %vm1444_vm0, %v2663_v21 }
 0x5fa   : > { %v2667_v51 = vpop.permute.xlu1 %2666 }
 0x5fb   : > { %v2665_v17 = vpop.permute.xlu0 %2664 }
 0x5fc   : > { %7824 = vmatprep.mubr.msk.bf16.mxu0 %vm1444_vm0, %v2665_v17 }
 0x5fd   : > { %7825 = vmatmul.mubr.msk.bf16.gmra.mrb[80].mxu0 %vm1444_vm0, %v2667_v51 }
 0x602   : > { %v2671_v61 = vpop.permute.xlu1 %2670 }
 0x603   : > { %v2669_v22 = vpop.permute.xlu0 %2668 }
 0x604   : > { %7828 = vmatprep.mubr.msk.bf16.mxu0 %vm1444_vm0, %v2669_v22 }
 0x605   : > { %7829 = vmatmul.mubr.msk.bf16.gmra.mrb[84].mxu0 %vm1444_vm0, %v2671_v61 }
 0x60a   : > { %v2675_v40 = vpop.permute.xlu1 %2674 }
 0x60b   : > { %v2673_v4 = vpop.permute.xlu0 %2672 }
 0x60c   : > { %7832 = vmatprep.mubr.msk.bf16.mxu0 %vm1444_vm0, %v2673_v4 }
 0x60d   : > { %7833 = vmatmul.mubr.msk.bf16.gmra.mrb[88].mxu0 %vm1444_vm0, %v2675_v40 }
 0x612   : > { %v2679_v13 = vpop.permute.xlu1 %2678 }
 0x613   : > { %v2677_v3 = vpop.permute.xlu0 %2676 }
 0x614   : > { %7836 = vmatprep.mubr.msk.bf16.mxu0 %vm1444_vm0, %v2677_v3 }
 0x615   : > { %7837 = vmatmul.mubr.msk.bf16.gmra.mrb[92].mxu0 %vm1444_vm0, %v2679_v13 }
 0x61a   : > { %v2683_v19 = vpop.permute.xlu1 %2682 }
 0x61b   : > { %v2681_v30 = vpop.permute.xlu0 %2680 }
 0x61c   : > { %7840 = vmatprep.mubr.msk.bf16.mxu0 %vm1444_vm0, %v2681_v30 }
 0x61d   : > { %7841 = vmatmul.mubr.msk.bf16.gmra.mrb[96].mxu0 %vm1444_vm0, %v2683_v19 }
 0x61e   : > { %7908 = vmatprep.mubr.msk.bf16.mxu0 %vm8453_vm9, %v8452_v26 }
 0x6b8   : > { %v7814_v45 = vpop.f32.mrb[68].mxu0 }
 0x6b9   : > { %v2799_v15 = vadd.f32 %v7814_v45, %v9578_v2  ;;  %v2790_v47 = vpop.f32.mrb[69].mxu0 }
 0x6ba   : > { %v2791_v48 = vadd.f32 %v9578_v2, %v2790_v47  ;;  %v7815_v46 = vpop.f32.mrb[70].mxu0 }
 0x6bb   : > { %v2919_v53 = vadd.f32 %v2799_v15, %v9402_v9  ;;  %v2802_v24 = vadd.f32 %v7815_v46, %v9578_v2  ;;  %v2793_v25 = vpop.f32.mrb[71].mxu0 }
 0x6bc   : > { %v2917_v58 = vadd.f32 %v2791_v48, %v9405_v10  ;;  %v2794_v56 = vadd.f32 %v9578_v2, %v2793_v25 }
 0x6bd   : > { %v2920_v37 = vadd.f32 %v2802_v24, %v9409_v39  ;;  %v3087_v57 = vmax.f32 %v2919_v53, 0.0 }
 0x6be   : > { %v2918_v5 = vadd.f32 %v2794_v56, %v9412_v43  ;;  %v2949_v20 = vsel %vm1444_vm0, %v2917_v58, -inf  ;;  %v3085_v12 = vmax.f32 %v2917_v58, 0.0  ;;  %v2952_v43 = vsel %vm1444_vm0, %v2919_v53, -inf }
 0x6bf   : > { %v3054_v0 = vpack.c.bf16 %v2920_v37, %v2919_v53  ;;  %v3088_v63 = vmax.f32 %v2920_v37, 0.0  ;;  %v2954_v15 = vsel %vm1444_vm0, %v2920_v37, -inf }
 0x6c0   : > { %v2950_v21 = vsel %vm1444_vm0, %v2918_v5, -inf  ;;  %v3053_v9 = vpack.c.bf16 %v2918_v5, %v2917_v58  ;;  %v3086_v17 = vmax.f32 %v2918_v5, 0.0  ;;  %v7818_v51 = vpop.f32.mrb[72].mxu0 }
 0x6c1   : > { %3070 = vst.msk [vmem:[#allocation3 + $0x8] sm:$0xff] %vm1444_vm0, %v3054_v0  ;;  %v2951_v10 = vmax.f32 %v2949_v20, %v2950_v21  ;;  %v2815_v22 = vadd.f32 %v7818_v51, %v9578_v2  ;;  %v2806_v61 = vpop.f32.mrb[73].mxu0  ;;  %v9592_v39 = vpack.c.bf16 %v3088_v63, %v3087_v57 }
 0x6c2   : > { %3069 = vst.msk [vmem:[#allocation3] sm:$0xff] %vm1444_vm0, %v3053_v9  ;;  %v2807_v4 = vadd.f32 %v9578_v2, %v2806_v61  ;;  %v7819_v40 = vpop.f32.mrb[74].mxu0  ;;  %v3117_v3 = vpack.c.bf16 %v3086_v17, %v3085_v12 }
 0x6c3   : > { %v2953_v13 = vmax.f32 %v2951_v10, %v2952_v43  ;;  %v2923_v30 = vadd.f32 %v2815_v22, %v9419_v11  ;;  %v2818_v19 = vadd.f32 %v7819_v40, %v9578_v2  ;;  %v2809_v45 = vpop.f32.mrb[75].mxu0 }
 0x6c4   : > { %v2921_v47 = vadd.f32 %v2807_v4, %v9422_v6  ;;  %v2810_v48 = vadd.f32 %v9578_v2, %v2809_v45  ;;  %3149 = vrot.lane.b32.xlu1 %v3117_v3, %s8451_s14 }
 0x6c5   : > { %v2955_v46 = vmax.f32 %v2953_v13, %v2954_v15  ;;  %v2924_v53 = vadd.f32 %v2818_v19, %v9425_v44  ;;  %v3091_v24 = vmax.f32 %v2923_v30, 0.0 }
 0x6c6   : > { %v2922_v25 = vadd.f32 %v2810_v48, %v9430_v18  ;;  %v2962_v11 = vsel %vm1444_vm0, %v2921_v47, -inf  ;;  %v3089_v57 = vmax.f32 %v2921_v47, 0.0  ;;  %v2965_v18 = vsel %vm1444_vm0, %v2923_v30, -inf }
 0x6c7   : > { %v2956_v58 = vrot.slane %v2955_v46, 4  ;;  %v3056_v56 = vpack.c.bf16 %v2924_v53, %v2923_v30  ;;  %v3092_v5 = vmax.f32 %v2924_v53, 0.0  ;;  %v2967_v3 = vsel %vm1444_vm0, %v2924_v53, -inf }
 0x6c8   : > { %v2963_v37 = vsel %vm1444_vm0, %v2922_v25, -inf  ;;  %v3055_v20 = vpack.c.bf16 %v2922_v25, %v2921_v47  ;;  %v3090_v6 = vmax.f32 %v2922_v25, 0.0  ;;  %v7822_v0 = vpop.f32.mrb[76].mxu0 }
 0x6c9   : > { %v2957_v63 = vmax.f32 %v2955_v46, %v2956_v58  ;;  %3072 = vst.msk [vmem:[#allocation3 + $0x18] sm:$0xff] %vm1444_vm0, %v3056_v56  ;;  %v2964_v12 = vmax.f32 %v2962_v11, %v2963_v37  ;;  %v2831_v44 = vadd.f32 %v7822_v0, %v9578_v2  ;;  %v2822_v21 = vpop.f32.mrb[77].mxu0  ;;  %v9609_v9 = vpack.c.bf16 %v3092_v5, %v3091_v24 }
 0x6ca   : > { %3071 = vst.msk [vmem:[#allocation3 + $0x10] sm:$0xff] %vm1444_vm0, %v3055_v20  ;;  %v2823_v17 = vadd.f32 %v9578_v2, %v2822_v21  ;;  %v7823_v51 = vpop.f32.mrb[78].mxu0  ;;  %v3119_v10 = vpack.c.bf16 %v3090_v6, %v3089_v57 }
 0x6cb   : > { %v2958_v22 = vrot.slane %v2957_v63, 2  ;;  %v2966_v61 = vmax.f32 %v2964_v12, %v2965_v18  ;;  %v2927_v43 = vadd.f32 %v2831_v44, %v9440_v55  ;;  %v2834_v4 = vadd.f32 %v7823_v51, %v9578_v2  ;;  %v2825_v40 = vpop.f32.mrb[79].mxu0 }
 0x6cc   : > { %v2925_v13 = vadd.f32 %v2823_v17, %v9444_v33  ;;  %v2826_v19 = vadd.f32 %v9578_v2, %v2825_v40  ;;  %3153 = vrot.lane.b32.xlu1 %v3119_v10, %s8451_s14 }
 0x6cd   : > { %v2959_v30 = vmax.f32 %v2957_v63, %v2958_v22  ;;  %v2968_v45 = vmax.f32 %v2966_v61, %v2967_v3  ;;  %v2978_v15 = vsel %vm1444_vm0, %v2927_v43, -inf  ;;  %v2928_v47 = vadd.f32 %v2834_v4, %v9448_v60 }
 0x6ce   : > { %v2926_v48 = vadd.f32 %v2826_v19, %v9451_v23  ;;  %v3095_v24 = vmax.f32 %v2927_v43, 0.0  ;;  %v2975_v25 = vsel %vm1444_vm0, %v2925_v13, -inf }
 0x6cf   : > { %v2960_v55 = vrot.slane %v2959_v30, 1  ;;  %v2969_v46 = vrot.slane %v2968_v45, 4  ;;  %v2980_v53 = vsel %vm1444_vm0, %v2928_v47, -inf  ;;  %v3058_v33 = vpack.c.bf16 %v2928_v47, %v2927_v43 }
 0x6d0   : > { %v3096_v58 = vmax.f32 %v2928_v47, 0.0  ;;  %v2976_v11 = vsel %vm1444_vm0, %v2926_v48, -inf  ;;  %v7826_v56 = vpop.f32.mrb[80].mxu0  ;;  %v3057_v20 = vpack.c.bf16 %v2926_v48, %v2925_v13  ;;  %v3094_v60 = vmax.f32 %v2926_v48, 0.0 }
 0x6d1   : > { %v2961_v5 = vmax.f32 %v2959_v30, %v2960_v55  ;;  %v2970_v57 = vmax.f32 %v2968_v45, %v2969_v46  ;;  %v2977_v37 = vmax.f32 %v2975_v25, %v2976_v11  ;;  %v2838_v6 = vpop.f32.mrb[81].mxu0  ;;  %3074 = vst.msk [vmem:[#allocation3 + $0x28] sm:$0xff] %vm1444_vm0, %v3058_v33  ;;  %v2847_v23 = vadd.f32 %v7826_v56, %v9578_v2 }
 0x6d2   : > { %v2839_v0 = vadd.f32 %v9578_v2, %v2838_v6  ;;  %v7827_v63 = vpop.f32.mrb[82].mxu0  ;;  %v9629_v12 = vpack.c.bf16 %v3096_v58, %v3095_v24  ;;  %3073 = vst.msk [vmem:[#allocation3 + $0x20] sm:$0xff] %vm1444_vm0, %v3057_v20  ;;  %v3093_v30 = vmax.f32 %v2925_v13, 0.0 }
 0x6d3   : > { %v7299_v44 = vpack.c.bf16 %v2961_v5, %v2961_v5  ;;  %v3504_v21 = vmax.f32 %v2961_v5, 0.0  ;;  %v2971_v18 = vrot.slane %v2970_v57, 2  ;;  %v2979_v17 = vmax.f32 %v2977_v37, %v2978_v15  ;;  %v2841_v51 = vpop.f32.mrb[83].mxu0 }
 0x6d4   : > { %v9633_v10 = vadd.f32 %v2847_v23, %v9461_v8  ;;  %v9636_v22 = vadd.f32 %v2839_v0, %v9465_v62  ;;  %v2850_v61 = vadd.f32 %v7827_v63, %v9578_v2  ;;  %v2842_v43 = vadd.f32 %v9578_v2, %v2841_v51 }
 0x6d5   : > { %v9640_v4 = vpack.c.bf16 %v3504_v21, %v3504_v21  ;;  %v2972_v40 = vmax.f32 %v2970_v57, %v2971_v18  ;;  %v2981_v3 = vmax.f32 %v2979_v17, %v2980_v53  ;;  %v3486_v19 = vunpack.c.l.b16 %v7299_v44 }
 0x6d6   : > { %v2991_v45 = vsel %vm1444_vm0, %v9633_v10, -inf  ;;  %v3099_v15 = vmax.f32 %v9633_v10, 0.0  ;;  %v2988_v62 = vsel %vm1444_vm0, %v9636_v22, -inf  ;;  %v9648_v48 = vadd.f32 %v2850_v61, %v9469_v7  ;;  %v8320_v7 = vld [vmem:[%s11416_s2 + $0x140] sm:$0xff]  }
 0x6d7   : > { %v2973_v8 = vrot.slane %v2972_v40, 1  ;;  %v2982_v47 = vrot.slane %v2981_v3, 4  ;;  %v3544_v55 = vunpack.c.l.b16 %v9640_v4  ;;  %v3097_v46 = vmax.f32 %v9636_v22, 0.0  ;;  %7893 = vmatpush3.bf16.msra.mxu0 %v8320_v7 }
 0x6d8   : > { %v9653_v24 = vadd.f32 %v2842_v43, %v9472_v52  ;;  %v3121_v13 = vpack.c.bf16 %v3094_v60, %v3093_v30  ;;  %v7830_v25 = vpop.f32.mrb[84].mxu0  ;;  %v2993_v58 = vsel %vm1444_vm0, %v9648_v48, -inf  ;;  %v3060_v11 = vpack.c.bf16 %v9648_v48, %v9633_v10  ;;  %v8321_v52 = vld [vmem:[%s11416_s2 + $0x100] sm:$0xff]   ;;  %7894 = vmatprep.subr.bf16.mxu0 %v8452_v26 }
 0x6d9   : > { %v2974_v53 = vmax.f32 %v2972_v40, %v2973_v8  ;;  %v2983_v33 = vmax.f32 %v2981_v3, %v2982_v47  ;;  %v2854_v56 = vpop.f32.mrb[85].mxu0  ;;  %v3100_v5 = vmax.f32 %v9648_v48, 0.0  ;;  %7844 = vmatprep.subr.bf16.mxu1 %v8321_v52  ;;  %v2863_v21 = vadd.f32 %v7830_v25, %v9578_v2 }
 0x6da   : > { %v2989_v57 = vsel %vm1444_vm0, %v9653_v24, -inf  ;;  %v3059_v37 = vpack.c.bf16 %v9653_v24, %v9636_v22  ;;  %v3098_v20 = vmax.f32 %v9653_v24, 0.0  ;;  %3157 = vrot.lane.b32.xlu1 %v3121_v13, %s8451_s14  ;;  %v7831_v6 = vpop.f32.mrb[86].mxu0  ;;  %3076 = vst.msk [vmem:[#allocation3 + $0x38] sm:$0xff] %vm1444_vm0, %v3060_v11  ;;  %v2855_v18 = vadd.f32 %v9578_v2, %v2854_v56  ;;  %7845 = vmatpush3.bf16.msra.mxu1 %v8321_v52 }
 0x6db   : > { %v7300_v60 = vpack.c.bf16 %v2974_v53, %v2974_v53  ;;  %v3505_v23 = vmax.f32 %v2974_v53, 0.0  ;;  %v2984_v0 = vrot.slane %v2983_v33, 2  ;;  %v2990_v63 = vmax.f32 %v2988_v62, %v2989_v57  ;;  %v2857_v44 = vpop.f32.mrb[87].mxu0 }
 0x6dc   : > { %3075 = vst.msk [vmem:[#allocation3 + $0x30] sm:$0xff] %vm1444_vm0, %v3059_v37  ;;  %v2866_v17 = vadd.f32 %v7831_v6, %v9578_v2  ;;  %v2858_v51 = vadd.f32 %v9578_v2, %v2857_v44  ;;  %v9682_v30 = vadd.f32 %v2863_v21, %v9481_v41  ;;  %v9685_v8 = vadd.f32 %v2855_v18, %v9485_v28  ;;  %v8322_v41 = vld [vmem:[%s11416_s2 + $0x148] sm:$0xff]  }
 0x6dd   : > { %v3487_v61 = vunpack.c.l.b16 %v7300_v60  ;;  %v9678_v43 = vpack.c.bf16 %v3505_v23, %v3505_v23  ;;  %v2985_v40 = vmax.f32 %v2983_v33, %v2984_v0  ;;  %v2992_v3 = vmax.f32 %v2990_v63, %v2991_v45  ;;  %v8323_v28 = vld [vmem:[%s11416_s2 + $0x108] sm:$0xff]   ;;  %7895 = vmatpush3.bf16.msra.mxu0 %v8322_v41 }
 0x6de   : > { %v9688_v47 = vadd.f32 %v2866_v17, %v9489_v42  ;;  %v9691_v62 = vadd.f32 %v2858_v51, %v9492_v35  ;;  %v3004_v42 = vsel %vm1444_vm0, %v9682_v30, -inf  ;;  %v3103_v35 = vmax.f32 %v9682_v30, 0.0  ;;  %7846 = vmatprep.subr.bf16.mxu1 %v8323_v28  ;;  %7896 = vmatprep.subr.bf16.mxu0 %v8452_v26 }
 0x6df   : > { %v3494_v24 = vsel %vm2232_vm1, %v3487_v61, %v3486_v19  ;;  %v3545_v13 = vunpack.c.l.b16 %v9678_v43  ;;  %v2986_v25 = vrot.slane %v2985_v40, 1  ;;  %v2994_v45 = vmax.f32 %v2992_v3, %v2993_v58  ;;  %7847 = vmatpush3.bf16.msra.mxu1 %v8323_v28 }
 0x6e0   : > { %v3001_v19 = vsel %vm1444_vm0, %v9685_v8, -inf  ;;  %v3101_v53 = vmax.f32 %v9685_v8, 0.0  ;;  %v7834_v33 = vpop.f32.mrb[88].mxu0  ;;  %v3006_v56 = vsel %vm1444_vm0, %v9688_v47, -inf  ;;  %v3062_v7 = vpack.c.bf16 %v9688_v47, %v9682_v30 }
 0x6e1   : > { %v2987_v58 = vmax.f32 %v2985_v40, %v2986_v25  ;;  %v2995_v11 = vrot.slane %v2994_v45, 4  ;;  %v2870_v52 = vpop.f32.mrb[89].mxu0  ;;  %v3104_v57 = vmax.f32 %v9688_v47, 0.0  ;;  %v3002_v37 = vsel %vm1444_vm0, %v9691_v62, -inf }
 0x6e2   : > { %v3061_v6 = vpack.c.bf16 %v9691_v62, %v9685_v8  ;;  %v3102_v60 = vmax.f32 %v9691_v62, 0.0  ;;  %v7835_v23 = vpop.f32.mrb[90].mxu0  ;;  %3078 = vst.msk [vmem:[#allocation3 + $0x48] sm:$0xff] %vm1444_vm0, %v3062_v7  ;;  %v3003_v21 = vmax.f32 %v3001_v19, %v3002_v37  ;;  %v3123_v17 = vpack.c.bf16 %v3098_v20, %v3097_v46 }
 0x6e3   : > { %v7301_v0 = vpack.c.bf16 %v2987_v58, %v2987_v58  ;;  %v3506_v63 = vmax.f32 %v2987_v58, 0.0  ;;  %v2996_v44 = vmax.f32 %v2994_v45, %v2995_v11  ;;  %v2873_v18 = vpop.f32.mrb[91].mxu0  ;;  %v2879_v51 = vadd.f32 %v7834_v33, %v9578_v2 }
 0x6e4   : > { %3077 = vst.msk [vmem:[#allocation3 + $0x40] sm:$0xff] %vm1444_vm0, %v3061_v6  ;;  %v2871_v61 = vadd.f32 %v9578_v2, %v2870_v52  ;;  %v2882_v40 = vadd.f32 %v7835_v23, %v9578_v2  ;;  %v3005_v25 = vmax.f32 %v3003_v21, %v3004_v42  ;;  %3161 = vrot.lane.b32.xlu1 %v3123_v17, %s8451_s14 }
 0x6e5   : > { %v3488_v3 = vunpack.c.l.b16 %v7301_v0  ;;  %v9725_v8 = vpack.c.bf16 %v3506_v63, %v3506_v63  ;;  %v2997_v62 = vrot.slane %v2996_v44, 2  ;;  %v9729_v45 = vadd.f32 %v2879_v51, %v9500_v34  ;;  %v8324_v34 = vld [vmem:[%s11416_s2 + $0x150] sm:$0xff]  }
 0x6e6   : > { %v9732_v41 = vadd.f32 %v2871_v61, %v9504_v27  ;;  %v9735_v22 = vadd.f32 %v2882_v40, %v9508_v16  ;;  %v2874_v46 = vadd.f32 %v9578_v2, %v2873_v18  ;;  %v3007_v42 = vmax.f32 %v3005_v25, %v3006_v56  ;;  %v8325_v27 = vld [vmem:[%s11416_s2 + $0x110] sm:$0xff]   ;;  %7897 = vmatpush3.bf16.msra.mxu0 %v8324_v34 }
 0x6e7   : > { %v9739_v20 = vsel %vm2234_vm2, %v3488_v3, %v3494_v24  ;;  %v3546_v28 = vunpack.c.l.b16 %v9725_v8  ;;  %v2998_v19 = vmax.f32 %v2996_v44, %v2997_v62  ;;  %v3017_v16 = vsel %vm1444_vm0, %v9729_v45, -inf  ;;  %7848 = vmatprep.subr.bf16.mxu1 %v8325_v27  ;;  %7898 = vmatprep.subr.bf16.mxu0 %v8452_v26 }
 0x6e8   : > { %v3107_v33 = vmax.f32 %v9729_v45, 0.0  ;;  %v3014_v24 = vsel %vm1444_vm0, %v9732_v41, -inf  ;;  %v3105_v58 = vmax.f32 %v9732_v41, 0.0  ;;  %v7838_v11 = vpop.f32.mrb[92].mxu0  ;;  %v3008_v7 = vrot.slane %v3007_v42, 4  ;;  %7849 = vmatpush3.bf16.msra.mxu1 %v8325_v27 }
 0x6e9   : > { %v2999_v56 = vrot.slane %v2998_v19, 1  ;;  %v3019_v52 = vsel %vm1444_vm0, %v9735_v22, -inf  ;;  %v3064_v37 = vpack.c.bf16 %v9735_v22, %v9729_v45  ;;  %v2886_v6 = vpop.f32.mrb[93].mxu0  ;;  %v3108_v23 = vmax.f32 %v9735_v22, 0.0 }
 0x6ea   : > { %v2938_v0 = vadd.f32 %v2874_v46, %v9511_v14  ;;  %v3125_v63 = vpack.c.bf16 %v3102_v60, %v3101_v53  ;;  %v2895_v44 = vadd.f32 %v7838_v11, %v9578_v2  ;;  %v7839_v21 = vpop.f32.mrb[94].mxu0  ;;  %v3009_v17 = vmax.f32 %v3007_v42, %v3008_v7  ;;  %v8326_v7 = vld [vmem:[%s11416_s2 + $0x158] sm:$0xff]  }
 0x6eb   : > { %v3000_v18 = vmax.f32 %v2998_v19, %v2999_v56  ;;  %3080 = vst.msk [vmem:[#allocation3 + $0x58] sm:$0xff] %vm1444_vm0, %v3064_v37  ;;  %v2887_v51 = vadd.f32 %v9578_v2, %v2886_v6  ;;  %v2898_v61 = vadd.f32 %v7839_v21, %v9578_v2  ;;  %v2889_v40 = vpop.f32.mrb[95].mxu0  ;;  %v8327_v37 = vld [vmem:[%s11416_s2 + $0x118] sm:$0xff]   ;;  %7899 = vmatpush3.bf16.msra.mxu0 %v8326_v7 }
 0x6ec   : > { %v3015_v3 = vsel %vm1444_vm0, %v2938_v0, -inf  ;;  %v3063_v14 = vpack.c.bf16 %v2938_v0, %v9732_v41  ;;  %v3106_v53 = vmax.f32 %v2938_v0, 0.0  ;;  %3165 = vrot.lane.b32.xlu1 %v3125_v63, %s8451_s14  ;;  %v9769_v60 = vadd.f32 %v2895_v44, %v9519_v36  ;;  %7850 = vmatprep.subr.bf16.mxu1 %v8327_v37 }
 0x6ed   : > { %v7302_v62 = vpack.c.bf16 %v3000_v18, %v3000_v18  ;;  %v3507_v25 = vmax.f32 %v3000_v18, 0.0  ;;  %v3010_v46 = vrot.slane %v3009_v17, 2  ;;  %v3016_v19 = vmax.f32 %v3014_v24, %v3015_v3  ;;  %7851 = vmatpush3.bf16.msra.mxu1 %v8327_v37  ;;  %7900 = vmatprep.subr.bf16.mxu0 %v8452_v26 }
 0x6ee   : > { %3079 = vst.msk [vmem:[#allocation3 + $0x50] sm:$0xff] %vm1444_vm0, %v3063_v14  ;;  %v9774_v42 = vsel %vm1444_vm0, %v9769_v60, -inf  ;;  %v3111_v34 = vmax.f32 %v9769_v60, 0.0  ;;  %v9778_v41 = vadd.f32 %v2887_v51, %v9523_v29  ;;  %v9781_v27 = vadd.f32 %v2898_v61, %v9527_v1 }
 0x6ef   : > { %v9783_v36 = vunpack.c.l.b16 %v7302_v62  ;;  %v9785_v11 = vpack.c.bf16 %v3507_v25, %v3507_v25  ;;  %v3011_v56 = vmax.f32 %v3009_v17, %v3010_v46  ;;  %v3018_v24 = vmax.f32 %v3016_v19, %v3017_v16 }
 0x6f0   : > { %v3027_v29 = vsel %vm1444_vm0, %v9778_v41, -inf  ;;  %v3109_v1 = vmax.f32 %v9778_v41, 0.0  ;;  %v9798_v6 = vsel %vm1444_vm0, %v9781_v27, -inf  ;;  %v3066_v16 = vpack.c.bf16 %v9781_v27, %v9769_v60  ;;  %v7842_v0 = vpop.f32.mrb[96].mxu0 }
 0x6f1   : > { %v3547_v63 = vunpack.c.l.b16 %v9785_v11  ;;  %v3012_v44 = vrot.slane %v3011_v56, 1  ;;  %v3020_v21 = vmax.f32 %v3018_v24, %v3019_v52  ;;  %v3112_v18 = vmax.f32 %v9781_v27, 0.0  ;;  %v2902_v17 = vpop.f32.mrb[97].mxu0 }
 0x6f2   : > { %3082 = vst.msk [vmem:[#allocation3 + $0x68] sm:$0xff] %vm1444_vm0, %v3066_v16  ;;  %v2890_v51 = vadd.f32 %v9578_v2, %v2889_v40  ;;  %v3127_v61 = vpack.c.bf16 %v3106_v53, %v3105_v58  ;;  %v2911_v3 = vadd.f32 %v7842_v0, %v9578_v2  ;;  %v2903_v14 = vadd.f32 %v9578_v2, %v2902_v17  ;;  %v7843_v62 = vpop.f32.mrb[98].mxu0  ;;  %v8328_v58 = vld [vmem:[%s11416_s2 + $0x160] sm:$0xff]  }
 0x6f3   : > { %v3013_v25 = vmax.f32 %v3011_v56, %v3012_v44  ;;  %v3021_v46 = vrot.slane %v3020_v21, 4  ;;  %v2914_v52 = vadd.f32 %v7843_v62, %v9578_v2  ;;  %v2905_v19 = vpop.f32.mrb[99].mxu0  ;;  %v3552_v24 = vsel %vm2232_vm1, %v3545_v13, %v3544_v55  ;;  %v8329_v40 = vld [vmem:[%s11416_s2 + $0x120] sm:$0xff]   ;;  %v8331_v13 = vld [vmem:[%s11416_s2 + $0x128] sm:$0xff]   ;;  %7901 = vmatpush3.bf16.msra.mxu0 %v8328_v58 }
 0x6f4   : > { %v2942_v53 = vadd.f32 %v2890_v51, %v9530_v59  ;;  %3169 = vrot.lane.b32.xlu1 %v3127_v61, %s8451_s14  ;;  %v9824_v4 = vadd.f32 %v2911_v3, %v9538_v32  ;;  %v2945_v43 = vadd.f32 %v2903_v14, %v9542_v50  ;;  %v2906_v55 = vadd.f32 %v9578_v2, %v2905_v19  ;;  %v8330_v59 = vld [vmem:[%s11416_s2 + $0x168] sm:$0xff]   ;;  %v8333_v51 = vld [vmem:[%s11416_s2 + $0x130] sm:$0xff]  }
 0x6f5   : > { %v7303_v56 = vpack.c.bf16 %v3013_v25, %v3013_v25  ;;  %v3022_v7 = vmax.f32 %v3020_v21, %v3021_v46  ;;  %v2948_v37 = vadd.f32 %v2914_v52, %v9546_v38  ;;  %v3508_v16 = vmax.f32 %v3013_v25, 0.0  ;;  %7852 = vmatprep.subr.bf16.mxu1 %v8329_v40  ;;  %7902 = vmatprep.subr.bf16.mxu0 %v8452_v26  ;;  %v8332_v19 = vld [vmem:[%s11416_s2 + $0x170] sm:$0xff]  }
 0x6f6   : > { %v3028_v32 = vsel %vm1444_vm0, %v2942_v53, -inf  ;;  %v3065_v50 = vpack.c.bf16 %v2942_v53, %v9778_v41  ;;  %v3110_v2 = vmax.f32 %v2942_v53, 0.0  ;;  %v3043_v0 = vsel %vm1444_vm0, %v9824_v4, -inf  ;;  %7853 = vmatpush3.bf16.msra.mxu1 %v8329_v40 }
 0x6f7   : > { %v3490_v44 = vunpack.c.l.b16 %v7303_v56  ;;  %v3023_v38 = vrot.slane %v3022_v7, 2  ;;  %v3029_v21 = vmax.f32 %v3027_v29, %v3028_v32  ;;  %v3115_v17 = vmax.f32 %v9824_v4, 0.0  ;;  %7854 = vmatprep.subr.bf16.mxu1 %v8331_v13  ;;  %7903 = vmatpush3.bf16.msra.mxu0 %v8330_v59 }
 0x6f8   : > { %3081 = vst.msk [vmem:[#allocation3 + $0x60] sm:$0xff] %vm1444_vm0, %v3065_v50  ;;  %v3040_v61 = vsel %vm1444_vm0, %v2945_v43, -inf  ;;  %v3113_v3 = vmax.f32 %v2945_v43, 0.0  ;;  %v3045_v14 = vsel %vm1444_vm0, %v2948_v37, -inf  ;;  %v3068_v62 = vpack.c.bf16 %v2948_v37, %v9824_v4  ;;  %7904 = vmatprep.subr.bf16.mxu0 %v8452_v26 }
 0x6f9   : > { %v3024_v25 = vmax.f32 %v3022_v7, %v3023_v38  ;;  %v3031_v46 = vmax.f32 %v3029_v21, %v9774_v42  ;;  %v3116_v29 = vmax.f32 %v2948_v37, 0.0  ;;  %v2946_v52 = vadd.f32 %v2906_v55, %v9549_v54 }
 0x6fa   : > { %3084 = vst.msk [vmem:[#allocation3 + $0x78] sm:$0xff] %vm1444_vm0, %v3068_v62  ;;  %v3129_v58 = vpack.c.bf16 %v3110_v2, %v3109_v1  ;;  %v7311_v40 = vpack.c.bf16 %v3508_v16, %v3508_v16  ;;  %v3553_v53 = vsel %vm2234_vm2, %v3546_v28, %v3552_v24  ;;  %v9863_v54 = vpack.c.bf16 %v3100_v5, %v3099_v15 }
 0x6fb   : > { %7855 = vmatpush3.bf16.msra.mxu1 %v8331_v13  ;;  %v3025_v42 = vrot.slane %v3024_v25, 1  ;;  %v3033_v4 = vmax.f32 %v3031_v46, %v9798_v6  ;;  %v3041_v55 = vsel %vm1444_vm0, %v2946_v52, -inf  ;;  %v3067_v56 = vpack.c.bf16 %v2946_v52, %v2945_v43  ;;  %7905 = vmatpush3.bf16.msra.mxu0 %v8332_v19 }
 0x6fc   : > { %7856 = vmatprep.subr.bf16.mxu1 %v8333_v51  ;;  %v3042_v41 = vmax.f32 %v3040_v61, %v3041_v55  ;;  %v3114_v8 = vmax.f32 %v2946_v52, 0.0  ;;  %3173 = vrot.lane.b32.xlu1 %v3129_v58, %s8451_s14  ;;  %v3548_v28 = vunpack.c.l.b16 %v7311_v40  ;;  %v3554_v10 = vsel %vm2236_vm4, %v3547_v63, %v3553_v53 }
 0x6fd   : > { %v3026_v15 = vmax.f32 %v3024_v25, %v3025_v42  ;;  %v3034_v48 = vrot.slane %v3033_v4, 4  ;;  %3083 = vst.msk [vmem:[#allocation3 + $0x70] sm:$0xff] %vm1444_vm0, %v3067_v56  ;;  %v3126_v5 = vpack.c.bf16 %v3104_v57, %v3103_v35  ;;  %v3128_v1 = vpack.c.bf16 %v3108_v23, %v3107_v33  ;;  %7906 = vmatprep.subr.bf16.mxu0 %v8452_v26 }
 0x6fe   : > { %v3044_v6 = vmax.f32 %v3042_v41, %v3043_v0  ;;  %v3131_v24 = vpack.c.bf16 %v3114_v8, %v3113_v3  ;;  %v3555_v11 = vsel %vm2238_vm5, %v3548_v28, %v3554_v10  ;;  %v3130_v63 = vpack.c.bf16 %v3112_v18, %v3111_v34 }
 0x6ff   : > { %7857 = vmatpush3.bf16.msra.mxu1 %v8333_v51  ;;  %v7304_v30 = vpack.c.bf16 %v3026_v15, %v3026_v15  ;;  %v3035_v43 = vmax.f32 %v3033_v4, %v3034_v48  ;;  %v3509_v47 = vmax.f32 %v3026_v15, 0.0  ;;  %v3132_v35 = vpack.c.bf16 %v3116_v29, %v3115_v17 }
 0x700   : > { %v3046_v57 = vmax.f32 %v3044_v6, %v3045_v14  ;;  %3177 = vrot.lane.b32.xlu1 %v3131_v24, %s8451_s14  ;;  %v3496_v45 = vsel %vm2236_vm4, %v9783_v36, %v9739_v20  ;;  %v8334_v36 = vld [vmem:[%s11416_s2 + $0x178] sm:$0xff]  }
 0x701   : > { %v3491_v22 = vunpack.c.l.b16 %v7304_v30  ;;  %v3036_v33 = vrot.slane %v3035_v43, 2  ;;  %v7312_v23 = vpack.c.bf16 %v3509_v47, %v3509_v47  ;;  %v3497_v60 = vsel %vm2238_vm5, %v3490_v44, %v3496_v45  ;;  %v8335_v44 = vld [vmem:[%s11416_s2 + $0x138] sm:$0xff]   ;;  %7907 = vmatpush3.bf16.msra.mxu0 %v8334_v36 }
 0x702   : > { %v3047_v34 = vrot.slane %v3046_v57, 4  ;;  %7858 = vmatprep.subr.bf16.mxu1 %v8335_v44 }
 0x703   : > { %v3037_v27 = vmax.f32 %v3035_v43, %v3036_v33  ;;  %v3549_v18 = vunpack.c.l.b16 %v7312_v23  ;;  %v3498_v13 = vsel %vm2240_vm6, %v3491_v22, %v3497_v60  ;;  %7859 = vmatpush3.bf16.msra.mxu1 %v8335_v44 }
 0x704   : > { %v3048_v7 = vmax.f32 %v3046_v57, %v3047_v34 }
 0x705   : > { %v3038_v37 = vrot.slane %v3037_v27, 1  ;;  %v3556_v16 = vsel %vm2240_vm6, %v3549_v18, %v3555_v11 }
 0x706   : > { %v3049_v59 = vrot.slane %v3048_v7, 2 }
 0x707   : > { %v3039_v32 = vmax.f32 %v3037_v27, %v3038_v37  ;;  %v8338_v37 = vld [vmem:[%s11417_s3 + $0x50] sm:$0xff]  }
 0x708   : > { %v3050_v50 = vmax.f32 %v3048_v7, %v3049_v59  ;;  %v8337_v7 = vld [vmem:[%s11417_s3 + $0x48] sm:$0xff]  }
 0x709   : > { %v7305_v2 = vpack.c.bf16 %v3039_v32, %v3039_v32  ;;  %v3510_v0 = vmax.f32 %v3039_v32, 0.0 }
 0x70a   : > { %v3051_v20 = vrot.slane %v3050_v50, 1 }
 0x70b   : > { %v3492_v38 = vunpack.c.l.b16 %v7305_v2  ;;  %v7313_v21 = vpack.c.bf16 %v3510_v0, %v3510_v0 }
 0x70c   : > { %v3052_v17 = vmax.f32 %v3050_v50, %v3051_v20 }
 0x70d   : > { %v3550_v51 = vunpack.c.l.b16 %v7313_v21  ;;  %v3499_v61 = vsel %vm2242_vm7, %v3492_v38, %v3498_v13  ;;  %v8336_v13 = vld [vmem:[%s11417_s3 + $0x40] sm:$0xff]  }
 0x70e   : > { %v7306_v3 = vpack.c.bf16 %v3052_v17, %v3052_v17  ;;  %v3511_v14 = vmax.f32 %v3052_v17, 0.0  ;;  %7912 = vmatprep.subr.bf16.mxu0 %v8336_v13 }
 0x70f   : > { %v3557_v62 = vsel %vm2242_vm7, %v3550_v51, %v3556_v16  ;;  %v8339_v16 = vld [vmem:[%s11417_s3 + $0x58] sm:$0xff]  }
 0x710   : > { %v3493_v25 = vunpack.c.l.b16 %v7306_v3  ;;  %v7314_v46 = vpack.c.bf16 %v3511_v14, %v3511_v14 }
 0x712   : > { %v3551_v29 = vunpack.c.l.b16 %v7314_v46  ;;  %v3500_v52 = vsel %vm2244_vm8, %v3493_v25, %v3499_v61  ;;  %v9958_v61 = vld [vmem:[%s11415_s1 + $0x8] ss:$0 sm:$0xff] }
 0x713   : > { %v3501_v19 = vpack.c.b16 %v3500_v52, %v3500_v52 }
 0x714   : > { %v3558_v58 = vsel %vm2244_vm8, %v3551_v29, %v3557_v62 }
 0x715   : > { %v3559_v40 = vpack.c.b16 %v3558_v58, %v3558_v58  ;;  %3503 = vst.msk [vmem:[#allocation4] sm:$0xf] %vm2248_vm10, %v3501_v19 }
 0x717   : > { %3560 = vrot.lane.b32.xlu0 %v3559_v40, %s8451_s14 }
 0x71b   : > { %3151 = vrot.lane.b32.xlu0 %v9592_v39, %s8451_s14 }
 0x71f   : > { %3155 = vrot.lane.b32.xlu0 %v9609_v9, %s8451_s14 }
 0x723   : > { %3159 = vrot.lane.b32.xlu0 %v9629_v12, %s8451_s14 }
 0x727   : > { %3163 = vrot.lane.b32.xlu0 %v9863_v54, %s8451_s14 }
 0x72b   : > { %3167 = vrot.lane.b32.xlu0 %v3126_v5, %s8451_s14 }
 0x72f   : > { %3171 = vrot.lane.b32.xlu0 %v3128_v1, %s8451_s14 }
 0x733   : > { %3175 = vrot.lane.b32.xlu0 %v3130_v63, %s8451_s14 }
 0x736   : > { %v3150_v53 = vpop.permute.xlu1 %3149 }
 0x737   : > { %3179 = vrot.lane.b32.xlu0 %v3132_v35, %s8451_s14  ;;  %3197 = vst.msk [vmem:[#allocation3] sm:$0xff] %vm1934_vm3, %v3150_v53 }
 0x73e   : > { %v3154_v39 = vpop.permute.xlu1 %3153  ;;  %v3213_v42 = vld [vmem:[#allocation3] sm:$0xff] }
 0x73f   : > { %3199 = vst.msk [vmem:[#allocation3 + $0x10] sm:$0xff] %vm1934_vm3, %v3154_v39  ;;  %7860 = vmatprep.mubr.bf16.mxu1 %v3213_v42 }
 0x746   : > { %v3215_v5 = vld [vmem:[#allocation3 + $0x10] sm:$0xff] }
 0x74c   : > { %v3158_v9 = vpop.permute.xlu1 %3157 }
 0x74d   : > { %3201 = vst.msk [vmem:[#allocation3 + $0x20] sm:$0xff] %vm1934_vm3, %v3158_v9 }
 0x754   : > { %v3217_v11 = vld [vmem:[#allocation3 + $0x20] sm:$0xff] }
 0x756   : > { %v3162_v12 = vpop.permute.xlu1 %3161 }
 0x757   : > { %3203 = vst.msk [vmem:[#allocation3 + $0x30] sm:$0xff] %vm1934_vm3, %v3162_v12 }
 0x75e   : > { %v3166_v54 = vpop.permute.xlu1 %3165  ;;  %v3219_v47 = vld [vmem:[#allocation3 + $0x30] sm:$0xff] }
 0x75f   : > { %3205 = vst.msk [vmem:[#allocation3 + $0x40] sm:$0xff] %vm1934_vm3, %v3166_v54 }
 0x766   : > { %v3170_v4 = vpop.permute.xlu1 %3169  ;;  %v3221_v45 = vld [vmem:[#allocation3 + $0x40] sm:$0xff] }
 0x767   : > { %3207 = vst.msk [vmem:[#allocation3 + $0x50] sm:$0xff] %vm1934_vm3, %v3170_v4 }
 0x76e   : > { %v3174_v55 = vpop.permute.xlu1 %3173  ;;  %v3223_v33 = vld [vmem:[#allocation3 + $0x50] sm:$0xff] }
 0x76f   : > { %3209 = vst.msk [vmem:[#allocation3 + $0x60] sm:$0xff] %vm1934_vm3, %v3174_v55 }
 0x772   : > { %v3178_v56 = vpop.permute.xlu1 %3177 }
 0x773   : > { %3211 = vst.msk [vmem:[#allocation3 + $0x70] sm:$0xff] %vm1934_vm3, %v3178_v56 }
 0x776   : > { %v3225_v60 = vld [vmem:[#allocation3 + $0x60] sm:$0xff] }
 0x77a   : > { %v3227_v27 = vld [vmem:[#allocation3 + $0x70] sm:$0xff] }
 0x789   : > { %v3561_v41 = vpop.permute.xlu0 %3560 }
 0x78a   : > { %3563 = vst.msk [vmem:[#allocation4] sm:$0xf] %vm2309_vm11, %v3561_v41 }
 0x78d   : > { %v3152_v8 = vpop.permute.xlu0 %3151 }
 0x78e   : > { %3198 = vst.msk [vmem:[#allocation3 + $0x8] sm:$0xff] %vm1934_vm3, %v3152_v8 }
 0x791   : > { %v3156_v28 = vpop.permute.xlu0 %3155  ;;  %v3564_v10 = vld [vmem:[#allocation4] sm:$0xf] }
 0x792   : > { %3200 = vst.msk [vmem:[#allocation3 + $0x18] sm:$0xff] %vm1934_vm3, %v3156_v28  ;;  %7909 = vmatmul.mubr.bf16.vlgmr.msra.gmra.mrb[100].mxu0 %v3564_v10 }
 0x793   : > { %7913 = vmatpush3.bf16.msra.mxu0 %v8336_v13 }
 0x794   : > { %7914 = vmatprep.subr.bf16.mxu0 %v8337_v7 }
 0x795   : > { %v3160_v15 = vpop.permute.xlu0 %3159  ;;  %v3214_v48 = vld [vmem:[#allocation3 + $0x8] sm:$0xff] }
 0x796   : > { %3202 = vst.msk [vmem:[#allocation3 + $0x28] sm:$0xff] %vm1934_vm3, %v3160_v15  ;;  %7861 = vmatmul.mubr.bf16.vlgmr.msra.gmra.mrb[64].mxu1 %v3214_v48 }
 0x797   : > { %7864 = vmatprep.mubr.bf16.mxu1 %v3215_v5  ;;  %7915 = vmatpush3.bf16.msra.mxu0 %v8337_v7 }
 0x798   : > { %7916 = vmatprep.subr.bf16.mxu0 %v8338_v37 }
 0x799   : > { %v3164_v1 = vpop.permute.xlu0 %3163  ;;  %v3216_v24 = vld [vmem:[#allocation3 + $0x18] sm:$0xff] }
 0x79a   : > { %3204 = vst.msk [vmem:[#allocation3 + $0x38] sm:$0xff] %vm1934_vm3, %v3164_v1 }
 0x79b   : > { %7917 = vmatpush3.bf16.msra.mxu0 %v8338_v37 }
 0x79c   : > { %7918 = vmatprep.subr.bf16.mxu0 %v8339_v16 }
 0x79d   : > { %v3168_v6 = vpop.permute.xlu0 %3167  ;;  %v3218_v43 = vld [vmem:[#allocation3 + $0x28] sm:$0xff] }
 0x79e   : > { %3206 = vst.msk [vmem:[#allocation3 + $0x48] sm:$0xff] %vm1934_vm3, %v3168_v6  ;;  %7865 = vmatmul.mubr.bf16.gmra.mrb[68].mxu1 %v3216_v24 }
 0x79f   : > { %7868 = vmatprep.mubr.bf16.mxu1 %v3217_v11  ;;  %7919 = vmatpush3.bf16.msra.mxu0 %v8339_v16 }
 0x7a0   : > { %8000 = vmatprep.subr.bf16.mxu0 %v8452_v26 }
 0x7a1   : > { %v3172_v63 = vpop.permute.xlu0 %3171  ;;  %v3220_v57 = vld [vmem:[#allocation3 + $0x38] sm:$0xff] }
 0x7a2   : > { %3208 = vst.msk [vmem:[#allocation3 + $0x58] sm:$0xff] %vm1934_vm3, %v3172_v63 }
 0x7a5   : > { %v3176_v30 = vpop.permute.xlu0 %3175  ;;  %v3222_v22 = vld [vmem:[#allocation3 + $0x48] sm:$0xff] }
 0x7a6   : > { %3210 = vst.msk [vmem:[#allocation3 + $0x68] sm:$0xff] %vm1934_vm3, %v3176_v30  ;;  %7869 = vmatmul.mubr.bf16.gmra.mrb[72].mxu1 %v3218_v43 }
 0x7a7   : > { %7872 = vmatprep.mubr.bf16.mxu1 %v3219_v47 }
 0x7a9   : > { %v3180_v35 = vpop.permute.xlu0 %3179  ;;  %v3224_v23 = vld [vmem:[#allocation3 + $0x58] sm:$0xff] }
 0x7aa   : > { %3212 = vst.msk [vmem:[#allocation3 + $0x78] sm:$0xff] %vm1934_vm3, %v3180_v35 }
 0x7ad   : > { %v3226_v34 = vld [vmem:[#allocation3 + $0x68] sm:$0xff] }
 0x7ae   : > { %7873 = vmatmul.mubr.bf16.gmra.mrb[76].mxu1 %v3220_v57 }
 0x7af   : > { %7876 = vmatprep.mubr.bf16.mxu1 %v3221_v45 }
 0x7b1   : > { %v3228_v18 = vld [vmem:[#allocation3 + $0x78] sm:$0xff] }
 0x7b6   : > { %7877 = vmatmul.mubr.bf16.gmra.mrb[80].mxu1 %v3222_v22 }
 0x7b7   : > { %7880 = vmatprep.mubr.bf16.mxu1 %v3223_v33 }
 0x7be   : > { %7881 = vmatmul.mubr.bf16.gmra.mrb[84].mxu1 %v3224_v23 }
 0x7bf   : > { %7884 = vmatprep.mubr.bf16.mxu1 %v3225_v60 }
 0x7c6   : > { %7885 = vmatmul.mubr.bf16.gmra.mrb[88].mxu1 %v3226_v34 }
 0x7c7   : > { %7888 = vmatprep.mubr.bf16.mxu1 %v3227_v27 }
 0x7ce   : > { %7889 = vmatmul.mubr.bf16.gmra.mrb[92].mxu1 %v3228_v18 }
 0x865   : > { %v9948_v59 = vpop.f32.mrb[100].mxu0 }
 0x866   : > { %v3677_v32 = vrot.slane %v9948_v59, %v9385_v31  ;;  %v7910_v50 = vpop.f32.mrb[101].mxu0  ;;  %v3670_v34 = vcombine.high %v9948_v59, %v9948_v59 }
 0x867   : > { %v3666_v2 = vpop.f32.mrb[102].mxu0 }
 0x868   : > { %v3685_v0 = vcombine.high %v3677_v32, %v3677_v32  ;;  %v3693_v20 = vrot.slane %v3677_v32, %v9385_v31  ;;  %v7911_v36 = vpop.f32.mrb[103].mxu0  ;;  %v3684_v59 = vrot.slane %v3670_v34, %v9385_v31 }
 0x869   : > { %v7862_v44 = vpop.f32.mrb[64].mxu1 }
 0x86a   : > { %v3327_v38 = vpop.f32.mrb[65].mxu1  ;;  %v3722_v21 = vrot.slane %v3693_v20, %v9391_v49  ;;  %v3707_v51 = vrot.slane %v3685_v0, %v9385_v31  ;;  %v3715_v55 = vcombine.high %v3693_v20, %v3693_v20 }
 0x86b   : > { %v7863_v17 = vpop.f32.mrb[66].mxu1 }
 0x86c   : > { %v3330_v3 = vpop.f32.mrb[67].mxu1  ;;  %v3761_v14 = vadd.f32 %v7862_v44, %v3722_v21  ;;  %v3759_v62 = vadd.f32 %v3722_v21, %v3327_v38  ;;  %v3762_v25 = vadd.f32 %v7863_v17, %v3722_v21  ;;  %v3726_v19 = vrot.slane %v3707_v51, %v9391_v49 }
 0x86d   : > { %v3760_v46 = vadd.f32 %v3722_v21, %v3330_v3  ;;  %v3730_v11 = vrot.slane %v3715_v55, %v9391_v49  ;;  %v3717_v27 = vcombine.high %v3707_v51, %v3707_v51 }
 0x86e   : > { %v9961_v29 = vadd.f32 %v9958_v61, %v3761_v14  ;;  %v9964_v52 = vadd.f32 %v9958_v61, %v3759_v62  ;;  %v9968_v58 = vadd.f32 %v9958_v61, %v3762_v25  ;;  %v3700_v25 = vrot.slane %v3684_v59, %v9385_v31 }
 0x86f   : > { %v9971_v40 = vadd.f32 %v9958_v61, %v3760_v46  ;;  %v3734_v20 = vrot.slane %v3717_v27, %v9391_v49 }
 0x870   : > { %v3830_v53 = vmax.f32 %v9961_v29, 0.0  ;;  %v3828_v39 = vmax.f32 %v9964_v52, 0.0  ;;  %v3831_v9 = vmax.f32 %v9968_v58, 0.0 }
 0x871   : > { %v7866_v42 = vpop.f32.mrb[68].mxu1  ;;  %v3829_v12 = vmax.f32 %v9971_v40, 0.0 }
 0x872   : > { %v3765_v54 = vadd.f32 %v7866_v42, %v3726_v19  ;;  %v3343_v4 = vpop.f32.mrb[69].mxu1  ;;  %v3861_v8 = vpack.c.bf16 %v3831_v9, %v3830_v53 }
 0x873   : > { %v3763_v56 = vadd.f32 %v3726_v19, %v3343_v4  ;;  %v7867_v41 = vpop.f32.mrb[70].mxu1  ;;  %v3860_v28 = vpack.c.bf16 %v3829_v12, %v3828_v39  ;;  %v3738_v4 = vrot.slane %v3700_v25, %v9391_v49 }
 0x874   : > { %v9978_v10 = vadd.f32 %v9958_v61, %v3765_v54  ;;  %v3766_v15 = vadd.f32 %v7867_v41, %v3726_v19  ;;  %v3346_v48 = vpop.f32.mrb[71].mxu1  ;;  %3907 = vrot.lane.b32.xlu0 %v3861_v8, %s8451_s14  ;;  %v3686_v54 = vcombine.high %v3684_v59, %v3684_v59 }
 0x875   : > { %v9981_v5 = vadd.f32 %v9958_v61, %v3763_v56  ;;  %v3764_v1 = vadd.f32 %v3726_v19, %v3346_v48  ;;  %3905 = vrot.lane.b32.xlu1 %v3860_v28, %s8451_s14 }
 0x876   : > { %v9984_v6 = vadd.f32 %v9958_v61, %v3766_v15  ;;  %v3834_v63 = vmax.f32 %v9978_v10, 0.0 }
 0x877   : > { %v9989_v24 = vadd.f32 %v9958_v61, %v3764_v1  ;;  %v3832_v43 = vmax.f32 %v9981_v5, 0.0 }
 0x878   : > { %v3835_v30 = vmax.f32 %v9984_v6, 0.0 }
 0x879   : > { %v3833_v47 = vmax.f32 %v9989_v24, 0.0  ;;  %v7870_v35 = vpop.f32.mrb[72].mxu1 }
 0x87a   : > { %v3863_v57 = vpack.c.bf16 %v3835_v30, %v3834_v63  ;;  %v3769_v45 = vadd.f32 %v7870_v35, %v3730_v11  ;;  %v3359_v22 = vpop.f32.mrb[73].mxu1 }
 0x87b   : > { %v3862_v33 = vpack.c.bf16 %v3833_v47, %v3832_v43  ;;  %v3767_v23 = vadd.f32 %v3730_v11, %v3359_v22  ;;  %v7871_v60 = vpop.f32.mrb[74].mxu1  ;;  %v3714_v43 = vrot.slane %v3686_v54, %v9385_v31 }
 0x87c   : > { %v9999_v18 = vadd.f32 %v9958_v61, %v3769_v45  ;;  %v3770_v13 = vadd.f32 %v7871_v60, %v3730_v11  ;;  %v3362_v7 = vpop.f32.mrb[75].mxu1  ;;  %3911 = vrot.lane.b32.xlu0 %v3863_v57, %s8451_s14 }
 0x87d   : > { %v10003_v37 = vadd.f32 %v9958_v61, %v3767_v23  ;;  %v3768_v16 = vadd.f32 %v3730_v11, %v3362_v7  ;;  %3909 = vrot.lane.b32.xlu1 %v3862_v33, %s8451_s14  ;;  %v3742_v27 = vrot.slane %v3714_v43, %v9391_v49 }
 0x87e   : > { %v10007_v32 = vadd.f32 %v9958_v61, %v3770_v13  ;;  %v3838_v2 = vmax.f32 %v9999_v18, 0.0 }
 0x87f   : > { %v10010_v50 = vadd.f32 %v9958_v61, %v3768_v16  ;;  %v3836_v36 = vmax.f32 %v10003_v37, 0.0 }
 0x880   : > { %v3839_v0 = vmax.f32 %v10007_v32, 0.0 }
 0x881   : > { %v3837_v44 = vmax.f32 %v10010_v50, 0.0  ;;  %v7874_v38 = vpop.f32.mrb[76].mxu1 }
 0x882   : > { %v3865_v21 = vpack.c.bf16 %v3839_v0, %v3838_v2  ;;  %v3773_v17 = vadd.f32 %v7874_v38, %v3734_v20  ;;  %v3375_v51 = vpop.f32.mrb[77].mxu1  ;;  %v3716_v38 = vcombine.high %v3700_v25, %v3700_v25 }
 0x883   : > { %v3864_v3 = vpack.c.bf16 %v3837_v44, %v3836_v36  ;;  %v3771_v14 = vadd.f32 %v3734_v20, %v3375_v51  ;;  %v7875_v62 = vpop.f32.mrb[78].mxu1 }
 0x884   : > { %v10020_v46 = vadd.f32 %v9958_v61, %v3773_v17  ;;  %v3774_v19 = vadd.f32 %v7875_v62, %v3734_v20  ;;  %v3378_v53 = vpop.f32.mrb[79].mxu1  ;;  %3915 = vrot.lane.b32.xlu0 %v3865_v21, %s8451_s14 }
 0x885   : > { %v10024_v39 = vadd.f32 %v9958_v61, %v3771_v14  ;;  %v3772_v42 = vadd.f32 %v3734_v20, %v3378_v53  ;;  %3913 = vrot.lane.b32.xlu1 %v3864_v3, %s8451_s14 }
 0x886   : > { %v10028_v9 = vadd.f32 %v9958_v61, %v3774_v19  ;;  %v3842_v55 = vmax.f32 %v10020_v46, 0.0 }
 0x887   : > { %v10031_v12 = vadd.f32 %v9958_v61, %v3772_v42  ;;  %v3840_v41 = vmax.f32 %v10024_v39, 0.0  ;;  %v3746_v42 = vrot.slane %v3716_v38, %v9391_v49 }
 0x888   : > { %v3843_v56 = vmax.f32 %v10028_v9, 0.0 }
 0x889   : > { %v3841_v8 = vmax.f32 %v10031_v12, 0.0  ;;  %v7878_v28 = vpop.f32.mrb[80].mxu1 }
 0x88a   : > { %v3867_v15 = vpack.c.bf16 %v3843_v56, %v3842_v55  ;;  %v3777_v48 = vadd.f32 %v7878_v28, %v3738_v4  ;;  %v3391_v1 = vpop.f32.mrb[81].mxu1 }
 0x88b   : > { %v3866_v11 = vpack.c.bf16 %v3841_v8, %v3840_v41  ;;  %v3775_v63 = vadd.f32 %v3738_v4, %v3391_v1  ;;  %v7879_v30 = vpop.f32.mrb[82].mxu1  ;;  %v3718_v1 = vcombine.high %v3714_v43, %v3714_v43 }
 0x88c   : > { %v10040_v47 = vadd.f32 %v9958_v61, %v3777_v48  ;;  %v3778_v35 = vadd.f32 %v7879_v30, %v3738_v4  ;;  %v3394_v57 = vpop.f32.mrb[83].mxu1  ;;  %3919 = vrot.lane.b32.xlu0 %v3867_v15, %s8451_s14 }
 0x88d   : > { %v10044_v45 = vadd.f32 %v9958_v61, %v3775_v63  ;;  %v3776_v22 = vadd.f32 %v3738_v4, %v3394_v57  ;;  %3917 = vrot.lane.b32.xlu1 %v3866_v11, %s8451_s14 }
 0x88e   : > { %v10048_v33 = vadd.f32 %v9958_v61, %v3778_v35  ;;  %v3846_v60 = vmax.f32 %v10040_v47, 0.0 }
 0x88f   : > { %v10051_v23 = vadd.f32 %v9958_v61, %v3776_v22  ;;  %v3844_v13 = vmax.f32 %v10044_v45, 0.0 }
 0x890   : > { %v3847_v34 = vmax.f32 %v10048_v33, 0.0 }
 0x891   : > { %v3845_v7 = vmax.f32 %v10051_v23, 0.0  ;;  %v7882_v16 = vpop.f32.mrb[84].mxu1 }
 0x892   : > { %v3869_v59 = vpack.c.bf16 %v3847_v34, %v3846_v60  ;;  %v3781_v2 = vadd.f32 %v7882_v16, %v3742_v27  ;;  %v3407_v0 = vpop.f32.mrb[85].mxu1 }
 0x893   : > { %v3868_v20 = vpack.c.bf16 %v3845_v7, %v3844_v13  ;;  %v3779_v36 = vadd.f32 %v3742_v27, %v3407_v0  ;;  %v7883_v44 = vpop.f32.mrb[86].mxu1 }
 0x894   : > { %v10059_v21 = vadd.f32 %v9958_v61, %v3781_v2  ;;  %v3782_v17 = vadd.f32 %v7883_v44, %v3742_v27  ;;  %v3410_v51 = vpop.f32.mrb[87].mxu1  ;;  %3923 = vrot.lane.b32.xlu0 %v3869_v59, %s8451_s14 }
 0x895   : > { %v10063_v3 = vadd.f32 %v9958_v61, %v3779_v36  ;;  %v3780_v14 = vadd.f32 %v3742_v27, %v3410_v51  ;;  %3921 = vrot.lane.b32.xlu1 %v3868_v20, %s8451_s14  ;;  %v3750_v27 = vrot.slane %v3718_v1, %v9391_v49 }
 0x896   : > { %v10067_v62 = vadd.f32 %v9958_v61, %v3782_v17  ;;  %v3850_v25 = vmax.f32 %v10059_v21, 0.0 }
 0x897   : > { %v10070_v19 = vadd.f32 %v9958_v61, %v3780_v14  ;;  %v3848_v54 = vmax.f32 %v10063_v3, 0.0 }
 0x898   : > { %v3851_v53 = vmax.f32 %v10067_v62, 0.0 }
 0x899   : > { %v3849_v4 = vmax.f32 %v10070_v19, 0.0  ;;  %v7886_v55 = vpop.f32.mrb[88].mxu1 }
 0x89a   : > { %v3871_v56 = vpack.c.bf16 %v3851_v53, %v3850_v25  ;;  %v3785_v41 = vadd.f32 %v7886_v55, %v3746_v42  ;;  %v3423_v8 = vpop.f32.mrb[89].mxu1 }
 0x89b   : > { %v3870_v28 = vpack.c.bf16 %v3849_v4, %v3848_v54  ;;  %v3783_v15 = vadd.f32 %v3746_v42, %v3423_v8  ;;  %v7887_v48 = vpop.f32.mrb[90].mxu1 }
 0x89c   : > { %v10078_v11 = vadd.f32 %v9958_v61, %v3785_v41  ;;  %v3786_v63 = vadd.f32 %v7887_v48, %v3746_v42  ;;  %v3426_v30 = vpop.f32.mrb[91].mxu1  ;;  %3927 = vrot.lane.b32.xlu0 %v3871_v56, %s8451_s14 }
 0x89d   : > { %v10082_v35 = vadd.f32 %v9958_v61, %v3783_v15  ;;  %v3784_v57 = vadd.f32 %v3746_v42, %v3426_v30  ;;  %3925 = vrot.lane.b32.xlu1 %v3870_v28, %s8451_s14 }
 0x89e   : > { %v10086_v22 = vadd.f32 %v9958_v61, %v3786_v63  ;;  %v3854_v43 = vmax.f32 %v10078_v11, 0.0 }
 0x89f   : > { %v10089_v60 = vadd.f32 %v9958_v61, %v3784_v57  ;;  %v3852_v13 = vmax.f32 %v10082_v35, 0.0 }
 0x8a0   : > { %v3855_v34 = vmax.f32 %v10086_v22, 0.0 }
 0x8a1   : > { %v3853_v7 = vmax.f32 %v10089_v60, 0.0  ;;  %v7890_v16 = vpop.f32.mrb[92].mxu1 }
 0x8a2   : > { %v3873_v59 = vpack.c.bf16 %v3855_v34, %v3854_v43  ;;  %v3789_v2 = vadd.f32 %v7890_v16, %v3750_v27  ;;  %v3439_v0 = vpop.f32.mrb[93].mxu1 }
 0x8a3   : > { %v3872_v20 = vpack.c.bf16 %v3853_v7, %v3852_v13  ;;  %v3787_v36 = vadd.f32 %v3750_v27, %v3439_v0  ;;  %v7891_v44 = vpop.f32.mrb[94].mxu1  ;;  %v10137_v0 = vld [vmem:[%s11415_s1 + $0x9] ss:$0 sm:$0xff] }
 0x8a4   : > { %v10097_v38 = vadd.f32 %v9958_v61, %v3789_v2  ;;  %v3790_v17 = vadd.f32 %v7891_v44, %v3750_v27  ;;  %v3442_v51 = vpop.f32.mrb[95].mxu1  ;;  %3931 = vrot.lane.b32.xlu0 %v3873_v59, %s8451_s14 }
 0x8a5   : > { %v10101_v14 = vadd.f32 %v9958_v61, %v3787_v36  ;;  %v3788_v25 = vadd.f32 %v3750_v27, %v3442_v51  ;;  %3929 = vrot.lane.b32.xlu1 %v3872_v20, %s8451_s14 }
 0x8a6   : > { %v10105_v53 = vadd.f32 %v9958_v61, %v3790_v17  ;;  %v3858_v54 = vmax.f32 %v10097_v38, 0.0 }
 0x8a7   : > { %v10108_v42 = vadd.f32 %v9958_v61, %v3788_v25  ;;  %v3856_v55 = vmax.f32 %v10101_v14, 0.0 }
 0x8a8   : > { %v3859_v4 = vmax.f32 %v10105_v53, 0.0 }
 0x8a9   : > { %v3857_v56 = vmax.f32 %v10108_v42, 0.0 }
 0x8aa   : > { %v3875_v41 = vpack.c.bf16 %v3859_v4, %v3858_v54 }
 0x8ab   : > { %v3874_v8 = vpack.c.bf16 %v3857_v56, %v3856_v55 }
 0x8ac   : > { %3935 = vrot.lane.b32.xlu0 %v3875_v41, %s8451_s14 }
 0x8ad   : > { %3933 = vrot.lane.b32.xlu1 %v3874_v8, %s8451_s14 }
 0x8e6   : > { %v3908_v15 = vpop.permute.xlu0 %3907 }
 0x8e7   : > { %v3906_v28 = vpop.permute.xlu1 %3905 }
 0x8e8   : > { %7920 = vmatprep.mubr.msk.bf16.mxu0 %vm1444_vm0, %v3906_v28 }
 0x8e9   : > { %7921 = vmatmul.mubr.msk.bf16.vlgmr.msra.gmra.mrb[104].mxu0 %vm1444_vm0, %v3908_v15 }
 0x8ee   : > { %v3912_v48 = vpop.permute.xlu0 %3911 }
 0x8ef   : > { %v3910_v61 = vpop.permute.xlu1 %3909 }
 0x8f0   : > { %7924 = vmatprep.mubr.msk.bf16.mxu0 %vm1444_vm0, %v3910_v61 }
 0x8f1   : > { %7925 = vmatmul.mubr.msk.bf16.gmra.mrb[108].mxu0 %vm1444_vm0, %v3912_v48 }
 0x8f6   : > { %v3916_v63 = vpop.permute.xlu0 %3915 }
 0x8f7   : > { %v3914_v1 = vpop.permute.xlu1 %3913 }
 0x8f8   : > { %7928 = vmatprep.mubr.msk.bf16.mxu0 %vm1444_vm0, %v3914_v1 }
 0x8f9   : > { %7929 = vmatmul.mubr.msk.bf16.gmra.mrb[112].mxu0 %vm1444_vm0, %v3916_v63 }
 0x8fe   : > { %v3920_v57 = vpop.permute.xlu0 %3919 }
 0x8ff   : > { %v3918_v30 = vpop.permute.xlu1 %3917 }
 0x900   : > { %7932 = vmatprep.mubr.msk.bf16.mxu0 %vm1444_vm0, %v3918_v30 }
 0x901   : > { %7933 = vmatmul.mubr.msk.bf16.gmra.mrb[116].mxu0 %vm1444_vm0, %v3920_v57 }
 0x906   : > { %v3924_v34 = vpop.permute.xlu0 %3923 }
 0x907   : > { %v3922_v43 = vpop.permute.xlu1 %3921 }
 0x908   : > { %7936 = vmatprep.mubr.msk.bf16.mxu0 %vm1444_vm0, %v3922_v43 }
 0x909   : > { %7937 = vmatmul.mubr.msk.bf16.gmra.mrb[120].mxu0 %vm1444_vm0, %v3924_v34 }
 0x90e   : > { %v3928_v13 = vpop.permute.xlu0 %3927 }
 0x90f   : > { %v3926_v27 = vpop.permute.xlu1 %3925 }
 0x910   : > { %7940 = vmatprep.mubr.msk.bf16.mxu0 %vm1444_vm0, %v3926_v27 }
 0x911   : > { %7941 = vmatmul.mubr.msk.bf16.gmra.mrb[124].mxu0 %vm1444_vm0, %v3928_v13 }
 0x916   : > { %v3932_v16 = vpop.permute.xlu0 %3931 }
 0x917   : > { %v3930_v7 = vpop.permute.xlu1 %3929 }
 0x918   : > { %7944 = vmatprep.mubr.msk.bf16.mxu0 %vm1444_vm0, %v3930_v7 }
 0x919   : > { %7945 = vmatmul.mubr.msk.bf16.gmra.mrb[128].mxu0 %vm1444_vm0, %v3932_v16 }
 0x91e   : > { %v3936_v2 = vpop.permute.xlu0 %3935 }
 0x91f   : > { %v3934_v59 = vpop.permute.xlu1 %3933 }
 0x920   : > { %7948 = vmatprep.mubr.msk.bf16.mxu0 %vm1444_vm0, %v3934_v59 }
 0x921   : > { %7949 = vmatmul.mubr.msk.bf16.gmra.mrb[132].mxu0 %vm1444_vm0, %v3936_v2 }
 0x922   : > { %8016 = vmatprep.mubr.msk.bf16.mxu0 %vm8453_vm9, %v8452_v26 }
 0x9bc   : > { %v7922_v20 = vpop.f32.mrb[104].mxu0 }
 0x9bd   : > { %v4052_v36 = vadd.f32 %v7922_v20, %v10137_v0  ;;  %v4043_v44 = vpop.f32.mrb[105].mxu0 }
 0x9be   : > { %v4044_v17 = vadd.f32 %v10137_v0, %v4043_v44  ;;  %v7923_v51 = vpop.f32.mrb[106].mxu0 }
 0x9bf   : > { %v4172_v25 = vadd.f32 %v4052_v36, %v9961_v29  ;;  %v4055_v54 = vadd.f32 %v7923_v51, %v10137_v0  ;;  %v4046_v4 = vpop.f32.mrb[107].mxu0 }
 0x9c0   : > { %v4170_v55 = vadd.f32 %v4044_v17, %v9964_v52  ;;  %v4047_v56 = vadd.f32 %v10137_v0, %v4046_v4 }
 0x9c1   : > { %v4173_v41 = vadd.f32 %v4055_v54, %v9968_v58  ;;  %v4340_v28 = vmax.f32 %v4172_v25, 0.0 }
 0x9c2   : > { %v4171_v8 = vadd.f32 %v4047_v56, %v9971_v40  ;;  %v4202_v15 = vsel %vm1444_vm0, %v4170_v55, -inf  ;;  %v4338_v1 = vmax.f32 %v4170_v55, 0.0  ;;  %v4205_v40 = vsel %vm1444_vm0, %v4172_v25, -inf }
 0x9c3   : > { %v4307_v61 = vpack.c.bf16 %v4173_v41, %v4172_v25  ;;  %v4341_v48 = vmax.f32 %v4173_v41, 0.0  ;;  %v4207_v36 = vsel %vm1444_vm0, %v4173_v41, -inf }
 0x9c4   : > { %v4203_v63 = vsel %vm1444_vm0, %v4171_v8, -inf  ;;  %v4306_v29 = vpack.c.bf16 %v4171_v8, %v4170_v55  ;;  %v4339_v30 = vmax.f32 %v4171_v8, 0.0  ;;  %v7926_v57 = vpop.f32.mrb[108].mxu0 }
 0x9c5   : > { %4323 = vst.msk [vmem:[#allocation3 + $0x8] sm:$0xff] %vm1444_vm0, %v4307_v61  ;;  %v4204_v52 = vmax.f32 %v4202_v15, %v4203_v63  ;;  %v4068_v43 = vadd.f32 %v7926_v57, %v10137_v0  ;;  %v4059_v34 = vpop.f32.mrb[109].mxu0  ;;  %v10151_v58 = vpack.c.bf16 %v4341_v48, %v4340_v28 }
 0x9c6   : > { %4322 = vst.msk [vmem:[#allocation3] sm:$0xff] %vm1444_vm0, %v4306_v29  ;;  %v4060_v27 = vadd.f32 %v10137_v0, %v4059_v34  ;;  %v7927_v13 = vpop.f32.mrb[110].mxu0  ;;  %v4370_v7 = vpack.c.bf16 %v4339_v30, %v4338_v1 }
 0x9c7   : > { %v4206_v16 = vmax.f32 %v4204_v52, %v4205_v40  ;;  %v4176_v59 = vadd.f32 %v4068_v43, %v9978_v10  ;;  %v4071_v2 = vadd.f32 %v7927_v13, %v10137_v0  ;;  %v4062_v20 = vpop.f32.mrb[111].mxu0 }
 0x9c8   : > { %v4174_v44 = vadd.f32 %v4060_v27, %v9981_v5  ;;  %v4063_v17 = vadd.f32 %v10137_v0, %v4062_v20  ;;  %4402 = vrot.lane.b32.xlu0 %v4370_v7, %s8451_s14 }
 0x9c9   : > { %v4208_v51 = vmax.f32 %v4206_v16, %v4207_v36  ;;  %v4177_v25 = vadd.f32 %v4071_v2, %v9984_v6  ;;  %v4344_v54 = vmax.f32 %v4176_v59, 0.0 }
 0x9ca   : > { %v4175_v4 = vadd.f32 %v4063_v17, %v9989_v24  ;;  %v4215_v10 = vsel %vm1444_vm0, %v4174_v44, -inf  ;;  %v4342_v28 = vmax.f32 %v4174_v44, 0.0  ;;  %v4218_v24 = vsel %vm1444_vm0, %v4176_v59, -inf }
 0x9cb   : > { %v4209_v55 = vrot.slane %v4208_v51, 4  ;;  %v4309_v56 = vpack.c.bf16 %v4177_v25, %v4176_v59  ;;  %v4345_v8 = vmax.f32 %v4177_v25, 0.0  ;;  %v4220_v7 = vsel %vm1444_vm0, %v4177_v25, -inf }
 0x9cc   : > { %v4216_v41 = vsel %vm1444_vm0, %v4175_v4, -inf  ;;  %v4308_v15 = vpack.c.bf16 %v4175_v4, %v4174_v44  ;;  %v4343_v5 = vmax.f32 %v4175_v4, 0.0  ;;  %v7930_v61 = vpop.f32.mrb[112].mxu0 }
 0x9cd   : > { %v4210_v48 = vmax.f32 %v4208_v51, %v4209_v55  ;;  %4325 = vst.msk [vmem:[#allocation3 + $0x18] sm:$0xff] %vm1444_vm0, %v4309_v56  ;;  %v4217_v1 = vmax.f32 %v4215_v10, %v4216_v41  ;;  %v4084_v6 = vadd.f32 %v7930_v61, %v10137_v0  ;;  %v4075_v63 = vpop.f32.mrb[113].mxu0  ;;  %v10168_v29 = vpack.c.bf16 %v4345_v8, %v4344_v54 }
 0x9ce   : > { %4324 = vst.msk [vmem:[#allocation3 + $0x10] sm:$0xff] %vm1444_vm0, %v4308_v15  ;;  %v4076_v30 = vadd.f32 %v10137_v0, %v4075_v63  ;;  %v7931_v57 = vpop.f32.mrb[114].mxu0  ;;  %v4372_v52 = vpack.c.bf16 %v4343_v5, %v4342_v28 }
 0x9cf   : > { %v4211_v43 = vrot.slane %v4210_v48, 2  ;;  %v4219_v34 = vmax.f32 %v4217_v1, %v4218_v24  ;;  %v4180_v40 = vadd.f32 %v4084_v6, %v9999_v18  ;;  %v4087_v27 = vadd.f32 %v7931_v57, %v10137_v0  ;;  %v4078_v13 = vpop.f32.mrb[115].mxu0 }
 0x9d0   : > { %v4178_v16 = vadd.f32 %v4076_v30, %v10003_v37  ;;  %v4079_v2 = vadd.f32 %v10137_v0, %v4078_v13  ;;  %4406 = vrot.lane.b32.xlu0 %v4372_v52, %s8451_s14 }
 0x9d1   : > { %v4212_v59 = vmax.f32 %v4210_v48, %v4211_v43  ;;  %v4221_v20 = vmax.f32 %v4219_v34, %v4220_v7  ;;  %v4231_v36 = vsel %vm1444_vm0, %v4180_v40, -inf  ;;  %v4181_v44 = vadd.f32 %v4087_v27, %v10007_v32 }
 0x9d2   : > { %v4179_v17 = vadd.f32 %v4079_v2, %v10010_v50  ;;  %v4348_v54 = vmax.f32 %v4180_v40, 0.0  ;;  %v4228_v4 = vsel %vm1444_vm0, %v4178_v16, -inf }
 0x9d3   : > { %v4213_v18 = vrot.slane %v4212_v59, 1  ;;  %v4222_v51 = vrot.slane %v4221_v20, 4  ;;  %v4233_v25 = vsel %vm1444_vm0, %v4181_v44, -inf  ;;  %v4311_v37 = vpack.c.bf16 %v4181_v44, %v4180_v40 }
 0x9d4   : > { %v4349_v55 = vmax.f32 %v4181_v44, 0.0  ;;  %v4229_v10 = vsel %vm1444_vm0, %v4179_v17, -inf  ;;  %v7934_v56 = vpop.f32.mrb[116].mxu0  ;;  %v4310_v15 = vpack.c.bf16 %v4179_v17, %v4178_v16  ;;  %v4347_v32 = vmax.f32 %v4179_v17, 0.0 }
 0x9d5   : > { %v4214_v8 = vmax.f32 %v4212_v59, %v4213_v18  ;;  %v4223_v28 = vmax.f32 %v4221_v20, %v4222_v51  ;;  %v4230_v41 = vmax.f32 %v4228_v4, %v4229_v10  ;;  %v4091_v5 = vpop.f32.mrb[117].mxu0  ;;  %4327 = vst.msk [vmem:[#allocation3 + $0x28] sm:$0xff] %vm1444_vm0, %v4311_v37  ;;  %v4100_v50 = vadd.f32 %v7934_v56, %v10137_v0  ;;  %v8341_v56 = vld [vmem:[%s11416_s2 + $0x180] sm:$0xff]  }
 0x9d6   : > { %v4092_v61 = vadd.f32 %v10137_v0, %v4091_v5  ;;  %v7935_v48 = vpop.f32.mrb[118].mxu0  ;;  %v10188_v1 = vpack.c.bf16 %v4349_v55, %v4348_v54  ;;  %4326 = vst.msk [vmem:[#allocation3 + $0x20] sm:$0xff] %vm1444_vm0, %v4310_v15  ;;  %v4346_v59 = vmax.f32 %v4178_v16, 0.0  ;;  %7952 = vmatprep.subr.bf16.mxu1 %v8341_v56 }
 0x9d7   : > { %v7315_v6 = vpack.c.bf16 %v4214_v8, %v4214_v8  ;;  %v4757_v63 = vmax.f32 %v4214_v8, 0.0  ;;  %v4224_v24 = vrot.slane %v4223_v28, 2  ;;  %v4232_v30 = vmax.f32 %v4230_v41, %v4231_v36  ;;  %v4094_v57 = vpop.f32.mrb[119].mxu0  ;;  %7953 = vmatpush3.bf16.msra.mxu1 %v8341_v56 }
 0x9d8   : > { %v10192_v52 = vadd.f32 %v4100_v50, %v10020_v46  ;;  %v10195_v43 = vadd.f32 %v4092_v61, %v10024_v39  ;;  %v4103_v34 = vadd.f32 %v7935_v48, %v10137_v0  ;;  %v4095_v40 = vadd.f32 %v10137_v0, %v4094_v57 }
 0x9d9   : > { %v10199_v27 = vpack.c.bf16 %v4757_v63, %v4757_v63  ;;  %v4225_v13 = vmax.f32 %v4223_v28, %v4224_v24  ;;  %v4234_v7 = vmax.f32 %v4232_v30, %v4233_v25  ;;  %v4739_v2 = vunpack.c.l.b16 %v7315_v6 }
 0x9da   : > { %v4244_v20 = vsel %vm1444_vm0, %v10192_v52, -inf  ;;  %v4352_v46 = vmax.f32 %v10192_v52, 0.0  ;;  %v10205_v39 = vadd.f32 %v4103_v34, %v10028_v9  ;;  %v4241_v17 = vsel %vm1444_vm0, %v10195_v43, -inf  ;;  %v8340_v9 = vld [vmem:[%s11416_s2 + $0x1c0] sm:$0xff]  }
 0x9db   : > { %v4226_v36 = vrot.slane %v4225_v13, 1  ;;  %v4235_v44 = vrot.slane %v4234_v7, 4  ;;  %v4350_v18 = vmax.f32 %v10195_v43, 0.0  ;;  %v10211_v51 = vadd.f32 %v4095_v40, %v10031_v12  ;;  %8001 = vmatpush3.bf16.msra.mxu0 %v8340_v9 }
 0x9dc   : > { %v4374_v54 = vpack.c.bf16 %v4347_v32, %v4346_v59  ;;  %v7938_v16 = vpop.f32.mrb[120].mxu0  ;;  %v4797_v4 = vunpack.c.l.b16 %v10199_v27  ;;  %v4313_v55 = vpack.c.bf16 %v10205_v39, %v10192_v52  ;;  %v4246_v12 = vsel %vm1444_vm0, %v10205_v39, -inf  ;;  %8002 = vmatprep.subr.bf16.mxu0 %v8452_v26 }
 0x9dd   : > { %v4227_v25 = vmax.f32 %v4225_v13, %v4226_v36  ;;  %v4236_v37 = vmax.f32 %v4234_v7, %v4235_v44  ;;  %v4107_v10 = vpop.f32.mrb[121].mxu0  ;;  %v4353_v8 = vmax.f32 %v10205_v39, 0.0  ;;  %v4242_v28 = vsel %vm1444_vm0, %v10211_v51, -inf }
 0x9de   : > { %v4312_v41 = vpack.c.bf16 %v10211_v51, %v10195_v43  ;;  %4410 = vrot.lane.b32.xlu0 %v4374_v54, %s8451_s14  ;;  %v7939_v15 = vpop.f32.mrb[122].mxu0  ;;  %4329 = vst.msk [vmem:[#allocation3 + $0x38] sm:$0xff] %vm1444_vm0, %v4313_v55  ;;  %v4243_v61 = vmax.f32 %v4241_v17, %v4242_v28  ;;  %v4116_v6 = vadd.f32 %v7938_v16, %v10137_v0 }
 0x9df   : > { %v7316_v5 = vpack.c.bf16 %v4227_v25, %v4227_v25  ;;  %v4758_v32 = vmax.f32 %v4227_v25, 0.0  ;;  %v4237_v50 = vrot.slane %v4236_v37, 2  ;;  %v4110_v48 = vpop.f32.mrb[123].mxu0  ;;  %v4108_v63 = vadd.f32 %v10137_v0, %v4107_v10 }
 0x9e0   : > { %4328 = vst.msk [vmem:[#allocation3 + $0x30] sm:$0xff] %vm1444_vm0, %v4312_v41  ;;  %v4119_v24 = vadd.f32 %v7939_v15, %v10137_v0  ;;  %v4111_v30 = vadd.f32 %v10137_v0, %v4110_v48  ;;  %v4245_v13 = vmax.f32 %v4243_v61, %v4244_v20  ;;  %v10240_v7 = vadd.f32 %v4116_v6, %v10040_v47  ;;  %v8342_v47 = vld [vmem:[%s11416_s2 + $0x1c8] sm:$0xff]  }
 0x9e1   : > { %v4740_v57 = vunpack.c.l.b16 %v7316_v5  ;;  %v10236_v34 = vpack.c.bf16 %v4758_v32, %v4758_v32  ;;  %v4238_v40 = vmax.f32 %v4236_v37, %v4237_v50  ;;  %v10243_v59 = vadd.f32 %v4108_v63, %v10044_v45  ;;  %v8343_v45 = vld [vmem:[%s11416_s2 + $0x188] sm:$0xff]   ;;  %8003 = vmatpush3.bf16.msra.mxu0 %v8342_v47 }
 0x9e2   : > { %v10246_v36 = vadd.f32 %v4119_v24, %v10048_v33  ;;  %v10249_v44 = vadd.f32 %v4111_v30, %v10051_v23  ;;  %v4247_v16 = vmax.f32 %v4245_v13, %v4246_v12  ;;  %v4351_v20 = vmax.f32 %v10211_v51, 0.0  ;;  %7954 = vmatprep.subr.bf16.mxu1 %v8343_v45  ;;  %8004 = vmatprep.subr.bf16.mxu0 %v8452_v26 }
 0x9e3   : > { %v4747_v17 = vsel %vm2232_vm1, %v4740_v57, %v4739_v2  ;;  %v4239_v54 = vrot.slane %v4238_v40, 1  ;;  %v4798_v33 = vunpack.c.l.b16 %v10236_v34  ;;  %v4257_v23 = vsel %vm1444_vm0, %v10240_v7, -inf  ;;  %7955 = vmatpush3.bf16.msra.mxu1 %v8343_v45 }
 0x9e4   : > { %v4356_v25 = vmax.f32 %v10240_v7, 0.0  ;;  %v4254_v2 = vsel %vm1444_vm0, %v10243_v59, -inf  ;;  %v7942_v37 = vpop.f32.mrb[124].mxu0  ;;  %v4248_v55 = vrot.slane %v4247_v16, 4  ;;  %v4354_v10 = vmax.f32 %v10243_v59, 0.0 }
 0x9e5   : > { %v4240_v51 = vmax.f32 %v4238_v40, %v4239_v54  ;;  %v4315_v9 = vpack.c.bf16 %v10246_v36, %v10240_v7  ;;  %v4123_v56 = vpop.f32.mrb[125].mxu0  ;;  %v4259_v12 = vsel %vm1444_vm0, %v10246_v36, -inf  ;;  %v4255_v28 = vsel %vm1444_vm0, %v10249_v44, -inf }
 0x9e6   : > { %v4314_v41 = vpack.c.bf16 %v10249_v44, %v10243_v59  ;;  %v4355_v15 = vmax.f32 %v10249_v44, 0.0  ;;  %v7943_v5 = vpop.f32.mrb[126].mxu0  ;;  %v4249_v61 = vmax.f32 %v4247_v16, %v4248_v55  ;;  %v4256_v48 = vmax.f32 %v4254_v2, %v4255_v28 }
 0x9e7   : > { %v7317_v32 = vpack.c.bf16 %v4240_v51, %v4240_v51  ;;  %v4759_v50 = vmax.f32 %v4240_v51, 0.0  ;;  %4331 = vst.msk [vmem:[#allocation3 + $0x48] sm:$0xff] %vm1444_vm0, %v4315_v9  ;;  %v4126_v6 = vpop.f32.mrb[127].mxu0  ;;  %v4376_v63 = vpack.c.bf16 %v4351_v20, %v4350_v18  ;;  %v4132_v24 = vadd.f32 %v7942_v37, %v10137_v0 }
 0x9e8   : > { %4330 = vst.msk [vmem:[#allocation3 + $0x40] sm:$0xff] %vm1444_vm0, %v4314_v41  ;;  %v4124_v30 = vadd.f32 %v10137_v0, %v4123_v56  ;;  %v4135_v57 = vadd.f32 %v7943_v5, %v10137_v0  ;;  %v4250_v59 = vrot.slane %v4249_v61, 2  ;;  %v4258_v44 = vmax.f32 %v4256_v48, %v4257_v23  ;;  %v8344_v23 = vld [vmem:[%s11416_s2 + $0x1d0] sm:$0xff]  }
 0x9e9   : > { %v4741_v40 = vunpack.c.l.b16 %v7317_v32  ;;  %v10283_v13 = vpack.c.bf16 %v4759_v50, %v4759_v50  ;;  %4414 = vrot.lane.b32.xlu0 %v4376_v63, %s8451_s14  ;;  %v10287_v54 = vadd.f32 %v4132_v24, %v10059_v21  ;;  %v4127_v18 = vadd.f32 %v10137_v0, %v4126_v6  ;;  %v8345_v21 = vld [vmem:[%s11416_s2 + $0x190] sm:$0xff]   ;;  %8005 = vmatpush3.bf16.msra.mxu0 %v8344_v23 }
 0x9ea   : > { %v10290_v16 = vadd.f32 %v4124_v30, %v10063_v3  ;;  %v10293_v43 = vadd.f32 %v4135_v57, %v10067_v62  ;;  %v4251_v47 = vmax.f32 %v4249_v61, %v4250_v59  ;;  %v4357_v45 = vmax.f32 %v10246_v36, 0.0  ;;  %7956 = vmatprep.subr.bf16.mxu1 %v8345_v21  ;;  %8006 = vmatprep.subr.bf16.mxu0 %v8452_v26 }
 0x9eb   : > { %v4748_v20 = vsel %vm2234_vm2, %v4741_v40, %v4747_v17  ;;  %v4260_v2 = vmax.f32 %v4258_v44, %v4259_v12  ;;  %v4799_v3 = vunpack.c.l.b16 %v10283_v13  ;;  %v4270_v62 = vsel %vm1444_vm0, %v10287_v54, -inf  ;;  %7957 = vmatpush3.bf16.msra.mxu1 %v8345_v21 }
 0x9ec   : > { %v4360_v37 = vmax.f32 %v10287_v54, 0.0  ;;  %v4267_v17 = vsel %vm1444_vm0, %v10290_v16, -inf  ;;  %v7946_v51 = vpop.f32.mrb[128].mxu0  ;;  %v4252_v55 = vrot.slane %v4251_v47, 1  ;;  %v4358_v56 = vmax.f32 %v10290_v16, 0.0 }
 0x9ed   : > { %v4261_v9 = vrot.slane %v4260_v2, 4  ;;  %v4317_v12 = vpack.c.bf16 %v10293_v43, %v10287_v54  ;;  %v4139_v28 = vpop.f32.mrb[129].mxu0  ;;  %v4272_v41 = vsel %vm1444_vm0, %v10293_v43, -inf  ;;  %v4191_v5 = vadd.f32 %v4127_v18, %v10070_v19 }
 0x9ee   : > { %v4378_v32 = vpack.c.bf16 %v4355_v15, %v4354_v10  ;;  %v4148_v50 = vadd.f32 %v7946_v51, %v10137_v0  ;;  %v7947_v61 = vpop.f32.mrb[130].mxu0  ;;  %v4253_v48 = vmax.f32 %v4251_v47, %v4252_v55  ;;  %v4140_v63 = vadd.f32 %v10137_v0, %v4139_v28 }
 0x9ef   : > { %v4262_v6 = vmax.f32 %v4260_v2, %v4261_v9  ;;  %4333 = vst.msk [vmem:[#allocation3 + $0x58] sm:$0xff] %vm1444_vm0, %v4317_v12  ;;  %v4151_v24 = vadd.f32 %v7947_v61, %v10137_v0  ;;  %v4142_v30 = vpop.f32.mrb[131].mxu0  ;;  %v4361_v57 = vmax.f32 %v10293_v43, 0.0  ;;  %v4268_v19 = vsel %vm1444_vm0, %v4191_v5, -inf  ;;  %v8347_v9 = vld [vmem:[%s11416_s2 + $0x198] sm:$0xff]  }
 0x9f0   : > { %v4316_v10 = vpack.c.bf16 %v4191_v5, %v10290_v16  ;;  %4418 = vrot.lane.b32.xlu0 %v4378_v32, %s8451_s14  ;;  %v10326_v15 = vadd.f32 %v4148_v50, %v10078_v11  ;;  %v7318_v40 = vpack.c.bf16 %v4253_v48, %v4253_v48  ;;  %v4760_v59 = vmax.f32 %v4253_v48, 0.0  ;;  %7958 = vmatprep.subr.bf16.mxu1 %v8347_v9 }
 0x9f1   : > { %v4263_v44 = vrot.slane %v4262_v6, 2  ;;  %v4269_v18 = vmax.f32 %v4267_v17, %v4268_v19  ;;  %v4359_v47 = vmax.f32 %v4191_v5, 0.0  ;;  %v10334_v23 = vadd.f32 %v4140_v63, %v10082_v35  ;;  %v8346_v17 = vld [vmem:[%s11416_s2 + $0x1d8] sm:$0xff]   ;;  %7959 = vmatpush3.bf16.msra.mxu1 %v8347_v9 }
 0x9f2   : > { %4332 = vst.msk [vmem:[#allocation3 + $0x50] sm:$0xff] %vm1444_vm0, %v4316_v10  ;;  %v10331_v2 = vsel %vm1444_vm0, %v10326_v15, -inf  ;;  %v10337_v16 = vadd.f32 %v4151_v24, %v10086_v22  ;;  %v4742_v21 = vunpack.c.l.b16 %v7318_v40  ;;  %v10339_v11 = vpack.c.bf16 %v4760_v59, %v4760_v59  ;;  %8007 = vmatpush3.bf16.msra.mxu0 %v8346_v17 }
 0x9f3   : > { %v4264_v51 = vmax.f32 %v4262_v6, %v4263_v44  ;;  %v4271_v55 = vmax.f32 %v4269_v18, %v4270_v62  ;;  %v4364_v12 = vmax.f32 %v10326_v15, 0.0  ;;  %v4280_v35 = vsel %vm1444_vm0, %v10334_v23, -inf  ;;  %8008 = vmatprep.subr.bf16.mxu0 %v8452_v26  ;;  %v8348_v18 = vld [vmem:[%s11416_s2 + $0x1e0] sm:$0xff]  }
 0x9f4   : > { %v4362_v22 = vmax.f32 %v10334_v23, 0.0  ;;  %v4319_v28 = vpack.c.bf16 %v10337_v16, %v10326_v15  ;;  %v7950_v5 = vpop.f32.mrb[132].mxu0  ;;  %v4749_v62 = vsel %vm2236_vm4, %v4742_v21, %v4748_v20  ;;  %v4285_v61 = vsel %vm1444_vm0, %v10337_v16, -inf }
 0x9f5   : > { %v4265_v32 = vrot.slane %v4264_v51, 1  ;;  %v4273_v50 = vmax.f32 %v4271_v55, %v4272_v41  ;;  %v4155_v48 = vpop.f32.mrb[133].mxu0  ;;  %v4800_v6 = vunpack.c.l.b16 %v10339_v11  ;;  %v4143_v63 = vadd.f32 %v10137_v0, %v4142_v30 }
 0x9f6   : > { %4335 = vst.msk [vmem:[#allocation3 + $0x68] sm:$0xff] %vm1444_vm0, %v4319_v28  ;;  %v4380_v24 = vpack.c.bf16 %v4359_v47, %v4358_v56  ;;  %v4164_v19 = vadd.f32 %v7950_v5, %v10137_v0  ;;  %v7951_v10 = vpop.f32.mrb[134].mxu0  ;;  %v4156_v40 = vadd.f32 %v10137_v0, %v4155_v48  ;;  %v8349_v56 = vld [vmem:[%s11416_s2 + $0x1a0] sm:$0xff]   ;;  %v4365_v30 = vmax.f32 %v10337_v16, 0.0  ;;  %8009 = vmatpush3.bf16.msra.mxu0 %v8348_v18  ;;  %v8353_v48 = vld [vmem:[%s11416_s2 + $0x1b0] sm:$0xff]  }
 0x9f7   : > { %v4266_v20 = vmax.f32 %v4264_v51, %v4265_v32  ;;  %v4274_v41 = vrot.slane %v4273_v50, 4  ;;  %v4167_v59 = vadd.f32 %v7951_v10, %v10137_v0  ;;  %v4158_v44 = vpop.f32.mrb[135].mxu0  ;;  %v4195_v47 = vadd.f32 %v4143_v63, %v10089_v60  ;;  %v8351_v51 = vld [vmem:[%s11416_s2 + $0x1a8] sm:$0xff]   ;;  %7960 = vmatprep.subr.bf16.mxu1 %v8349_v56  ;;  %8010 = vmatprep.subr.bf16.mxu0 %v8452_v26  ;;  %v8352_v10 = vld [vmem:[%s11416_s2 + $0x1f0] sm:$0xff]  }
 0x9f8   : > { %4422 = vrot.lane.b32.xlu0 %v4380_v24, %s8451_s14  ;;  %v10373_v21 = vadd.f32 %v4164_v19, %v10097_v38  ;;  %v4805_v11 = vsel %vm2232_vm1, %v4798_v33, %v4797_v4  ;;  %v4198_v16 = vadd.f32 %v4156_v40, %v10101_v14  ;;  %v8350_v38 = vld [vmem:[%s11416_s2 + $0x1e8] sm:$0xff]   ;;  %v4159_v33 = vadd.f32 %v10137_v0, %v4158_v44 }
 0x9f9   : > { %v7319_v55 = vpack.c.bf16 %v4266_v20, %v4266_v20  ;;  %v4275_v17 = vmax.f32 %v4273_v50, %v4274_v41  ;;  %v10385_v60 = vadd.f32 %v4167_v59, %v10105_v53  ;;  %v4281_v27 = vsel %vm1444_vm0, %v4195_v47, -inf  ;;  %7961 = vmatpush3.bf16.msra.mxu1 %v8349_v56 }
 0x9fa   : > { %v4318_v4 = vpack.c.bf16 %v4195_v47, %v10334_v23  ;;  %v4363_v34 = vmax.f32 %v4195_v47, 0.0  ;;  %v4282_v28 = vmax.f32 %v4280_v35, %v4281_v27  ;;  %v4296_v53 = vsel %vm1444_vm0, %v10373_v21, -inf  ;;  %7962 = vmatprep.subr.bf16.mxu1 %v8351_v51  ;;  %8011 = vmatpush3.bf16.msra.mxu0 %v8350_v38 }
 0x9fb   : > { %v4743_v9 = vunpack.c.l.b16 %v7319_v55  ;;  %v4276_v14 = vrot.slane %v4275_v17, 2  ;;  %v4368_v5 = vmax.f32 %v10373_v21, 0.0  ;;  %v4293_v32 = vsel %vm1444_vm0, %v4198_v16, -inf  ;;  %8012 = vmatprep.subr.bf16.mxu0 %v8452_v26 }
 0x9fc   : > { %4334 = vst.msk [vmem:[#allocation3 + $0x60] sm:$0xff] %vm1444_vm0, %v4318_v4  ;;  %v4366_v50 = vmax.f32 %v4198_v16, 0.0  ;;  %v4321_v0 = vpack.c.bf16 %v10385_v60, %v10373_v21  ;;  %v4284_v24 = vmax.f32 %v4282_v28, %v10331_v2  ;;  %v4369_v19 = vmax.f32 %v10385_v60, 0.0  ;;  %v8354_v28 = vld [vmem:[%s11416_s2 + $0x1f8] sm:$0xff]  }
 0x9fd   : > { %v4750_v35 = vsel %vm2238_vm5, %v4743_v9, %v4749_v62  ;;  %v4277_v63 = vmax.f32 %v4275_v17, %v4276_v14  ;;  %v4199_v41 = vadd.f32 %v4159_v33, %v10108_v42  ;;  %v4382_v40 = vpack.c.bf16 %v4363_v34, %v4362_v22  ;;  %7963 = vmatpush3.bf16.msra.mxu1 %v8351_v51 }
 0x9fe   : > { %4337 = vst.msk [vmem:[#allocation3 + $0x78] sm:$0xff] %vm1444_vm0, %v4321_v0  ;;  %v4761_v59 = vmax.f32 %v4266_v20, 0.0  ;;  %v4806_v62 = vsel %vm2234_vm2, %v4799_v3, %v4805_v11  ;;  %v4286_v44 = vmax.f32 %v4284_v24, %v4285_v61  ;;  %v10423_v56 = vpack.c.bf16 %v4353_v8, %v4352_v46  ;;  %7964 = vmatprep.subr.bf16.mxu1 %v8353_v48 }
 0x9ff   : > { %v4278_v2 = vrot.slane %v4277_v63, 1  ;;  %v4807_v18 = vsel %vm2236_vm4, %v4800_v6, %v4806_v62  ;;  %v4294_v42 = vsel %vm1444_vm0, %v4199_v41, -inf  ;;  %v4320_v23 = vpack.c.bf16 %v4199_v41, %v4198_v16  ;;  %4426 = vrot.lane.b32.xlu0 %v4382_v40, %s8451_s14  ;;  %8013 = vmatpush3.bf16.msra.mxu0 %v8352_v10 }
 0xa00   : > { %v4367_v22 = vmax.f32 %v4199_v41, 0.0  ;;  %v7327_v13 = vpack.c.bf16 %v4761_v59, %v4761_v59  ;;  %v4287_v20 = vrot.slane %v4286_v44, 4  ;;  %v4295_v61 = vmax.f32 %v4293_v32, %v4294_v42  ;;  %8014 = vmatprep.subr.bf16.mxu0 %v8452_v26 }
 0xa01   : > { %v4279_v3 = vmax.f32 %v4277_v63, %v4278_v2  ;;  %v4379_v52 = vpack.c.bf16 %v4357_v45, %v4356_v25  ;;  %4336 = vst.msk [vmem:[#allocation3 + $0x70] sm:$0xff] %vm1444_vm0, %v4320_v23  ;;  %v4381_v8 = vpack.c.bf16 %v4361_v57, %v4360_v37  ;;  %v4383_v6 = vpack.c.bf16 %v4365_v30, %v4364_v12 }
 0xa02   : > { %v4384_v46 = vpack.c.bf16 %v4367_v22, %v4366_v50  ;;  %v4801_v39 = vunpack.c.l.b16 %v7327_v13  ;;  %v4288_v7 = vmax.f32 %v4286_v44, %v4287_v20  ;;  %v4297_v21 = vmax.f32 %v4295_v61, %v4296_v53  ;;  %7965 = vmatpush3.bf16.msra.mxu1 %v8353_v48  ;;  %v8355_v53 = vld [vmem:[%s11416_s2 + $0x1b8] sm:$0xff]  }
 0xa03   : > { %v7320_v47 = vpack.c.bf16 %v4279_v3, %v4279_v3  ;;  %v4762_v36 = vmax.f32 %v4279_v3, 0.0  ;;  %v4298_v25 = vsel %vm1444_vm0, %v10385_v60, -inf  ;;  %v4385_v45 = vpack.c.bf16 %v4369_v19, %v4368_v5  ;;  %8015 = vmatpush3.bf16.msra.mxu0 %v8354_v28  ;;  %7966 = vmatprep.subr.bf16.mxu1 %v8355_v53 }
 0xa04   : > { %4430 = vrot.lane.b32.xlu0 %v4384_v46, %s8451_s14  ;;  %v4808_v54 = vsel %vm2238_vm5, %v4801_v39, %v4807_v18  ;;  %v4289_v37 = vrot.slane %v4288_v7, 2  ;;  %v4299_v57 = vmax.f32 %v4297_v21, %v4298_v25 }
 0xa05   : > { %v4744_v43 = vunpack.c.l.b16 %v7320_v47  ;;  %v7328_v15 = vpack.c.bf16 %v4762_v36, %v4762_v36 }
 0xa06   : > { %v4290_v30 = vmax.f32 %v4288_v7, %v4289_v37  ;;  %v4300_v11 = vrot.slane %v4299_v57, 4  ;;  %7967 = vmatpush3.bf16.msra.mxu1 %v8355_v53 }
 0xa07   : > { %v4751_v12 = vsel %vm2240_vm6, %v4744_v43, %v4750_v35  ;;  %v4802_v51 = vunpack.c.l.b16 %v7328_v15 }
 0xa08   : > { %v4291_v55 = vrot.slane %v4290_v30, 1  ;;  %v4301_v17 = vmax.f32 %v4299_v57, %v4300_v11 }
 0xa09   : > { %v4809_v16 = vsel %vm2240_vm6, %v4802_v51, %v4808_v54  ;;  %v8356_v51 = vld [vmem:[%s11417_s3 + $0x60] sm:$0xff]  }
 0xa0a   : > { %v4302_v38 = vrot.slane %v4301_v17, 2  ;;  %v4292_v60 = vmax.f32 %v4290_v30, %v4291_v55  ;;  %8020 = vmatprep.subr.bf16.mxu1 %v8356_v51  ;;  %v8357_v55 = vld [vmem:[%s11417_s3 + $0x68] sm:$0xff]  }
 0xa0c   : > { %v4303_v27 = vmax.f32 %v4301_v17, %v4302_v38  ;;  %v7321_v4 = vpack.c.bf16 %v4292_v60, %v4292_v60  ;;  %v4763_v34 = vmax.f32 %v4292_v60, 0.0  ;;  %v8358_v17 = vld [vmem:[%s11417_s3 + $0x70] sm:$0xff]  }
 0xa0e   : > { %v4304_v33 = vrot.slane %v4303_v27, 1  ;;  %v4745_v9 = vunpack.c.l.b16 %v7321_v4  ;;  %v7329_v14 = vpack.c.bf16 %v4763_v34, %v4763_v34 }
 0xa10   : > { %v4305_v5 = vmax.f32 %v4303_v27, %v4304_v33  ;;  %v4803_v32 = vunpack.c.l.b16 %v7329_v14  ;;  %v4752_v50 = vsel %vm2242_vm7, %v4745_v9, %v4751_v12 }
 0xa12   : > { %v7322_v0 = vpack.c.bf16 %v4305_v5, %v4305_v5  ;;  %v4764_v48 = vmax.f32 %v4305_v5, 0.0  ;;  %v4810_v35 = vsel %vm2242_vm7, %v4803_v32, %v4809_v16  ;;  %v8359_v16 = vld [vmem:[%s11417_s3 + $0x78] sm:$0xff]  }
 0xa14   : > { %v4746_v63 = vunpack.c.l.b16 %v7322_v0  ;;  %v7330_v24 = vpack.c.bf16 %v4764_v48, %v4764_v48 }
 0xa16   : > { %v4804_v19 = vunpack.c.l.b16 %v7330_v24  ;;  %v4753_v10 = vsel %vm2244_vm8, %v4746_v63, %v4752_v50  ;;  %v10509_v50 = vld [vmem:[%s11415_s1 + $0xa] ss:$0 sm:$0xff] }
 0xa17   : > { %v4754_v41 = vpack.c.b16 %v4753_v10, %v4753_v10 }
 0xa18   : > { %v4811_v40 = vsel %vm2244_vm8, %v4804_v19, %v4810_v35 }
 0xa19   : > { %v4812_v59 = vpack.c.b16 %v4811_v40, %v4811_v40  ;;  %4756 = vst.msk [vmem:[#allocation4] sm:$0xf] %vm2248_vm10, %v4754_v41 }
 0xa1b   : > { %4813 = vrot.lane.b32.xlu1 %v4812_v59, %s8451_s14 }
 0xa1f   : > { %4404 = vrot.lane.b32.xlu1 %v10151_v58, %s8451_s14 }
 0xa23   : > { %4408 = vrot.lane.b32.xlu1 %v10168_v29, %s8451_s14 }
 0xa27   : > { %4412 = vrot.lane.b32.xlu1 %v10188_v1, %s8451_s14 }
 0xa2b   : > { %4416 = vrot.lane.b32.xlu1 %v10423_v56, %s8451_s14 }
 0xa2f   : > { %4420 = vrot.lane.b32.xlu1 %v4379_v52, %s8451_s14 }
 0xa33   : > { %4424 = vrot.lane.b32.xlu1 %v4381_v8, %s8451_s14 }
 0xa37   : > { %4428 = vrot.lane.b32.xlu1 %v4383_v6, %s8451_s14 }
 0xa3a   : > { %v4403_v62 = vpop.permute.xlu0 %4402 }
 0xa3b   : > { %4450 = vst.msk [vmem:[#allocation3] sm:$0xff] %vm1934_vm3, %v4403_v62  ;;  %4432 = vrot.lane.b32.xlu1 %v4385_v45, %s8451_s14 }
 0xa42   : > { %v4407_v58 = vpop.permute.xlu0 %4406  ;;  %v4466_v2 = vld [vmem:[#allocation3] sm:$0xff] }
 0xa43   : > { %4452 = vst.msk [vmem:[#allocation3 + $0x10] sm:$0xff] %vm1934_vm3, %v4407_v58  ;;  %7968 = vmatprep.mubr.bf16.mxu1 %v4466_v2 }
 0xa4a   : > { %v4468_v52 = vld [vmem:[#allocation3 + $0x10] sm:$0xff] }
 0xa50   : > { %v4411_v29 = vpop.permute.xlu0 %4410 }
 0xa51   : > { %4454 = vst.msk [vmem:[#allocation3 + $0x20] sm:$0xff] %vm1934_vm3, %v4411_v29 }
 0xa58   : > { %v4470_v6 = vld [vmem:[#allocation3 + $0x20] sm:$0xff] }
 0xa5b   : > { %v4415_v1 = vpop.permute.xlu0 %4414 }
 0xa5c   : > { %4456 = vst.msk [vmem:[#allocation3 + $0x30] sm:$0xff] %vm1934_vm3, %v4415_v1 }
 0xa62   : > { %v4419_v44 = vpop.permute.xlu0 %4418 }
 0xa63   : > { %4458 = vst.msk [vmem:[#allocation3 + $0x40] sm:$0xff] %vm1934_vm3, %v4419_v44  ;;  %v4472_v36 = vld [vmem:[#allocation3 + $0x30] sm:$0xff] }
 0xa6a   : > { %v4423_v18 = vpop.permute.xlu0 %4422  ;;  %v4474_v45 = vld [vmem:[#allocation3 + $0x40] sm:$0xff] }
 0xa6b   : > { %4460 = vst.msk [vmem:[#allocation3 + $0x50] sm:$0xff] %vm1934_vm3, %v4423_v18 }
 0xa71   : > { %v4427_v56 = vpop.permute.xlu0 %4426 }
 0xa72   : > { %4462 = vst.msk [vmem:[#allocation3 + $0x60] sm:$0xff] %vm1934_vm3, %v4427_v56  ;;  %v4476_v37 = vld [vmem:[#allocation3 + $0x50] sm:$0xff] }
 0xa76   : > { %v4431_v42 = vpop.permute.xlu0 %4430 }
 0xa77   : > { %4464 = vst.msk [vmem:[#allocation3 + $0x70] sm:$0xff] %vm1934_vm3, %v4431_v42 }
 0xa79   : > { %v4478_v15 = vld [vmem:[#allocation3 + $0x60] sm:$0xff] }
 0xa7e   : > { %v4480_v30 = vld [vmem:[#allocation3 + $0x70] sm:$0xff] }
 0xa8d   : > { %v4814_v23 = vpop.permute.xlu1 %4813 }
 0xa8e   : > { %4816 = vst.msk [vmem:[#allocation4] sm:$0xf] %vm2309_vm11, %v4814_v23 }
 0xa91   : > { %v4405_v22 = vpop.permute.xlu1 %4404 }
 0xa92   : > { %4451 = vst.msk [vmem:[#allocation3 + $0x8] sm:$0xff] %vm1934_vm3, %v4405_v22 }
 0xa95   : > { %v4409_v13 = vpop.permute.xlu1 %4408  ;;  %v4817_v3 = vld [vmem:[#allocation4] sm:$0xf] }
 0xa96   : > { %4453 = vst.msk [vmem:[#allocation3 + $0x18] sm:$0xff] %vm1934_vm3, %v4409_v13  ;;  %8017 = vmatmul.mubr.bf16.vlgmr.msra.gmra.mrb[136].mxu0 %v4817_v3 }
 0xa99   : > { %v4413_v20 = vpop.permute.xlu1 %4412  ;;  %v4467_v61 = vld [vmem:[#allocation3 + $0x8] sm:$0xff] }
 0xa9a   : > { %4455 = vst.msk [vmem:[#allocation3 + $0x28] sm:$0xff] %vm1934_vm3, %v4413_v20  ;;  %7969 = vmatmul.mubr.bf16.vlgmr.msra.gmra.mrb[96].mxu1 %v4467_v61 }
 0xa9b   : > { %7972 = vmatprep.mubr.bf16.mxu1 %v4468_v52  ;;  %8021 = vmatpush3.bf16.msra.mxu1 %v8356_v51 }
 0xa9c   : > { %8022 = vmatprep.subr.bf16.mxu1 %v8357_v55 }
 0xa9d   : > { %v4417_v46 = vpop.permute.xlu1 %4416  ;;  %v4469_v8 = vld [vmem:[#allocation3 + $0x18] sm:$0xff] }
 0xa9e   : > { %4457 = vst.msk [vmem:[#allocation3 + $0x38] sm:$0xff] %vm1934_vm3, %v4417_v46 }
 0xa9f   : > { %8023 = vmatpush3.bf16.msra.mxu1 %v8357_v55 }
 0xaa0   : > { %8024 = vmatprep.subr.bf16.mxu1 %v8358_v17 }
 0xaa1   : > { %v4421_v39 = vpop.permute.xlu1 %4420  ;;  %v4471_v21 = vld [vmem:[#allocation3 + $0x28] sm:$0xff] }
 0xaa2   : > { %4459 = vst.msk [vmem:[#allocation3 + $0x48] sm:$0xff] %vm1934_vm3, %v4421_v39  ;;  %7973 = vmatmul.mubr.bf16.gmra.mrb[100].mxu1 %v4469_v8 }
 0xaa3   : > { %7976 = vmatprep.mubr.bf16.mxu1 %v4470_v6  ;;  %8025 = vmatpush3.bf16.msra.mxu1 %v8358_v17 }
 0xaa4   : > { %8026 = vmatprep.subr.bf16.mxu1 %v8359_v16 }
 0xaa5   : > { %v4425_v47 = vpop.permute.xlu1 %4424  ;;  %v4473_v54 = vld [vmem:[#allocation3 + $0x38] sm:$0xff] }
 0xaa6   : > { %4461 = vst.msk [vmem:[#allocation3 + $0x58] sm:$0xff] %vm1934_vm3, %v4425_v47 }
 0xaa7   : > { %8027 = vmatpush3.bf16.msra.mxu1 %v8359_v16 }
 0xaa8   : > { %8108 = vmatprep.subr.bf16.mxu1 %v8452_v26 }
 0xaa9   : > { %v4429_v7 = vpop.permute.xlu1 %4428  ;;  %v4475_v43 = vld [vmem:[#allocation3 + $0x48] sm:$0xff] }
 0xaaa   : > { %4463 = vst.msk [vmem:[#allocation3 + $0x68] sm:$0xff] %vm1934_vm3, %v4429_v7  ;;  %7977 = vmatmul.mubr.bf16.gmra.mrb[104].mxu1 %v4471_v21 }
 0xaab   : > { %7980 = vmatprep.mubr.bf16.mxu1 %v4472_v36 }
 0xaad   : > { %v4433_v25 = vpop.permute.xlu1 %4432  ;;  %v4477_v57 = vld [vmem:[#allocation3 + $0x58] sm:$0xff] }
 0xaae   : > { %4465 = vst.msk [vmem:[#allocation3 + $0x78] sm:$0xff] %vm1934_vm3, %v4433_v25 }
 0xab1   : > { %v4479_v12 = vld [vmem:[#allocation3 + $0x68] sm:$0xff] }
 0xab2   : > { %7981 = vmatmul.mubr.bf16.gmra.mrb[108].mxu1 %v4473_v54 }
 0xab3   : > { %7984 = vmatprep.mubr.bf16.mxu1 %v4474_v45 }
 0xab5   : > { %v4481_v11 = vld [vmem:[#allocation3 + $0x78] sm:$0xff] }
 0xaba   : > { %7985 = vmatmul.mubr.bf16.gmra.mrb[112].mxu1 %v4475_v43 }
 0xabb   : > { %7988 = vmatprep.mubr.bf16.mxu1 %v4476_v37 }
 0xac2   : > { %7989 = vmatmul.mubr.bf16.gmra.mrb[116].mxu1 %v4477_v57 }
 0xac3   : > { %7992 = vmatprep.mubr.bf16.mxu1 %v4478_v15 }
 0xaca   : > { %7993 = vmatmul.mubr.bf16.gmra.mrb[120].mxu1 %v4479_v12 }
 0xacb   : > { %7996 = vmatprep.mubr.bf16.mxu1 %v4480_v30 }
 0xad2   : > { %7997 = vmatmul.mubr.bf16.gmra.mrb[124].mxu1 %v4481_v11 }
 0xb69   : > { %v10499_v38 = vpop.f32.mrb[136].mxu0 }
 0xb6a   : > { %v4930_v60 = vrot.slane %v10499_v38, %v9385_v31  ;;  %v8018_v27 = vpop.f32.mrb[137].mxu0  ;;  %v4923_v12 = vcombine.high %v10499_v38, %v10499_v38 }
 0xb6b   : > { %v4919_v4 = vpop.f32.mrb[138].mxu0 }
 0xb6c   : > { %v4938_v34 = vcombine.high %v4930_v60, %v4930_v60  ;;  %v4946_v33 = vrot.slane %v4930_v60, %v9385_v31  ;;  %v8019_v9 = vpop.f32.mrb[139].mxu0  ;;  %v4937_v38 = vrot.slane %v4923_v12, %v9385_v31 }
 0xb6d   : > { %v7970_v14 = vpop.f32.mrb[96].mxu1 }
 0xb6e   : > { %v4580_v28 = vpop.f32.mrb[97].mxu1  ;;  %v4975_v53 = vrot.slane %v4946_v33, %v9391_v49  ;;  %v4960_v32 = vrot.slane %v4938_v34, %v9385_v31  ;;  %v4968_v56 = vcombine.high %v4946_v33, %v4946_v33 }
 0xb6f   : > { %v7971_v5 = vpop.f32.mrb[98].mxu1 }
 0xb70   : > { %v4583_v0 = vpop.f32.mrb[99].mxu1  ;;  %v5014_v48 = vadd.f32 %v7970_v14, %v4975_v53  ;;  %v5012_v35 = vadd.f32 %v4975_v53, %v4580_v28  ;;  %v5015_v63 = vadd.f32 %v7971_v5, %v4975_v53  ;;  %v4979_v41 = vrot.slane %v4960_v32, %v9391_v49 }
 0xb71   : > { %v5013_v24 = vadd.f32 %v4975_v53, %v4583_v0  ;;  %v4983_v6 = vrot.slane %v4968_v56, %v9391_v49  ;;  %v4970_v30 = vcombine.high %v4960_v32, %v4960_v32 }
 0xb72   : > { %v10512_v19 = vadd.f32 %v10509_v50, %v5014_v48  ;;  %v10515_v10 = vadd.f32 %v10509_v50, %v5012_v35  ;;  %v10519_v40 = vadd.f32 %v10509_v50, %v5015_v63  ;;  %v4953_v63 = vrot.slane %v4937_v38, %v9385_v31 }
 0xb73   : > { %v10522_v59 = vadd.f32 %v10509_v50, %v5013_v24  ;;  %v4987_v33 = vrot.slane %v4970_v30, %v9391_v49 }
 0xb74   : > { %v5083_v62 = vmax.f32 %v10512_v19, 0.0  ;;  %v5081_v58 = vmax.f32 %v10515_v10, 0.0  ;;  %v5084_v29 = vmax.f32 %v10519_v40, 0.0 }
 0xb75   : > { %v7974_v2 = vpop.f32.mrb[100].mxu1  ;;  %v5082_v1 = vmax.f32 %v10522_v59, 0.0 }
 0xb76   : > { %v5018_v44 = vadd.f32 %v7974_v2, %v4979_v41  ;;  %v4596_v18 = vpop.f32.mrb[101].mxu1  ;;  %v5114_v22 = vpack.c.bf16 %v5084_v29, %v5083_v62 }
 0xb77   : > { %v5016_v42 = vadd.f32 %v4979_v41, %v4596_v18  ;;  %v7975_v23 = vpop.f32.mrb[102].mxu1  ;;  %v5113_v13 = vpack.c.bf16 %v5082_v1, %v5081_v58  ;;  %v4991_v18 = vrot.slane %v4953_v63, %v9391_v49 }
 0xb78   : > { %v10529_v3 = vadd.f32 %v10509_v50, %v5018_v44  ;;  %v5019_v20 = vadd.f32 %v7975_v23, %v4979_v41  ;;  %v4599_v61 = vpop.f32.mrb[103].mxu1  ;;  %5160 = vrot.lane.b32.xlu1 %v5114_v22, %s8451_s14  ;;  %v4939_v44 = vcombine.high %v4937_v38, %v4937_v38 }
 0xb79   : > { %v10532_v52 = vadd.f32 %v10509_v50, %v5016_v42  ;;  %v5017_v46 = vadd.f32 %v4979_v41, %v4599_v61  ;;  %5158 = vrot.lane.b32.xlu0 %v5113_v13, %s8451_s14 }
 0xb7a   : > { %v10535_v39 = vadd.f32 %v10509_v50, %v5019_v20  ;;  %v5087_v47 = vmax.f32 %v10529_v3, 0.0 }
 0xb7b   : > { %v10540_v8 = vadd.f32 %v10509_v50, %v5017_v46  ;;  %v5085_v21 = vmax.f32 %v10532_v52, 0.0 }
 0xb7c   : > { %v5088_v7 = vmax.f32 %v10535_v39, 0.0 }
 0xb7d   : > { %v5086_v36 = vmax.f32 %v10540_v8, 0.0  ;;  %v7978_v25 = vpop.f32.mrb[104].mxu1 }
 0xb7e   : > { %v5116_v54 = vpack.c.bf16 %v5088_v7, %v5087_v47  ;;  %v5022_v45 = vadd.f32 %v7978_v25, %v4983_v6  ;;  %v4612_v43 = vpop.f32.mrb[105].mxu1 }
 0xb7f   : > { %v5115_v37 = vpack.c.bf16 %v5086_v36, %v5085_v21  ;;  %v5020_v57 = vadd.f32 %v4983_v6, %v4612_v43  ;;  %v7979_v15 = vpop.f32.mrb[106].mxu1  ;;  %v4967_v21 = vrot.slane %v4939_v44, %v9385_v31 }
 0xb80   : > { %v10550_v11 = vadd.f32 %v10509_v50, %v5022_v45  ;;  %v5023_v51 = vadd.f32 %v7979_v15, %v4983_v6  ;;  %v4615_v55 = vpop.f32.mrb[107].mxu1  ;;  %5164 = vrot.lane.b32.xlu1 %v5116_v54, %s8451_s14 }
 0xb81   : > { %v10554_v17 = vadd.f32 %v10509_v50, %v5020_v57  ;;  %v5021_v16 = vadd.f32 %v4983_v6, %v4615_v55  ;;  %5162 = vrot.lane.b32.xlu0 %v5115_v37, %s8451_s14  ;;  %v4995_v30 = vrot.slane %v4967_v21, %v9391_v49 }
 0xb82   : > { %v10558_v60 = vadd.f32 %v10509_v50, %v5023_v51  ;;  %v5091_v4 = vmax.f32 %v10550_v11, 0.0 }
 0xb83   : > { %v10561_v27 = vadd.f32 %v10509_v50, %v5021_v16  ;;  %v5089_v9 = vmax.f32 %v10554_v17, 0.0 }
 0xb84   : > { %v5092_v34 = vmax.f32 %v10558_v60, 0.0 }
 0xb85   : > { %v5090_v14 = vmax.f32 %v10561_v27, 0.0  ;;  %v7982_v28 = vpop.f32.mrb[108].mxu1 }
 0xb86   : > { %v5118_v53 = vpack.c.bf16 %v5092_v34, %v5091_v4  ;;  %v5026_v5 = vadd.f32 %v7982_v28, %v4987_v33  ;;  %v4628_v32 = vpop.f32.mrb[109].mxu1  ;;  %v4969_v28 = vcombine.high %v4953_v63, %v4953_v63 }
 0xb87   : > { %v5117_v0 = vpack.c.bf16 %v5090_v14, %v5089_v9  ;;  %v5024_v48 = vadd.f32 %v4987_v33, %v4628_v32  ;;  %v7983_v35 = vpop.f32.mrb[110].mxu1 }
 0xb88   : > { %v10571_v24 = vadd.f32 %v10509_v50, %v5026_v5  ;;  %v5027_v41 = vadd.f32 %v7983_v35, %v4987_v33  ;;  %v4631_v62 = vpop.f32.mrb[111].mxu1  ;;  %5168 = vrot.lane.b32.xlu1 %v5118_v53, %s8451_s14 }
 0xb89   : > { %v10575_v58 = vadd.f32 %v10509_v50, %v5024_v48  ;;  %v5025_v2 = vadd.f32 %v4987_v33, %v4631_v62  ;;  %5166 = vrot.lane.b32.xlu0 %v5117_v0, %s8451_s14 }
 0xb8a   : > { %v10579_v29 = vadd.f32 %v10509_v50, %v5027_v41  ;;  %v5095_v56 = vmax.f32 %v10571_v24, 0.0 }
 0xb8b   : > { %v10582_v1 = vadd.f32 %v10509_v50, %v5025_v2  ;;  %v5093_v23 = vmax.f32 %v10575_v58, 0.0  ;;  %v4999_v2 = vrot.slane %v4969_v28, %v9391_v49 }
 0xb8c   : > { %v5096_v42 = vmax.f32 %v10579_v29, 0.0 }
 0xb8d   : > { %v5094_v22 = vmax.f32 %v10582_v1, 0.0  ;;  %v7986_v13 = vpop.f32.mrb[112].mxu1 }
 0xb8e   : > { %v5120_v20 = vpack.c.bf16 %v5096_v42, %v5095_v56  ;;  %v5030_v61 = vadd.f32 %v7986_v13, %v4991_v18  ;;  %v4644_v46 = vpop.f32.mrb[113].mxu1 }
 0xb8f   : > { %v5119_v6 = vpack.c.bf16 %v5094_v22, %v5093_v23  ;;  %v5028_v47 = vadd.f32 %v4991_v18, %v4644_v46  ;;  %v7987_v7 = vpop.f32.mrb[114].mxu1  ;;  %v4971_v46 = vcombine.high %v4967_v21, %v4967_v21 }
 0xb90   : > { %v10591_v36 = vadd.f32 %v10509_v50, %v5030_v61  ;;  %v5031_v25 = vadd.f32 %v7987_v7, %v4991_v18  ;;  %v4647_v54 = vpop.f32.mrb[115].mxu1  ;;  %5172 = vrot.lane.b32.xlu1 %v5120_v20, %s8451_s14 }
 0xb91   : > { %v10595_v45 = vadd.f32 %v10509_v50, %v5028_v47  ;;  %v5029_v43 = vadd.f32 %v4991_v18, %v4647_v54  ;;  %5170 = vrot.lane.b32.xlu0 %v5119_v6, %s8451_s14 }
 0xb92   : > { %v10599_v37 = vadd.f32 %v10509_v50, %v5031_v25  ;;  %v5099_v15 = vmax.f32 %v10591_v36, 0.0 }
 0xb93   : > { %v10602_v57 = vadd.f32 %v10509_v50, %v5029_v43  ;;  %v5097_v51 = vmax.f32 %v10595_v45, 0.0 }
 0xb94   : > { %v5100_v12 = vmax.f32 %v10599_v37, 0.0 }
 0xb95   : > { %v5098_v55 = vmax.f32 %v10602_v57, 0.0  ;;  %v7990_v16 = vpop.f32.mrb[116].mxu1 }
 0xb96   : > { %v5122_v38 = vpack.c.bf16 %v5100_v12, %v5099_v15  ;;  %v5034_v4 = vadd.f32 %v7990_v16, %v4995_v30  ;;  %v4660_v34 = vpop.f32.mrb[117].mxu1 }
 0xb97   : > { %v5121_v33 = vpack.c.bf16 %v5098_v55, %v5097_v51  ;;  %v5032_v9 = vadd.f32 %v4995_v30, %v4660_v34  ;;  %v7991_v14 = vpop.f32.mrb[118].mxu1 }
 0xb98   : > { %v10610_v53 = vadd.f32 %v10509_v50, %v5034_v4  ;;  %v5035_v5 = vadd.f32 %v7991_v14, %v4995_v30  ;;  %v4663_v32 = vpop.f32.mrb[119].mxu1  ;;  %5176 = vrot.lane.b32.xlu1 %v5122_v38, %s8451_s14 }
 0xb99   : > { %v10614_v0 = vadd.f32 %v10509_v50, %v5032_v9  ;;  %v5033_v48 = vadd.f32 %v4995_v30, %v4663_v32  ;;  %5174 = vrot.lane.b32.xlu0 %v5121_v33, %s8451_s14  ;;  %v5003_v30 = vrot.slane %v4971_v46, %v9391_v49 }
 0xb9a   : > { %v10618_v35 = vadd.f32 %v10509_v50, %v5035_v5  ;;  %v5103_v63 = vmax.f32 %v10610_v53, 0.0 }
 0xb9b   : > { %v10621_v41 = vadd.f32 %v10509_v50, %v5033_v48  ;;  %v5101_v44 = vmax.f32 %v10614_v0, 0.0 }
 0xb9c   : > { %v5104_v62 = vmax.f32 %v10618_v35, 0.0 }
 0xb9d   : > { %v5102_v18 = vmax.f32 %v10621_v41, 0.0  ;;  %v7994_v56 = vpop.f32.mrb[120].mxu1 }
 0xb9e   : > { %v5124_v42 = vpack.c.bf16 %v5104_v62, %v5103_v63  ;;  %v5038_v23 = vadd.f32 %v7994_v56, %v4999_v2  ;;  %v4676_v22 = vpop.f32.mrb[121].mxu1 }
 0xb9f   : > { %v5123_v13 = vpack.c.bf16 %v5102_v18, %v5101_v44  ;;  %v5036_v20 = vadd.f32 %v4999_v2, %v4676_v22  ;;  %v7995_v61 = vpop.f32.mrb[122].mxu1 }
 0xba0   : > { %v10629_v6 = vadd.f32 %v10509_v50, %v5038_v23  ;;  %v5039_v47 = vadd.f32 %v7995_v61, %v4999_v2  ;;  %v4679_v7 = vpop.f32.mrb[123].mxu1  ;;  %5180 = vrot.lane.b32.xlu1 %v5124_v42, %s8451_s14 }
 0xba1   : > { %v10633_v25 = vadd.f32 %v10509_v50, %v5036_v20  ;;  %v5037_v54 = vadd.f32 %v4999_v2, %v4679_v7  ;;  %5178 = vrot.lane.b32.xlu0 %v5123_v13, %s8451_s14 }
 0xba2   : > { %v10637_v43 = vadd.f32 %v10509_v50, %v5039_v47  ;;  %v5107_v21 = vmax.f32 %v10629_v6, 0.0 }
 0xba3   : > { %v10640_v15 = vadd.f32 %v10509_v50, %v5037_v54  ;;  %v5105_v51 = vmax.f32 %v10633_v25, 0.0 }
 0xba4   : > { %v5108_v12 = vmax.f32 %v10637_v43, 0.0 }
 0xba5   : > { %v5106_v55 = vmax.f32 %v10640_v15, 0.0  ;;  %v7998_v16 = vpop.f32.mrb[124].mxu1 }
 0xba6   : > { %v5126_v38 = vpack.c.bf16 %v5108_v12, %v5107_v21  ;;  %v5042_v4 = vadd.f32 %v7998_v16, %v5003_v30  ;;  %v4692_v34 = vpop.f32.mrb[125].mxu1 }
 0xba7   : > { %v5125_v33 = vpack.c.bf16 %v5106_v55, %v5105_v51  ;;  %v5040_v9 = vadd.f32 %v5003_v30, %v4692_v34  ;;  %v7999_v14 = vpop.f32.mrb[126].mxu1  ;;  %v10688_v34 = vld [vmem:[%s11415_s1 + $0xb] ss:$0 sm:$0xff] }
 0xba8   : > { %v10648_v28 = vadd.f32 %v10509_v50, %v5042_v4  ;;  %v5043_v5 = vadd.f32 %v7999_v14, %v5003_v30  ;;  %v4695_v32 = vpop.f32.mrb[127].mxu1  ;;  %5184 = vrot.lane.b32.xlu1 %v5126_v38, %s8451_s14 }
 0xba9   : > { %v10652_v48 = vadd.f32 %v10509_v50, %v5040_v9  ;;  %v5041_v63 = vadd.f32 %v5003_v30, %v4695_v32  ;;  %5182 = vrot.lane.b32.xlu0 %v5125_v33, %s8451_s14 }
 0xbaa   : > { %v10656_v62 = vadd.f32 %v10509_v50, %v5043_v5  ;;  %v5111_v44 = vmax.f32 %v10648_v28, 0.0 }
 0xbab   : > { %v10659_v2 = vadd.f32 %v10509_v50, %v5041_v63  ;;  %v5109_v56 = vmax.f32 %v10652_v48, 0.0 }
 0xbac   : > { %v5112_v18 = vmax.f32 %v10656_v62, 0.0 }
 0xbad   : > { %v5110_v42 = vmax.f32 %v10659_v2, 0.0 }
 0xbae   : > { %v5128_v23 = vpack.c.bf16 %v5112_v18, %v5111_v44 }
 0xbaf   : > { %v5127_v22 = vpack.c.bf16 %v5110_v42, %v5109_v56 }
 0xbb0   : > { %5188 = vrot.lane.b32.xlu1 %v5128_v23, %s8451_s14 }
 0xbb1   : > { %5186 = vrot.lane.b32.xlu0 %v5127_v22, %s8451_s14 }
 0xbea   : > { %v5161_v20 = vpop.permute.xlu1 %5160 }
 0xbeb   : > { %v5159_v13 = vpop.permute.xlu0 %5158 }
 0xbec   : > { %8028 = vmatprep.mubr.msk.bf16.mxu1 %vm1444_vm0, %v5159_v13 }
 0xbed   : > { %8029 = vmatmul.mubr.msk.bf16.vlgmr.msra.gmra.mrb[128].mxu1 %vm1444_vm0, %v5161_v20 }
 0xbf2   : > { %v5165_v61 = vpop.permute.xlu1 %5164 }
 0xbf3   : > { %v5163_v50 = vpop.permute.xlu0 %5162 }
 0xbf4   : > { %8032 = vmatprep.mubr.msk.bf16.mxu1 %vm1444_vm0, %v5163_v50 }
 0xbf5   : > { %8033 = vmatmul.mubr.msk.bf16.gmra.mrb[132].mxu1 %vm1444_vm0, %v5165_v61 }
 0xbfa   : > { %v5169_v47 = vpop.permute.xlu1 %5168 }
 0xbfb   : > { %v5167_v46 = vpop.permute.xlu0 %5166 }
 0xbfc   : > { %8036 = vmatprep.mubr.msk.bf16.mxu1 %vm1444_vm0, %v5167_v46 }
 0xbfd   : > { %8037 = vmatmul.mubr.msk.bf16.gmra.mrb[136].mxu1 %vm1444_vm0, %v5169_v47 }
 0xc02   : > { %v5173_v54 = vpop.permute.xlu1 %5172 }
 0xc03   : > { %v5171_v7 = vpop.permute.xlu0 %5170 }
 0xc04   : > { %8040 = vmatprep.mubr.msk.bf16.mxu1 %vm1444_vm0, %v5171_v7 }
 0xc05   : > { %8041 = vmatmul.mubr.msk.bf16.gmra.mrb[140].mxu1 %vm1444_vm0, %v5173_v54 }
 0xc0a   : > { %v5177_v12 = vpop.permute.xlu1 %5176 }
 0xc0b   : > { %v5175_v21 = vpop.permute.xlu0 %5174 }
 0xc0c   : > { %8044 = vmatprep.mubr.msk.bf16.mxu1 %vm1444_vm0, %v5175_v21 }
 0xc0d   : > { %8045 = vmatmul.mubr.msk.bf16.gmra.mrb[144].mxu1 %vm1444_vm0, %v5177_v12 }
 0xc12   : > { %v5181_v51 = vpop.permute.xlu1 %5180 }
 0xc13   : > { %v5179_v30 = vpop.permute.xlu0 %5178 }
 0xc14   : > { %8048 = vmatprep.mubr.msk.bf16.mxu1 %vm1444_vm0, %v5179_v30 }
 0xc15   : > { %8049 = vmatmul.mubr.msk.bf16.gmra.mrb[148].mxu1 %vm1444_vm0, %v5181_v51 }
 0xc1a   : > { %v5185_v16 = vpop.permute.xlu1 %5184 }
 0xc1b   : > { %v5183_v55 = vpop.permute.xlu0 %5182 }
 0xc1c   : > { %8052 = vmatprep.mubr.msk.bf16.mxu1 %vm1444_vm0, %v5183_v55 }
 0xc1d   : > { %8053 = vmatmul.mubr.msk.bf16.gmra.mrb[152].mxu1 %vm1444_vm0, %v5185_v16 }
 0xc22   : > { %v5189_v4 = vpop.permute.xlu1 %5188 }
 0xc23   : > { %v5187_v38 = vpop.permute.xlu0 %5186 }
 0xc24   : > { %8056 = vmatprep.mubr.msk.bf16.mxu1 %vm1444_vm0, %v5187_v38 }
 0xc25   : > { %8057 = vmatmul.mubr.msk.bf16.gmra.mrb[156].mxu1 %vm1444_vm0, %v5189_v4 }
 0xc26   : > { %8124 = vmatprep.mubr.msk.bf16.mxu1 %vm8453_vm9, %v8452_v26 }
 0xcc0   : > { %v8030_v33 = vpop.f32.mrb[128].mxu1 }
 0xcc1   : > { %v5305_v9 = vadd.f32 %v8030_v33, %v10688_v34  ;;  %v5296_v14 = vpop.f32.mrb[129].mxu1 }
 0xcc2   : > { %v5297_v5 = vadd.f32 %v10688_v34, %v5296_v14  ;;  %v8031_v32 = vpop.f32.mrb[130].mxu1 }
 0xcc3   : > { %v5425_v63 = vadd.f32 %v5305_v9, %v10512_v19  ;;  %v5308_v44 = vadd.f32 %v8031_v32, %v10688_v34  ;;  %v5299_v18 = vpop.f32.mrb[131].mxu1 }
 0xcc4   : > { %v5423_v56 = vadd.f32 %v5297_v5, %v10515_v10  ;;  %v5300_v42 = vadd.f32 %v10688_v34, %v5299_v18 }
 0xcc5   : > { %v5426_v23 = vadd.f32 %v5308_v44, %v10519_v40  ;;  %v5593_v13 = vmax.f32 %v5425_v63, 0.0 }
 0xcc6   : > { %v5424_v22 = vadd.f32 %v5300_v42, %v10522_v59  ;;  %v5455_v20 = vsel %vm1444_vm0, %v5423_v56, -inf  ;;  %v5591_v46 = vmax.f32 %v5423_v56, 0.0  ;;  %v5458_v59 = vsel %vm1444_vm0, %v5425_v63, -inf }
 0xcc7   : > { %v5560_v50 = vpack.c.bf16 %v5426_v23, %v5425_v63  ;;  %v5594_v61 = vmax.f32 %v5426_v23, 0.0  ;;  %v5460_v9 = vsel %vm1444_vm0, %v5426_v23, -inf }
 0xcc8   : > { %v5456_v47 = vsel %vm1444_vm0, %v5424_v22, -inf  ;;  %v5559_v19 = vpack.c.bf16 %v5424_v22, %v5423_v56  ;;  %v5592_v7 = vmax.f32 %v5424_v22, 0.0  ;;  %v8034_v54 = vpop.f32.mrb[132].mxu1 }
 0xcc9   : > { %5576 = vst.msk [vmem:[#allocation3 + $0x8] sm:$0xff] %vm1444_vm0, %v5560_v50  ;;  %v5457_v10 = vmax.f32 %v5455_v20, %v5456_v47  ;;  %v5321_v21 = vadd.f32 %v8034_v54, %v10688_v34  ;;  %v5312_v12 = vpop.f32.mrb[133].mxu1  ;;  %v10702_v40 = vpack.c.bf16 %v5594_v61, %v5593_v13 }
 0xcca   : > { %5575 = vst.msk [vmem:[#allocation3] sm:$0xff] %vm1444_vm0, %v5559_v19  ;;  %v5313_v30 = vadd.f32 %v10688_v34, %v5312_v12  ;;  %v8035_v51 = vpop.f32.mrb[134].mxu1  ;;  %v5623_v55 = vpack.c.bf16 %v5592_v7, %v5591_v46 }
 0xccb   : > { %v5459_v16 = vmax.f32 %v5457_v10, %v5458_v59  ;;  %v5429_v38 = vadd.f32 %v5321_v21, %v10529_v3  ;;  %v5324_v4 = vadd.f32 %v8035_v51, %v10688_v34  ;;  %v5315_v33 = vpop.f32.mrb[135].mxu1 }
 0xccc   : > { %v5427_v14 = vadd.f32 %v5313_v30, %v10532_v52  ;;  %v5316_v5 = vadd.f32 %v10688_v34, %v5315_v33  ;;  %5655 = vrot.lane.b32.xlu1 %v5623_v55, %s8451_s14 }
 0xccd   : > { %v5461_v32 = vmax.f32 %v5459_v16, %v5460_v9  ;;  %v5430_v63 = vadd.f32 %v5324_v4, %v10535_v39  ;;  %v5597_v44 = vmax.f32 %v5429_v38, 0.0 }
 0xcce   : > { %v5428_v18 = vadd.f32 %v5316_v5, %v10540_v8  ;;  %v5468_v3 = vsel %vm1444_vm0, %v5427_v14, -inf  ;;  %v5595_v13 = vmax.f32 %v5427_v14, 0.0  ;;  %v5471_v8 = vsel %vm1444_vm0, %v5429_v38, -inf }
 0xccf   : > { %v5462_v56 = vrot.slane %v5461_v32, 4  ;;  %v5562_v42 = vpack.c.bf16 %v5430_v63, %v5429_v38  ;;  %v5598_v22 = vmax.f32 %v5430_v63, 0.0  ;;  %v5473_v55 = vsel %vm1444_vm0, %v5430_v63, -inf }
 0xcd0   : > { %v5469_v23 = vsel %vm1444_vm0, %v5428_v18, -inf  ;;  %v5561_v20 = vpack.c.bf16 %v5428_v18, %v5427_v14  ;;  %v5596_v52 = vmax.f32 %v5428_v18, 0.0  ;;  %v8038_v50 = vpop.f32.mrb[136].mxu1 }
 0xcd1   : > { %v5463_v61 = vmax.f32 %v5461_v32, %v5462_v56  ;;  %5578 = vst.msk [vmem:[#allocation3 + $0x18] sm:$0xff] %vm1444_vm0, %v5562_v42  ;;  %v5470_v46 = vmax.f32 %v5468_v3, %v5469_v23  ;;  %v5337_v39 = vadd.f32 %v8038_v50, %v10688_v34  ;;  %v5328_v47 = vpop.f32.mrb[137].mxu1  ;;  %v10719_v19 = vpack.c.bf16 %v5598_v22, %v5597_v44 }
 0xcd2   : > { %5577 = vst.msk [vmem:[#allocation3 + $0x10] sm:$0xff] %vm1444_vm0, %v5561_v20  ;;  %v5329_v7 = vadd.f32 %v10688_v34, %v5328_v47  ;;  %v8039_v54 = vpop.f32.mrb[138].mxu1  ;;  %v5625_v10 = vpack.c.bf16 %v5596_v52, %v5595_v13 }
 0xcd3   : > { %v5464_v21 = vrot.slane %v5463_v61, 2  ;;  %v5472_v12 = vmax.f32 %v5470_v46, %v5471_v8  ;;  %v5433_v59 = vadd.f32 %v5337_v39, %v10550_v11  ;;  %v5340_v30 = vadd.f32 %v8039_v54, %v10688_v34  ;;  %v5331_v51 = vpop.f32.mrb[139].mxu1 }
 0xcd4   : > { %v5431_v16 = vadd.f32 %v5329_v7, %v10554_v17  ;;  %v5332_v4 = vadd.f32 %v10688_v34, %v5331_v51  ;;  %5659 = vrot.lane.b32.xlu1 %v5625_v10, %s8451_s14 }
 0xcd5   : > { %v5465_v38 = vmax.f32 %v5463_v61, %v5464_v21  ;;  %v5474_v33 = vmax.f32 %v5472_v12, %v5473_v55  ;;  %v5484_v9 = vsel %vm1444_vm0, %v5433_v59, -inf  ;;  %v5434_v14 = vadd.f32 %v5340_v30, %v10558_v60 }
 0xcd6   : > { %v5432_v5 = vadd.f32 %v5332_v4, %v10561_v27  ;;  %v5601_v44 = vmax.f32 %v5433_v59, 0.0  ;;  %v5481_v18 = vsel %vm1444_vm0, %v5431_v16, -inf }
 0xcd7   : > { %v5466_v11 = vrot.slane %v5465_v38, 1  ;;  %v5475_v32 = vrot.slane %v5474_v33, 4  ;;  %v5486_v63 = vsel %vm1444_vm0, %v5434_v14, -inf  ;;  %v5564_v17 = vpack.c.bf16 %v5434_v14, %v5433_v59 }
 0xcd8   : > { %v5602_v56 = vmax.f32 %v5434_v14, 0.0  ;;  %v5482_v3 = vsel %vm1444_vm0, %v5432_v5, -inf  ;;  %v8042_v42 = vpop.f32.mrb[140].mxu1  ;;  %v5563_v20 = vpack.c.bf16 %v5432_v5, %v5431_v16  ;;  %v5600_v60 = vmax.f32 %v5432_v5, 0.0 }
 0xcd9   : > { %v5467_v22 = vmax.f32 %v5465_v38, %v5466_v11  ;;  %v5476_v13 = vmax.f32 %v5474_v33, %v5475_v32  ;;  %v5483_v23 = vmax.f32 %v5481_v18, %v5482_v3  ;;  %v5344_v52 = vpop.f32.mrb[141].mxu1  ;;  %5580 = vst.msk [vmem:[#allocation3 + $0x28] sm:$0xff] %vm1444_vm0, %v5564_v17  ;;  %v5353_v27 = vadd.f32 %v8042_v42, %v10688_v34 }
 0xcda   : > { %v5345_v50 = vadd.f32 %v10688_v34, %v5344_v52  ;;  %v8043_v61 = vpop.f32.mrb[142].mxu1  ;;  %v10739_v46 = vpack.c.bf16 %v5602_v56, %v5601_v44  ;;  %5579 = vst.msk [vmem:[#allocation3 + $0x20] sm:$0xff] %vm1444_vm0, %v5563_v20  ;;  %v5599_v38 = vmax.f32 %v5431_v16, 0.0 }
 0xcdb   : > { %v7331_v39 = vpack.c.bf16 %v5467_v22, %v5467_v22  ;;  %v6010_v47 = vmax.f32 %v5467_v22, 0.0  ;;  %v5477_v8 = vrot.slane %v5476_v13, 2  ;;  %v5485_v7 = vmax.f32 %v5483_v23, %v5484_v9  ;;  %v5347_v54 = vpop.f32.mrb[143].mxu1 }
 0xcdc   : > { %v10743_v10 = vadd.f32 %v5353_v27, %v10571_v24  ;;  %v10746_v21 = vadd.f32 %v5345_v50, %v10575_v58  ;;  %v5356_v12 = vadd.f32 %v8043_v61, %v10688_v34  ;;  %v5348_v59 = vadd.f32 %v10688_v34, %v5347_v54 }
 0xcdd   : > { %v10750_v30 = vpack.c.bf16 %v6010_v47, %v6010_v47  ;;  %v5478_v51 = vmax.f32 %v5476_v13, %v5477_v8  ;;  %v5487_v55 = vmax.f32 %v5485_v7, %v5486_v63  ;;  %v5992_v4 = vunpack.c.l.b16 %v7331_v39 }
 0xcde   : > { %v5497_v33 = vsel %vm1444_vm0, %v10743_v10, -inf  ;;  %v5605_v24 = vmax.f32 %v10743_v10, 0.0  ;;  %v10756_v58 = vadd.f32 %v5356_v12, %v10579_v29  ;;  %v5494_v5 = vsel %vm1444_vm0, %v10746_v21, -inf  ;;  %v8360_v29 = vld [vmem:[%s11416_s2 + $0x240] sm:$0xff]  }
 0xcdf   : > { %v5479_v9 = vrot.slane %v5478_v51, 1  ;;  %v5488_v14 = vrot.slane %v5487_v55, 4  ;;  %v5603_v11 = vmax.f32 %v10746_v21, 0.0  ;;  %v10762_v32 = vadd.f32 %v5348_v59, %v10582_v1  ;;  %8109 = vmatpush3.bf16.msra.mxu1 %v8360_v29 }
 0xce0   : > { %v5627_v44 = vpack.c.bf16 %v5600_v60, %v5599_v38  ;;  %v8046_v16 = vpop.f32.mrb[144].mxu1  ;;  %v6050_v18 = vunpack.c.l.b16 %v10750_v30  ;;  %v5566_v56 = vpack.c.bf16 %v10756_v58, %v10743_v10  ;;  %v5499_v42 = vsel %vm1444_vm0, %v10756_v58, -inf  ;;  %8110 = vmatprep.subr.bf16.mxu1 %v8452_v26 }
 0xce1   : > { %v5480_v63 = vmax.f32 %v5478_v51, %v5479_v9  ;;  %v5489_v17 = vmax.f32 %v5487_v55, %v5488_v14  ;;  %v5360_v3 = vpop.f32.mrb[145].mxu1  ;;  %v5606_v1 = vmax.f32 %v10756_v58, 0.0  ;;  %v5495_v22 = vsel %vm1444_vm0, %v10762_v32, -inf }
 0xce2   : > { %v5565_v13 = vpack.c.bf16 %v10762_v32, %v10746_v21  ;;  %5663 = vrot.lane.b32.xlu1 %v5627_v44, %s8451_s14  ;;  %v8047_v23 = vpop.f32.mrb[146].mxu1  ;;  %5582 = vst.msk [vmem:[#allocation3 + $0x38] sm:$0xff] %vm1444_vm0, %v5566_v56  ;;  %v5496_v27 = vmax.f32 %v5494_v5, %v5495_v22  ;;  %v5369_v61 = vadd.f32 %v8046_v16, %v10688_v34  ;;  %v5604_v16 = vmax.f32 %v10762_v32, 0.0 }
 0xce3   : > { %v7332_v20 = vpack.c.bf16 %v5480_v63, %v5480_v63  ;;  %v6011_v52 = vmax.f32 %v5480_v63, 0.0  ;;  %v5490_v60 = vrot.slane %v5489_v17, 2  ;;  %v5363_v50 = vpop.f32.mrb[147].mxu1  ;;  %v5361_v39 = vadd.f32 %v10688_v34, %v5360_v3 }
 0xce4   : > { %5581 = vst.msk [vmem:[#allocation3 + $0x30] sm:$0xff] %vm1444_vm0, %v5565_v13  ;;  %v5372_v47 = vadd.f32 %v8047_v23, %v10688_v34  ;;  %v5364_v8 = vadd.f32 %v10688_v34, %v5363_v50  ;;  %v5498_v59 = vmax.f32 %v5496_v27, %v5497_v33  ;;  %v10788_v51 = vadd.f32 %v5369_v61, %v10591_v36  ;;  %v8361_v33 = vld [vmem:[%s11416_s2 + $0x248] sm:$0xff]  }
 0xce5   : > { %v5993_v7 = vunpack.c.l.b16 %v7332_v20  ;;  %v10785_v54 = vpack.c.bf16 %v6011_v52, %v6011_v52  ;;  %v5491_v12 = vmax.f32 %v5489_v17, %v5490_v60  ;;  %v10791_v55 = vadd.f32 %v5361_v39, %v10595_v45  ;;  %8111 = vmatpush3.bf16.msra.mxu1 %v8361_v33 }
 0xce6   : > { %v10794_v38 = vadd.f32 %v5372_v47, %v10599_v37  ;;  %v5440_v9 = vadd.f32 %v5364_v8, %v10602_v57  ;;  %v5500_v44 = vmax.f32 %v5498_v59, %v5499_v42  ;;  %v5510_v45 = vsel %vm1444_vm0, %v10788_v51, -inf  ;;  %8112 = vmatprep.subr.bf16.mxu1 %v8452_v26 }
 0xce7   : > { %v6000_v14 = vsel %vm2232_vm1, %v5993_v7, %v5992_v4  ;;  %v5492_v5 = vrot.slane %v5491_v12, 1  ;;  %v6051_v36 = vunpack.c.l.b16 %v10785_v54  ;;  %v5609_v37 = vmax.f32 %v10788_v51, 0.0 }
 0xce8   : > { %v5507_v57 = vsel %vm1444_vm0, %v10791_v55, -inf  ;;  %v8050_v63 = vpop.f32.mrb[148].mxu1  ;;  %v5501_v17 = vrot.slane %v5500_v44, 4  ;;  %v5607_v56 = vmax.f32 %v10791_v55, 0.0  ;;  %v5568_v32 = vpack.c.bf16 %v10794_v38, %v10788_v51 }
 0xce9   : > { %v5493_v4 = vmax.f32 %v5491_v12, %v5492_v5  ;;  %v5376_v3 = vpop.f32.mrb[149].mxu1  ;;  %v5512_v29 = vsel %vm1444_vm0, %v10794_v38, -inf  ;;  %v5508_v42 = vsel %vm1444_vm0, %v5440_v9, -inf  ;;  %v5567_v22 = vpack.c.bf16 %v5440_v9, %v10791_v55 }
 0xcea   : > { %v5608_v13 = vmax.f32 %v5440_v9, 0.0  ;;  %v8051_v23 = vpop.f32.mrb[150].mxu1  ;;  %v5502_v60 = vmax.f32 %v5500_v44, %v5501_v17  ;;  %5584 = vst.msk [vmem:[#allocation3 + $0x48] sm:$0xff] %vm1444_vm0, %v5568_v32  ;;  %v5509_v27 = vmax.f32 %v5507_v57, %v5508_v42  ;;  %v5629_v61 = vpack.c.bf16 %v5604_v16, %v5603_v11 }
 0xceb   : > { %v7333_v20 = vpack.c.bf16 %v5493_v4, %v5493_v4  ;;  %v6012_v52 = vmax.f32 %v5493_v4, 0.0  ;;  %v5379_v50 = vpop.f32.mrb[151].mxu1  ;;  %5583 = vst.msk [vmem:[#allocation3 + $0x40] sm:$0xff] %vm1444_vm0, %v5567_v22  ;;  %v5385_v39 = vadd.f32 %v8050_v63, %v10688_v34  ;;  %v5377_v47 = vadd.f32 %v10688_v34, %v5376_v3 }
 0xcec   : > { %v5388_v8 = vadd.f32 %v8051_v23, %v10688_v34  ;;  %v5503_v59 = vrot.slane %v5502_v60, 2  ;;  %v5511_v55 = vmax.f32 %v5509_v27, %v5510_v45  ;;  %5667 = vrot.lane.b32.xlu1 %v5629_v61, %s8451_s14  ;;  %v5380_v11 = vadd.f32 %v10688_v34, %v5379_v50  ;;  %v8362_v45 = vld [vmem:[%s11416_s2 + $0x250] sm:$0xff]  }
 0xced   : > { %v5994_v7 = vunpack.c.l.b16 %v7333_v20  ;;  %v10823_v12 = vpack.c.bf16 %v6012_v52, %v6012_v52  ;;  %v10827_v9 = vadd.f32 %v5385_v39, %v10610_v53  ;;  %v10830_v5 = vadd.f32 %v5377_v47, %v10614_v0  ;;  %8113 = vmatpush3.bf16.msra.mxu1 %v8362_v45 }
 0xcee   : > { %v10833_v21 = vadd.f32 %v5388_v8, %v10618_v35  ;;  %v5504_v16 = vmax.f32 %v5502_v60, %v5503_v59  ;;  %v5610_v33 = vmax.f32 %v10794_v38, 0.0  ;;  %v5513_v57 = vmax.f32 %v5511_v55, %v5512_v29  ;;  %8114 = vmatprep.subr.bf16.mxu1 %v8452_v26 }
 0xcef   : > { %v6001_v44 = vsel %vm2234_vm2, %v5994_v7, %v6000_v14  ;;  %v6052_v53 = vunpack.c.l.b16 %v10823_v12  ;;  %v5523_v0 = vsel %vm1444_vm0, %v10827_v9, -inf  ;;  %v5613_v35 = vmax.f32 %v10827_v9, 0.0 }
 0xcf0   : > { %v5520_v63 = vsel %vm1444_vm0, %v10830_v5, -inf  ;;  %v8054_v4 = vpop.f32.mrb[152].mxu1  ;;  %v5505_v14 = vrot.slane %v5504_v16, 1  ;;  %v5514_v17 = vrot.slane %v5513_v57, 4  ;;  %v5611_v32 = vmax.f32 %v10830_v5, 0.0 }
 0xcf1   : > { %v5570_v3 = vpack.c.bf16 %v10833_v21, %v10827_v9  ;;  %v5392_v29 = vpop.f32.mrb[153].mxu1  ;;  %v5525_v42 = vsel %vm1444_vm0, %v10833_v21, -inf  ;;  %v5444_v22 = vadd.f32 %v5380_v11, %v10621_v41  ;;  %v5631_v23 = vpack.c.bf16 %v5608_v13, %v5607_v56 }
 0xcf2   : > { %v5401_v20 = vadd.f32 %v8054_v4, %v10688_v34  ;;  %v8055_v52 = vpop.f32.mrb[154].mxu1  ;;  %v5506_v60 = vmax.f32 %v5504_v16, %v5505_v14  ;;  %v5515_v27 = vmax.f32 %v5513_v57, %v5514_v17  ;;  %v5393_v50 = vadd.f32 %v10688_v34, %v5392_v29 }
 0xcf3   : > { %5586 = vst.msk [vmem:[#allocation3 + $0x58] sm:$0xff] %vm1444_vm0, %v5570_v3  ;;  %v5404_v61 = vadd.f32 %v8055_v52, %v10688_v34  ;;  %v5395_v39 = vpop.f32.mrb[155].mxu1  ;;  %v5614_v47 = vmax.f32 %v10833_v21, 0.0  ;;  %v5521_v8 = vsel %vm1444_vm0, %v5444_v22, -inf  ;;  %v5569_v41 = vpack.c.bf16 %v5444_v22, %v10830_v5  ;;  %5671 = vrot.lane.b32.xlu1 %v5631_v23, %s8451_s14 }
 0xcf4   : > { %v10863_v56 = vadd.f32 %v5401_v20, %v10629_v6  ;;  %v7334_v13 = vpack.c.bf16 %v5506_v60, %v5506_v60  ;;  %v6013_v7 = vmax.f32 %v5506_v60, 0.0  ;;  %v5516_v59 = vrot.slane %v5515_v27, 2 }
 0xcf5   : > { %v5522_v55 = vmax.f32 %v5520_v63, %v5521_v8  ;;  %v5612_v11 = vmax.f32 %v5444_v22, 0.0  ;;  %5585 = vst.msk [vmem:[#allocation3 + $0x50] sm:$0xff] %vm1444_vm0, %v5569_v41  ;;  %v10871_v57 = vadd.f32 %v5393_v50, %v10633_v25  ;;  %v10874_v5 = vadd.f32 %v5404_v61, %v10637_v43  ;;  %v8363_v63 = vld [vmem:[%s11416_s2 + $0x258] sm:$0xff]  }
 0xcf6   : > { %v10868_v16 = vsel %vm1444_vm0, %v10863_v56, -inf  ;;  %v5995_v45 = vunpack.c.l.b16 %v7334_v13  ;;  %v10876_v6 = vpack.c.bf16 %v6013_v7, %v6013_v7  ;;  %v5517_v4 = vmax.f32 %v5515_v27, %v5516_v59  ;;  %8115 = vmatpush3.bf16.msra.mxu1 %v8363_v63  ;;  %v8364_v59 = vld [vmem:[%s11416_s2 + $0x260] sm:$0xff]  }
 0xcf7   : > { %v5524_v14 = vmax.f32 %v5522_v55, %v5523_v0  ;;  %v5617_v17 = vmax.f32 %v10863_v56, 0.0  ;;  %v5533_v3 = vsel %vm1444_vm0, %v10871_v57, -inf  ;;  %v5615_v25 = vmax.f32 %v10871_v57, 0.0  ;;  %8116 = vmatprep.subr.bf16.mxu1 %v8452_v26 }
 0xcf8   : > { %v5572_v43 = vpack.c.bf16 %v10874_v5, %v10863_v56  ;;  %v8058_v29 = vpop.f32.mrb[156].mxu1  ;;  %v6002_v22 = vsel %vm2236_vm4, %v5995_v45, %v6001_v44  ;;  %v5518_v23 = vrot.slane %v5517_v4, 1  ;;  %v5538_v0 = vsel %vm1444_vm0, %v10874_v5, -inf }
 0xcf9   : > { %v5526_v20 = vmax.f32 %v5524_v14, %v5525_v42  ;;  %v5408_v52 = vpop.f32.mrb[157].mxu1  ;;  %v6053_v60 = vunpack.c.l.b16 %v10876_v6  ;;  %v5396_v27 = vadd.f32 %v10688_v34, %v5395_v39  ;;  %v5633_v50 = vpack.c.bf16 %v5612_v11, %v5611_v32  ;;  %v8365_v32 = vld [vmem:[%s11416_s2 + $0x200] sm:$0xff]   ;;  %v8366_v6 = vld [vmem:[%s11416_s2 + $0x208] sm:$0xff]  }
 0xcfa   : > { %5588 = vst.msk [vmem:[#allocation3 + $0x68] sm:$0xff] %vm1444_vm0, %v5572_v43  ;;  %v5417_v61 = vadd.f32 %v8058_v29, %v10688_v34  ;;  %v8059_v8 = vpop.f32.mrb[158].mxu1  ;;  %v5519_v44 = vmax.f32 %v5517_v4, %v5518_v23  ;;  %v5409_v42 = vadd.f32 %v10688_v34, %v5408_v52  ;;  %v5618_v39 = vmax.f32 %v10874_v5, 0.0  ;;  %8117 = vmatpush3.bf16.msra.mxu1 %v8364_v59  ;;  %v8368_v52 = vld [vmem:[%s11416_s2 + $0x210] sm:$0xff]  }
 0xcfb   : > { %v5527_v41 = vrot.slane %v5526_v20, 4  ;;  %v5420_v13 = vadd.f32 %v8059_v8, %v10688_v34  ;;  %v5411_v7 = vpop.f32.mrb[159].mxu1  ;;  %v5448_v55 = vadd.f32 %v5396_v27, %v10640_v15  ;;  %5675 = vrot.lane.b32.xlu1 %v5633_v50, %s8451_s14  ;;  %v6058_v45 = vsel %vm2232_vm1, %v6051_v36, %v6050_v18  ;;  %8060 = vmatprep.subr.bf16.mxu0 %v8365_v32  ;;  %v8370_v8 = vld [vmem:[%s11416_s2 + $0x270] sm:$0xff]  }
 0xcfc   : > { %v10907_v11 = vadd.f32 %v5417_v61, %v10648_v28  ;;  %v7335_v4 = vpack.c.bf16 %v5519_v44, %v5519_v44  ;;  %v5451_v63 = vadd.f32 %v5409_v42, %v10652_v48  ;;  %v8367_v28 = vld [vmem:[%s11416_s2 + $0x268] sm:$0xff]   ;;  %v5412_v36 = vadd.f32 %v10688_v34, %v5411_v7  ;;  %8118 = vmatprep.subr.bf16.mxu1 %v8452_v26 }
 0xcfd   : > { %v5528_v14 = vmax.f32 %v5526_v20, %v5527_v41  ;;  %v10919_v15 = vadd.f32 %v5420_v13, %v10656_v62  ;;  %v5534_v30 = vsel %vm1444_vm0, %v5448_v55, -inf  ;;  %v5571_v18 = vpack.c.bf16 %v5448_v55, %v10871_v57  ;;  %8061 = vmatpush3.bf16.msra.mxu0 %v8365_v32 }
 0xcfe   : > { %v5616_v54 = vmax.f32 %v5448_v55, 0.0  ;;  %v5996_v43 = vunpack.c.l.b16 %v7335_v4  ;;  %v5535_v29 = vmax.f32 %v5533_v3, %v5534_v30  ;;  %v5549_v62 = vsel %vm1444_vm0, %v10907_v11, -inf  ;;  %8062 = vmatprep.subr.bf16.mxu0 %v8366_v6  ;;  %8119 = vmatpush3.bf16.msra.mxu1 %v8367_v28 }
 0xcff   : > { %v5529_v48 = vrot.slane %v5528_v14, 2  ;;  %5587 = vst.msk [vmem:[#allocation3 + $0x60] sm:$0xff] %vm1444_vm0, %v5571_v18  ;;  %v5621_v23 = vmax.f32 %v10907_v11, 0.0  ;;  %v5546_v20 = vsel %vm1444_vm0, %v5451_v63, -inf  ;;  %v5619_v57 = vmax.f32 %v5451_v63, 0.0  ;;  %8120 = vmatprep.subr.bf16.mxu1 %v8452_v26 }
 0xd00   : > { %v5574_v34 = vpack.c.bf16 %v10919_v15, %v10907_v11  ;;  %v6003_v3 = vsel %vm2238_vm5, %v5996_v43, %v6002_v22  ;;  %v5537_v50 = vmax.f32 %v5535_v29, %v10868_v16  ;;  %v5622_v61 = vmax.f32 %v10919_v15, 0.0 }
 0xd01   : > { %v5530_v27 = vmax.f32 %v5528_v14, %v5529_v48  ;;  %v5452_v41 = vadd.f32 %v5412_v36, %v10659_v2  ;;  %v5635_v42 = vpack.c.bf16 %v5616_v54, %v5615_v25  ;;  %v6014_v13 = vmax.f32 %v5519_v44, 0.0  ;;  %8063 = vmatpush3.bf16.msra.mxu0 %v8366_v6 }
 0xd02   : > { %5590 = vst.msk [vmem:[#allocation3 + $0x78] sm:$0xff] %vm1444_vm0, %v5574_v34  ;;  %v6059_v22 = vsel %vm2234_vm2, %v6052_v53, %v6058_v45  ;;  %v5539_v7 = vmax.f32 %v5537_v50, %v5538_v0  ;;  %v10955_v32 = vpack.c.bf16 %v5606_v1, %v5605_v24  ;;  %8064 = vmatprep.subr.bf16.mxu0 %v8368_v52  ;;  %v8369_v53 = vld [vmem:[%s11416_s2 + $0x218] sm:$0xff]   ;;  %v5551_v9 = vsel %vm1444_vm0, %v10919_v15, -inf }
 0xd03   : > { %v5531_v16 = vrot.slane %v5530_v27, 1  ;;  %v6060_v59 = vsel %vm2236_vm4, %v6053_v60, %v6059_v22  ;;  %v5547_v2 = vsel %vm1444_vm0, %v5452_v41, -inf  ;;  %v5573_v25 = vpack.c.bf16 %v5452_v41, %v5451_v63  ;;  %5679 = vrot.lane.b32.xlu1 %v5635_v42, %s8451_s14  ;;  %8121 = vmatpush3.bf16.msra.mxu1 %v8370_v8  ;;  %v8375_v22 = vld [vmem:[%s11416_s2 + $0x238] sm:$0xff]  }
 0xd04   : > { %v5620_v44 = vmax.f32 %v5452_v41, 0.0  ;;  %v7343_v12 = vpack.c.bf16 %v6014_v13, %v6014_v13  ;;  %v5540_v60 = vrot.slane %v5539_v7, 4  ;;  %v5548_v10 = vmax.f32 %v5546_v20, %v5547_v2  ;;  %8122 = vmatprep.subr.bf16.mxu1 %v8452_v26  ;;  %v8373_v20 = vld [vmem:[%s11416_s2 + $0x278] sm:$0xff]  }
 0xd05   : > { %v5532_v0 = vmax.f32 %v5530_v27, %v5531_v16  ;;  %v10966_v24 = vpack.c.bf16 %v5610_v33, %v5609_v37  ;;  %5589 = vst.msk [vmem:[#allocation3 + $0x70] sm:$0xff] %vm1444_vm0, %v5573_v25  ;;  %v10973_v55 = vpack.c.bf16 %v5614_v47, %v5613_v35  ;;  %v10979_v51 = vpack.c.bf16 %v5618_v39, %v5617_v17  ;;  %v8371_v47 = vld [vmem:[%s11416_s2 + $0x220] sm:$0xff]  }
 0xd06   : > { %v5637_v58 = vpack.c.bf16 %v5620_v44, %v5619_v57  ;;  %v6054_v1 = vunpack.c.l.b16 %v7343_v12  ;;  %v5541_v37 = vmax.f32 %v5539_v7, %v5540_v60  ;;  %v5550_v33 = vmax.f32 %v5548_v10, %v5549_v62  ;;  %8065 = vmatpush3.bf16.msra.mxu0 %v8368_v52 }
 0xd07   : > { %v7336_v38 = vpack.c.bf16 %v5532_v0, %v5532_v0  ;;  %v6015_v11 = vmax.f32 %v5532_v0, 0.0  ;;  %v5638_v35 = vpack.c.bf16 %v5622_v61, %v5621_v23  ;;  %8066 = vmatprep.subr.bf16.mxu0 %v8369_v53  ;;  %v8372_v23 = vld [vmem:[%s11416_s2 + $0x228] sm:$0xff]   ;;  %8123 = vmatpush3.bf16.msra.mxu1 %v8373_v20  ;;  %v8374_v61 = vld [vmem:[%s11416_s2 + $0x230] sm:$0xff]  }
 0xd08   : > { %5683 = vrot.lane.b32.xlu1 %v5637_v58, %s8451_s14  ;;  %v6061_v21 = vsel %vm2238_vm5, %v6054_v1, %v6060_v59  ;;  %v5542_v5 = vrot.slane %v5541_v37, 2  ;;  %v5552_v17 = vmax.f32 %v5550_v33, %v5551_v9 }
 0xd09   : > { %v5997_v56 = vunpack.c.l.b16 %v7336_v38  ;;  %v7344_v39 = vpack.c.bf16 %v6015_v11, %v6015_v11 }
 0xd0a   : > { %v5543_v6 = vmax.f32 %v5541_v37, %v5542_v5  ;;  %v5553_v4 = vrot.slane %v5552_v17, 4  ;;  %8067 = vmatpush3.bf16.msra.mxu0 %v8369_v53 }
 0xd0b   : > { %v6004_v45 = vsel %vm2240_vm6, %v5997_v56, %v6003_v3  ;;  %v6055_v14 = vunpack.c.l.b16 %v7344_v39  ;;  %8068 = vmatprep.subr.bf16.mxu0 %v8371_v47 }
 0xd0c   : > { %v5544_v63 = vrot.slane %v5543_v6, 1  ;;  %v5554_v15 = vmax.f32 %v5552_v17, %v5553_v4 }
 0xd0d   : > { %v6062_v28 = vsel %vm2240_vm6, %v6055_v14, %v6061_v21 }
 0xd0e   : > { %v5555_v30 = vrot.slane %v5554_v15, 2  ;;  %v5545_v18 = vmax.f32 %v5543_v6, %v5544_v63  ;;  %8069 = vmatpush3.bf16.msra.mxu0 %v8371_v47 }
 0xd0f   : > { %8070 = vmatprep.subr.bf16.mxu0 %v8372_v23 }
 0xd10   : > { %v5556_v54 = vmax.f32 %v5554_v15, %v5555_v30  ;;  %v7337_v36 = vpack.c.bf16 %v5545_v18, %v5545_v18  ;;  %v6016_v43 = vmax.f32 %v5545_v18, 0.0  ;;  %v8376_v15 = vld [vmem:[%s11417_s3 + $0x80] sm:$0xff]   ;;  %v8378_v30 = vld [vmem:[%s11417_s3 + $0x90] sm:$0xff]   ;;  %v8379_v18 = vld [vmem:[%s11417_s3 + $0x98] sm:$0xff]  }
 0xd11   : > { %8128 = vmatprep.subr.bf16.mxu1 %v8376_v15 }
 0xd12   : > { %v5557_v48 = vrot.slane %v5556_v54, 1  ;;  %v5998_v29 = vunpack.c.l.b16 %v7337_v36  ;;  %v7345_v62 = vpack.c.bf16 %v6016_v43, %v6016_v43  ;;  %8071 = vmatpush3.bf16.msra.mxu0 %v8372_v23 }
 0xd13   : > { %8072 = vmatprep.subr.bf16.mxu0 %v8374_v61 }
 0xd14   : > { %v5558_v57 = vmax.f32 %v5556_v54, %v5557_v48  ;;  %v6005_v34 = vsel %vm2242_vm7, %v5998_v29, %v6004_v45  ;;  %v6056_v52 = vunpack.c.l.b16 %v7345_v62 }
 0xd16   : > { %v6017_v3 = vmax.f32 %v5558_v57, 0.0  ;;  %v6063_v27 = vsel %vm2242_vm7, %v6056_v52, %v6062_v28  ;;  %v7338_v50 = vpack.c.bf16 %v5558_v57, %v5558_v57  ;;  %8073 = vmatpush3.bf16.msra.mxu0 %v8374_v61  ;;  %v8377_v28 = vld [vmem:[%s11417_s3 + $0x88] sm:$0xff]  }
 0xd17   : > { %8074 = vmatprep.subr.bf16.mxu0 %v8375_v22 }
 0xd18   : > { %v7346_v8 = vpack.c.bf16 %v6017_v3, %v6017_v3  ;;  %v5999_v41 = vunpack.c.l.b16 %v7338_v50 }
 0xd1a   : > { %v6057_v42 = vunpack.c.l.b16 %v7346_v8  ;;  %v6006_v13 = vsel %vm2244_vm8, %v5999_v41, %v6005_v34  ;;  %8075 = vmatpush3.bf16.msra.mxu0 %v8375_v22 }
 0xd1b   : > { %v6007_v16 = vpack.c.b16 %v6006_v13, %v6006_v13  ;;  %8168 = vmatprep.subr.bf16.mxu0 %v8452_v26 }
 0xd1c   : > { %v6064_v7 = vsel %vm2244_vm8, %v6057_v42, %v6063_v27  ;;  %v11066_v27 = vld [vmem:[%s11415_s1 + $0xc] ss:$0 sm:$0xff] }
 0xd1d   : > { %v6065_v59 = vpack.c.b16 %v6064_v7, %v6064_v7  ;;  %6009 = vst.msk [vmem:[#allocation4] sm:$0xf] %vm2248_vm10, %v6007_v16 }
 0xd1f   : > { %6066 = vrot.lane.b32.xlu0 %v6065_v59, %s8451_s14 }
 0xd23   : > { %5657 = vrot.lane.b32.xlu0 %v10702_v40, %s8451_s14 }
 0xd27   : > { %5661 = vrot.lane.b32.xlu0 %v10719_v19, %s8451_s14 }
 0xd2b   : > { %5665 = vrot.lane.b32.xlu0 %v10739_v46, %s8451_s14 }
 0xd2f   : > { %5669 = vrot.lane.b32.xlu0 %v10955_v32, %s8451_s14 }
 0xd33   : > { %5673 = vrot.lane.b32.xlu0 %v10966_v24, %s8451_s14 }
 0xd37   : > { %5677 = vrot.lane.b32.xlu0 %v10973_v55, %s8451_s14 }
 0xd3b   : > { %5681 = vrot.lane.b32.xlu0 %v10979_v51, %s8451_s14 }
 0xd3e   : > { %v5656_v2 = vpop.permute.xlu1 %5655 }
 0xd3f   : > { %5703 = vst.msk [vmem:[#allocation3] sm:$0xff] %vm1934_vm3, %v5656_v2  ;;  %5685 = vrot.lane.b32.xlu0 %v5638_v35, %s8451_s14 }
 0xd46   : > { %v5660_v40 = vpop.permute.xlu1 %5659  ;;  %v5719_v19 = vld [vmem:[#allocation3] sm:$0xff] }
 0xd47   : > { %5705 = vst.msk [vmem:[#allocation3 + $0x10] sm:$0xff] %vm1934_vm3, %v5660_v40  ;;  %8076 = vmatprep.mubr.bf16.mxu0 %v5719_v19 }
 0xd4e   : > { %v5721_v55 = vld [vmem:[#allocation3 + $0x10] sm:$0xff] }
 0xd54   : > { %v5664_v46 = vpop.permute.xlu1 %5663 }
 0xd55   : > { %5707 = vst.msk [vmem:[#allocation3 + $0x20] sm:$0xff] %vm1934_vm3, %v5664_v46 }
 0xd5c   : > { %v5723_v33 = vld [vmem:[#allocation3 + $0x20] sm:$0xff] }
 0xd5e   : > { %v5668_v32 = vpop.permute.xlu1 %5667 }
 0xd5f   : > { %5709 = vst.msk [vmem:[#allocation3 + $0x30] sm:$0xff] %vm1934_vm3, %v5668_v32 }
 0xd65   : > { %v5672_v25 = vpop.permute.xlu1 %5671 }
 0xd66   : > { %5711 = vst.msk [vmem:[#allocation3 + $0x40] sm:$0xff] %vm1934_vm3, %v5672_v25  ;;  %v5725_v35 = vld [vmem:[#allocation3 + $0x30] sm:$0xff] }
 0xd6d   : > { %v5676_v44 = vpop.permute.xlu1 %5675  ;;  %v5727_v5 = vld [vmem:[#allocation3 + $0x40] sm:$0xff] }
 0xd6e   : > { %5713 = vst.msk [vmem:[#allocation3 + $0x50] sm:$0xff] %vm1934_vm3, %v5676_v44 }
 0xd75   : > { %v5680_v12 = vpop.permute.xlu1 %5679  ;;  %v5729_v39 = vld [vmem:[#allocation3 + $0x50] sm:$0xff] }
 0xd76   : > { %5715 = vst.msk [vmem:[#allocation3 + $0x60] sm:$0xff] %vm1934_vm3, %v5680_v12 }
 0xd7a   : > { %v5684_v53 = vpop.permute.xlu1 %5683 }
 0xd7b   : > { %5717 = vst.msk [vmem:[#allocation3 + $0x70] sm:$0xff] %vm1934_vm3, %v5684_v53 }
 0xd7d   : > { %v5731_v6 = vld [vmem:[#allocation3 + $0x60] sm:$0xff] }
 0xd82   : > { %v5733_v14 = vld [vmem:[#allocation3 + $0x70] sm:$0xff] }
 0xd91   : > { %v6067_v0 = vpop.permute.xlu0 %6066 }
 0xd92   : > { %6069 = vst.msk [vmem:[#allocation4] sm:$0xf] %vm2309_vm11, %v6067_v0 }
 0xd95   : > { %v5658_v60 = vpop.permute.xlu0 %5657 }
 0xd96   : > { %5704 = vst.msk [vmem:[#allocation3 + $0x8] sm:$0xff] %vm1934_vm3, %v5658_v60 }
 0xd99   : > { %v5662_v10 = vpop.permute.xlu0 %5661  ;;  %v6070_v24 = vld [vmem:[#allocation4] sm:$0xf] }
 0xd9a   : > { %5706 = vst.msk [vmem:[#allocation3 + $0x18] sm:$0xff] %vm1934_vm3, %v5662_v10  ;;  %8125 = vmatmul.mubr.bf16.vlgmr.msra.gmra.mrb[160].mxu1 %v6070_v24 }
 0xd9b   : > { %8129 = vmatpush3.bf16.msra.mxu1 %v8376_v15 }
 0xd9c   : > { %8130 = vmatprep.subr.bf16.mxu1 %v8377_v28 }
 0xd9d   : > { %v5666_v58 = vpop.permute.xlu0 %5665  ;;  %v5720_v1 = vld [vmem:[#allocation3 + $0x8] sm:$0xff] }
 0xd9e   : > { %5708 = vst.msk [vmem:[#allocation3 + $0x28] sm:$0xff] %vm1934_vm3, %v5666_v58  ;;  %8077 = vmatmul.mubr.bf16.vlgmr.msra.gmra.mrb[140].mxu0 %v5720_v1 }
 0xd9f   : > { %8080 = vmatprep.mubr.bf16.mxu0 %v5721_v55  ;;  %8131 = vmatpush3.bf16.msra.mxu1 %v8377_v28 }
 0xda0   : > { %8132 = vmatprep.subr.bf16.mxu1 %v8378_v30 }
 0xda1   : > { %v5670_v51 = vpop.permute.xlu0 %5669  ;;  %v5722_v37 = vld [vmem:[#allocation3 + $0x18] sm:$0xff] }
 0xda2   : > { %5710 = vst.msk [vmem:[#allocation3 + $0x38] sm:$0xff] %vm1934_vm3, %v5670_v51 }
 0xda3   : > { %8133 = vmatpush3.bf16.msra.mxu1 %v8378_v30 }
 0xda4   : > { %8134 = vmatprep.subr.bf16.mxu1 %v8379_v18 }
 0xda5   : > { %v5674_v38 = vpop.permute.xlu0 %5673  ;;  %v5724_v21 = vld [vmem:[#allocation3 + $0x28] sm:$0xff] }
 0xda6   : > { %5712 = vst.msk [vmem:[#allocation3 + $0x48] sm:$0xff] %vm1934_vm3, %v5674_v38  ;;  %8081 = vmatmul.mubr.bf16.gmra.mrb[144].mxu0 %v5722_v37 }
 0xda7   : > { %8084 = vmatprep.mubr.bf16.mxu0 %v5723_v33  ;;  %8135 = vmatpush3.bf16.msra.mxu1 %v8379_v18 }
 0xda9   : > { %v5678_v11 = vpop.permute.xlu0 %5677  ;;  %v5726_v56 = vld [vmem:[#allocation3 + $0x38] sm:$0xff] }
 0xdaa   : > { %5714 = vst.msk [vmem:[#allocation3 + $0x58] sm:$0xff] %vm1934_vm3, %v5678_v11 }
 0xdad   : > { %v5682_v9 = vpop.permute.xlu0 %5681  ;;  %v5728_v17 = vld [vmem:[#allocation3 + $0x48] sm:$0xff] }
 0xdae   : > { %5716 = vst.msk [vmem:[#allocation3 + $0x68] sm:$0xff] %vm1934_vm3, %v5682_v9  ;;  %8085 = vmatmul.mubr.bf16.gmra.mrb[148].mxu0 %v5724_v21 }
 0xdaf   : > { %8088 = vmatprep.mubr.bf16.mxu0 %v5725_v35 }
 0xdb1   : > { %v5686_v47 = vpop.permute.xlu0 %5685  ;;  %v5730_v45 = vld [vmem:[#allocation3 + $0x58] sm:$0xff] }
 0xdb2   : > { %5718 = vst.msk [vmem:[#allocation3 + $0x78] sm:$0xff] %vm1934_vm3, %v5686_v47 }
 0xdb5   : > { %v5732_v4 = vld [vmem:[#allocation3 + $0x68] sm:$0xff] }
 0xdb6   : > { %8089 = vmatmul.mubr.bf16.gmra.mrb[152].mxu0 %v5726_v56 }
 0xdb7   : > { %8092 = vmatprep.mubr.bf16.mxu0 %v5727_v5 }
 0xdb9   : > { %v5734_v63 = vld [vmem:[#allocation3 + $0x78] sm:$0xff] }
 0xdbe   : > { %8093 = vmatmul.mubr.bf16.gmra.mrb[156].mxu0 %v5728_v17 }
 0xdbf   : > { %8096 = vmatprep.mubr.bf16.mxu0 %v5729_v39 }
 0xdc6   : > { %8097 = vmatmul.mubr.bf16.gmra.mrb[160].mxu0 %v5730_v45 }
 0xdc7   : > { %8100 = vmatprep.mubr.bf16.mxu0 %v5731_v6 }
 0xdce   : > { %8101 = vmatmul.mubr.bf16.gmra.mrb[164].mxu0 %v5732_v4 }
 0xdcf   : > { %8104 = vmatprep.mubr.bf16.mxu0 %v5733_v14 }
 0xdd6   : > { %8105 = vmatmul.mubr.bf16.gmra.mrb[168].mxu0 %v5734_v63 }
 0xdd7   : > { %8176 = vmatprep.mubr.msk.bf16.mxu0 %vm8453_vm9, %v8452_v26 }
 0xe6d   : > { %v11056_v54 = vpop.f32.mrb[160].mxu1 }
 0xe6e   : > { %v6183_v36 = vrot.slane %v11056_v54, %v9385_v31  ;;  %v8126_v43 = vpop.f32.mrb[161].mxu1  ;;  %v6176_v4 = vcombine.high %v11056_v54, %v11056_v54 }
 0xe6f   : > { %v6172_v48 = vpop.f32.mrb[162].mxu1 }
 0xe70   : > { %v6191_v29 = vcombine.high %v6183_v36, %v6183_v36  ;;  %v6199_v62 = vrot.slane %v6183_v36, %v9385_v31  ;;  %v8127_v23 = vpop.f32.mrb[163].mxu1  ;;  %v6190_v54 = vrot.slane %v6176_v4, %v9385_v31 }
 0xe71   : > { %v8078_v20 = vpop.f32.mrb[140].mxu0 }
 0xe72   : > { %v5833_v57 = vpop.f32.mrb[141].mxu0  ;;  %v6228_v34 = vrot.slane %v6199_v62, %v9391_v49  ;;  %v6213_v3 = vrot.slane %v6191_v29, %v9385_v31  ;;  %v6221_v12 = vcombine.high %v6199_v62, %v6199_v62 }
 0xe73   : > { %v8079_v52 = vpop.f32.mrb[142].mxu0 }
 0xe74   : > { %v5836_v50 = vpop.f32.mrb[143].mxu0  ;;  %v6267_v61 = vadd.f32 %v8078_v20, %v6228_v34  ;;  %v6265_v8 = vadd.f32 %v6228_v34, %v5833_v57  ;;  %v6268_v41 = vadd.f32 %v8079_v52, %v6228_v34  ;;  %v6232_v16 = vrot.slane %v6213_v3, %v9391_v49 }
 0xe75   : > { %v6266_v42 = vadd.f32 %v6228_v34, %v5836_v50  ;;  %v6236_v33 = vrot.slane %v6221_v12, %v9391_v49  ;;  %v6223_v14 = vcombine.high %v6213_v3, %v6213_v3 }
 0xe76   : > { %v11069_v13 = vadd.f32 %v11066_v27, %v6267_v61  ;;  %v11072_v22 = vadd.f32 %v11066_v27, %v6265_v8  ;;  %v11076_v7 = vadd.f32 %v11066_v27, %v6268_v41  ;;  %v6206_v41 = vrot.slane %v6190_v54, %v9385_v31 }
 0xe77   : > { %v11079_v59 = vadd.f32 %v11066_v27, %v6266_v42  ;;  %v6240_v62 = vrot.slane %v6223_v14, %v9391_v49 }
 0xe78   : > { %v6336_v2 = vmax.f32 %v11069_v13, 0.0  ;;  %v6334_v40 = vmax.f32 %v11072_v22, 0.0  ;;  %v6337_v46 = vmax.f32 %v11076_v7, 0.0 }
 0xe79   : > { %v8082_v19 = vpop.f32.mrb[144].mxu0  ;;  %v6335_v32 = vmax.f32 %v11079_v59, 0.0 }
 0xe7a   : > { %v6271_v25 = vadd.f32 %v8082_v19, %v6232_v16  ;;  %v5849_v44 = vpop.f32.mrb[145].mxu0  ;;  %v6367_v60 = vpack.c.bf16 %v6337_v46, %v6336_v2 }
 0xe7b   : > { %v6269_v53 = vadd.f32 %v6232_v16, %v5849_v44  ;;  %v8083_v0 = vpop.f32.mrb[146].mxu0  ;;  %v6366_v10 = vpack.c.bf16 %v6335_v32, %v6334_v40  ;;  %v6244_v44 = vrot.slane %v6206_v41, %v9391_v49 }
 0xe7c   : > { %v11086_v24 = vadd.f32 %v11066_v27, %v6271_v25  ;;  %v6272_v58 = vadd.f32 %v8083_v0, %v6232_v16  ;;  %v5852_v1 = vpop.f32.mrb[147].mxu0  ;;  %6413 = vrot.lane.b32.xlu0 %v6367_v60, %s8451_s14  ;;  %v6192_v25 = vcombine.high %v6190_v54, %v6190_v54 }
 0xe7d   : > { %v11089_v55 = vadd.f32 %v11066_v27, %v6269_v53  ;;  %v6270_v51 = vadd.f32 %v6232_v16, %v5852_v1  ;;  %6411 = vrot.lane.b32.xlu1 %v6366_v10, %s8451_s14 }
 0xe7e   : > { %v11092_v38 = vadd.f32 %v11066_v27, %v6272_v58  ;;  %v6340_v11 = vmax.f32 %v11086_v24, 0.0 }
 0xe7f   : > { %v11097_v37 = vadd.f32 %v11066_v27, %v6270_v51  ;;  %v6338_v21 = vmax.f32 %v11089_v55, 0.0 }
 0xe80   : > { %v6341_v9 = vmax.f32 %v11092_v38, 0.0 }
 0xe81   : > { %v6339_v35 = vmax.f32 %v11097_v37, 0.0  ;;  %v8086_v47 = vpop.f32.mrb[148].mxu0 }
 0xe82   : > { %v6369_v56 = vpack.c.bf16 %v6341_v9, %v6340_v11  ;;  %v6275_v5 = vadd.f32 %v8086_v47, %v6236_v33  ;;  %v5865_v17 = vpop.f32.mrb[149].mxu0 }
 0xe83   : > { %v6368_v39 = vpack.c.bf16 %v6339_v35, %v6338_v21  ;;  %v6273_v45 = vadd.f32 %v6236_v33, %v5865_v17  ;;  %v8087_v6 = vpop.f32.mrb[150].mxu0  ;;  %v6220_v21 = vrot.slane %v6192_v25, %v9385_v31 }
 0xe84   : > { %v11107_v63 = vadd.f32 %v11066_v27, %v6275_v5  ;;  %v6276_v15 = vadd.f32 %v8087_v6, %v6236_v33  ;;  %6417 = vrot.lane.b32.xlu0 %v6369_v56, %s8451_s14  ;;  %v5868_v28 = vpop.f32.mrb[151].mxu0 }
 0xe85   : > { %v11111_v30 = vadd.f32 %v11066_v27, %v6273_v45  ;;  %v6274_v18 = vadd.f32 %v6236_v33, %v5868_v28  ;;  %6415 = vrot.lane.b32.xlu1 %v6368_v39, %s8451_s14  ;;  %v6248_v4 = vrot.slane %v6220_v21, %v9391_v49 }
 0xe86   : > { %v11115_v36 = vadd.f32 %v11066_v27, %v6276_v15  ;;  %v6344_v48 = vmax.f32 %v11107_v63, 0.0 }
 0xe87   : > { %v11118_v43 = vadd.f32 %v11066_v27, %v6274_v18  ;;  %v6342_v23 = vmax.f32 %v11111_v30, 0.0 }
 0xe88   : > { %v6345_v29 = vmax.f32 %v11115_v36, 0.0 }
 0xe89   : > { %v6343_v20 = vmax.f32 %v11118_v43, 0.0  ;;  %v8090_v57 = vpop.f32.mrb[152].mxu0 }
 0xe8a   : > { %v6371_v34 = vpack.c.bf16 %v6345_v29, %v6344_v48  ;;  %v6279_v52 = vadd.f32 %v8090_v57, %v6240_v62  ;;  %v5881_v3 = vpop.f32.mrb[153].mxu0 }
 0xe8b   : > { %v6370_v50 = vpack.c.bf16 %v6343_v20, %v6342_v23  ;;  %v6277_v61 = vadd.f32 %v6240_v62, %v5881_v3  ;;  %v8091_v8 = vpop.f32.mrb[154].mxu0  ;;  %v6222_v20 = vcombine.high %v6206_v41, %v6206_v41 }
 0xe8c   : > { %v11128_v42 = vadd.f32 %v11066_v27, %v6279_v52  ;;  %v6280_v16 = vadd.f32 %v8091_v8, %v6240_v62  ;;  %6421 = vrot.lane.b32.xlu0 %v6371_v34, %s8451_s14  ;;  %v5884_v2 = vpop.f32.mrb[155].mxu0 }
 0xe8d   : > { %v11132_v40 = vadd.f32 %v11066_v27, %v6277_v61  ;;  %v6278_v19 = vadd.f32 %v6240_v62, %v5884_v2  ;;  %6419 = vrot.lane.b32.xlu1 %v6370_v50, %s8451_s14  ;;  %v6252_v2 = vrot.slane %v6222_v20, %v9391_v49 }
 0xe8e   : > { %v11136_v46 = vadd.f32 %v11066_v27, %v6280_v16  ;;  %v6348_v12 = vmax.f32 %v11128_v42, 0.0 }
 0xe8f   : > { %v11139_v32 = vadd.f32 %v11066_v27, %v6278_v19  ;;  %v6346_v0 = vmax.f32 %v11132_v40, 0.0 }
 0xe90   : > { %v6349_v53 = vmax.f32 %v11136_v46, 0.0 }
 0xe91   : > { %v6347_v60 = vmax.f32 %v11139_v32, 0.0  ;;  %v8094_v10 = vpop.f32.mrb[156].mxu0 }
 0xe92   : > { %v6373_v58 = vpack.c.bf16 %v6349_v53, %v6348_v12  ;;  %v6283_v1 = vadd.f32 %v8094_v10, %v6244_v44  ;;  %v5897_v51 = vpop.f32.mrb[157].mxu0 }
 0xe93   : > { %v6372_v33 = vpack.c.bf16 %v6347_v60, %v6346_v0  ;;  %v6281_v11 = vadd.f32 %v6244_v44, %v5897_v51  ;;  %v8095_v9 = vpop.f32.mrb[158].mxu0 }
 0xe94   : > { %v11148_v35 = vadd.f32 %v11066_v27, %v6283_v1  ;;  %v6284_v47 = vadd.f32 %v8095_v9, %v6244_v44  ;;  %6425 = vrot.lane.b32.xlu0 %v6373_v58, %s8451_s14  ;;  %v5900_v56 = vpop.f32.mrb[159].mxu0  ;;  %v6224_v1 = vcombine.high %v6220_v21, %v6220_v21 }
 0xe95   : > { %v11152_v5 = vadd.f32 %v11066_v27, %v6281_v11  ;;  %v6282_v17 = vadd.f32 %v6244_v44, %v5900_v56  ;;  %6423 = vrot.lane.b32.xlu1 %v6372_v33, %s8451_s14 }
 0xe96   : > { %v11156_v39 = vadd.f32 %v11066_v27, %v6284_v47  ;;  %v6352_v31 = vmax.f32 %v11148_v35, 0.0 }
 0xe97   : > { %v11159_v45 = vadd.f32 %v11066_v27, %v6282_v17  ;;  %v6350_v14 = vmax.f32 %v11152_v5, 0.0 }
 0xe98   : > { %v6353_v6 = vmax.f32 %v11156_v39, 0.0 }
 0xe99   : > { %v6351_v15 = vmax.f32 %v11159_v45, 0.0  ;;  %v8098_v28 = vpop.f32.mrb[160].mxu0 }
 0xe9a   : > { %v6375_v18 = vpack.c.bf16 %v6353_v6, %v6352_v31  ;;  %v6287_v54 = vadd.f32 %v8098_v28, %v6248_v4  ;;  %v5913_v48 = vpop.f32.mrb[161].mxu0  ;;  %v6256_v6 = vrot.slane %v6224_v1, %v9391_v49 }
 0xe9b   : > { %v6374_v29 = vpack.c.bf16 %v6351_v15, %v6350_v14  ;;  %v6285_v62 = vadd.f32 %v6248_v4, %v5913_v48  ;;  %v8099_v23 = vpop.f32.mrb[162].mxu0 }
 0xe9c   : > { %v11167_v57 = vadd.f32 %v11066_v27, %v6287_v54  ;;  %v6288_v34 = vadd.f32 %v8099_v23, %v6248_v4  ;;  %6429 = vrot.lane.b32.xlu0 %v6375_v18, %s8451_s14  ;;  %v5916_v52 = vpop.f32.mrb[163].mxu0 }
 0xe9d   : > { %v11171_v3 = vadd.f32 %v11066_v27, %v6285_v62  ;;  %v6286_v50 = vadd.f32 %v6248_v4, %v5916_v52  ;;  %6427 = vrot.lane.b32.xlu1 %v6374_v29, %s8451_s14 }
 0xe9e   : > { %v11175_v61 = vadd.f32 %v11066_v27, %v6288_v34  ;;  %v6356_v41 = vmax.f32 %v11167_v57, 0.0 }
 0xe9f   : > { %v11178_v8 = vadd.f32 %v11066_v27, %v6286_v50  ;;  %v6354_v19 = vmax.f32 %v11171_v3, 0.0 }
 0xea0   : > { %v6357_v16 = vmax.f32 %v11175_v61, 0.0 }
 0xea1   : > { %v6355_v25 = vmax.f32 %v11178_v8, 0.0  ;;  %v8102_v44 = vpop.f32.mrb[164].mxu0 }
 0xea2   : > { %v6377_v12 = vpack.c.bf16 %v6357_v16, %v6356_v41  ;;  %v6291_v53 = vadd.f32 %v8102_v44, %v6252_v2  ;;  %v5929_v0 = vpop.f32.mrb[165].mxu0 }
 0xea3   : > { %v6376_v60 = vpack.c.bf16 %v6355_v25, %v6354_v19  ;;  %v6289_v10 = vadd.f32 %v6252_v2, %v5929_v0  ;;  %v8103_v58 = vpop.f32.mrb[166].mxu0 }
 0xea4   : > { %v11186_v51 = vadd.f32 %v11066_v27, %v6291_v53  ;;  %v6292_v33 = vadd.f32 %v8103_v58, %v6252_v2  ;;  %6433 = vrot.lane.b32.xlu0 %v6377_v12, %s8451_s14  ;;  %v5932_v11 = vpop.f32.mrb[167].mxu0 }
 0xea5   : > { %v11190_v9 = vadd.f32 %v11066_v27, %v6289_v10  ;;  %v6290_v47 = vadd.f32 %v6252_v2, %v5932_v11  ;;  %6431 = vrot.lane.b32.xlu1 %v6376_v60, %s8451_s14 }
 0xea6   : > { %v11194_v56 = vadd.f32 %v11066_v27, %v6292_v33  ;;  %v6360_v21 = vmax.f32 %v11186_v51, 0.0 }
 0xea7   : > { %v11197_v17 = vadd.f32 %v11066_v27, %v6290_v47  ;;  %v6358_v4 = vmax.f32 %v11190_v9, 0.0 }
 0xea8   : > { %v6361_v31 = vmax.f32 %v11194_v56, 0.0 }
 0xea9   : > { %v6359_v14 = vmax.f32 %v11197_v17, 0.0  ;;  %v8106_v15 = vpop.f32.mrb[168].mxu0 }
 0xeaa   : > { %v6379_v28 = vpack.c.bf16 %v6361_v31, %v6360_v21  ;;  %v6295_v18 = vadd.f32 %v8106_v15, %v6256_v6  ;;  %v5945_v54 = vpop.f32.mrb[169].mxu0 }
 0xeab   : > { %v6378_v48 = vpack.c.bf16 %v6359_v14, %v6358_v4  ;;  %v6293_v29 = vadd.f32 %v6256_v6, %v5945_v54  ;;  %v8107_v62 = vpop.f32.mrb[170].mxu0  ;;  %v8382_v54 = vld [vmem:[%s11418_s4 + $0x10] sm:$0xff]  }
 0xeac   : > { %v11205_v23 = vadd.f32 %v11066_v27, %v6295_v18  ;;  %v6296_v20 = vadd.f32 %v8107_v62, %v6256_v6  ;;  %6437 = vrot.lane.b32.xlu0 %v6379_v28, %s8451_s14  ;;  %v5948_v34 = vpop.f32.mrb[171].mxu0  ;;  %v8380_v28 = vld [vmem:[%s11418_s4] sm:$0xff]   ;;  %v8381_v18 = vld [vmem:[%s11418_s4 + $0x8] sm:$0xff]  }
 0xead   : > { %v11209_v49 = vadd.f32 %v11066_v27, %v6293_v29  ;;  %v6294_v52 = vadd.f32 %v6256_v6, %v5948_v34  ;;  %6435 = vrot.lane.b32.xlu1 %v6378_v48, %s8451_s14  ;;  %8169 = vmatpush3.bf16.msra.mxu0 %v8380_v28  ;;  %v8383_v48 = vld [vmem:[%s11418_s4 + $0x18] sm:$0xff]   ;;  %v11258_v29 = vld [vmem:[%s11415_s1 + $0xd] ss:$0 sm:$0xff] }
 0xeae   : > { %v11213_v50 = vadd.f32 %v11066_v27, %v6296_v20  ;;  %v6364_v16 = vmax.f32 %v11205_v23, 0.0  ;;  %8170 = vmatprep.subr.bf16.mxu0 %v8452_v26 }
 0xeaf   : > { %v11216_v41 = vadd.f32 %v11066_v27, %v6294_v52  ;;  %v6362_v19 = vmax.f32 %v11209_v49, 0.0 }
 0xeb0   : > { %v6365_v2 = vmax.f32 %v11213_v50, 0.0 }
 0xeb1   : > { %v6363_v25 = vmax.f32 %v11216_v41, 0.0  ;;  %8171 = vmatpush3.bf16.msra.mxu0 %v8381_v18 }
 0xeb2   : > { %v6381_v44 = vpack.c.bf16 %v6365_v2, %v6364_v16  ;;  %8172 = vmatprep.subr.bf16.mxu0 %v8452_v26 }
 0xeb3   : > { %v6380_v12 = vpack.c.bf16 %v6363_v25, %v6362_v19 }
 0xeb4   : > { %6441 = vrot.lane.b32.xlu0 %v6381_v44, %s8451_s14 }
 0xeb5   : > { %6439 = vrot.lane.b32.xlu1 %v6380_v12, %s8451_s14  ;;  %8173 = vmatpush3.bf16.msra.mxu0 %v8382_v54  ;;  %s6947_s14 = sshll.u32 %s220_s8, 4  ;;  %s11374_s14 = int_to_ptr.vmem [resolvable:$true] %s6947_s14 }
 0xeb6   : > { %8174 = vmatprep.subr.bf16.mxu0 %v8452_v26  ;;  %s8384_s22 = scalar_lea.vmem %s11374_s14, 128  ;;  %p8391_p0 = scmp.lt.s32.totalorder %s11374_s14, %s8389_s16 }
 0xeb7   : > { %p8385_p11 = scmp.ne.s32.totalorder %s11374_s14, %s8384_s22  ;;  %p8392_p1 = scmp.lt.s32.totalorder %s8390_s17, %s8384_s22 }
 0xeb9   : > { %8175 = vmatpush3.bf16.msra.mxu0 %v8383_v48  ;;  %p8386_p12 = pnand %p8385_p11, %p8524_p5  ;;  %p8393_p2 = por %p8392_p1, %p8391_p0 }
 0xebb   : > { %p8387_p13 = pneg %p8386_p12 }
 0xebd   : > { %p8394_p3 = pnand %p8393_p2, %p8387_p13 }
 0xeee   : > { %v6414_v0 = vpop.permute.xlu0 %6413 }
 0xeef   : > { %v6412_v53 = vpop.permute.xlu1 %6411 }
 0xef0   : > { %8136 = vmatprep.mubr.msk.bf16.mxu1 %vm1444_vm0, %v6412_v53 }
 0xef1   : > { %8137 = vmatmul.mubr.msk.bf16.vlgmr.msra.gmra.mrb[164].mxu1 %vm1444_vm0, %v6414_v0 }
 0xef6   : > { %v6418_v60 = vpop.permute.xlu0 %6417 }
 0xef7   : > { %v6416_v27 = vpop.permute.xlu1 %6415 }
 0xef8   : > { %8140 = vmatprep.mubr.msk.bf16.mxu1 %vm1444_vm0, %v6416_v27 }
 0xef9   : > { %8141 = vmatmul.mubr.msk.bf16.gmra.mrb[168].mxu1 %vm1444_vm0, %v6418_v60 }
 0xefe   : > { %v6422_v58 = vpop.permute.xlu0 %6421 }
 0xeff   : > { %v6420_v10 = vpop.permute.xlu1 %6419 }
 0xf00   : > { %8144 = vmatprep.mubr.msk.bf16.mxu1 %vm1444_vm0, %v6420_v10 }
 0xf01   : > { %8145 = vmatmul.mubr.msk.bf16.gmra.mrb[172].mxu1 %vm1444_vm0, %v6422_v58 }
 0xf06   : > { %v6426_v33 = vpop.permute.xlu0 %6425 }
 0xf07   : > { %v6424_v1 = vpop.permute.xlu1 %6423 }
 0xf08   : > { %8148 = vmatprep.mubr.msk.bf16.mxu1 %vm1444_vm0, %v6424_v1 }
 0xf09   : > { %8149 = vmatmul.mubr.msk.bf16.gmra.mrb[176].mxu1 %vm1444_vm0, %v6426_v33 }
 0xf0e   : > { %v6430_v47 = vpop.permute.xlu0 %6429 }
 0xf0f   : > { %v6428_v11 = vpop.permute.xlu1 %6427 }
 0xf10   : > { %8152 = vmatprep.mubr.msk.bf16.mxu1 %vm1444_vm0, %v6428_v11 }
 0xf11   : > { %8153 = vmatmul.mubr.msk.bf16.gmra.mrb[180].mxu1 %vm1444_vm0, %v6430_v47 }
 0xf16   : > { %v6434_v31 = vpop.permute.xlu0 %6433 }
 0xf17   : > { %v6432_v21 = vpop.permute.xlu1 %6431 }
 0xf18   : > { %8156 = vmatprep.mubr.msk.bf16.mxu1 %vm1444_vm0, %v6432_v21 }
 0xf19   : > { %8157 = vmatmul.mubr.msk.bf16.gmra.mrb[184].mxu1 %vm1444_vm0, %v6434_v31 }
 0xf1e   : > { %v6438_v4 = vpop.permute.xlu0 %6437 }
 0xf1f   : > { %v6436_v6 = vpop.permute.xlu1 %6435 }
 0xf20   : > { %8160 = vmatprep.mubr.msk.bf16.mxu1 %vm1444_vm0, %v6436_v6 }
 0xf21   : > { %8161 = vmatmul.mubr.msk.bf16.gmra.mrb[188].mxu1 %vm1444_vm0, %v6438_v4 }
 0xf26   : > { %v6442_v15 = vpop.permute.xlu0 %6441 }
 0xf27   : > { %v6440_v14 = vpop.permute.xlu1 %6439 }
 0xf28   : > { %8164 = vmatprep.mubr.msk.bf16.mxu1 %vm1444_vm0, %v6440_v14 }
 0xf29   : > { %8165 = vmatmul.mubr.msk.bf16.gmra.mrb[192].mxu1 %vm1444_vm0, %v6442_v15 }
 0xfc4   : > { %v8138_v62 = vpop.f32.mrb[164].mxu1 }
 0xfc5   : > { %v6549_v20 = vpop.f32.mrb[165].mxu1  ;;  %v6558_v34 = vadd.f32 %v8138_v62, %v11258_v29 }
 0xfc6   : > { %v6550_v52 = vadd.f32 %v11258_v29, %v6549_v20  ;;  %v8139_v16 = vpop.f32.mrb[166].mxu1 }
 0xfc7   : > { %v6552_v2 = vpop.f32.mrb[167].mxu1  ;;  %v6561_v25 = vadd.f32 %v8139_v16, %v11258_v29  ;;  %v6678_v44 = vadd.f32 %v6558_v34, %v11069_v13 }
 0xfc8   : > { %v6676_v19 = vadd.f32 %v6550_v52, %v11072_v22  ;;  %v6553_v26 = vadd.f32 %v11258_v29, %v6552_v2 }
 0xfc9   : > { %v6679_v0 = vadd.f32 %v6561_v25, %v11076_v7  ;;  %v6711_v1 = vsel %vm1444_vm0, %v6678_v44, -inf }
 0xfca   : > { %v6677_v12 = vadd.f32 %v6553_v26, %v11079_v59  ;;  %v6708_v53 = vsel %vm1444_vm0, %v6676_v19, -inf }
 0xfcb   : > { %v6713_v59 = vsel %vm1444_vm0, %v6679_v0, -inf }
 0xfcc   : > { %v6709_v27 = vsel %vm1444_vm0, %v6677_v12, -inf  ;;  %v8142_v60 = vpop.f32.mrb[168].mxu1 }
 0xfcd   : > { %v6710_v10 = vmax.f32 %v6708_v53, %v6709_v27  ;;  %v6565_v58 = vpop.f32.mrb[169].mxu1  ;;  %v6574_v22 = vadd.f32 %v8142_v60, %v11258_v29 }
 0xfce   : > { %v6566_v33 = vadd.f32 %v11258_v29, %v6565_v58  ;;  %v8143_v11 = vpop.f32.mrb[170].mxu1 }
 0xfcf   : > { %v6712_v47 = vmax.f32 %v6710_v10, %v6711_v1  ;;  %v6568_v13 = vpop.f32.mrb[171].mxu1  ;;  %v6577_v7 = vadd.f32 %v8143_v11, %v11258_v29  ;;  %v6682_v4 = vadd.f32 %v6574_v22, %v11086_v24 }
 0xfd0   : > { %v6680_v21 = vadd.f32 %v6566_v33, %v11089_v55  ;;  %v6569_v31 = vadd.f32 %v11258_v29, %v6568_v13 }
 0xfd1   : > { %v6714_v6 = vmax.f32 %v6712_v47, %v6713_v59  ;;  %v6683_v18 = vadd.f32 %v6577_v7, %v11092_v38  ;;  %v6724_v34 = vsel %vm1444_vm0, %v6682_v4, -inf }
 0xfd2   : > { %v6681_v14 = vadd.f32 %v6569_v31, %v11097_v37  ;;  %v6721_v28 = vsel %vm1444_vm0, %v6680_v21, -inf }
 0xfd3   : > { %v6715_v15 = vrot.slane %v6714_v6, 4  ;;  %v6726_v25 = vsel %vm1444_vm0, %v6683_v18, -inf }
 0xfd4   : > { %v6722_v54 = vsel %vm1444_vm0, %v6681_v14, -inf  ;;  %v8146_v48 = vpop.f32.mrb[172].mxu1 }
 0xfd5   : > { %v6716_v62 = vmax.f32 %v6714_v6, %v6715_v15  ;;  %v6723_v20 = vmax.f32 %v6721_v28, %v6722_v54  ;;  %v6581_v55 = vpop.f32.mrb[173].mxu1  ;;  %v6590_v52 = vadd.f32 %v8146_v48, %v11258_v29 }
 0xfd6   : > { %v6582_v16 = vadd.f32 %v11258_v29, %v6581_v55  ;;  %v8147_v24 = vpop.f32.mrb[174].mxu1 }
 0xfd7   : > { %v6717_v2 = vrot.slane %v6716_v62, 2  ;;  %v6725_v37 = vmax.f32 %v6723_v20, %v6724_v34  ;;  %v6584_v19 = vpop.f32.mrb[175].mxu1  ;;  %v6593_v26 = vadd.f32 %v8147_v24, %v11258_v29  ;;  %v6686_v0 = vadd.f32 %v6590_v52, %v11107_v63 }
 0xfd8   : > { %v6684_v38 = vadd.f32 %v6582_v16, %v11111_v30  ;;  %v6585_v44 = vadd.f32 %v11258_v29, %v6584_v19 }
 0xfd9   : > { %v6718_v12 = vmax.f32 %v6716_v62, %v6717_v2  ;;  %v6727_v53 = vmax.f32 %v6725_v37, %v6726_v25  ;;  %v6687_v1 = vadd.f32 %v6593_v26, %v11115_v36  ;;  %v6737_v13 = vsel %vm1444_vm0, %v6686_v0, -inf }
 0xfda   : > { %v6685_v27 = vadd.f32 %v6585_v44, %v11118_v43  ;;  %v6734_v58 = vsel %vm1444_vm0, %v6684_v38, -inf }
 0xfdb   : > { %v6719_v60 = vrot.slane %v6718_v12, 1  ;;  %v6728_v10 = vrot.slane %v6727_v53, 4  ;;  %v6739_v4 = vsel %vm1444_vm0, %v6687_v1, -inf }
 0xfdc   : > { %v6735_v22 = vsel %vm1444_vm0, %v6685_v27, -inf  ;;  %v8150_v33 = vpop.f32.mrb[176].mxu1 }
 0xfdd   : > { %v6729_v30 = vmax.f32 %v6727_v53, %v6728_v10  ;;  %v6736_v11 = vmax.f32 %v6734_v58, %v6735_v22  ;;  %v6597_v47 = vpop.f32.mrb[177].mxu1  ;;  %v6606_v59 = vadd.f32 %v8150_v33, %v11258_v29  ;;  %v6720_v43 = vmax.f32 %v6718_v12, %v6719_v60 }
 0xfde   : > { %v6598_v63 = vadd.f32 %v11258_v29, %v6597_v47  ;;  %v8151_v21 = vpop.f32.mrb[178].mxu1 }
 0xfdf   : > { %v6730_v7 = vrot.slane %v6729_v30, 2  ;;  %v6738_v31 = vmax.f32 %v6736_v11, %v6737_v13  ;;  %v6600_v6 = vpop.f32.mrb[179].mxu1  ;;  %v6609_v14 = vadd.f32 %v8151_v21, %v11258_v29  ;;  %v6690_v54 = vadd.f32 %v6606_v59, %v11128_v42 }
 0xfe0   : > { %v6688_v36 = vadd.f32 %v6598_v63, %v11132_v40  ;;  %v6601_v15 = vadd.f32 %v11258_v29, %v6600_v6  ;;  %v6812_v62 = vmax.f32 %v6720_v43, 0.0 }
 0xfe1   : > { %v6731_v28 = vmax.f32 %v6729_v30, %v6730_v7  ;;  %v6740_v18 = vmax.f32 %v6738_v31, %v6739_v4  ;;  %v6691_v52 = vadd.f32 %v6609_v14, %v11136_v46  ;;  %v6750_v25 = vsel %vm1444_vm0, %v6690_v54, -inf }
 0xfe2   : > { %v6689_v48 = vadd.f32 %v6601_v15, %v11139_v32  ;;  %v6747_v34 = vsel %vm1444_vm0, %v6688_v36, -inf  ;;  %v6820_v26 = vpack.c.bf16 %v6812_v62, %v6812_v62 }
 0xfe3   : > { %v6732_v20 = vrot.slane %v6731_v28, 1  ;;  %v6741_v55 = vrot.slane %v6740_v18, 4  ;;  %v6752_v46 = vsel %vm1444_vm0, %v6691_v52, -inf }
 0xfe4   : > { %v6748_v16 = vsel %vm1444_vm0, %v6689_v48, -inf  ;;  %v8154_v40 = vpop.f32.mrb[180].mxu1  ;;  %v6849_v11 = vunpack.c.l.b16 %v6820_v26 }
 0xfe5   : > { %v6733_v24 = vmax.f32 %v6731_v28, %v6732_v20  ;;  %v6742_v2 = vmax.f32 %v6740_v18, %v6741_v55  ;;  %v6749_v37 = vmax.f32 %v6747_v34, %v6748_v16  ;;  %v6613_v19 = vpop.f32.mrb[181].mxu1  ;;  %v6622_v42 = vadd.f32 %v8154_v40, %v11258_v29 }
 0xfe6   : > { %v6614_v32 = vadd.f32 %v11258_v29, %v6613_v19  ;;  %v8155_v38 = vpop.f32.mrb[182].mxu1 }
 0xfe7   : > { %v6813_v44 = vmax.f32 %v6733_v24, 0.0  ;;  %v6743_v12 = vrot.slane %v6742_v2, 2  ;;  %v6751_v53 = vmax.f32 %v6749_v37, %v6750_v25  ;;  %v6616_v0 = vpop.f32.mrb[183].mxu1  ;;  %v6625_v60 = vadd.f32 %v8155_v38, %v11258_v29 }
 0xfe8   : > { %v6692_v27 = vadd.f32 %v6614_v32, %v11152_v5  ;;  %v6617_v10 = vadd.f32 %v11258_v29, %v6616_v0  ;;  %v6694_v33 = vadd.f32 %v6622_v42, %v11148_v35 }
 0xfe9   : > { %v6821_v58 = vpack.c.bf16 %v6813_v44, %v6813_v44  ;;  %v6744_v1 = vmax.f32 %v6742_v2, %v6743_v12  ;;  %v6753_v22 = vmax.f32 %v6751_v53, %v6752_v46  ;;  %v6695_v21 = vadd.f32 %v6625_v60, %v11156_v39 }
 0xfea   : > { %v6693_v30 = vadd.f32 %v6617_v10, %v11159_v45  ;;  %v6760_v63 = vsel %vm1444_vm0, %v6692_v27, -inf  ;;  %v6763_v35 = vsel %vm1444_vm0, %v6694_v33, -inf }
 0xfeb   : > { %v6850_v47 = vunpack.c.l.b16 %v6821_v58  ;;  %v6745_v13 = vrot.slane %v6744_v1, 1  ;;  %v6754_v59 = vrot.slane %v6753_v22, 4  ;;  %v6765_v48 = vsel %vm1444_vm0, %v6695_v21, -inf }
 0xfec   : > { %v6761_v5 = vsel %vm1444_vm0, %v6693_v30, -inf  ;;  %v8158_v43 = vpop.f32.mrb[184].mxu1 }
 0xfed   : > { %v6857_v7 = vsel %vm2232_vm1, %v6850_v47, %v6849_v11  ;;  %v6746_v31 = vmax.f32 %v6744_v1, %v6745_v13  ;;  %v6755_v6 = vmax.f32 %v6753_v22, %v6754_v59  ;;  %v6762_v4 = vmax.f32 %v6760_v63, %v6761_v5  ;;  %v6629_v36 = vpop.f32.mrb[185].mxu1 }
 0xfee   : > { %v6638_v45 = vadd.f32 %v8158_v43, %v11258_v29  ;;  %v6630_v14 = vadd.f32 %v11258_v29, %v6629_v36  ;;  %v8159_v15 = vpop.f32.mrb[186].mxu1 }
 0xfef   : > { %v6814_v28 = vmax.f32 %v6746_v31, 0.0  ;;  %v6756_v18 = vrot.slane %v6755_v6, 2  ;;  %v6764_v54 = vmax.f32 %v6762_v4, %v6763_v35  ;;  %v6632_v39 = vpop.f32.mrb[187].mxu1  ;;  %v6641_v20 = vadd.f32 %v8159_v15, %v11258_v29 }
 0xff0   : > { %v6696_v62 = vadd.f32 %v6630_v14, %v11171_v3  ;;  %v6633_v55 = vadd.f32 %v11258_v29, %v6632_v39  ;;  %v6698_v40 = vadd.f32 %v6638_v45, %v11167_v57 }
 0xff1   : > { %v6822_v34 = vpack.c.bf16 %v6814_v28, %v6814_v28  ;;  %v6757_v52 = vmax.f32 %v6755_v6, %v6756_v18  ;;  %v6766_v16 = vmax.f32 %v6764_v54, %v6765_v48  ;;  %v6699_v42 = vadd.f32 %v6641_v20, %v11175_v61 }
 0xff2   : > { %v6697_v24 = vadd.f32 %v6633_v55, %v11178_v8  ;;  %v6773_v25 = vsel %vm1444_vm0, %v6696_v62, -inf  ;;  %v6776_v57 = vsel %vm1444_vm0, %v6698_v40, -inf }
 0xff3   : > { %v6851_v2 = vunpack.c.l.b16 %v6822_v34  ;;  %v6758_v37 = vrot.slane %v6757_v52, 1  ;;  %v6767_v19 = vrot.slane %v6766_v16, 4  ;;  %v6778_v58 = vsel %vm1444_vm0, %v6699_v42, -inf }
 0xff4   : > { %v6774_v3 = vsel %vm1444_vm0, %v6697_v24, -inf  ;;  %v8162_v32 = vpop.f32.mrb[188].mxu1 }
 0xff5   : > { %v6858_v38 = vsel %vm2234_vm2, %v6851_v2, %v6857_v7  ;;  %v6759_v26 = vmax.f32 %v6757_v52, %v6758_v37  ;;  %v6768_v44 = vmax.f32 %v6766_v16, %v6767_v19  ;;  %v6775_v12 = vmax.f32 %v6773_v25, %v6774_v3  ;;  %v6645_v53 = vpop.f32.mrb[189].mxu1 }
 0xff6   : > { %v6654_v8 = vadd.f32 %v8162_v32, %v11258_v29  ;;  %v6646_v0 = vadd.f32 %v11258_v29, %v6645_v53  ;;  %v8163_v46 = vpop.f32.mrb[190].mxu1 }
 0xff7   : > { %v6815_v27 = vmax.f32 %v6759_v26, 0.0  ;;  %v6769_v60 = vrot.slane %v6768_v44, 2  ;;  %v6777_v10 = vmax.f32 %v6775_v12, %v6776_v57  ;;  %v6648_v61 = vpop.f32.mrb[191].mxu1  ;;  %v6657_v22 = vadd.f32 %v8163_v46, %v11258_v29 }
 0xff8   : > { %v6700_v1 = vadd.f32 %v6646_v0, %v11190_v9  ;;  %v6649_v33 = vadd.f32 %v11258_v29, %v6648_v61  ;;  %v6702_v13 = vadd.f32 %v6654_v8, %v11186_v51 }
 0xff9   : > { %v6823_v30 = vpack.c.bf16 %v6815_v27, %v6815_v27  ;;  %v6770_v11 = vmax.f32 %v6768_v44, %v6769_v60  ;;  %v6779_v47 = vmax.f32 %v6777_v10, %v6778_v58  ;;  %v6703_v7 = vadd.f32 %v6657_v22, %v11194_v56 }
 0xffa   : > { %v6701_v59 = vadd.f32 %v6649_v33, %v11197_v17  ;;  %v6786_v43 = vsel %vm1444_vm0, %v6700_v1, -inf  ;;  %v6789_v51 = vsel %vm1444_vm0, %v6702_v13, -inf }
 0xffb   : > { %v6852_v63 = vunpack.c.l.b16 %v6823_v30  ;;  %v6771_v21 = vrot.slane %v6770_v11, 1  ;;  %v6780_v5 = vrot.slane %v6779_v47, 4  ;;  %v6791_v39 = vsel %vm1444_vm0, %v6703_v7, -inf }
 0xffc   : > { %v6787_v9 = vsel %vm1444_vm0, %v6701_v59, -inf  ;;  %v8166_v31 = vpop.f32.mrb[192].mxu1 }
 0xffd   : > { %v6859_v6 = vsel %vm2236_vm4, %v6852_v63, %v6858_v38  ;;  %v6772_v4 = vmax.f32 %v6770_v11, %v6771_v21  ;;  %v6781_v36 = vmax.f32 %v6779_v47, %v6780_v5  ;;  %v6788_v35 = vmax.f32 %v6786_v43, %v6787_v9  ;;  %v6661_v45 = vpop.f32.mrb[193].mxu1  ;;  %v7272_v5 = vld [vmem:[%s11415_s1 + $0xe] ss:$0 sm:$0xff] }
 0xffe   : > { %v6670_v17 = vadd.f32 %v8166_v31, %v11258_v29  ;;  %v6662_v14 = vadd.f32 %v11258_v29, %v6661_v45  ;;  %v8167_v15 = vpop.f32.mrb[194].mxu1 }
 0xfff   : > { %v6816_v28 = vmax.f32 %v6772_v4, 0.0  ;;  %v6782_v18 = vrot.slane %v6781_v36, 2  ;;  %v6790_v54 = vmax.f32 %v6788_v35, %v6789_v51  ;;  %v6664_v56 = vpop.f32.mrb[195].mxu1  ;;  %v6673_v62 = vadd.f32 %v8167_v15, %v11258_v29 }
0x1000   : > { %v6704_v48 = vadd.f32 %v6662_v14, %v11209_v49  ;;  %v6665_v20 = vadd.f32 %v11258_v29, %v6664_v56  ;;  %v6706_v16 = vadd.f32 %v6670_v17, %v11205_v23 }
0x1001   : > { %v6824_v55 = vpack.c.bf16 %v6816_v28, %v6816_v28  ;;  %v6783_v34 = vmax.f32 %v6781_v36, %v6782_v18  ;;  %v6792_v52 = vmax.f32 %v6790_v54, %v6791_v39  ;;  %v6707_v25 = vadd.f32 %v6673_v62, %v11213_v50 }
0x1002   : > { %v6705_v40 = vadd.f32 %v6665_v20, %v11216_v41  ;;  %v6799_v19 = vsel %vm1444_vm0, %v6704_v48, -inf  ;;  %v6802_v38 = vsel %vm1444_vm0, %v6706_v16, -inf }
0x1003   : > { %v6853_v24 = vunpack.c.l.b16 %v6824_v55  ;;  %v6784_v2 = vrot.slane %v6783_v34, 1  ;;  %v6793_v37 = vrot.slane %v6792_v52, 4  ;;  %v6804_v41 = vsel %vm1444_vm0, %v6707_v25, -inf }
0x1004   : > { %v6800_v49 = vsel %vm1444_vm0, %v6705_v40, -inf }
0x1005   : > { %v6860_v42 = vsel %vm2238_vm5, %v6853_v24, %v6859_v6  ;;  %v6785_v3 = vmax.f32 %v6783_v34, %v6784_v2  ;;  %v6794_v29 = vmax.f32 %v6792_v52, %v6793_v37  ;;  %v6801_v32 = vmax.f32 %v6799_v19, %v6800_v49 }
0x1007   : > { %v6817_v26 = vmax.f32 %v6785_v3, 0.0  ;;  %v6795_v23 = vrot.slane %v6794_v29, 2  ;;  %v6803_v44 = vmax.f32 %v6801_v32, %v6802_v38 }
0x1009   : > { %v6825_v12 = vpack.c.bf16 %v6817_v26, %v6817_v26  ;;  %v6796_v53 = vmax.f32 %v6794_v29, %v6795_v23  ;;  %v6805_v57 = vmax.f32 %v6803_v44, %v6804_v41 }
0x100b   : > { %v6854_v8 = vunpack.c.l.b16 %v6825_v12  ;;  %v6797_v0 = vrot.slane %v6796_v53, 1  ;;  %v6806_v50 = vrot.slane %v6805_v57, 4 }
0x100d   : > { %v6861_v46 = vsel %vm2240_vm6, %v6854_v8, %v6860_v42  ;;  %v6798_v27 = vmax.f32 %v6796_v53, %v6797_v0  ;;  %v6807_v60 = vmax.f32 %v6805_v57, %v6806_v50 }
0x100f   : > { %v6818_v10 = vmax.f32 %v6798_v27, 0.0  ;;  %v6808_v61 = vrot.slane %v6807_v60, 2 }
0x1011   : > { %v6826_v58 = vpack.c.bf16 %v6818_v10, %v6818_v10  ;;  %v6809_v1 = vmax.f32 %v6807_v60, %v6808_v61 }
0x1013   : > { %v6855_v22 = vunpack.c.l.b16 %v6826_v58  ;;  %v6810_v33 = vrot.slane %v6809_v1, 1 }
0x1015   : > { %v6811_v30 = vmax.f32 %v6809_v1, %v6810_v33  ;;  %v6862_v11 = vsel %vm2242_vm7, %v6855_v22, %v6861_v46 }
0x1017   : > { %v6819_v47 = vmax.f32 %v6811_v30, 0.0 }
0x1019   : > { %v6827_v13 = vpack.c.bf16 %v6819_v47, %v6819_v47 }
0x101b   : > { %v6856_v59 = vunpack.c.l.b16 %v6827_v13 }
0x101d   : > { %v6863_v63 = vsel %vm2244_vm8, %v6856_v59, %v6862_v11 }
0x101e   : > { %v6864_v21 = vpack.c.b16 %v6863_v63, %v6863_v63 }
0x1020   : > { %8177 = vmatmul.mubr.msk.bf16.vlgmr.msra.gmra.mrb[172].mxu0 %vm1444_vm0, %v6864_v21 }
0x10f3   : > { %v6926_v43 = vpop.f32.mrb[172].mxu0 }
0x10f4   : > { %v6927_v7 = vadd.f32 %v7272_v5, %v6926_v43  ;;  %v8178_v9 = vpop.f32.mrb[173].mxu0 }
0x10f5   : > { %v6929_v31 = vpop.f32.mrb[174].mxu0 }
0x10f6   : > { %6932 = vst [vmem:[%s220_s8] sm:$0xff] %v6927_v7  ;;  %v8179_v6 = vpop.f32.mrb[175].mxu0 }
0x10f7   : > { %8397 = shalt.err (!%p8394_p3)
}
0x10f8   : > { %s8398_s23 = scalar_lea.hbm %s11372_s11, 128  ;;  %s8402_s26 = scalar_lea.hbm %s11419_s5, 256 }
0x10f9   : > { %p8399_p4 = scmp.ne.s32.totalorder %s11372_s11, %s8398_s23  ;;  %p8403_p9 = scmp.lt.u32.totalorder %s11372_s11, %s11419_s5 }
0x10fa   : > { %p8404_p10 = scmp.lt.u32.totalorder %s8402_s26, %s8398_s23  ;;  %p8406_p12 = scmp.lt.u32.totalorder %s8398_s23, %s11372_s11 }
0x10fb   : > { %p8400_p7 = pnand %p8399_p4, %p8524_p5 }
0x10fc   : > { %p8405_p11 = por %p8404_p10, %p8403_p9 }
0x10fd   : > { %p8401_p8 = pneg %p8400_p7 }
0x10fe   : > { %p8407_p13 = por %p8406_p12, %p8405_p11 }
0x1100   : > { %p8408_p0 = pnand %p8407_p13, %p8401_p8 }
0x1102   : > { %8411 = shalt.err (!%p8408_p0)
}
0x1103   : > { %8180 = dma.vmem_to_hbm [thread:$0]  (%p8524_p5), %s11374_s14, 128, %s11372_s11, %s6934_s12  }
0x1104 PF: > { %p8186_p1 = scmp.ge.s32.totalorder %s8446_s21, 2  ;;  %s6959_s7 = sand.u32 1, %s8434_s18  }
0x1105   : > { %s6960_s8 = scalar_lea.sflag [#allocation6], %s6959_s7 }
0x1106   : > { %p8183_p2 = pnand %p8186_p1, %p8528_p6 }
0x1108   : > { %8429 = dma.done.wait (!%p8183_p2), %s6960_s8, 128  }
0x1109   : > { %8431 = vsyncadd (!%p8183_p2), %s6960_s8, 4294967168  ;;  %p15_p3 = scmp.ge.s32.totalorder %s8511_s24, 4   ;;  %s11422_s18 = smov %s8438_s19 }
0x110a   : > { %s11423_s19 = smov %s8442_s20  ;;  %s11424_s20 = smov %s8522_s27 }
0x110b   : > { %s11425_s21 = smov %s8511_s24  ;;  %17 = sbr.rel (!%p15_p3) target bundleno = 3 (0x3), region = 75 }
0x1112   :  { %6965 = vsyncpa [#allocation6], 1 }
0x1113   :  { %6967 = vsyncpa [#allocation6 + $0x1], 1 }

</bundles_post_ra>
